<compile_context>
chip_gen: v6e
topology: v6e:2x2x1
jax: 0.10.0
libtpu: 0.0.40
codegen_flags: <defaults>
</compile_context>

<pallas_src>
import functools

import jax
import jax.numpy as jnp
from jax.experimental import pallas as pl
from jax.experimental.pallas import tpu as pltpu

BN_EPS = 1e-4                  # norm_fn = BatchNorm1d(eps=0.0001)
LANE_TILE_MAX = 2048           # voxel/point lane tile; K=27*16 bf16 slab @2048 ~1.8MB/buf
VMEM_LIMIT = 32 * 1024 * 1024  # explicit scoped-VMEM budget (safe on v5e/v6e/v7x)


def _round_up(x, m):
    return (x + m - 1) // m * m


def _lane_tiling(n, tmax=LANE_TILE_MAX, min_tiles=2):
    """Return (lane_tile, padded_n).

    lane_tile is a multiple of 128, <= tmax, and chosen so that there are at
    least `min_tiles` grid tiles whenever there is enough work — keeps the
    "parallel" grid axis shardable across both v7x TensorCores.
    """
    base = _round_up(max(n, 1), 128)
    tiles = min_tiles if base >= min_tiles * 128 else 1
    tn = min(tmax, _round_up(-(-base // tiles), 128))
    return tn, _round_up(base, tn)


def _cparams():
    return pltpu.CompilerParams(dimension_semantics=("parallel",),
                                vmem_limit_bytes=VMEM_LIMIT)


# ----------------------------- Pallas kernels ------------------------------

def _conv_kernel(*refs, with_norm, with_residual):
    """y(Cout,TN) = W(Cout,K) @ [BN+ReLU](g)(K,TN) [+ identity]; BN-stat epilogue.

    g is one lane tile of the im2col slab (K = 27*Cin rows, cin-major row order
    r = cin*27 + offset).  When with_norm, the preceding BatchNorm+ReLU is
    applied to the slab rows in-kernel (nsc/nsh are per-channel scale/shift
    repeated 27x); the gather source's sentinel column was pre-poisoned so
    missing neighbours map exactly to 0 after the ReLU.
    """
    it = iter(refs)
    g_ref = next(it)
    if with_norm:
        nsc_ref = next(it)
        nsh_ref = next(it)
    w_ref = next(it)
    if with_residual:
        res_ref = next(it)
    y_ref = next(it)
    s_ref = next(it)
    sq_ref = next(it)

    g = g_ref[...]                                      # (K, TN) bf16
    if with_norm:
        # BN affine + ReLU in f32 (v5e VPU has no bf16), back to bf16 for MXU.
        g = jnp.maximum(g.astype(jnp.float32) * nsc_ref[...] + nsh_ref[...], 0.0)
        g = g.astype(jnp.bfloat16)
    acc = jnp.dot(w_ref[...], g, preferred_element_type=jnp.float32)
    if with_residual:
        acc = acc + res_ref[...].astype(jnp.float32)
    y_ref[...] = acc.astype(y_ref.dtype)                # bf16 writeback
    # per-tile partial BN statistics of the produced tensor (free epilogue work)
    s_ref[0] = jnp.sum(acc, axis=1, keepdims=True)
    sq_ref[0] = jnp.sum(acc * acc, axis=1, keepdims=True)


def subm_conv(g_t, w2d, *, tn, norm=None, identity_t=None):
    """SubMConv3d matmul on the im2col slab g_t (27*Cin, Npad) bf16, bias-free.

    norm: optional (slab_scale, slab_shift), each (27*Cin, 1) f32 — fuses the
    preceding BatchNorm+ReLU into the conv.  identity_t (Cout, Npad) bf16 fuses
    the ResidualBlock residual add.  Returns
    (y (Cout, Npad) bf16, per-tile sum (n_tiles, Cout, 1) f32, per-tile sum-sq).
    """
    k, npad = g_t.shape
    cout = w2d.shape[0]
    n_tiles = npad // tn
    with_norm = norm is not None
    with_res = identity_t is not None
    kernel = functools.partial(_conv_kernel, with_norm=with_norm,
                               with_residual=with_res)
    in_specs = [pl.BlockSpec((k, tn), lambda i: (0, i))]
    args = [g_t]
    if with_norm:
        in_specs += [pl.BlockSpec((k, 1), lambda i: (0, 0)),
                     pl.BlockSpec((k, 1), lambda i: (0, 0))]
        args += [norm[0], norm[1]]
    in_specs.append(pl.BlockSpec((cout, k), lambda i: (0, 0)))
    args.append(w2d)
    if with_res:
        in_specs.append(pl.BlockSpec((cout, tn), lambda i: (0, i)))
        args.append(identity_t)
    return pl.pallas_call(
        kernel,
        out_shape=(jax.ShapeDtypeStruct((cout, npad), jnp.bfloat16),
                   jax.ShapeDtypeStruct((n_tiles, cout, 1), jnp.float32),
                   jax.ShapeDtypeStruct((n_tiles, cout, 1), jnp.float32)),
        grid=(n_tiles,),
        in_specs=in_specs,
        out_specs=(pl.BlockSpec((cout, tn), lambda i: (0, i)),
                   pl.BlockSpec((1, cout, 1), lambda i: (i, 0, 0)),
                   pl.BlockSpec((1, cout, 1), lambda i: (i, 0, 0))),
        compiler_params=_cparams(),
    )(*args)


def _head1_kernel(x_ref, osc_ref, osh_ref, w_ref, b_ref, h_ref, s_ref, sq_ref,
                  *, tn, n_valid):
    # output_layer BN + ReLU (on the gathered point rows, bf16 in) fused with
    # Linear1; padded point columns are excluded from the BN statistics.
    xn = jnp.maximum(x_ref[...] * osc_ref[...] + osh_ref[...], 0.0)
    h = jnp.dot(w_ref[...], xn.astype(jnp.bfloat16),
                preferred_element_type=jnp.float32) + b_ref[...]
    col = pl.program_id(0) * tn + jax.lax.broadcasted_iota(jnp.int32, h.shape, 1)
    h = jnp.where(col < n_valid, h, 0.0)
    h_ref[...] = h
    s_ref[0] = jnp.sum(h, axis=1, keepdims=True)
    sq_ref[0] = jnp.sum(h * h, axis=1, keepdims=True)


def semantic_linear1(pts_t, out_scale, out_shift, w1, b1, n_valid, *, tn):
    c, npad = pts_t.shape
    m = w1.shape[0]
    n_tiles = npad // tn
    kernel = functools.partial(_head1_kernel, tn=tn, n_valid=n_valid)
    return pl.pallas_call(
        kernel,
        out_shape=(jax.ShapeDtypeStruct((m, npad), jnp.float32),
                   jax.ShapeDtypeStruct((n_tiles, m, 1), jnp.float32),
                   jax.ShapeDtypeStruct((n_tiles, m, 1), jnp.float32)),
        grid=(n_tiles,),
        in_specs=[pl.BlockSpec((c, tn), lambda i: (0, i)),
                  pl.BlockSpec((c, 1), lambda i: (0, 0)),
                  pl.BlockSpec((c, 1), lambda i: (0, 0)),
                  pl.BlockSpec((m, c), lambda i: (0, 0)),
                  pl.BlockSpec((m, 1), lambda i: (0, 0))],
        out_specs=(pl.BlockSpec((m, tn), lambda i: (0, i)),
                   pl.BlockSpec((1, m, 1), lambda i: (i, 0, 0)),
                   pl.BlockSpec((1, m, 1), lambda i: (i, 0, 0))),
        compiler_params=_cparams(),
    )(pts_t, out_scale, out_shift, w1, b1)


def _head2_kernel(h_ref, sc_ref, sh_ref, w_ref, b_ref, o_ref):
    # semantic BN + ReLU fused with Linear2.
    hn = jnp.maximum(h_ref[...] * sc_ref[...] + sh_ref[...], 0.0)
    o_ref[...] = (jnp.dot(w_ref[...], hn.astype(jnp.bfloat16),
                          preferred_element_type=jnp.float32) + b_ref[...])


def semantic_linear2(h_t, scale, shift, w2, b2, *, tn):
    c, npad = h_t.shape
    m = w2.shape[0]
    return pl.pallas_call(
        _head2_kernel,
        out_shape=jax.ShapeDtypeStruct((m, npad), jnp.float32),
        grid=(npad // tn,),
        in_specs=[pl.BlockSpec((c, tn), lambda i: (0, i)),
                  pl.BlockSpec((c, 1), lambda i: (0, 0)),
                  pl.BlockSpec((c, 1), lambda i: (0, 0)),
                  pl.BlockSpec((m, c), lambda i: (0, 0)),
                  pl.BlockSpec((m, 1), lambda i: (0, 0))],
        out_specs=pl.BlockSpec((m, tn), lambda i: (0, i)),
        compiler_params=_cparams(),
    )(h_t, scale, shift, w2, b2)


# ------------------------- BN statistics finalization ------------------------

def bn_scale_shift(sum_parts, sq_parts, gamma, beta, n_valid, eps=BN_EPS):
    """Finalize per-tile partial sums into BN scale/shift (tiny O(C) JAX math).

    Matches torch training-mode BatchNorm1d: biased batch variance, eps=1e-4.
    Padded columns contributed exactly 0 to the partials, so dividing by the
    true row count n_valid gives exact statistics.
    (Single-pass E[x^2]-mean^2 variance in f32 — flagged numerical deviation
    if activations ever have mean >> std.)
    """
    mean = jnp.sum(sum_parts, axis=0)[:, 0] / n_valid        # (C,)
    msq = jnp.sum(sq_parts, axis=0)[:, 0] / n_valid
    var = jnp.maximum(msq - mean * mean, 0.0)
    scale = gamma * jax.lax.rsqrt(var + eps)
    shift = beta - mean * scale
    return scale[:, None], shift[:, None]                    # (C, 1) each


def _slab_norm(scale, shift):
    """Broadcast per-channel BN factors to slab rows (row = cin*27 + offset)."""
    return jnp.repeat(scale, 27, axis=0), jnp.repeat(shift, 27, axis=0)


def _poison_sentinel(x_t, scale, shift, sentinel):
    """Overwrite the zero-sentinel column so the BN+ReLU fused into the next
    conv maps it exactly to 0 (missing rulebook neighbours contribute nothing,
    matching spconv SubMConv3d).  The -(1+|shift|) target keeps the post-affine
    value strictly negative under bf16 rounding of the stored column."""
    tgt = -(1.0 + jnp.abs(shift[:, 0]))
    v = (tgt - shift[:, 0]) / scale[:, 0]
    return x_t.at[:, sentinel].set(v.astype(x_t.dtype))


# -------------------- sparse submanifold conv rulebook ----------------------

def build_subm_rulebook(coords, grid_size):
    """coords: (N, 3) int32 unique voxel coords in [0, grid_size).

    Dense-LUT rulebook: returns (N, 27) int32 with the active-voxel index at
    coord+offset for each of the 27 offsets in [-1,0,1]^3, or -1 if inactive.
    (spconv 'indice_key=subm1' rulebook, shared by every SubMConv3d here.)
    TODO(synk): dense (grid+2)^3 LUT will not scale to very large voxel grids.
    """
    g = grid_size + 2

    def key(c):
        c = c + 1
        return (c[..., 0] * g + c[..., 1]) * g + c[..., 2]

    n = coords.shape[0]
    lut = jnp.full((g * g * g,), -1, jnp.int32)
    lut = lut.at[key(coords)].set(jnp.arange(n, dtype=jnp.int32))
    offs = jnp.stack(jnp.meshgrid(jnp.arange(-1, 2), jnp.arange(-1, 2),
                                  jnp.arange(-1, 2), indexing="ij"),
                     axis=-1).reshape(27, 3)
    nbr_keys = key(coords[:, None, :] + offs[None, :, :])    # (N, 27)
    return lut[nbr_keys]


# ------------------------------ U_NET forward ------------------------------

def init_params(key, input_c, width, classes, block_reps):
    keys = iter(jax.random.split(key, 5 + 2 * block_reps))
    s = 0.1

    def conv_w(k, cin, cout):
        # PyTorch SubMConv3d weight (27, Cin, Cout) laid out for the transposed
        # kernel: rows = Cout, cols ordered cin*27 + offset (matches im2col).
        w = s * jax.random.normal(k, (27, cin, cout), jnp.float32)
        return w.transpose(2, 1, 0).reshape(cout, cin * 27).astype(jnp.bfloat16)

    params = {
        "input_conv_w": conv_w(next(keys), input_c, width),
        "unet_blocks": [],
        "out_bn_g": jnp.ones((width,), jnp.float32),    # set_bn_init: weight=1
        "out_bn_b": jnp.zeros((width,), jnp.float32),   # set_bn_init: bias=0
        "sem_w1": (s * jax.random.normal(next(keys), (width, width), jnp.float32)
                   ).astype(jnp.bfloat16),
        "sem_b1": s * jax.random.normal(next(keys), (width, 1), jnp.float32),
        "sem_bn_g": jnp.ones((width,), jnp.float32),
        "sem_bn_b": jnp.zeros((width,), jnp.float32),
        "sem_w2": (s * jax.random.normal(next(keys), (classes, width), jnp.float32)
                   ).astype(jnp.bfloat16),
        "sem_b2": s * jax.random.normal(next(keys), (classes, 1), jnp.float32),
    }
    for _ in range(block_reps):
        params["unet_blocks"].append({
            "bn1_g": jnp.ones((width,), jnp.float32),
            "bn1_b": jnp.zeros((width,), jnp.float32),
            "conv1_w": conv_w(next(keys), width, width),
            "bn2_g": jnp.ones((width,), jnp.float32),
            "bn2_b": jnp.zeros((width,), jnp.float32),
            "conv2_w": conv_w(next(keys), width, width),
        })
    return params


def u_net_forward(params, voxel_feats_t, nbr_flat, input_map_pad,
                  n_vox, n_pts, tn_vox, tn_pts):
    """voxel_feats_t: (Cin, Npad) f32 (zero padded, column n_vox is the
    sentinel); nbr_flat: (27*Npad,) int32 (missing neighbors -> sentinel);
    input_map_pad: (Npts_pad,) int32."""
    npad_vox = voxel_feats_t.shape[1]

    def gather_im2col(x_t):
        # XLA gather building the (27*Cin, Npad) bf16 im2col slab.
        # TODO(synk): fuse this gather into the conv kernel (VMEM-resident x +
        # in-kernel lane gather / DMA row gather) to remove the remaining 27x
        # HBM slab traffic — the dominant remaining cost at realistic N.
        c = x_t.shape[0]
        return jnp.take(x_t, nbr_flat, axis=1).reshape(c * 27, npad_vox)

    # self.input_conv: SubMConv3d(input_c, width, 3, padding=1, bias=False)
    x, s_p, sq_p = subm_conv(gather_im2col(voxel_feats_t.astype(jnp.bfloat16)),
                             params["input_conv_w"], tn=tn_vox)

    # self.unet: block_reps pre-activation ResidualBlocks at the top resolution.
    # TODO(synk): deeper UBlock levels (strided SparseConv3d downsample,
    # recursive UBlock, SparseInverseConv3d upsample + skip concat + tail
    # blocks) need per-level spconv rulebooks and are not implemented here.
    for blk in params["unet_blocks"]:
        identity = x                                            # bf16 (width, Npad)
        sc1, sh1 = bn_scale_shift(s_p, sq_p, blk["bn1_g"], blk["bn1_b"], n_vox)
        g1 = gather_im2col(_poison_sentinel(x, sc1, sh1, n_vox))
        y, s_p, sq_p = subm_conv(g1, blk["conv1_w"], tn=tn_vox,
                                 norm=_slab_norm(sc1, sh1))     # BN1+ReLU fused
        sc2, sh2 = bn_scale_shift(s_p, sq_p, blk["bn2_g"], blk["bn2_b"], n_vox)
        g2 = gather_im2col(_poison_sentinel(y, sc2, sh2, n_vox))
        x, s_p, sq_p = subm_conv(g2, blk["conv2_w"], tn=tn_vox,
                                 norm=_slab_norm(sc2, sh2),
                                 identity_t=identity)           # residual fused

    # self.output_layer: BatchNorm1d(width) + ReLU.  Stats over all voxels come
    # free from the last conv epilogue; the normalize+ReLU itself is applied
    # only to the gathered point rows inside semantic_linear1.
    out_sc, out_sh = bn_scale_shift(s_p, sq_p, params["out_bn_g"],
                                    params["out_bn_b"], n_vox)

    # output_feats = output.features[input_map.long()]
    # TODO(synk): fuse this point gather into semantic_linear1 via
    # scalar-prefetched input_map instead of an XLA gather.
    pts_t = jnp.take(x, input_map_pad, axis=1)         # (width, Npts_pad) bf16

    # self.semantic_linear: Linear -> BN -> ReLU -> Linear (BN/ReLU fused)
    h, hs_p, hsq_p = semantic_linear1(pts_t, out_sc, out_sh,
                                      params["sem_w1"], params["sem_b1"],
                                      n_pts, tn=tn_pts)
    sem_sc, sem_sh = bn_scale_shift(hs_p, hsq_p, params["sem_bn_g"],
                                    params["sem_bn_b"], n_pts)
    scores_t = semantic_linear2(h, sem_sc, sem_sh,
                                params["sem_w2"], params["sem_b2"], tn=tn_pts)

    return {"semantic_scores": scores_t[:, :n_pts].T}   # (N_pts, classes)


# ----------------------------------- main -----------------------------------

if __name__ == "__main__":
    # small synthetic config (cfg.input_channel=3, cfg.use_coords=True -> 6,
    # cfg.width=16, cfg.classes=8, cfg.block_reps=2)
    INPUT_CHANNEL = 3
    USE_COORDS = True
    WIDTH = 16
    CLASSES = 8
    BLOCK_REPS = 2
    INPUT_C = INPUT_CHANNEL + (3 if USE_COORDS else 0)

    N_VOX = 700       # active voxels (not tile-aligned: exercises padding)
    N_PTS = 900       # points mapped through input_map
    GRID = 16

    root = jax.random.PRNGKey(0)
    k_coords, k_rgb, k_map, k_params = jax.random.split(root, 4)

    # unique voxel coords on a 16^3 grid
    flat = jax.random.choice(k_coords, GRID ** 3, shape=(N_VOX,), replace=False)
    coords = jnp.stack([flat // (GRID * GRID),
                        (flat // GRID) % GRID,
                        flat % GRID], axis=-1).astype(jnp.int32)
    rgb = jax.random.normal(k_rgb, (N_VOX, INPUT_CHANNEL), jnp.float32)
    voxel_feats = jnp.concatenate(
        [rgb, coords.astype(jnp.float32) / GRID], axis=-1)           # (N_VOX, 6)
    input_map = jax.random.randint(k_map, (N_PTS,), 0, N_VOX, jnp.int32)

    # --- pad to lane tiles; transpose to the (C, N) kernel layout ------------
    tn_vox, npad_vox = _lane_tiling(N_VOX + 1)   # +1 for the sentinel column
    tn_pts, npad_pts = _lane_tiling(N_PTS)

    voxel_feats_t = jnp.zeros((INPUT_C, npad_vox), jnp.float32)
    voxel_feats_t = voxel_feats_t.at[:, :N_VOX].set(voxel_feats.T)
    input_map_pad = jnp.zeros((npad_pts,), jnp.int32).at[:N_PTS].set(input_map)

    # spconv 'subm1' rulebook, shared by every SubMConv3d at this resolution.
    nbr = build_subm_rulebook(coords, GRID)         # (N_VOX, 27), -1 = missing
    nbr = jnp.where(nbr >= 0, nbr, N_VOX)           # missing -> sentinel column
    nbr_pad = jnp.full((npad_vox, 27), N_VOX, jnp.int32).at[:N_VOX].set(nbr)
    nbr_flat = nbr_pad.T.reshape(-1)                # (27 * npad_vox,)

    params = init_params(k_params, INPUT_C, WIDTH, CLASSES, BLOCK_REPS)

    fwd = jax.jit(u_net_forward,
                  static_argnames=("n_vox", "n_pts", "tn_vox", "tn_pts"))
    ret = fwd(params, voxel_feats_t, nbr_flat, input_map_pad,
              n_vox=N_VOX, n_pts=N_PTS, tn_vox=tn_vox, tn_pts=tn_pts)
    scores = jax.block_until_ready(ret["semantic_scores"])
    assert scores.shape == (N_PTS, CLASSES)
    assert bool(jnp.all(jnp.isfinite(scores)))
    print("KERNEL_OK")
</pallas_src>

<mosaic_0001>
module attributes {stable_mosaic.version = 11 : i64} {
  func.func @_conv_kernel(%arg0: i32, %arg1: memref<162x384xbf16, #tpu.memory_space<vmem>>, %arg2: memref<16x162xbf16, #tpu.memory_space<vmem>>, %arg3: memref<16x384xbf16, #tpu.memory_space<vmem>>, %arg4: memref<1x16x1xf32, #tpu.memory_space<vmem>>, %arg5: memref<1x16x1xf32, #tpu.memory_space<vmem>>) attributes {dimension_semantics = [#tpu.dimension_semantics<parallel>], iteration_bounds = array<i64: 2>, scalar_prefetch = 0 : i64, scratch_operands = 0 : i64, tpu.core_type = #tpu.core_type<tc>, window_params = [{transform_indices = @transform_0, window_bounds = array<i64: 162, 384>}, {pipeline_mode = #tpu.pipeline_mode<synchronous>, transform_indices = @transform_1, window_bounds = array<i64: 16, 162>}, {transform_indices = @transform_2, window_bounds = array<i64: 16, 384>}, {transform_indices = @transform_3, window_bounds = array<i64: 1, 16, 1>}, {transform_indices = @transform_4, window_bounds = array<i64: 1, 16, 1>}]} {
    %c0 = arith.constant 0 : index
    %c0_0 = arith.constant 0 : index
    %0 = vector.load %arg1[%c0, %c0_0] : memref<162x384xbf16, #tpu.memory_space<vmem>>, vector<162x384xbf16>
    %c0_1 = arith.constant 0 : index
    %c0_2 = arith.constant 0 : index
    %1 = vector.load %arg2[%c0_1, %c0_2] : memref<16x162xbf16, #tpu.memory_space<vmem>>, vector<16x162xbf16>
    %cst = arith.constant dense<0.000000e+00> : vector<16x384xf32>
    %2 = tpu.matmul %1, %0, %cst {dimension_numbers = #tpu.dot_dimension_numbers<[1], [0], [0], [1], [0, 0, 1, 1], [], []>} : vector<16x162xbf16>, vector<162x384xbf16>, vector<16x384xf32> -> vector<16x384xf32>
    %3 = arith.truncf %2 : vector<16x384xf32> to vector<16x384xbf16>
    %c0_3 = arith.constant 0 : index
    %c0_4 = arith.constant 0 : index
    %4 = vector.load %arg3[%c0_3, %c0_4] : memref<16x384xbf16, #tpu.memory_space<vmem>>, vector<16x384xbf16>
    tpu.vector_store %arg3[%c0_3, %c0_4], %3 {strides = array<i32>} : memref<16x384xbf16, #tpu.memory_space<vmem>>, vector<16x384xbf16>,
    %cst_5 = arith.constant dense<0.000000e+00> : vector<16xf32>
    %5 = vector.multi_reduction <add>, %2, %cst_5 [1] : vector<16x384xf32> to vector<16xf32>
    %6 = vector.shape_cast %5 : vector<16xf32> to vector<16x1xf32>
    %c0_6 = arith.constant 0 : index
    %c0_7 = arith.constant 0 : index
    %c0_8 = arith.constant 0 : index
    %7 = vector.load %arg4[%c0_6, %c0_7, %c0_8] : memref<1x16x1xf32, #tpu.memory_space<vmem>>, vector<1x16x1xf32>
    %8 = vector.shape_cast %7 : vector<1x16x1xf32> to vector<16x1xf32>
    %9 = vector.shape_cast %6 : vector<16x1xf32> to vector<1x16x1xf32>
    tpu.vector_store %arg4[%c0_6, %c0_7, %c0_8], %9 {strides = array<i32>} : memref<1x16x1xf32, #tpu.memory_space<vmem>>, vector<1x16x1xf32>,
    %10 = arith.mulf %2, %2 : vector<16x384xf32>
    %cst_9 = arith.constant dense<0.000000e+00> : vector<16xf32>
    %11 = vector.multi_reduction <add>, %10, %cst_9 [1] : vector<16x384xf32> to vector<16xf32>
    %12 = vector.shape_cast %11 : vector<16xf32> to vector<16x1xf32>
    %c0_10 = arith.constant 0 : index
    %c0_11 = arith.constant 0 : index
    %c0_12 = arith.constant 0 : index
    %13 = vector.load %arg5[%c0_10, %c0_11, %c0_12] : memref<1x16x1xf32, #tpu.memory_space<vmem>>, vector<1x16x1xf32>
    %14 = vector.shape_cast %13 : vector<1x16x1xf32> to vector<16x1xf32>
    %15 = vector.shape_cast %12 : vector<16x1xf32> to vector<1x16x1xf32>
    tpu.vector_store %arg5[%c0_10, %c0_11, %c0_12], %15 {strides = array<i32>} : memref<1x16x1xf32, #tpu.memory_space<vmem>>, vector<1x16x1xf32>,
    return
  }
  func.func @transform_0(%arg0: i32) -> (i32, i32) {
    %c0_i32 = arith.constant 0 : i32
    %c0_i32_0 = arith.constant 0 : i32
    return %c0_i32, %arg0 : i32, i32
  }
  func.func @transform_1(%arg0: i32) -> (i32, i32) {
    %c0_i32 = arith.constant 0 : i32
    %c0_i32_0 = arith.constant 0 : i32
    %c0_i32_1 = arith.constant 0 : i32
    return %c0_i32, %c0_i32_0 : i32, i32
  }
  func.func @transform_2(%arg0: i32) -> (i32, i32) {
    %c0_i32 = arith.constant 0 : i32
    %c0_i32_0 = arith.constant 0 : i32
    return %c0_i32, %arg0 : i32, i32
  }
  func.func @transform_3(%arg0: i32) -> (i32, i32, i32) {
    %c0_i32 = arith.constant 0 : i32
    %c0_i32_0 = arith.constant 0 : i32
    %c0_i32_1 = arith.constant 0 : i32
    return %arg0, %c0_i32, %c0_i32_0 : i32, i32, i32
  }
  func.func @transform_4(%arg0: i32) -> (i32, i32, i32) {
    %c0_i32 = arith.constant 0 : i32
    %c0_i32_0 = arith.constant 0 : i32
    %c0_i32_1 = arith.constant 0 : i32
    return %arg0, %c0_i32, %c0_i32_0 : i32, i32, i32
  }
}

module attributes {stable_mosaic.version = 11 : i64} {
  func.func @_conv_kernel(%arg0: i32, %arg1: memref<432x384xbf16, #tpu.memory_space<vmem>>, %arg2: memref<432x1xf32, #tpu.memory_space<vmem>>, %arg3: memref<432x1xf32, #tpu.memory_space<vmem>>, %arg4: memref<16x432xbf16, #tpu.memory_space<vmem>>, %arg5: memref<16x384xbf16, #tpu.memory_space<vmem>>, %arg6: memref<1x16x1xf32, #tpu.memory_space<vmem>>, %arg7: memref<1x16x1xf32, #tpu.memory_space<vmem>>) attributes {dimension_semantics = [#tpu.dimension_semantics<parallel>], iteration_bounds = array<i64: 2>, scalar_prefetch = 0 : i64, scratch_operands = 0 : i64, tpu.core_type = #tpu.core_type<tc>, window_params = [{transform_indices = @transform_0, window_bounds = array<i64: 432, 384>}, {pipeline_mode = #tpu.pipeline_mode<synchronous>, transform_indices = @transform_1, window_bounds = array<i64: 432, 1>}, {pipeline_mode = #tpu.pipeline_mode<synchronous>, transform_indices = @transform_2, window_bounds = array<i64: 432, 1>}, {pipeline_mode = #tpu.pipeline_mode<synchronous>, transform_indices = @transform_3, window_bounds = array<i64: 16, 432>}, {transform_indices = @transform_4, window_bounds = array<i64: 16, 384>}, {transform_indices = @transform_5, window_bounds = array<i64: 1, 16, 1>}, {transform_indices = @transform_6, window_bounds = array<i64: 1, 16, 1>}]} {
    %c0 = arith.constant 0 : index
    %c0_0 = arith.constant 0 : index
    %0 = vector.load %arg1[%c0, %c0_0] : memref<432x384xbf16, #tpu.memory_space<vmem>>, vector<432x384xbf16>
    %1 = arith.extf %0 : vector<432x384xbf16> to vector<432x384xf32>
    %c0_1 = arith.constant 0 : index
    %c0_2 = arith.constant 0 : index
    %2 = vector.load %arg2[%c0_1, %c0_2] : memref<432x1xf32, #tpu.memory_space<vmem>>, vector<432x1xf32>
    %3 = vector.broadcast %2 : vector<432x1xf32> to vector<432x384xf32>
    %4 = arith.mulf %1, %3 : vector<432x384xf32>
    %c0_3 = arith.constant 0 : index
    %c0_4 = arith.constant 0 : index
    %5 = vector.load %arg3[%c0_3, %c0_4] : memref<432x1xf32, #tpu.memory_space<vmem>>, vector<432x1xf32>
    %6 = vector.broadcast %5 : vector<432x1xf32> to vector<432x384xf32>
    %7 = arith.addf %4, %6 : vector<432x384xf32>
    %cst = arith.constant 0.000000e+00 : f32
    %8 = vector.broadcast %cst : f32 to vector<432x384xf32>
    %9 = arith.maximumf %7, %8 : vector<432x384xf32>
    %10 = arith.truncf %9 : vector<432x384xf32> to vector<432x384xbf16>
    %c0_5 = arith.constant 0 : index
    %c0_6 = arith.constant 0 : index
    %11 = vector.load %arg4[%c0_5, %c0_6] : memref<16x432xbf16, #tpu.memory_space<vmem>>, vector<16x432xbf16>
    %cst_7 = arith.constant dense<0.000000e+00> : vector<16x384xf32>
    %12 = tpu.matmul %11, %10, %cst_7 {dimension_numbers = #tpu.dot_dimension_numbers<[1], [0], [0], [1], [0, 0, 1, 1], [], []>} : vector<16x432xbf16>, vector<432x384xbf16>, vector<16x384xf32> -> vector<16x384xf32>
    %13 = arith.truncf %12 : vector<16x384xf32> to vector<16x384xbf16>
    %c0_8 = arith.constant 0 : index
    %c0_9 = arith.constant 0 : index
    %14 = vector.load %arg5[%c0_8, %c0_9] : memref<16x384xbf16, #tpu.memory_space<vmem>>, vector<16x384xbf16>
    tpu.vector_store %arg5[%c0_8, %c0_9], %13 {strides = array<i32>} : memref<16x384xbf16, #tpu.memory_space<vmem>>, vector<16x384xbf16>,
    %cst_10 = arith.constant dense<0.000000e+00> : vector<16xf32>
    %15 = vector.multi_reduction <add>, %12, %cst_10 [1] : vector<16x384xf32> to vector<16xf32>
    %16 = vector.shape_cast %15 : vector<16xf32> to vector<16x1xf32>
    %c0_11 = arith.constant 0 : index
    %c0_12 = arith.constant 0 : index
    %c0_13 = arith.constant 0 : index
    %17 = vector.load %arg6[%c0_11, %c0_12, %c0_13] : memref<1x16x1xf32, #tpu.memory_space<vmem>>, vector<1x16x1xf32>
    %18 = vector.shape_cast %17 : vector<1x16x1xf32> to vector<16x1xf32>
    %19 = vector.shape_cast %16 : vector<16x1xf32> to vector<1x16x1xf32>
    tpu.vector_store %arg6[%c0_11, %c0_12, %c0_13], %19 {strides = array<i32>} : memref<1x16x1xf32, #tpu.memory_space<vmem>>, vector<1x16x1xf32>,
    %20 = arith.mulf %12, %12 : vector<16x384xf32>
    %cst_14 = arith.constant dense<0.000000e+00> : vector<16xf32>
    %21 = vector.multi_reduction <add>, %20, %cst_14 [1] : vector<16x384xf32> to vector<16xf32>
    %22 = vector.shape_cast %21 : vector<16xf32> to vector<16x1xf32>
    %c0_15 = arith.constant 0 : index
    %c0_16 = arith.constant 0 : index
    %c0_17 = arith.constant 0 : index
    %23 = vector.load %arg7[%c0_15, %c0_16, %c0_17] : memref<1x16x1xf32, #tpu.memory_space<vmem>>, vector<1x16x1xf32>
    %24 = vector.shape_cast %23 : vector<1x16x1xf32> to vector<16x1xf32>
    %25 = vector.shape_cast %22 : vector<16x1xf32> to vector<1x16x1xf32>
    tpu.vector_store %arg7[%c0_15, %c0_16, %c0_17], %25 {strides = array<i32>} : memref<1x16x1xf32, #tpu.memory_space<vmem>>, vector<1x16x1xf32>,
    return
  }
  func.func @transform_0(%arg0: i32) -> (i32, i32) {
    %c0_i32 = arith.constant 0 : i32
    %c0_i32_0 = arith.constant 0 : i32
    return %c0_i32, %arg0 : i32, i32
  }
  func.func @transform_1(%arg0: i32) -> (i32, i32) {
    %c0_i32 = arith.constant 0 : i32
    %c0_i32_0 = arith.constant 0 : i32
    %c0_i32_1 = arith.constant 0 : i32
    return %c0_i32, %c0_i32_0 : i32, i32
  }
  func.func @transform_2(%arg0: i32) -> (i32, i32) {
    %c0_i32 = arith.constant 0 : i32
    %c0_i32_0 = arith.constant 0 : i32
    %c0_i32_1 = arith.constant 0 : i32
    return %c0_i32, %c0_i32_0 : i32, i32
  }
  func.func @transform_3(%arg0: i32) -> (i32, i32) {
    %c0_i32 = arith.constant 0 : i32
    %c0_i32_0 = arith.constant 0 : i32
    %c0_i32_1 = arith.constant 0 : i32
    return %c0_i32, %c0_i32_0 : i32, i32
  }
  func.func @transform_4(%arg0: i32) -> (i32, i32) {
    %c0_i32 = arith.constant 0 : i32
    %c0_i32_0 = arith.constant 0 : i32
    return %c0_i32, %arg0 : i32, i32
  }
  func.func @transform_5(%arg0: i32) -> (i32, i32, i32) {
    %c0_i32 = arith.constant 0 : i32
    %c0_i32_0 = arith.constant 0 : i32
    %c0_i32_1 = arith.constant 0 : i32
    return %arg0, %c0_i32, %c0_i32_0 : i32, i32, i32
  }
  func.func @transform_6(%arg0: i32) -> (i32, i32, i32) {
    %c0_i32 = arith.constant 0 : i32
    %c0_i32_0 = arith.constant 0 : i32
    %c0_i32_1 = arith.constant 0 : i32
    return %arg0, %c0_i32, %c0_i32_0 : i32, i32, i32
  }
}

module attributes {stable_mosaic.version = 11 : i64} {
  func.func @_conv_kernel(%arg0: i32, %arg1: memref<432x384xbf16, #tpu.memory_space<vmem>>, %arg2: memref<432x1xf32, #tpu.memory_space<vmem>>, %arg3: memref<432x1xf32, #tpu.memory_space<vmem>>, %arg4: memref<16x432xbf16, #tpu.memory_space<vmem>>, %arg5: memref<16x384xbf16, #tpu.memory_space<vmem>>, %arg6: memref<16x384xbf16, #tpu.memory_space<vmem>>, %arg7: memref<1x16x1xf32, #tpu.memory_space<vmem>>, %arg8: memref<1x16x1xf32, #tpu.memory_space<vmem>>) attributes {dimension_semantics = [#tpu.dimension_semantics<parallel>], iteration_bounds = array<i64: 2>, scalar_prefetch = 0 : i64, scratch_operands = 0 : i64, tpu.core_type = #tpu.core_type<tc>, window_params = [{transform_indices = @transform_0, window_bounds = array<i64: 432, 384>}, {pipeline_mode = #tpu.pipeline_mode<synchronous>, transform_indices = @transform_1, window_bounds = array<i64: 432, 1>}, {pipeline_mode = #tpu.pipeline_mode<synchronous>, transform_indices = @transform_2, window_bounds = array<i64: 432, 1>}, {pipeline_mode = #tpu.pipeline_mode<synchronous>, transform_indices = @transform_3, window_bounds = array<i64: 16, 432>}, {transform_indices = @transform_4, window_bounds = array<i64: 16, 384>}, {transform_indices = @transform_5, window_bounds = array<i64: 16, 384>}, {transform_indices = @transform_6, window_bounds = array<i64: 1, 16, 1>}, {transform_indices = @transform_7, window_bounds = array<i64: 1, 16, 1>}]} {
    %c0 = arith.constant 0 : index
    %c0_0 = arith.constant 0 : index
    %0 = vector.load %arg1[%c0, %c0_0] : memref<432x384xbf16, #tpu.memory_space<vmem>>, vector<432x384xbf16>
    %1 = arith.extf %0 : vector<432x384xbf16> to vector<432x384xf32>
    %c0_1 = arith.constant 0 : index
    %c0_2 = arith.constant 0 : index
    %2 = vector.load %arg2[%c0_1, %c0_2] : memref<432x1xf32, #tpu.memory_space<vmem>>, vector<432x1xf32>
    %3 = vector.broadcast %2 : vector<432x1xf32> to vector<432x384xf32>
    %4 = arith.mulf %1, %3 : vector<432x384xf32>
    %c0_3 = arith.constant 0 : index
    %c0_4 = arith.constant 0 : index
    %5 = vector.load %arg3[%c0_3, %c0_4] : memref<432x1xf32, #tpu.memory_space<vmem>>, vector<432x1xf32>
    %6 = vector.broadcast %5 : vector<432x1xf32> to vector<432x384xf32>
    %7 = arith.addf %4, %6 : vector<432x384xf32>
    %cst = arith.constant 0.000000e+00 : f32
    %8 = vector.broadcast %cst : f32 to vector<432x384xf32>
    %9 = arith.maximumf %7, %8 : vector<432x384xf32>
    %10 = arith.truncf %9 : vector<432x384xf32> to vector<432x384xbf16>
    %c0_5 = arith.constant 0 : index
    %c0_6 = arith.constant 0 : index
    %11 = vector.load %arg4[%c0_5, %c0_6] : memref<16x432xbf16, #tpu.memory_space<vmem>>, vector<16x432xbf16>
    %cst_7 = arith.constant dense<0.000000e+00> : vector<16x384xf32>
    %12 = tpu.matmul %11, %10, %cst_7 {dimension_numbers = #tpu.dot_dimension_numbers<[1], [0], [0], [1], [0, 0, 1, 1], [], []>} : vector<16x432xbf16>, vector<432x384xbf16>, vector<16x384xf32> -> vector<16x384xf32>
    %c0_8 = arith.constant 0 : index
    %c0_9 = arith.constant 0 : index
    %13 = vector.load %arg5[%c0_8, %c0_9] : memref<16x384xbf16, #tpu.memory_space<vmem>>, vector<16x384xbf16>
    %14 = arith.extf %13 : vector<16x384xbf16> to vector<16x384xf32>
    %15 = arith.addf %12, %14 : vector<16x384xf32>
    %16 = arith.truncf %15 : vector<16x384xf32> to vector<16x384xbf16>
    %c0_10 = arith.constant 0 : index
    %c0_11 = arith.constant 0 : index
    %17 = vector.load %arg6[%c0_10, %c0_11] : memref<16x384xbf16, #tpu.memory_space<vmem>>, vector<16x384xbf16>
    tpu.vector_store %arg6[%c0_10, %c0_11], %16 {strides = array<i32>} : memref<16x384xbf16, #tpu.memory_space<vmem>>, vector<16x384xbf16>,
    %cst_12 = arith.constant dense<0.000000e+00> : vector<16xf32>
    %18 = vector.multi_reduction <add>, %15, %cst_12 [1] : vector<16x384xf32> to vector<16xf32>
    %19 = vector.shape_cast %18 : vector<16xf32> to vector<16x1xf32>
    %c0_13 = arith.constant 0 : index
    %c0_14 = arith.constant 0 : index
    %c0_15 = arith.constant 0 : index
    %20 = vector.load %arg7[%c0_13, %c0_14, %c0_15] : memref<1x16x1xf32, #tpu.memory_space<vmem>>, vector<1x16x1xf32>
    %21 = vector.shape_cast %20 : vector<1x16x1xf32> to vector<16x1xf32>
    %22 = vector.shape_cast %19 : vector<16x1xf32> to vector<1x16x1xf32>
    tpu.vector_store %arg7[%c0_13, %c0_14, %c0_15], %22 {strides = array<i32>} : memref<1x16x1xf32, #tpu.memory_space<vmem>>, vector<1x16x1xf32>,
    %23 = arith.mulf %15, %15 : vector<16x384xf32>
    %cst_16 = arith.constant dense<0.000000e+00> : vector<16xf32>
    %24 = vector.multi_reduction <add>, %23, %cst_16 [1] : vector<16x384xf32> to vector<16xf32>
    %25 = vector.shape_cast %24 : vector<16xf32> to vector<16x1xf32>
    %c0_17 = arith.constant 0 : index
    %c0_18 = arith.constant 0 : index
    %c0_19 = arith.constant 0 : index
    %26 = vector.load %arg8[%c0_17, %c0_18, %c0_19] : memref<1x16x1xf32, #tpu.memory_space<vmem>>, vector<1x16x1xf32>
    %27 = vector.shape_cast %26 : vector<1x16x1xf32> to vector<16x1xf32>
    %28 = vector.shape_cast %25 : vector<16x1xf32> to vector<1x16x1xf32>
    tpu.vector_store %arg8[%c0_17, %c0_18, %c0_19], %28 {strides = array<i32>} : memref<1x16x1xf32, #tpu.memory_space<vmem>>, vector<1x16x1xf32>,
    return
  }
  func.func @transform_0(%arg0: i32) -> (i32, i32) {
    %c0_i32 = arith.constant 0 : i32
    %c0_i32_0 = arith.constant 0 : i32
    return %c0_i32, %arg0 : i32, i32
  }
  func.func @transform_1(%arg0: i32) -> (i32, i32) {
    %c0_i32 = arith.constant 0 : i32
    %c0_i32_0 = arith.constant 0 : i32
    %c0_i32_1 = arith.constant 0 : i32
    return %c0_i32, %c0_i32_0 : i32, i32
  }
  func.func @transform_2(%arg0: i32) -> (i32, i32) {
    %c0_i32 = arith.constant 0 : i32
    %c0_i32_0 = arith.constant 0 : i32
    %c0_i32_1 = arith.constant 0 : i32
    return %c0_i32, %c0_i32_0 : i32, i32
  }
  func.func @transform_3(%arg0: i32) -> (i32, i32) {
    %c0_i32 = arith.constant 0 : i32
    %c0_i32_0 = arith.constant 0 : i32
    %c0_i32_1 = arith.constant 0 : i32
    return %c0_i32, %c0_i32_0 : i32, i32
  }
  func.func @transform_4(%arg0: i32) -> (i32, i32) {
    %c0_i32 = arith.constant 0 : i32
    %c0_i32_0 = arith.constant 0 : i32
    return %c0_i32, %arg0 : i32, i32
  }
  func.func @transform_5(%arg0: i32) -> (i32, i32) {
    %c0_i32 = arith.constant 0 : i32
    %c0_i32_0 = arith.constant 0 : i32
    return %c0_i32, %arg0 : i32, i32
  }
  func.func @transform_6(%arg0: i32) -> (i32, i32, i32) {
    %c0_i32 = arith.constant 0 : i32
    %c0_i32_0 = arith.constant 0 : i32
    %c0_i32_1 = arith.constant 0 : i32
    return %arg0, %c0_i32, %c0_i32_0 : i32, i32, i32
  }
  func.func @transform_7(%arg0: i32) -> (i32, i32, i32) {
    %c0_i32 = arith.constant 0 : i32
    %c0_i32_0 = arith.constant 0 : i32
    %c0_i32_1 = arith.constant 0 : i32
    return %arg0, %c0_i32, %c0_i32_0 : i32, i32, i32
  }
}

module attributes {stable_mosaic.version = 11 : i64} {
  func.func @_head1_kernel(%arg0: i32, %arg1: memref<16x512xbf16, #tpu.memory_space<vmem>>, %arg2: memref<16x1xf32, #tpu.memory_space<vmem>>, %arg3: memref<16x1xf32, #tpu.memory_space<vmem>>, %arg4: memref<16x16xbf16, #tpu.memory_space<vmem>>, %arg5: memref<16x1xf32, #tpu.memory_space<vmem>>, %arg6: memref<16x512xf32, #tpu.memory_space<vmem>>, %arg7: memref<1x16x1xf32, #tpu.memory_space<vmem>>, %arg8: memref<1x16x1xf32, #tpu.memory_space<vmem>>) attributes {dimension_semantics = [#tpu.dimension_semantics<parallel>], iteration_bounds = array<i64: 2>, scalar_prefetch = 0 : i64, scratch_operands = 0 : i64, tpu.core_type = #tpu.core_type<tc>, window_params = [{transform_indices = @transform_0, window_bounds = array<i64: 16, 512>}, {pipeline_mode = #tpu.pipeline_mode<synchronous>, transform_indices = @transform_1, window_bounds = array<i64: 16, 1>}, {pipeline_mode = #tpu.pipeline_mode<synchronous>, transform_indices = @transform_2, window_bounds = array<i64: 16, 1>}, {pipeline_mode = #tpu.pipeline_mode<synchronous>, transform_indices = @transform_3, window_bounds = array<i64: 16, 16>}, {pipeline_mode = #tpu.pipeline_mode<synchronous>, transform_indices = @transform_4, window_bounds = array<i64: 16, 1>}, {transform_indices = @transform_5, window_bounds = array<i64: 16, 512>}, {transform_indices = @transform_6, window_bounds = array<i64: 1, 16, 1>}, {transform_indices = @transform_7, window_bounds = array<i64: 1, 16, 1>}]} {
    %c0 = arith.constant 0 : index
    %c0_0 = arith.constant 0 : index
    %0 = vector.load %arg1[%c0, %c0_0] : memref<16x512xbf16, #tpu.memory_space<vmem>>, vector<16x512xbf16>
    %c0_1 = arith.constant 0 : index
    %c0_2 = arith.constant 0 : index
    %1 = vector.load %arg2[%c0_1, %c0_2] : memref<16x1xf32, #tpu.memory_space<vmem>>, vector<16x1xf32>
    %2 = arith.extf %0 : vector<16x512xbf16> to vector<16x512xf32>
    %3 = vector.broadcast %1 : vector<16x1xf32> to vector<16x512xf32>
    %4 = arith.mulf %2, %3 : vector<16x512xf32>
    %c0_3 = arith.constant 0 : index
    %c0_4 = arith.constant 0 : index
    %5 = vector.load %arg3[%c0_3, %c0_4] : memref<16x1xf32, #tpu.memory_space<vmem>>, vector<16x1xf32>
    %6 = vector.broadcast %5 : vector<16x1xf32> to vector<16x512xf32>
    %7 = arith.addf %4, %6 : vector<16x512xf32>
    %cst = arith.constant 0.000000e+00 : f32
    %8 = vector.broadcast %cst : f32 to vector<16x512xf32>
    %9 = arith.maximumf %7, %8 : vector<16x512xf32>
    %c0_5 = arith.constant 0 : index
    %c0_6 = arith.constant 0 : index
    %10 = vector.load %arg4[%c0_5, %c0_6] : memref<16x16xbf16, #tpu.memory_space<vmem>>, vector<16x16xbf16>
    %11 = arith.truncf %9 : vector<16x512xf32> to vector<16x512xbf16>
    %cst_7 = arith.constant dense<0.000000e+00> : vector<16x512xf32>
    %12 = tpu.matmul %10, %11, %cst_7 {dimension_numbers = #tpu.dot_dimension_numbers<[1], [0], [0], [1], [0, 0, 1, 1], [], []>} : vector<16x16xbf16>, vector<16x512xbf16>, vector<16x512xf32> -> vector<16x512xf32>
    %c0_8 = arith.constant 0 : index
    %c0_9 = arith.constant 0 : index
    %13 = vector.load %arg5[%c0_8, %c0_9] : memref<16x1xf32, #tpu.memory_space<vmem>>, vector<16x1xf32>
    %14 = vector.broadcast %13 : vector<16x1xf32> to vector<16x512xf32>
    %15 = arith.addf %12, %14 : vector<16x512xf32>
    %c512_i32 = arith.constant 512 : i32
    %16 = arith.muli %arg0, %c512_i32 : i32
    %17 = tpu.iota {dimensions = array<i32: 1>} : vector<16x512xi32>
    %18 = vector.broadcast %16 : i32 to vector<16x512xi32>
    %19 = arith.addi %18, %17 : vector<16x512xi32>
    %c900_i32 = arith.constant 900 : i32
    %20 = vector.broadcast %c900_i32 : i32 to vector<16x512xi32>
    %21 = arith.cmpi slt, %19, %20 : vector<16x512xi32>
    %cst_10 = arith.constant 0.000000e+00 : f32
    %22 = vector.broadcast %cst_10 : f32 to vector<16x512xf32>
    %23 = arith.select %21, %15, %22 : vector<16x512xi1>, vector<16x512xf32>
    %c0_11 = arith.constant 0 : index
    %c0_12 = arith.constant 0 : index
    %24 = vector.load %arg6[%c0_11, %c0_12] : memref<16x512xf32, #tpu.memory_space<vmem>>, vector<16x512xf32>
    tpu.vector_store %arg6[%c0_11, %c0_12], %23 {strides = array<i32>} : memref<16x512xf32, #tpu.memory_space<vmem>>, vector<16x512xf32>,
    %cst_13 = arith.constant dense<0.000000e+00> : vector<16xf32>
    %25 = vector.multi_reduction <add>, %23, %cst_13 [1] : vector<16x512xf32> to vector<16xf32>
    %26 = vector.shape_cast %25 : vector<16xf32> to vector<16x1xf32>
    %c0_14 = arith.constant 0 : index
    %c0_15 = arith.constant 0 : index
    %c0_16 = arith.constant 0 : index
    %27 = vector.load %arg7[%c0_14, %c0_15, %c0_16] : memref<1x16x1xf32, #tpu.memory_space<vmem>>, vector<1x16x1xf32>
    %28 = vector.shape_cast %27 : vector<1x16x1xf32> to vector<16x1xf32>
    %29 = vector.shape_cast %26 : vector<16x1xf32> to vector<1x16x1xf32>
    tpu.vector_store %arg7[%c0_14, %c0_15, %c0_16], %29 {strides = array<i32>} : memref<1x16x1xf32, #tpu.memory_space<vmem>>, vector<1x16x1xf32>,
    %30 = arith.mulf %23, %23 : vector<16x512xf32>
    %cst_17 = arith.constant dense<0.000000e+00> : vector<16xf32>
    %31 = vector.multi_reduction <add>, %30, %cst_17 [1] : vector<16x512xf32> to vector<16xf32>
    %32 = vector.shape_cast %31 : vector<16xf32> to vector<16x1xf32>
    %c0_18 = arith.constant 0 : index
    %c0_19 = arith.constant 0 : index
    %c0_20 = arith.constant 0 : index
    %33 = vector.load %arg8[%c0_18, %c0_19, %c0_20] : memref<1x16x1xf32, #tpu.memory_space<vmem>>, vector<1x16x1xf32>
    %34 = vector.shape_cast %33 : vector<1x16x1xf32> to vector<16x1xf32>
    %35 = vector.shape_cast %32 : vector<16x1xf32> to vector<1x16x1xf32>
    tpu.vector_store %arg8[%c0_18, %c0_19, %c0_20], %35 {strides = array<i32>} : memref<1x16x1xf32, #tpu.memory_space<vmem>>, vector<1x16x1xf32>,
    return
  }
  func.func @transform_0(%arg0: i32) -> (i32, i32) {
    %c0_i32 = arith.constant 0 : i32
    %c0_i32_0 = arith.constant 0 : i32
    return %c0_i32, %arg0 : i32, i32
  }
  func.func @transform_1(%arg0: i32) -> (i32, i32) {
    %c0_i32 = arith.constant 0 : i32
    %c0_i32_0 = arith.constant 0 : i32
    %c0_i32_1 = arith.constant 0 : i32
    return %c0_i32, %c0_i32_0 : i32, i32
  }
  func.func @transform_2(%arg0: i32) -> (i32, i32) {
    %c0_i32 = arith.constant 0 : i32
    %c0_i32_0 = arith.constant 0 : i32
    %c0_i32_1 = arith.constant 0 : i32
    return %c0_i32, %c0_i32_0 : i32, i32
  }
  func.func @transform_3(%arg0: i32) -> (i32, i32) {
    %c0_i32 = arith.constant 0 : i32
    %c0_i32_0 = arith.constant 0 : i32
    %c0_i32_1 = arith.constant 0 : i32
    return %c0_i32, %c0_i32_0 : i32, i32
  }
  func.func @transform_4(%arg0: i32) -> (i32, i32) {
    %c0_i32 = arith.constant 0 : i32
    %c0_i32_0 = arith.constant 0 : i32
    %c0_i32_1 = arith.constant 0 : i32
    return %c0_i32, %c0_i32_0 : i32, i32
  }
  func.func @transform_5(%arg0: i32) -> (i32, i32) {
    %c0_i32 = arith.constant 0 : i32
    %c0_i32_0 = arith.constant 0 : i32
    return %c0_i32, %arg0 : i32, i32
  }
  func.func @transform_6(%arg0: i32) -> (i32, i32, i32) {
    %c0_i32 = arith.constant 0 : i32
    %c0_i32_0 = arith.constant 0 : i32
    %c0_i32_1 = arith.constant 0 : i32
    return %arg0, %c0_i32, %c0_i32_0 : i32, i32, i32
  }
  func.func @transform_7(%arg0: i32) -> (i32, i32, i32) {
    %c0_i32 = arith.constant 0 : i32
    %c0_i32_0 = arith.constant 0 : i32
    %c0_i32_1 = arith.constant 0 : i32
    return %arg0, %c0_i32, %c0_i32_0 : i32, i32, i32
  }
}

module attributes {stable_mosaic.version = 11 : i64} {
  func.func @_head2_kernel(%arg0: i32, %arg1: memref<16x512xf32, #tpu.memory_space<vmem>>, %arg2: memref<16x1xf32, #tpu.memory_space<vmem>>, %arg3: memref<16x1xf32, #tpu.memory_space<vmem>>, %arg4: memref<8x16xbf16, #tpu.memory_space<vmem>>, %arg5: memref<8x1xf32, #tpu.memory_space<vmem>>, %arg6: memref<8x512xf32, #tpu.memory_space<vmem>>) attributes {dimension_semantics = [#tpu.dimension_semantics<parallel>], iteration_bounds = array<i64: 2>, scalar_prefetch = 0 : i64, scratch_operands = 0 : i64, tpu.core_type = #tpu.core_type<tc>, window_params = [{transform_indices = @transform_0, window_bounds = array<i64: 16, 512>}, {pipeline_mode = #tpu.pipeline_mode<synchronous>, transform_indices = @transform_1, window_bounds = array<i64: 16, 1>}, {pipeline_mode = #tpu.pipeline_mode<synchronous>, transform_indices = @transform_2, window_bounds = array<i64: 16, 1>}, {pipeline_mode = #tpu.pipeline_mode<synchronous>, transform_indices = @transform_3, window_bounds = array<i64: 8, 16>}, {pipeline_mode = #tpu.pipeline_mode<synchronous>, transform_indices = @transform_4, window_bounds = array<i64: 8, 1>}, {transform_indices = @transform_5, window_bounds = array<i64: 8, 512>}]} {
    %c0 = arith.constant 0 : index
    %c0_0 = arith.constant 0 : index
    %0 = vector.load %arg1[%c0, %c0_0] : memref<16x512xf32, #tpu.memory_space<vmem>>, vector<16x512xf32>
    %c0_1 = arith.constant 0 : index
    %c0_2 = arith.constant 0 : index
    %1 = vector.load %arg2[%c0_1, %c0_2] : memref<16x1xf32, #tpu.memory_space<vmem>>, vector<16x1xf32>
    %2 = vector.broadcast %1 : vector<16x1xf32> to vector<16x512xf32>
    %3 = arith.mulf %0, %2 : vector<16x512xf32>
    %c0_3 = arith.constant 0 : index
    %c0_4 = arith.constant 0 : index
    %4 = vector.load %arg3[%c0_3, %c0_4] : memref<16x1xf32, #tpu.memory_space<vmem>>, vector<16x1xf32>
    %5 = vector.broadcast %4 : vector<16x1xf32> to vector<16x512xf32>
    %6 = arith.addf %3, %5 : vector<16x512xf32>
    %cst = arith.constant 0.000000e+00 : f32
    %7 = vector.broadcast %cst : f32 to vector<16x512xf32>
    %8 = arith.maximumf %6, %7 : vector<16x512xf32>
    %c0_5 = arith.constant 0 : index
    %c0_6 = arith.constant 0 : index
    %9 = vector.load %arg4[%c0_5, %c0_6] : memref<8x16xbf16, #tpu.memory_space<vmem>>, vector<8x16xbf16>
    %10 = arith.truncf %8 : vector<16x512xf32> to vector<16x512xbf16>
    %cst_7 = arith.constant dense<0.000000e+00> : vector<8x512xf32>
    %11 = tpu.matmul %9, %10, %cst_7 {dimension_numbers = #tpu.dot_dimension_numbers<[1], [0], [0], [1], [0, 0, 1, 1], [], []>} : vector<8x16xbf16>, vector<16x512xbf16>, vector<8x512xf32> -> vector<8x512xf32>
    %c0_8 = arith.constant 0 : index
    %c0_9 = arith.constant 0 : index
    %12 = vector.load %arg5[%c0_8, %c0_9] : memref<8x1xf32, #tpu.memory_space<vmem>>, vector<8x1xf32>
    %13 = vector.broadcast %12 : vector<8x1xf32> to vector<8x512xf32>
    %14 = arith.addf %11, %13 : vector<8x512xf32>
    %c0_10 = arith.constant 0 : index
    %c0_11 = arith.constant 0 : index
    %15 = vector.load %arg6[%c0_10, %c0_11] : memref<8x512xf32, #tpu.memory_space<vmem>>, vector<8x512xf32>
    tpu.vector_store %arg6[%c0_10, %c0_11], %14 {strides = array<i32>} : memref<8x512xf32, #tpu.memory_space<vmem>>, vector<8x512xf32>,
    return
  }
  func.func @transform_0(%arg0: i32) -> (i32, i32) {
    %c0_i32 = arith.constant 0 : i32
    %c0_i32_0 = arith.constant 0 : i32
    return %c0_i32, %arg0 : i32, i32
  }
  func.func @transform_1(%arg0: i32) -> (i32, i32) {
    %c0_i32 = arith.constant 0 : i32
    %c0_i32_0 = arith.constant 0 : i32
    %c0_i32_1 = arith.constant 0 : i32
    return %c0_i32, %c0_i32_0 : i32, i32
  }
  func.func @transform_2(%arg0: i32) -> (i32, i32) {
    %c0_i32 = arith.constant 0 : i32
    %c0_i32_0 = arith.constant 0 : i32
    %c0_i32_1 = arith.constant 0 : i32
    return %c0_i32, %c0_i32_0 : i32, i32
  }
  func.func @transform_3(%arg0: i32) -> (i32, i32) {
    %c0_i32 = arith.constant 0 : i32
    %c0_i32_0 = arith.constant 0 : i32
    %c0_i32_1 = arith.constant 0 : i32
    return %c0_i32, %c0_i32_0 : i32, i32
  }
  func.func @transform_4(%arg0: i32) -> (i32, i32) {
    %c0_i32 = arith.constant 0 : i32
    %c0_i32_0 = arith.constant 0 : i32
    %c0_i32_1 = arith.constant 0 : i32
    return %c0_i32, %c0_i32_0 : i32, i32
  }
  func.func @transform_5(%arg0: i32) -> (i32, i32) {
    %c0_i32 = arith.constant 0 : i32
    %c0_i32_0 = arith.constant 0 : i32
    return %c0_i32, %arg0 : i32, i32
  }
}

</mosaic_0001>

<bundles_post_ra>
// kernel: u_net_forward.7
= control target key start
LH: loop header
LB: loop body
LE: loop exit
PB: predicated region body
PF: predicated region fallthrough
CT: control target
= control target key end

     0   :  { %s1108_s15 = smov 0   ;;  %s1110_s16 = smov 0   ;;  %s1329_s0 = inlined_call_operand.vmem [shape: bf16[162,768], index: 0, kind: input, shape index: {}]   ;;  %s1330_s1 = inlined_call_operand.vmem [shape: bf16[16,162], index: 1, kind: input, shape index: {}]   ;;  %s1331_s2 = inlined_call_operand.vmem [shape: bf16[16,768], index: 2, kind: output, shape index: {0}]   ;;  %s1332_s3 = inlined_call_operand.vmem [shape: f32[2,16,1], index: 3, kind: output, shape index: {1}]   ;;  %s1333_s4 = inlined_call_operand.vmem [shape: f32[2,16,1], index: 4, kind: output, shape index: {2}]  }
   0x1   :  { %s1112_s17 = smov 0  }
   0x2 LB: > { %s1124_s18 = sadd.s32 4294967295, %s1080_s17   ;;  %s1127_s19 = sadd.s32 1, %s1080_s17   ;;  %s1080_s17 = sphi %s1112_s17, %s1337_s17   ;;  %s1076_s16 = sphi %s1110_s16, %s1336_s16   ;;  %s1072_s15 = sphi %s1108_s15, %s1335_s15  }
   0x3   : > { %s19_s20 = ssub.s32 %s1080_s17, %s1127_s19  ;;  %s22_s21 = sadd.s32 1, %s1076_s16 }
   0x4   : > { %p20_p0 = scmp.eq.s32.totalorder %s19_s20, 0  ;;  %p29_p1 = scmp.ne.s32.totalorder %s1076_s16, %s1072_s15 }
   0x5   : > { %p30_p2 = scmp.eq.s32.totalorder %s1080_s17, 0  ;;  %p80_p3 = scmp.eq.s32.totalorder %s1124_s18, 1 }
   0x6   : > { %s1137_s22 = scalar_select %p20_p0, %s1076_s16, %s22_s21  }
   0x7   : > { %p31_p4 = por %p30_p2, %p29_p1  ;;  %p1139_p5 = por %p80_p3, %p29_p1 }
   0x8   : > { %p878_p6 = scmp.ge.s32.totalorder %s1080_s17, 2 }
   0xa   : > { %157 = sbr.rel (%p878_p6) target bundleno = 44 (0x2c), region = 20 }
   0xf   : > { %160 = sbr.rel (!%p31_p4) target bundleno = 44 (0x2c), region = 24  ;;  %s162_s24 = sand.u32 (%p31_p4), 1, %s1076_s16  }
  0x10   : > { %s976_s25 = smul.u32 (%p31_p4), 12, %s1080_s17 }
  0x11   : > { %s984_s26 = smul.u32 (%p31_p4), 252, %s162_s24 }
  0x12   : > { %s1149_s29 = scalar_lea.vmem (%p31_p4), %s1329_s0, %s976_s25 }
  0x13   : > { %v182_v0 = vld [vmem:[%s1149_s29] sm:$0xff] (%p31_p4)  ;;  %v184_v1 = vld [vmem:[%s1149_s29 + $0x18] sm:$0xff] (%p31_p4)  ;;  %v186_v2 = vld [vmem:[%s1149_s29 + $0x30] sm:$0xff] (%p31_p4)  ;;  %s1154_s30 = scalar_lea.vmem (%p31_p4), [#allocation2], %s984_s26 }
  0x14   : > { %183 = vst [vmem:[%s1154_s30] sm:$0xff] %v182_v0  ;;  %185 = vst [vmem:[%s1154_s30 + $0xc] sm:$0xff] %v184_v1  ;;  %v188_v3 = vld [vmem:[%s1149_s29 + $0x48] sm:$0xff]  ;;  %v190_v4 = vld [vmem:[%s1149_s29 + $0x60] sm:$0xff] }
  0x15   : > { %187 = vst [vmem:[%s1154_s30 + $0x18] sm:$0xff] %v186_v2  ;;  %v192_v5 = vld [vmem:[%s1149_s29 + $0x78] sm:$0xff]  ;;  %189 = vst [vmem:[%s1154_s30 + $0x24] sm:$0xff] %v188_v3  ;;  %v194_v6 = vld [vmem:[%s1149_s29 + $0x90] sm:$0xff] }
  0x16   : > { %191 = vst [vmem:[%s1154_s30 + $0x30] sm:$0xff] %v190_v4  ;;  %193 = vst [vmem:[%s1154_s30 + $0x3c] sm:$0xff] %v192_v5  ;;  %v196_v7 = vld [vmem:[%s1149_s29 + $0xa8] sm:$0xff]  ;;  %v198_v8 = vld [vmem:[%s1149_s29 + $0xc0] sm:$0xff] }
  0x17   : > { %195 = vst [vmem:[%s1154_s30 + $0x48] sm:$0xff] %v194_v6  ;;  %197 = vst [vmem:[%s1154_s30 + $0x54] sm:$0xff] %v196_v7  ;;  %v200_v9 = vld [vmem:[%s1149_s29 + $0xd8] sm:$0xff]  ;;  %v202_v10 = vld [vmem:[%s1149_s29 + $0xf0] sm:$0xff] }
  0x18   : > { %199 = vst [vmem:[%s1154_s30 + $0x60] sm:$0xff] %v198_v8  ;;  %v204_v11 = vld [vmem:[%s1149_s29 + $0x108] sm:$0xff]  ;;  %201 = vst [vmem:[%s1154_s30 + $0x6c] sm:$0xff] %v200_v9  ;;  %v206_v12 = vld [vmem:[%s1149_s29 + $0x120] sm:$0xff] }
  0x19   : > { %203 = vst [vmem:[%s1154_s30 + $0x78] sm:$0xff] %v202_v10  ;;  %205 = vst [vmem:[%s1154_s30 + $0x84] sm:$0xff] %v204_v11  ;;  %v208_v13 = vld [vmem:[%s1149_s29 + $0x138] sm:$0xff]  ;;  %v210_v14 = vld [vmem:[%s1149_s29 + $0x150] sm:$0xff] }
  0x1a   : > { %207 = vst [vmem:[%s1154_s30 + $0x90] sm:$0xff] %v206_v12  ;;  %209 = vst [vmem:[%s1154_s30 + $0x9c] sm:$0xff] %v208_v13  ;;  %v212_v15 = vld [vmem:[%s1149_s29 + $0x168] sm:$0xff]  ;;  %v214_v16 = vld [vmem:[%s1149_s29 + $0x180] sm:$0xff] }
  0x1b   : > { %211 = vst [vmem:[%s1154_s30 + $0xa8] sm:$0xff] %v210_v14  ;;  %v216_v17 = vld [vmem:[%s1149_s29 + $0x198] sm:$0xff]  ;;  %213 = vst [vmem:[%s1154_s30 + $0xb4] sm:$0xff] %v212_v15  ;;  %v218_v18 = vld [vmem:[%s1149_s29 + $0x1b0] sm:$0xff] }
  0x1c   : > { %215 = vst [vmem:[%s1154_s30 + $0xc0] sm:$0xff] %v214_v16  ;;  %217 = vst [vmem:[%s1154_s30 + $0xcc] sm:$0xff] %v216_v17  ;;  %v220_v19 = vld [vmem:[%s1149_s29 + $0x1c8] sm:$0xff]  ;;  %v222_v20 = vld [vmem:[%s1149_s29 + $0x1e0] sm:$0xff] }
  0x1d   : > { %219 = vst [vmem:[%s1154_s30 + $0xd8] sm:$0xff] %v218_v18  ;;  %221 = vst [vmem:[%s1154_s30 + $0xe4] sm:$0xff] %v220_v19  ;;  %v880_v21 = vld [vmem:[%s1149_s29 + $0x8] sm:$0xf]  ;;  %v882_v22 = vld [vmem:[%s1149_s29 + $0x20] sm:$0xf] }
  0x1e   : > { %223 = vst [vmem:[%s1154_s30 + $0xf0] sm:$0xff] %v222_v20  ;;  %v884_v23 = vld [vmem:[%s1149_s29 + $0x38] sm:$0xf]  ;;  %881 = vst [vmem:[%s1154_s30 + $0x8] sm:$0xf] %v880_v21 }
  0x1f   : > { %883 = vst [vmem:[%s1154_s30 + $0x14] sm:$0xf] %v882_v22  ;;  %885 = vst [vmem:[%s1154_s30 + $0x20] sm:$0xf] %v884_v23  ;;  %v886_v24 = vld [vmem:[%s1149_s29 + $0x50] sm:$0xf] }
  0x20   : > { %v888_v25 = vld [vmem:[%s1149_s29 + $0x68] sm:$0xf]  ;;  %v890_v26 = vld [vmem:[%s1149_s29 + $0x80] sm:$0xf]  ;;  %887 = vst [vmem:[%s1154_s30 + $0x2c] sm:$0xf] %v886_v24 }
  0x21   : > { %889 = vst [vmem:[%s1154_s30 + $0x38] sm:$0xf] %v888_v25  ;;  %891 = vst [vmem:[%s1154_s30 + $0x44] sm:$0xf] %v890_v26  ;;  %v892_v27 = vld [vmem:[%s1149_s29 + $0x98] sm:$0xf] }
  0x22   : > { %v894_v28 = vld [vmem:[%s1149_s29 + $0xb0] sm:$0xf]  ;;  %v896_v29 = vld [vmem:[%s1149_s29 + $0xc8] sm:$0xf]  ;;  %893 = vst [vmem:[%s1154_s30 + $0x50] sm:$0xf] %v892_v27 }
  0x23   : > { %895 = vst [vmem:[%s1154_s30 + $0x5c] sm:$0xf] %v894_v28  ;;  %897 = vst [vmem:[%s1154_s30 + $0x68] sm:$0xf] %v896_v29  ;;  %v898_v30 = vld [vmem:[%s1149_s29 + $0xe0] sm:$0xf] }
  0x24   : > { %v900_v31 = vld [vmem:[%s1149_s29 + $0xf8] sm:$0xf]  ;;  %v902_v32 = vld [vmem:[%s1149_s29 + $0x110] sm:$0xf]  ;;  %899 = vst [vmem:[%s1154_s30 + $0x74] sm:$0xf] %v898_v30 }
  0x25   : > { %901 = vst [vmem:[%s1154_s30 + $0x80] sm:$0xf] %v900_v31  ;;  %903 = vst [vmem:[%s1154_s30 + $0x8c] sm:$0xf] %v902_v32  ;;  %v904_v33 = vld [vmem:[%s1149_s29 + $0x128] sm:$0xf] }
  0x26   : > { %v906_v34 = vld [vmem:[%s1149_s29 + $0x140] sm:$0xf]  ;;  %v908_v35 = vld [vmem:[%s1149_s29 + $0x158] sm:$0xf]  ;;  %905 = vst [vmem:[%s1154_s30 + $0x98] sm:$0xf] %v904_v33 }
  0x27   : > { %907 = vst [vmem:[%s1154_s30 + $0xa4] sm:$0xf] %v906_v34  ;;  %909 = vst [vmem:[%s1154_s30 + $0xb0] sm:$0xf] %v908_v35  ;;  %v910_v36 = vld [vmem:[%s1149_s29 + $0x170] sm:$0xf] }
  0x28   : > { %v912_v37 = vld [vmem:[%s1149_s29 + $0x188] sm:$0xf]  ;;  %v914_v38 = vld [vmem:[%s1149_s29 + $0x1a0] sm:$0xf]  ;;  %911 = vst [vmem:[%s1154_s30 + $0xbc] sm:$0xf] %v910_v36 }
  0x29   : > { %913 = vst [vmem:[%s1154_s30 + $0xc8] sm:$0xf] %v912_v37  ;;  %915 = vst [vmem:[%s1154_s30 + $0xd4] sm:$0xf] %v914_v38  ;;  %v916_v39 = vld [vmem:[%s1149_s29 + $0x1b8] sm:$0xf] }
  0x2a   : > { %v918_v40 = vld [vmem:[%s1149_s29 + $0x1d0] sm:$0xf]  ;;  %v920_v41 = vld [vmem:[%s1149_s29 + $0x1e8] sm:$0xf]  ;;  %917 = vst [vmem:[%s1154_s30 + $0xe0] sm:$0xf] %v916_v39 }
  0x2b   : > { %919 = vst [vmem:[%s1154_s30 + $0xec] sm:$0xf] %v918_v40  ;;  %921 = vst [vmem:[%s1154_s30 + $0xf8] sm:$0xf] %v920_v41 }
  0x2c PF: > { %p922_p7 = scmp.ge.s32.totalorder %s1080_s17, 1  ;;  %p278_p8 = scmp.lt.s32.totalorder %s1080_s17, 3 }
  0x2e   : > { %p279_p9 = pnand %p922_p7, %p278_p8 }
  0x2f   : > { %s285_s5 = sand.u32 (!%p279_p9), 1, %s1072_s15   ;;  %p321_p10 = scmp.lt.s32.totalorder (!%p279_p9), %s1124_s18, 1 }
  0x30   : > { %282 = sbr.rel (%p279_p9) target bundleno = 444 (0x1bc), region = 50 }
  0x31   : > { %s985_s6 = smul.u32 (!%p279_p9), 252, %s285_s5 }
  0x32   : > { %s986_s12 = smul.u32 (!%p279_p9), 24, %s285_s5 }
  0x33   : > { %s1246_s9 = scalar_lea.vmem (!%p279_p9), [#allocation2], %s985_s6 }
  0x34   : > { %s1295_s13 = scalar_lea.vmem (!%p279_p9), [#allocation3], %s986_s12 }
  0x35   : > { %vm553_vm0 = vcmask 277504   ;;  %v1082_v42 = vmov 0   ;;  %v1057_v43 = vld [vmem:[%s1330_s1 + $0x4] ss:$8 sps:$4 sm:$0xff]   ;;  %v1016_v47 = vld [vmem:[%s1246_s9 + $0x94] ss:$12 sps:$4 sm:$0xff]  }
  0x36   : > { %610 = vmatprep.subr.bf16.mxu1 %v1082_v42  ;;  %964 = vmatprep.mubr.msk.bf16.mxu1 %vm553_vm0, %v1057_v43  ;;  %v1012_v44 = vld [vmem:[%s1246_s9 + $0xac] ss:$12 sps:$4 sm:$0xff]   ;;  %v1014_v45 = vld [vmem:[%s1246_s9 + $0xb0] ss:$12 sps:$4 sm:$0xff]   ;;  %v1015_v46 = vld [vmem:[%s1246_s9 + $0xa8] ss:$12 sps:$4 sm:$0xff]  }
  0x37   : > { %963 = vmatprep.mubr.msk.bf16.mxu0 %vm553_vm0, %v1057_v43  ;;  %567 = vmatprep.subr.bf16.mxu0 %v1012_v44  ;;  %v1018_v48 = vld [vmem:[%s1246_s9 + $0x98] ss:$12 sps:$4 sm:$0xff]   ;;  %v1019_v49 = vld [vmem:[%s1246_s9 + $0x90] ss:$12 sps:$4 sm:$0xff]   ;;  %v1022_v51 = vld [vmem:[%s1246_s9 + $0x80] ss:$12 sps:$4 sm:$0xff]  }
  0x38   : > { %611 = vmatpush1.bf16.msra.mxu1 %v1014_v45  ;;  %568 = vmatpush1.bf16.msra.mxu0 %v1015_v46  ;;  %v1020_v50 = vld [vmem:[%s1246_s9 + $0x7c] ss:$12 sps:$4 sm:$0xff]   ;;  %v1023_v52 = vld [vmem:[%s1246_s9 + $0x78] ss:$12 sps:$4 sm:$0xff]   ;;  %v1027_v55 = vld [vmem:[%s1246_s9 + $0x60] ss:$12 sps:$4 sm:$0xff]  }
  0x39   : > { %612 = vmatprep.subr.bf16.mxu1 %v1082_v42  ;;  %569 = vmatprep.subr.bf16.mxu0 %v1016_v47  ;;  %v1024_v53 = vld [vmem:[%s1246_s9 + $0x64] ss:$12 sps:$4 sm:$0xff]   ;;  %v1026_v54 = vld [vmem:[%s1246_s9 + $0x68] ss:$12 sps:$4 sm:$0xff]   ;;  %v1028_v56 = vld [vmem:[%s1246_s9 + $0x4c] ss:$12 sps:$4 sm:$0xff]  }
  0x3a   : > { %v1030_v57 = vld [vmem:[%s1246_s9 + $0x50] ss:$12 sps:$4 sm:$0xff]   ;;  %v1031_v58 = vld [vmem:[%s1246_s9 + $0x48] ss:$12 sps:$4 sm:$0xff]   ;;  %v1034_v60 = vld [vmem:[%s1246_s9 + $0x38] ss:$12 sps:$4 sm:$0xff]  }
  0x3b   : > { %v1032_v59 = vld [vmem:[%s1246_s9 + $0x34] ss:$12 sps:$4 sm:$0xff]   ;;  %v1035_v61 = vld [vmem:[%s1246_s9 + $0x30] ss:$12 sps:$4 sm:$0xff]   ;;  %v1039_v0 = vld [vmem:[%s1246_s9 + $0x18] ss:$12 sps:$4 sm:$0xff]  }
  0x3c   : > { %613 = vmatpush1.bf16.msra.mxu1 %v1018_v48  ;;  %570 = vmatpush1.bf16.msra.mxu0 %v1019_v49  ;;  %v1036_v62 = vld [vmem:[%s1246_s9 + $0x1c] ss:$12 sps:$4 sm:$0xff]   ;;  %v1038_v63 = vld [vmem:[%s1246_s9 + $0x20] ss:$12 sps:$4 sm:$0xff]   ;;  %v1040_v1 = vld [vmem:[%s1246_s9 + $0x4] ss:$12 sps:$4 sm:$0xff]  }
  0x3d   : > { %614 = vmatprep.subr.bf16.mxu1 %v1082_v42  ;;  %571 = vmatprep.subr.bf16.mxu0 %v1020_v50  ;;  %v372_v2 = vld [vmem:[%s1246_s9 + $0xf0] sm:$0x11]  ;;  %v1043_v4 = vld [vmem:[%s1246_s9] ss:$12 sps:$4 sm:$0xff]   ;;  %vm557_vm1 = vcmask 1040384   ;;  %s322_s14 = scalar_select %p321_p10, %s1124_s18, 1 }
  0x3e   : > { %v1042_v3 = vld [vmem:[%s1246_s9 + $0x8] ss:$12 sps:$4 sm:$0xff]   ;;  %v1045_v5 = vld [vmem:[%s1246_s9 + $0xf8] ss:$0 sps:$4 sm:$0x11]   ;;  %v960_v6 = vcombine.high %v372_v2, %v372_v2  ;;  %v959_v7 = vcombine.low %v372_v2, %v372_v2  ;;  %vm683_vm2 = vcmask 7168  }
  0x3f   : > { %v565_v8 = vsel %vm557_vm1, %v1045_v5, 0  ;;  %v1047_v10 = vld [vmem:[%s1246_s9 + $0xdc] ss:$12 sps:$4 sm:$0xff]   ;;  %v1049_v11 = vld [vmem:[%s1246_s9 + $0xe0] ss:$12 sps:$4 sm:$0xff]   ;;  %s977_s15 = sshll.u32 %s322_s14, 4 }
  0x40   : > { %615 = vmatpush1.bf16.msra.mxu1 %v1022_v51  ;;  %572 = vmatpush1.bf16.msra.mxu0 %v1023_v52  ;;  %v559_v9 = vsel %vm557_vm1, %v959_v7, 0  ;;  %v1050_v12 = vld [vmem:[%s1246_s9 + $0xd8] ss:$12 sps:$4 sm:$0xff]   ;;  %v1053_v14 = vld [vmem:[%s1246_s9 + $0xc8] ss:$12 sps:$4 sm:$0xff]   ;;  %s325_s21 = scalar_lea.vmem %s1332_s3, %s977_s15  ;;  %s330_s26 = scalar_lea.vmem %s1333_s4, %s977_s15 }
  0x41   : > { %616 = vmatprep.subr.bf16.mxu1 %v1082_v42  ;;  %573 = vmatprep.subr.bf16.mxu0 %v1024_v53  ;;  %v1051_v13 = vld [vmem:[%s1246_s9 + $0xc4] ss:$12 sps:$4 sm:$0xff]   ;;  %v1054_v15 = vld [vmem:[%s1246_s9 + $0xc0] ss:$12 sps:$4 sm:$0xff]   ;;  %s983_s27 = smul.u32 (%p1139_p5), 12, %s1124_s18 }
  0x42   : > { %v1055_v16 = vld [vmem:[%s1330_s1] ss:$8 sps:$4 sm:$0xff]  }
  0x43   : > { %s721_s30 = scalar_lea.vmem (%p1139_p5), %s1331_s2, %s983_s27 }
  0x44   : > { %617 = vmatpush1.bf16.msra.mxu1 %v1026_v54  ;;  %574 = vmatpush1.bf16.msra.mxu0 %v1027_v55 }
  0x45   : > { %618 = vmatprep.subr.bf16.mxu1 %v1082_v42  ;;  %575 = vmatprep.subr.bf16.mxu0 %v1028_v56 }
  0x48   : > { %619 = vmatpush1.bf16.msra.mxu1 %v1030_v57  ;;  %576 = vmatpush1.bf16.msra.mxu0 %v1031_v58 }
  0x49   : > { %620 = vmatprep.subr.bf16.mxu1 %v1082_v42  ;;  %577 = vmatprep.subr.bf16.mxu0 %v1032_v59 }
  0x4c   : > { %621 = vmatpush1.bf16.msra.mxu1 %v1034_v60  ;;  %578 = vmatpush1.bf16.msra.mxu0 %v1035_v61 }
  0x4d   : > { %622 = vmatprep.subr.bf16.mxu1 %v1082_v42  ;;  %579 = vmatprep.subr.bf16.mxu0 %v1036_v62 }
  0x50   : > { %623 = vmatpush1.bf16.msra.mxu1 %v1038_v63  ;;  %580 = vmatpush1.bf16.msra.mxu0 %v1039_v0 }
  0x51   : > { %624 = vmatprep.subr.bf16.mxu1 %v1082_v42  ;;  %581 = vmatprep.subr.bf16.mxu0 %v1040_v1 }
  0x54   : > { %625 = vmatpush1.bf16.msra.mxu1 %v1042_v3  ;;  %582 = vmatpush1.bf16.msra.mxu0 %v1043_v4 }
  0x55   : > { %636 = vmatprep.subr.bf16.mxu1 %v1082_v42  ;;  %962 = vmatprep.subr.msk.bf16.mxu0 %vm557_vm1, %v960_v6 }
  0x58   : > { %637 = vmatpush2.bf16.msra.mxu1 %v565_v8  ;;  %594 = vmatpush2.bf16.msra.mxu0 %v559_v9 }
  0x59   : > { %638 = vmatprep.subr.bf16.mxu1 %v1082_v42  ;;  %595 = vmatprep.subr.bf16.mxu0 %v1047_v10 }
  0x5c   : > { %639 = vmatpush2.bf16.msra.mxu1 %v1049_v11  ;;  %596 = vmatpush2.bf16.msra.mxu0 %v1050_v12 }
  0x5d   : > { %640 = vmatprep.subr.bf16.mxu1 %v1082_v42  ;;  %597 = vmatprep.subr.bf16.mxu0 %v1051_v13 }
  0x60   : > { %641 = vmatpush2.bf16.msra.mxu1 %v1053_v14  ;;  %598 = vmatpush2.bf16.msra.mxu0 %v1054_v15 }
  0x63   : > { %643 = vmatmul.mubr.bf16.vlgmr.msra.gmra.mxu1 %v1055_v16  ;;  %600 = vmatmul.mubr.bf16.vlgmr.msra.gmra.mxu0 %v1055_v16 }
 0x123   : > { %v644_v17 = vpop.f32.mrf.mxu1  ;;  %v601_v19 = vpop.f32.mrf.mxu0 }
 0x124   : > { %v980_v18 = vpack.c.bf16 %v644_v17, %v644_v17  ;;  %v688_v22 = vmul.f32 %v644_v17, %v644_v17  ;;  %v686_v23 = vmul.f32 %v601_v19, %v601_v19 }
 0x125   : > { %v646_v20 = vpop.f32.mrf.mxu1  ;;  %v603_v21 = vpop.f32.mrf.mxu0 }
 0x126   : > { %672 = vst [vmem:[%s1295_s13 + $0x8] sm:$0xf] %v980_v18  ;;  %v979_v24 = vpack.c.bf16 %v603_v21, %v601_v19  ;;  %v687_v25 = vmul.f32 %v603_v21, %v603_v21  ;;  %v675_v27 = vadd.f32 %v603_v21, %v601_v19 }
 0x127   : > { %v647_v26 = vpop.f32.mrf.mxu1  ;;  %v605_v29 = vpop.f32.mrf.mxu0 }
 0x128   : > { %v982_v28 = vpack.c.bf16 %v647_v26, %v647_v26  ;;  %671 = vst [vmem:[%s1295_s13] sm:$0xff] %v979_v24  ;;  %v676_v31 = vadd.f32 %v675_v27, %v644_v17  ;;  %v692_v32 = vadd.f32 %v687_v25, %v686_v23  ;;  %v689_v33 = vmul.f32 %v605_v29, %v605_v29 }
 0x129   : > { %v649_v30 = vpop.f32.mrf.mxu1  ;;  %v607_v34 = vpop.f32.mrf.mxu0  ;;  %v691_v40 = vmul.f32 %v647_v26, %v647_v26 }
 0x12a   : > { %674 = vst [vmem:[%s1295_s13 + $0x14] sm:$0xf] %v982_v28  ;;  %v981_v35 = vpack.c.bf16 %v607_v34, %v605_v29  ;;  %v679_v36 = vadd.f32 %v607_v34, %v605_v29  ;;  %v690_v37 = vmul.f32 %v607_v34, %v607_v34  ;;  %677 = vadd.xlane.f32.xlu0 %v676_v31 }
 0x12b   : > { %v693_v38 = vadd.f32 %v692_v32, %v688_v22 }
 0x12c   : > { %673 = vst [vmem:[%s1295_s13 + $0xc] sm:$0xff] %v981_v35  ;;  %v680_v39 = vadd.f32 %v679_v36, %v647_v26  ;;  %v696_v41 = vadd.f32 %v690_v37, %v689_v33 }
 0x12d   : > { %694 = vadd.xlane.f32.xlu1 %v693_v38  ;;  %v970_v49 = vld [vmem:[%s1295_s13 + $0x8] sm:$0xf] (%p1139_p5) }
 0x12e   : > { %681 = vadd.xlane.f32.xlu0 %v680_v39  ;;  %v697_v42 = vadd.f32 %v696_v41, %v691_v40  ;;  %971 = vst [vmem:[%s721_s30 + $0x8] sm:$0xf] (%p1139_p5), %v970_v49 }
 0x12f   : > { %v736_v47 = vld [vmem:[%s1295_s13] sm:$0xff] (%p1139_p5) }
 0x130   : > { %737 = vst [vmem:[%s721_s30] sm:$0xff] (%p1139_p5), %v736_v47 }
 0x131   : > { %698 = vadd.xlane.f32.xlu1 %v697_v42  ;;  %v972_v50 = vld [vmem:[%s1295_s13 + $0x14] sm:$0xf] (%p1139_p5) }
 0x132   : > { %973 = vst [vmem:[%s721_s30 + $0x20] sm:$0xf] (%p1139_p5), %v972_v50 }
 0x133   : > { %v738_v48 = vld [vmem:[%s1295_s13 + $0xc] sm:$0xff] (%p1139_p5) }
 0x134   : > { %739 = vst [vmem:[%s721_s30 + $0x18] sm:$0xff] (%p1139_p5), %v738_v48 }
 0x1b3   : > { %v678_v43 = vpop.xlane.xlu0 %677 }
 0x1b4   : > { %684 = vst.msk [vmem:[%s325_s21] sm:$0xff] %vm683_vm2, %v678_v43 }
 0x1b6   : > { %v695_v44 = vpop.xlane.xlu1 %694 }
 0x1b7   : > { %700 = vst.msk [vmem:[%s330_s26] sm:$0xff] %vm683_vm2, %v695_v44  ;;  %v682_v45 = vpop.xlane.xlu0 %681  ;;  %718 = sbr.rel (!%p1139_p5) target bundleno = 444 (0x1bc), region = 58 }
 0x1b8   : > { %685 = vst.msk [vmem:[%s325_s21 + $0x8] sm:$0xff] %vm683_vm2, %v682_v45 }
 0x1ba   : > { %v699_v46 = vpop.xlane.xlu1 %698 }
 0x1bb   : > { %701 = vst.msk [vmem:[%s330_s26 + $0x8] sm:$0xff] %vm683_vm2, %v699_v46 }
 0x1bc PF: > { %p12_p11 = scmp.ge.s32.totalorder %s1127_s19, 4   ;;  %s1335_s15 = smov %s1076_s16 }
 0x1bd   : > { %s1336_s16 = smov %s1137_s22  ;;  %s1337_s17 = smov %s1127_s19 }
 0x1be   :  { %14 = sbr.rel (!%p12_p11) target bundleno = 2 (0x2), region = 151 }

// kernel: u_net_forward.8
= control target key start
LH: loop header
LB: loop body
LE: loop exit
PB: predicated region body
PF: predicated region fallthrough
CT: control target
= control target key end

     0   :  { %s2685_s21 = smov 0   ;;  %s2687_s22 = smov 0   ;;  %s3681_s0 = inlined_call_operand.vmem [shape: bf16[432,768], index: 0, kind: input, shape index: {}]   ;;  %s3682_s1 = inlined_call_operand.vmem [shape: f32[432,1], index: 1, kind: input, shape index: {}]   ;;  %s3683_s2 = inlined_call_operand.vmem [shape: f32[432,1], index: 2, kind: input, shape index: {}]   ;;  %s3684_s3 = inlined_call_operand.vmem [shape: bf16[16,432], index: 3, kind: input, shape index: {}]   ;;  %s3685_s4 = inlined_call_operand.vmem [shape: bf16[16,768], index: 4, kind: output, shape index: {0}]   ;;  %s3686_s5 = inlined_call_operand.vmem [shape: f32[2,16,1], index: 5, kind: output, shape index: {1}]   ;;  %s3687_s6 = inlined_call_operand.vmem [shape: f32[2,16,1], index: 6, kind: output, shape index: {2}]  }
   0x1   :  { %s2689_s23 = smov 0  }
   0x2 LB: > { %s2701_s24 = sadd.s32 4294967295, %s2647_s23   ;;  %s2704_s25 = sadd.s32 1, %s2647_s23   ;;  %s2647_s23 = sphi %s2689_s23, %s3725_s23   ;;  %s2643_s22 = sphi %s2687_s22, %s3724_s22   ;;  %s2639_s21 = sphi %s2685_s21, %s3723_s21  }
   0x3   : > { %s21_s26 = ssub.s32 %s2647_s23, %s2704_s25  ;;  %s24_s27 = sadd.s32 1, %s2643_s22 }
   0x4   : > { %p22_p0 = scmp.eq.s32.totalorder %s21_s26, 0  ;;  %p31_p1 = scmp.ne.s32.totalorder %s2643_s22, %s2639_s21 }
   0x5   : > { %p32_p2 = scmp.eq.s32.totalorder %s2647_s23, 0  ;;  %p124_p3 = scmp.eq.s32.totalorder %s2701_s24, 1 }
   0x6   : > { %s2714_s28 = scalar_select %p22_p0, %s2643_s22, %s24_s27  }
   0x7   : > { %p33_p4 = por %p32_p2, %p31_p1  ;;  %p2716_p5 = por %p124_p3, %p31_p1 }
   0x8   : > { %p2425_p6 = scmp.ge.s32.totalorder %s2647_s23, 2 }
   0xa   : > { %207 = sbr.rel (%p2425_p6) target bundleno = 83 (0x53), region = 28 }
   0xf   : > { %210 = sbr.rel (!%p33_p4) target bundleno = 83 (0x53), region = 32  ;;  %s212_s30 = sand.u32 (%p33_p4), 1, %s2643_s22  }
  0x10   : > { %s2557_s7 = smul.u32 (%p33_p4), 12, %s2647_s23 }
  0x11   : > { %s2587_s8 = smul.u32 (%p33_p4), 648, %s212_s30 }
  0x12   : > { %s2726_s11 = scalar_lea.vmem (%p33_p4), %s3681_s0, %s2557_s7 }
  0x13   : > { %v232_v0 = vld [vmem:[%s2726_s11] sm:$0xff] (%p33_p4)  ;;  %v234_v1 = vld [vmem:[%s2726_s11 + $0x18] sm:$0xff] (%p33_p4)  ;;  %v236_v2 = vld [vmem:[%s2726_s11 + $0x30] sm:$0xff] (%p33_p4)  ;;  %s2731_s12 = scalar_lea.vmem (%p33_p4), [#allocation2], %s2587_s8 }
  0x14   : > { %233 = vst [vmem:[%s2731_s12] sm:$0xff] %v232_v0  ;;  %235 = vst [vmem:[%s2731_s12 + $0xc] sm:$0xff] %v234_v1  ;;  %v238_v3 = vld [vmem:[%s2726_s11 + $0x48] sm:$0xff]  ;;  %v240_v4 = vld [vmem:[%s2726_s11 + $0x60] sm:$0xff] }
  0x15   : > { %237 = vst [vmem:[%s2731_s12 + $0x18] sm:$0xff] %v236_v2  ;;  %v242_v5 = vld [vmem:[%s2726_s11 + $0x78] sm:$0xff]  ;;  %239 = vst [vmem:[%s2731_s12 + $0x24] sm:$0xff] %v238_v3  ;;  %v244_v6 = vld [vmem:[%s2726_s11 + $0x90] sm:$0xff] }
  0x16   : > { %241 = vst [vmem:[%s2731_s12 + $0x30] sm:$0xff] %v240_v4  ;;  %243 = vst [vmem:[%s2731_s12 + $0x3c] sm:$0xff] %v242_v5  ;;  %v246_v7 = vld [vmem:[%s2726_s11 + $0xa8] sm:$0xff]  ;;  %v248_v8 = vld [vmem:[%s2726_s11 + $0xc0] sm:$0xff] }
  0x17   : > { %245 = vst [vmem:[%s2731_s12 + $0x48] sm:$0xff] %v244_v6  ;;  %247 = vst [vmem:[%s2731_s12 + $0x54] sm:$0xff] %v246_v7  ;;  %v250_v9 = vld [vmem:[%s2726_s11 + $0xd8] sm:$0xff]  ;;  %v252_v10 = vld [vmem:[%s2726_s11 + $0xf0] sm:$0xff] }
  0x18   : > { %249 = vst [vmem:[%s2731_s12 + $0x60] sm:$0xff] %v248_v8  ;;  %v254_v11 = vld [vmem:[%s2726_s11 + $0x108] sm:$0xff]  ;;  %251 = vst [vmem:[%s2731_s12 + $0x6c] sm:$0xff] %v250_v9  ;;  %v256_v12 = vld [vmem:[%s2726_s11 + $0x120] sm:$0xff] }
  0x19   : > { %253 = vst [vmem:[%s2731_s12 + $0x78] sm:$0xff] %v252_v10  ;;  %255 = vst [vmem:[%s2731_s12 + $0x84] sm:$0xff] %v254_v11  ;;  %v258_v13 = vld [vmem:[%s2726_s11 + $0x138] sm:$0xff]  ;;  %v260_v14 = vld [vmem:[%s2726_s11 + $0x150] sm:$0xff] }
  0x1a   : > { %257 = vst [vmem:[%s2731_s12 + $0x90] sm:$0xff] %v256_v12  ;;  %259 = vst [vmem:[%s2731_s12 + $0x9c] sm:$0xff] %v258_v13  ;;  %v262_v15 = vld [vmem:[%s2726_s11 + $0x168] sm:$0xff]  ;;  %v264_v16 = vld [vmem:[%s2726_s11 + $0x180] sm:$0xff] }
  0x1b   : > { %261 = vst [vmem:[%s2731_s12 + $0xa8] sm:$0xff] %v260_v14  ;;  %v266_v17 = vld [vmem:[%s2726_s11 + $0x198] sm:$0xff]  ;;  %263 = vst [vmem:[%s2731_s12 + $0xb4] sm:$0xff] %v262_v15  ;;  %v268_v18 = vld [vmem:[%s2726_s11 + $0x1b0] sm:$0xff] }
  0x1c   : > { %265 = vst [vmem:[%s2731_s12 + $0xc0] sm:$0xff] %v264_v16  ;;  %267 = vst [vmem:[%s2731_s12 + $0xcc] sm:$0xff] %v266_v17  ;;  %v270_v19 = vld [vmem:[%s2726_s11 + $0x1c8] sm:$0xff]  ;;  %v272_v20 = vld [vmem:[%s2726_s11 + $0x1e0] sm:$0xff] }
  0x1d   : > { %269 = vst [vmem:[%s2731_s12 + $0xd8] sm:$0xff] %v268_v18  ;;  %271 = vst [vmem:[%s2731_s12 + $0xe4] sm:$0xff] %v270_v19  ;;  %v274_v21 = vld [vmem:[%s2726_s11 + $0x1f8] sm:$0xff]  ;;  %v276_v22 = vld [vmem:[%s2726_s11 + $0x210] sm:$0xff] }
  0x1e   : > { %273 = vst [vmem:[%s2731_s12 + $0xf0] sm:$0xff] %v272_v20  ;;  %v278_v23 = vld [vmem:[%s2726_s11 + $0x228] sm:$0xff]  ;;  %275 = vst [vmem:[%s2731_s12 + $0xfc] sm:$0xff] %v274_v21  ;;  %v280_v24 = vld [vmem:[%s2726_s11 + $0x240] sm:$0xff] }
  0x1f   : > { %277 = vst [vmem:[%s2731_s12 + $0x108] sm:$0xff] %v276_v22  ;;  %279 = vst [vmem:[%s2731_s12 + $0x114] sm:$0xff] %v278_v23  ;;  %v282_v25 = vld [vmem:[%s2726_s11 + $0x258] sm:$0xff]  ;;  %v284_v26 = vld [vmem:[%s2726_s11 + $0x270] sm:$0xff] }
  0x20   : > { %281 = vst [vmem:[%s2731_s12 + $0x120] sm:$0xff] %v280_v24  ;;  %283 = vst [vmem:[%s2731_s12 + $0x12c] sm:$0xff] %v282_v25  ;;  %v286_v27 = vld [vmem:[%s2726_s11 + $0x288] sm:$0xff]  ;;  %v288_v28 = vld [vmem:[%s2726_s11 + $0x2a0] sm:$0xff] }
  0x21   : > { %285 = vst [vmem:[%s2731_s12 + $0x138] sm:$0xff] %v284_v26  ;;  %v290_v29 = vld [vmem:[%s2726_s11 + $0x2b8] sm:$0xff]  ;;  %287 = vst [vmem:[%s2731_s12 + $0x144] sm:$0xff] %v286_v27  ;;  %v292_v30 = vld [vmem:[%s2726_s11 + $0x2d0] sm:$0xff] }
  0x22   : > { %289 = vst [vmem:[%s2731_s12 + $0x150] sm:$0xff] %v288_v28  ;;  %291 = vst [vmem:[%s2731_s12 + $0x15c] sm:$0xff] %v290_v29  ;;  %v294_v31 = vld [vmem:[%s2726_s11 + $0x2e8] sm:$0xff]  ;;  %v296_v32 = vld [vmem:[%s2726_s11 + $0x300] sm:$0xff] }
  0x23   : > { %293 = vst [vmem:[%s2731_s12 + $0x168] sm:$0xff] %v292_v30  ;;  %295 = vst [vmem:[%s2731_s12 + $0x174] sm:$0xff] %v294_v31  ;;  %v298_v33 = vld [vmem:[%s2726_s11 + $0x318] sm:$0xff]  ;;  %v300_v34 = vld [vmem:[%s2726_s11 + $0x330] sm:$0xff] }
  0x24   : > { %297 = vst [vmem:[%s2731_s12 + $0x180] sm:$0xff] %v296_v32  ;;  %v302_v35 = vld [vmem:[%s2726_s11 + $0x348] sm:$0xff]  ;;  %299 = vst [vmem:[%s2731_s12 + $0x18c] sm:$0xff] %v298_v33  ;;  %v304_v36 = vld [vmem:[%s2726_s11 + $0x360] sm:$0xff] }
  0x25   : > { %301 = vst [vmem:[%s2731_s12 + $0x198] sm:$0xff] %v300_v34  ;;  %303 = vst [vmem:[%s2731_s12 + $0x1a4] sm:$0xff] %v302_v35  ;;  %v306_v37 = vld [vmem:[%s2726_s11 + $0x378] sm:$0xff]  ;;  %v308_v38 = vld [vmem:[%s2726_s11 + $0x390] sm:$0xff] }
  0x26   : > { %305 = vst [vmem:[%s2731_s12 + $0x1b0] sm:$0xff] %v304_v36  ;;  %307 = vst [vmem:[%s2731_s12 + $0x1bc] sm:$0xff] %v306_v37  ;;  %v310_v39 = vld [vmem:[%s2726_s11 + $0x3a8] sm:$0xff]  ;;  %v312_v40 = vld [vmem:[%s2726_s11 + $0x3c0] sm:$0xff] }
  0x27   : > { %309 = vst [vmem:[%s2731_s12 + $0x1c8] sm:$0xff] %v308_v38  ;;  %v314_v41 = vld [vmem:[%s2726_s11 + $0x3d8] sm:$0xff]  ;;  %311 = vst [vmem:[%s2731_s12 + $0x1d4] sm:$0xff] %v310_v39  ;;  %v316_v42 = vld [vmem:[%s2726_s11 + $0x3f0] sm:$0xff] }
  0x28   : > { %313 = vst [vmem:[%s2731_s12 + $0x1e0] sm:$0xff] %v312_v40  ;;  %315 = vst [vmem:[%s2731_s12 + $0x1ec] sm:$0xff] %v314_v41  ;;  %v318_v43 = vld [vmem:[%s2726_s11 + $0x408] sm:$0xff]  ;;  %v320_v44 = vld [vmem:[%s2726_s11 + $0x420] sm:$0xff] }
  0x29   : > { %317 = vst [vmem:[%s2731_s12 + $0x1f8] sm:$0xff] %v316_v42  ;;  %319 = vst [vmem:[%s2731_s12 + $0x204] sm:$0xff] %v318_v43  ;;  %v322_v45 = vld [vmem:[%s2726_s11 + $0x438] sm:$0xff]  ;;  %v324_v46 = vld [vmem:[%s2726_s11 + $0x450] sm:$0xff] }
  0x2a   : > { %321 = vst [vmem:[%s2731_s12 + $0x210] sm:$0xff] %v320_v44  ;;  %v326_v47 = vld [vmem:[%s2726_s11 + $0x468] sm:$0xff]  ;;  %323 = vst [vmem:[%s2731_s12 + $0x21c] sm:$0xff] %v322_v45  ;;  %v328_v48 = vld [vmem:[%s2726_s11 + $0x480] sm:$0xff] }
  0x2b   : > { %325 = vst [vmem:[%s2731_s12 + $0x228] sm:$0xff] %v324_v46  ;;  %327 = vst [vmem:[%s2731_s12 + $0x234] sm:$0xff] %v326_v47  ;;  %v330_v49 = vld [vmem:[%s2726_s11 + $0x498] sm:$0xff]  ;;  %v332_v50 = vld [vmem:[%s2726_s11 + $0x4b0] sm:$0xff] }
  0x2c   : > { %329 = vst [vmem:[%s2731_s12 + $0x240] sm:$0xff] %v328_v48  ;;  %331 = vst [vmem:[%s2731_s12 + $0x24c] sm:$0xff] %v330_v49  ;;  %v334_v51 = vld [vmem:[%s2726_s11 + $0x4c8] sm:$0xff]  ;;  %v336_v52 = vld [vmem:[%s2726_s11 + $0x4e0] sm:$0xff] }
  0x2d   : > { %333 = vst [vmem:[%s2731_s12 + $0x258] sm:$0xff] %v332_v50  ;;  %v338_v53 = vld [vmem:[%s2726_s11 + $0x4f8] sm:$0xff]  ;;  %335 = vst [vmem:[%s2731_s12 + $0x264] sm:$0xff] %v334_v51  ;;  %v2427_v54 = vld [vmem:[%s2726_s11 + $0x8] sm:$0xf] }
  0x2e   : > { %337 = vst [vmem:[%s2731_s12 + $0x270] sm:$0xff] %v336_v52  ;;  %339 = vst [vmem:[%s2731_s12 + $0x27c] sm:$0xff] %v338_v53  ;;  %v2429_v55 = vld [vmem:[%s2726_s11 + $0x20] sm:$0xf]  ;;  %v2431_v56 = vld [vmem:[%s2726_s11 + $0x38] sm:$0xf] }
  0x2f   : > { %2428 = vst [vmem:[%s2731_s12 + $0x8] sm:$0xf] %v2427_v54  ;;  %2430 = vst [vmem:[%s2731_s12 + $0x14] sm:$0xf] %v2429_v55  ;;  %v2433_v57 = vld [vmem:[%s2726_s11 + $0x50] sm:$0xf] }
  0x30   : > { %2432 = vst [vmem:[%s2731_s12 + $0x20] sm:$0xf] %v2431_v56  ;;  %v2435_v58 = vld [vmem:[%s2726_s11 + $0x68] sm:$0xf]  ;;  %v2437_v59 = vld [vmem:[%s2726_s11 + $0x80] sm:$0xf] }
  0x31   : > { %2434 = vst [vmem:[%s2731_s12 + $0x2c] sm:$0xf] %v2433_v57  ;;  %2436 = vst [vmem:[%s2731_s12 + $0x38] sm:$0xf] %v2435_v58  ;;  %v2439_v60 = vld [vmem:[%s2726_s11 + $0x98] sm:$0xf] }
  0x32   : > { %2438 = vst [vmem:[%s2731_s12 + $0x44] sm:$0xf] %v2437_v59  ;;  %v2441_v61 = vld [vmem:[%s2726_s11 + $0xb0] sm:$0xf]  ;;  %v2443_v62 = vld [vmem:[%s2726_s11 + $0xc8] sm:$0xf] }
  0x33   : > { %2440 = vst [vmem:[%s2731_s12 + $0x50] sm:$0xf] %v2439_v60  ;;  %2442 = vst [vmem:[%s2731_s12 + $0x5c] sm:$0xf] %v2441_v61  ;;  %v2445_v63 = vld [vmem:[%s2726_s11 + $0xe0] sm:$0xf] }
  0x34   : > { %2444 = vst [vmem:[%s2731_s12 + $0x68] sm:$0xf] %v2443_v62  ;;  %v2447_v0 = vld [vmem:[%s2726_s11 + $0xf8] sm:$0xf]  ;;  %v2449_v1 = vld [vmem:[%s2726_s11 + $0x110] sm:$0xf] }
  0x35   : > { %2446 = vst [vmem:[%s2731_s12 + $0x74] sm:$0xf] %v2445_v63  ;;  %2448 = vst [vmem:[%s2731_s12 + $0x80] sm:$0xf] %v2447_v0  ;;  %v2451_v2 = vld [vmem:[%s2726_s11 + $0x128] sm:$0xf] }
  0x36   : > { %2450 = vst [vmem:[%s2731_s12 + $0x8c] sm:$0xf] %v2449_v1  ;;  %v2453_v3 = vld [vmem:[%s2726_s11 + $0x140] sm:$0xf]  ;;  %v2455_v4 = vld [vmem:[%s2726_s11 + $0x158] sm:$0xf] }
  0x37   : > { %2452 = vst [vmem:[%s2731_s12 + $0x98] sm:$0xf] %v2451_v2  ;;  %2454 = vst [vmem:[%s2731_s12 + $0xa4] sm:$0xf] %v2453_v3  ;;  %v2457_v5 = vld [vmem:[%s2726_s11 + $0x170] sm:$0xf] }
  0x38   : > { %2456 = vst [vmem:[%s2731_s12 + $0xb0] sm:$0xf] %v2455_v4  ;;  %v2459_v6 = vld [vmem:[%s2726_s11 + $0x188] sm:$0xf]  ;;  %v2461_v7 = vld [vmem:[%s2726_s11 + $0x1a0] sm:$0xf] }
  0x39   : > { %2458 = vst [vmem:[%s2731_s12 + $0xbc] sm:$0xf] %v2457_v5  ;;  %2460 = vst [vmem:[%s2731_s12 + $0xc8] sm:$0xf] %v2459_v6  ;;  %v2463_v8 = vld [vmem:[%s2726_s11 + $0x1b8] sm:$0xf] }
  0x3a   : > { %2462 = vst [vmem:[%s2731_s12 + $0xd4] sm:$0xf] %v2461_v7  ;;  %v2465_v9 = vld [vmem:[%s2726_s11 + $0x1d0] sm:$0xf]  ;;  %v2467_v10 = vld [vmem:[%s2726_s11 + $0x1e8] sm:$0xf] }
  0x3b   : > { %2464 = vst [vmem:[%s2731_s12 + $0xe0] sm:$0xf] %v2463_v8  ;;  %2466 = vst [vmem:[%s2731_s12 + $0xec] sm:$0xf] %v2465_v9  ;;  %v2469_v11 = vld [vmem:[%s2726_s11 + $0x200] sm:$0xf] }
  0x3c   : > { %2468 = vst [vmem:[%s2731_s12 + $0xf8] sm:$0xf] %v2467_v10  ;;  %v2471_v12 = vld [vmem:[%s2726_s11 + $0x218] sm:$0xf]  ;;  %v2473_v13 = vld [vmem:[%s2726_s11 + $0x230] sm:$0xf] }
  0x3d   : > { %2470 = vst [vmem:[%s2731_s12 + $0x104] sm:$0xf] %v2469_v11  ;;  %2472 = vst [vmem:[%s2731_s12 + $0x110] sm:$0xf] %v2471_v12  ;;  %v2475_v14 = vld [vmem:[%s2726_s11 + $0x248] sm:$0xf] }
  0x3e   : > { %2474 = vst [vmem:[%s2731_s12 + $0x11c] sm:$0xf] %v2473_v13  ;;  %v2477_v15 = vld [vmem:[%s2726_s11 + $0x260] sm:$0xf]  ;;  %v2479_v16 = vld [vmem:[%s2726_s11 + $0x278] sm:$0xf] }
  0x3f   : > { %2476 = vst [vmem:[%s2731_s12 + $0x128] sm:$0xf] %v2475_v14  ;;  %2478 = vst [vmem:[%s2731_s12 + $0x134] sm:$0xf] %v2477_v15  ;;  %v2481_v17 = vld [vmem:[%s2726_s11 + $0x290] sm:$0xf] }
  0x40   : > { %2480 = vst [vmem:[%s2731_s12 + $0x140] sm:$0xf] %v2479_v16  ;;  %v2483_v18 = vld [vmem:[%s2726_s11 + $0x2a8] sm:$0xf]  ;;  %v2485_v19 = vld [vmem:[%s2726_s11 + $0x2c0] sm:$0xf] }
  0x41   : > { %2482 = vst [vmem:[%s2731_s12 + $0x14c] sm:$0xf] %v2481_v17  ;;  %2484 = vst [vmem:[%s2731_s12 + $0x158] sm:$0xf] %v2483_v18  ;;  %v2487_v20 = vld [vmem:[%s2726_s11 + $0x2d8] sm:$0xf] }
  0x42   : > { %2486 = vst [vmem:[%s2731_s12 + $0x164] sm:$0xf] %v2485_v19  ;;  %v2489_v21 = vld [vmem:[%s2726_s11 + $0x2f0] sm:$0xf]  ;;  %v2491_v22 = vld [vmem:[%s2726_s11 + $0x308] sm:$0xf] }
  0x43   : > { %2488 = vst [vmem:[%s2731_s12 + $0x170] sm:$0xf] %v2487_v20  ;;  %2490 = vst [vmem:[%s2731_s12 + $0x17c] sm:$0xf] %v2489_v21  ;;  %v2493_v23 = vld [vmem:[%s2726_s11 + $0x320] sm:$0xf] }
  0x44   : > { %2492 = vst [vmem:[%s2731_s12 + $0x188] sm:$0xf] %v2491_v22  ;;  %v2495_v24 = vld [vmem:[%s2726_s11 + $0x338] sm:$0xf]  ;;  %v2497_v25 = vld [vmem:[%s2726_s11 + $0x350] sm:$0xf] }
  0x45   : > { %2494 = vst [vmem:[%s2731_s12 + $0x194] sm:$0xf] %v2493_v23  ;;  %2496 = vst [vmem:[%s2731_s12 + $0x1a0] sm:$0xf] %v2495_v24  ;;  %v2499_v26 = vld [vmem:[%s2726_s11 + $0x368] sm:$0xf] }
  0x46   : > { %2498 = vst [vmem:[%s2731_s12 + $0x1ac] sm:$0xf] %v2497_v25  ;;  %v2501_v27 = vld [vmem:[%s2726_s11 + $0x380] sm:$0xf]  ;;  %v2503_v28 = vld [vmem:[%s2726_s11 + $0x398] sm:$0xf] }
  0x47   : > { %2500 = vst [vmem:[%s2731_s12 + $0x1b8] sm:$0xf] %v2499_v26  ;;  %2502 = vst [vmem:[%s2731_s12 + $0x1c4] sm:$0xf] %v2501_v27  ;;  %v2505_v29 = vld [vmem:[%s2726_s11 + $0x3b0] sm:$0xf] }
  0x48   : > { %2504 = vst [vmem:[%s2731_s12 + $0x1d0] sm:$0xf] %v2503_v28  ;;  %v2507_v30 = vld [vmem:[%s2726_s11 + $0x3c8] sm:$0xf]  ;;  %v2509_v31 = vld [vmem:[%s2726_s11 + $0x3e0] sm:$0xf] }
  0x49   : > { %2506 = vst [vmem:[%s2731_s12 + $0x1dc] sm:$0xf] %v2505_v29  ;;  %2508 = vst [vmem:[%s2731_s12 + $0x1e8] sm:$0xf] %v2507_v30  ;;  %v2511_v32 = vld [vmem:[%s2726_s11 + $0x3f8] sm:$0xf] }
  0x4a   : > { %2510 = vst [vmem:[%s2731_s12 + $0x1f4] sm:$0xf] %v2509_v31  ;;  %v2513_v33 = vld [vmem:[%s2726_s11 + $0x410] sm:$0xf]  ;;  %v2515_v34 = vld [vmem:[%s2726_s11 + $0x428] sm:$0xf] }
  0x4b   : > { %2512 = vst [vmem:[%s2731_s12 + $0x200] sm:$0xf] %v2511_v32  ;;  %2514 = vst [vmem:[%s2731_s12 + $0x20c] sm:$0xf] %v2513_v33  ;;  %v2517_v35 = vld [vmem:[%s2726_s11 + $0x440] sm:$0xf] }
  0x4c   : > { %2516 = vst [vmem:[%s2731_s12 + $0x218] sm:$0xf] %v2515_v34  ;;  %v2519_v36 = vld [vmem:[%s2726_s11 + $0x458] sm:$0xf]  ;;  %v2521_v37 = vld [vmem:[%s2726_s11 + $0x470] sm:$0xf] }
  0x4d   : > { %2518 = vst [vmem:[%s2731_s12 + $0x224] sm:$0xf] %v2517_v35  ;;  %2520 = vst [vmem:[%s2731_s12 + $0x230] sm:$0xf] %v2519_v36  ;;  %v2523_v38 = vld [vmem:[%s2726_s11 + $0x488] sm:$0xf] }
  0x4e   : > { %2522 = vst [vmem:[%s2731_s12 + $0x23c] sm:$0xf] %v2521_v37  ;;  %v2525_v39 = vld [vmem:[%s2726_s11 + $0x4a0] sm:$0xf]  ;;  %v2527_v40 = vld [vmem:[%s2726_s11 + $0x4b8] sm:$0xf] }
  0x4f   : > { %2524 = vst [vmem:[%s2731_s12 + $0x248] sm:$0xf] %v2523_v38  ;;  %2526 = vst [vmem:[%s2731_s12 + $0x254] sm:$0xf] %v2525_v39  ;;  %v2529_v41 = vld [vmem:[%s2726_s11 + $0x4d0] sm:$0xf] }
  0x50   : > { %2528 = vst [vmem:[%s2731_s12 + $0x260] sm:$0xf] %v2527_v40  ;;  %v2531_v42 = vld [vmem:[%s2726_s11 + $0x4e8] sm:$0xf]  ;;  %v2533_v43 = vld [vmem:[%s2726_s11 + $0x500] sm:$0xf] }
  0x51   : > { %2530 = vst [vmem:[%s2731_s12 + $0x26c] sm:$0xf] %v2529_v41  ;;  %2532 = vst [vmem:[%s2731_s12 + $0x278] sm:$0xf] %v2531_v42 }
  0x52   : > { %2534 = vst [vmem:[%s2731_s12 + $0x284] sm:$0xf] %v2533_v43 }
  0x53 PF: > { %p2535_p7 = scmp.ge.s32.totalorder %s2647_s23, 1  ;;  %p460_p8 = scmp.lt.s32.totalorder %s2647_s23, 3 }
  0x55   : > { %p461_p9 = pnand %p2535_p7, %p460_p8 }
  0x57   : > { %464 = sbr.rel (%p461_p9) target bundleno = 822 (0x336), region = 58 }
  0x5c   : > { %v1288_v44 = vld [vmem:[%s3683_s2 + $0x70] sm:$0xff]  ;;  %v3688_v46 = vmov 0   ;;  %v1289_v47 = vld [vmem:[%s3683_s2 + $0x78] sm:$0xff]  ;;  %v801_v49 = vld [vmem:[%s3682_s1 + $0x68] sm:$0xff]  ;;  %s467_s17 = sand.u32 1, %s2639_s21   ;;  %vm2026_vm0 = vcmask 392192  }
  0x5d   : > { %v802_v45 = vld [vmem:[%s3682_s1 + $0x70] sm:$0xff]  ;;  %2616 = vset.pattern.permute.xlu1 %v3688_v46  ;;  %2615 = vset.pattern.permute.xlu0 %v3688_v46  ;;  %v803_v48 = vld [vmem:[%s3682_s1 + $0x78] sm:$0xff]  ;;  %v800_v50 = vld [vmem:[%s3682_s1 + $0x60] sm:$0xff]  ;;  %s2588_s26 = smul.u32 648, %s467_s17  ;;  %p507_p10 = scmp.lt.s32.totalorder %s2701_s24, 1  ;;  %vm2230_vm1 = vcmask 7168  }
  0x5e   : > { %1400 = vperm.xlu1 %2616, %v1288_v44   ;;  %914 = vperm.xlu0 %2615, %v802_v45   ;;  %v1287_v51 = vld [vmem:[%s3683_s2 + $0x68] sm:$0xff]  ;;  %v1286_v52 = vld [vmem:[%s3683_s2 + $0x60] sm:$0xff]  ;;  %v799_v53 = vld [vmem:[%s3682_s1 + $0x58] sm:$0xff]  ;;  %s2564_s10 = smul.u32 (%p2716_p5), 12, %s2701_s24 }
  0x5f   : > { %v798_v54 = vld [vmem:[%s3682_s1 + $0x50] sm:$0xff]  ;;  %v1285_v55 = vld [vmem:[%s3683_s2 + $0x58] sm:$0xff]  ;;  %v797_v57 = vld [vmem:[%s3682_s1 + $0x48] sm:$0xff]  ;;  %s3139_s13 = scalar_lea.vmem [#allocation2], %s2588_s26 }
  0x60   : > { %v1284_v56 = vld [vmem:[%s3683_s2 + $0x50] sm:$0xff]  ;;  %v796_v58 = vld [vmem:[%s3682_s1 + $0x40] sm:$0xff]  ;;  %v1283_v59 = vld [vmem:[%s3683_s2 + $0x48] sm:$0xff]  ;;  %s508_s21 = scalar_select %p507_p10, %s2701_s24, 1 }
  0x61   : > { %v1282_v60 = vld [vmem:[%s3683_s2 + $0x40] sm:$0xff]  ;;  %v795_v61 = vld [vmem:[%s3682_s1 + $0x38] sm:$0xff]  ;;  %v794_v62 = vld [vmem:[%s3682_s1 + $0x30] sm:$0xff]  ;;  %s2268_s14 = scalar_lea.vmem (%p2716_p5), %s3685_s4, %s2564_s10 }
  0x62   : > { %1405 = vperm.xlu1 %2616, %v1289_v47   ;;  %919 = vperm.xlu0 %2615, %v803_v48   ;;  %v1281_v63 = vld [vmem:[%s3683_s2 + $0x38] sm:$0xff]  ;;  %v1280_v0 = vld [vmem:[%s3683_s2 + $0x30] sm:$0xff]  ;;  %v793_v1 = vld [vmem:[%s3682_s1 + $0x28] sm:$0xff] }
  0x63   : > { %v792_v2 = vld [vmem:[%s3682_s1 + $0x20] sm:$0xff]  ;;  %v1279_v3 = vld [vmem:[%s3683_s2 + $0x28] sm:$0xff]  ;;  %v791_v5 = vld [vmem:[%s3682_s1 + $0x18] sm:$0xff] }
  0x64   : > { %v1278_v4 = vld [vmem:[%s3683_s2 + $0x20] sm:$0xff]  ;;  %v790_v6 = vld [vmem:[%s3682_s1 + $0x10] sm:$0xff]  ;;  %v1277_v7 = vld [vmem:[%s3683_s2 + $0x18] sm:$0xff] }
  0x65   : > { %v1276_v8 = vld [vmem:[%s3683_s2 + $0x10] sm:$0xff]  ;;  %v789_v9 = vld [vmem:[%s3682_s1 + $0x8] sm:$0xff]  ;;  %v788_v10 = vld [vmem:[%s3682_s1] sm:$0xff] }
  0x66   : > { %909 = vperm.xlu1 %2616, %v801_v49   ;;  %904 = vperm.xlu0 %2615, %v800_v50   ;;  %v835_v11 = vld [vmem:[%s3682_s1 + $0x178] sm:$0xff]  ;;  %v834_v12 = vld [vmem:[%s3682_s1 + $0x170] sm:$0xff]  ;;  %v1275_v13 = vld [vmem:[%s3683_s2 + $0x8] sm:$0xff] }
  0x67   : > { %v1274_v14 = vld [vmem:[%s3683_s2] sm:$0xff]  ;;  %v1321_v15 = vld [vmem:[%s3683_s2 + $0x178] sm:$0xff]  ;;  %v1320_v16 = vld [vmem:[%s3683_s2 + $0x170] sm:$0xff] }
  0x68   : > { %v819_v17 = vld [vmem:[%s3682_s1 + $0xf8] sm:$0xff]  ;;  %v818_v18 = vld [vmem:[%s3682_s1 + $0xf0] sm:$0xff]  ;;  %v833_v19 = vld [vmem:[%s3682_s1 + $0x168] sm:$0xff] }
  0x69   : > { %v832_v20 = vld [vmem:[%s3682_s1 + $0x160] sm:$0xff]  ;;  %v1305_v21 = vld [vmem:[%s3683_s2 + $0xf8] sm:$0xff]  ;;  %v1304_v22 = vld [vmem:[%s3683_s2 + $0xf0] sm:$0xff] }
  0x6a   : > { %1395 = vperm.xlu1 %2616, %v1287_v51   ;;  %1390 = vperm.xlu0 %2615, %v1286_v52   ;;  %v1319_v23 = vld [vmem:[%s3683_s2 + $0x168] sm:$0xff]  ;;  %v1318_v24 = vld [vmem:[%s3683_s2 + $0x160] sm:$0xff]  ;;  %v831_v27 = vld [vmem:[%s3682_s1 + $0x158] sm:$0xff] }
  0x6b   : > { %v817_v25 = vld [vmem:[%s3682_s1 + $0xe8] sm:$0xff]  ;;  %v816_v26 = vld [vmem:[%s3682_s1 + $0xe0] sm:$0xff]  ;;  %v830_v28 = vld [vmem:[%s3682_s1 + $0x150] sm:$0xff] }
  0x6c   : > { %v1303_v29 = vld [vmem:[%s3683_s2 + $0xe8] sm:$0xff]  ;;  %v1302_v30 = vld [vmem:[%s3683_s2 + $0xe0] sm:$0xff]  ;;  %v1317_v31 = vld [vmem:[%s3683_s2 + $0x158] sm:$0xff] }
  0x6d   : > { %v1316_v32 = vld [vmem:[%s3683_s2 + $0x150] sm:$0xff]  ;;  %v815_v33 = vld [vmem:[%s3682_s1 + $0xd8] sm:$0xff]  ;;  %v829_v35 = vld [vmem:[%s3682_s1 + $0x148] sm:$0xff] }
  0x6e   : > { %899 = vperm.xlu1 %2616, %v799_v53   ;;  %894 = vperm.xlu0 %2615, %v798_v54   ;;  %v814_v34 = vld [vmem:[%s3682_s1 + $0xd0] sm:$0xff]  ;;  %v828_v36 = vld [vmem:[%s3682_s1 + $0x140] sm:$0xff]  ;;  %v1301_v37 = vld [vmem:[%s3683_s2 + $0xd8] sm:$0xff] }
  0x6f   : > { %v1300_v38 = vld [vmem:[%s3683_s2 + $0xd0] sm:$0xff]  ;;  %v1315_v39 = vld [vmem:[%s3683_s2 + $0x148] sm:$0xff]  ;;  %v1314_v40 = vld [vmem:[%s3683_s2 + $0x140] sm:$0xff] }
  0x70   : > { %v813_v41 = vld [vmem:[%s3682_s1 + $0xc8] sm:$0xff]  ;;  %v812_v42 = vld [vmem:[%s3682_s1 + $0xc0] sm:$0xff]  ;;  %v827_v44 = vld [vmem:[%s3682_s1 + $0x138] sm:$0xff] }
  0x71   : > { %v546_v43 = vld [vmem:[%s3139_s13 + $0xa8] sm:$0xff]  ;;  %v548_v47 = vld [vmem:[%s3139_s13 + $0xb4] sm:$0xff] }
  0x72   : > { %1385 = vperm.xlu1 %2616, %v1285_v55   ;;  %1380 = vperm.xlu0 %2615, %v1284_v56   ;;  %v826_v45 = vld [vmem:[%s3682_s1 + $0x130] sm:$0xff]  ;;  %v669_v48 = vunpack.c.h.bf16 %v546_v43  ;;  %v668_v51 = vunpack.c.l.bf16 %v546_v43  ;;  %v671_v52 = vunpack.c.l.bf16 %v548_v47  ;;  %v672_v53 = vunpack.c.h.bf16 %v548_v47  ;;  %v1299_v54 = vld [vmem:[%s3683_s2 + $0xc8] sm:$0xff]  ;;  %v1298_v55 = vld [vmem:[%s3683_s2 + $0xc0] sm:$0xff] }
  0x73   : > { %v1297_v47 = vld [vmem:[%s3683_s2 + $0xb8] sm:$0xff] }
  0x76   : > { %889 = vperm.xlu1 %2616, %v797_v57   ;;  %884 = vperm.xlu0 %2615, %v796_v58   ;;  %v544_v57 = vld [vmem:[%s3139_s13 + $0x9c] sm:$0xff] }
  0x7a   : > { %1375 = vperm.xlu1 %2616, %v1283_v59   ;;  %1370 = vperm.xlu0 %2615, %v1282_v60  }
  0x7e   : > { %879 = vperm.xlu1 %2616, %v795_v61   ;;  %874 = vperm.xlu0 %2615, %v794_v62   ;;  %v542_v61 = vld [vmem:[%s3139_s13 + $0x90] sm:$0xff] }
  0x82   : > { %1365 = vperm.xlu1 %2616, %v1281_v63   ;;  %1360 = vperm.xlu0 %2615, %v1280_v0   ;;  %v665_v0 = vunpack.c.l.bf16 %v544_v57 }
  0x86   : > { %869 = vperm.xlu1 %2616, %v793_v1   ;;  %864 = vperm.xlu0 %2615, %v792_v2   ;;  %v1313_v1 = vld [vmem:[%s3683_s2 + $0x138] sm:$0xff]  ;;  %v1312_v2 = vld [vmem:[%s3683_s2 + $0x130] sm:$0xff] }
  0x8a   : > { %1355 = vperm.xlu1 %2616, %v1279_v3   ;;  %1350 = vperm.xlu0 %2615, %v1278_v4   ;;  %v666_v4 = vunpack.c.h.bf16 %v544_v57 }
  0x8e   : > { %859 = vperm.xlu1 %2616, %v791_v5   ;;  %854 = vperm.xlu0 %2615, %v790_v6   ;;  %v662_v5 = vunpack.c.l.bf16 %v542_v61 }
  0x92   : > { %1345 = vperm.xlu1 %2616, %v1277_v7   ;;  %1340 = vperm.xlu0 %2615, %v1276_v8  }
  0x96   : > { %849 = vperm.xlu1 %2616, %v789_v9   ;;  %844 = vperm.xlu0 %2615, %v788_v10   ;;  %v663_v10 = vunpack.c.h.bf16 %v542_v61  ;;  %v534_v61 = vld [vmem:[%s3139_s13 + $0x60] sm:$0xff] }
  0x9a   : > { %1079 = vperm.xlu1 %2616, %v835_v11   ;;  %1074 = vperm.xlu0 %2615, %v834_v12   ;;  %v811_v12 = vld [vmem:[%s3682_s1 + $0xb8] sm:$0xff] }
  0x9e   : > { %1335 = vperm.xlu1 %2616, %v1275_v13   ;;  %1330 = vperm.xlu0 %2615, %v1274_v14  }
  0xa2   : > { %1565 = vperm.xlu1 %2616, %v1321_v15   ;;  %1560 = vperm.xlu0 %2615, %v1320_v16  }
  0xa6   : > { %999 = vperm.xlu1 %2616, %v819_v17   ;;  %994 = vperm.xlu0 %2615, %v818_v18   ;;  %v810_v18 = vld [vmem:[%s3682_s1 + $0xb0] sm:$0xff] }
  0xaa   : > { %1069 = vperm.xlu1 %2616, %v833_v19   ;;  %1064 = vperm.xlu0 %2615, %v832_v20   ;;  %v540_v20 = vld [vmem:[%s3139_s13 + $0x84] sm:$0xff] }
  0xae   : > { %1485 = vperm.xlu1 %2616, %v1305_v21   ;;  %1480 = vperm.xlu0 %2615, %v1304_v22  }
  0xb2   : > { %1555 = vperm.xlu1 %2616, %v1319_v23   ;;  %1550 = vperm.xlu0 %2615, %v1318_v24  }
  0xb6   : > { %989 = vperm.xlu1 %2616, %v817_v25   ;;  %984 = vperm.xlu0 %2615, %v816_v26   ;;  %v538_v26 = vld [vmem:[%s3139_s13 + $0x78] sm:$0xff] }
  0xba   : > { %1059 = vperm.xlu1 %2616, %v831_v27   ;;  %1054 = vperm.xlu0 %2615, %v830_v28  }
  0xbe   : > { %1475 = vperm.xlu1 %2616, %v1303_v29   ;;  %1470 = vperm.xlu0 %2615, %v1302_v30  }
  0xc2   : > { %1545 = vperm.xlu1 %2616, %v1317_v31   ;;  %1540 = vperm.xlu0 %2615, %v1316_v32   ;;  %v659_v32 = vunpack.c.l.bf16 %v540_v20 }
  0xc6   : > { %979 = vperm.xlu1 %2616, %v815_v33   ;;  %974 = vperm.xlu0 %2615, %v814_v34   ;;  %v660_v33 = vunpack.c.h.bf16 %v540_v20  ;;  %v825_v34 = vld [vmem:[%s3682_s1 + $0x128] sm:$0xff] }
  0xca   : > { %1049 = vperm.xlu1 %2616, %v829_v35   ;;  %1044 = vperm.xlu0 %2615, %v828_v36   ;;  %v656_v35 = vunpack.c.l.bf16 %v538_v26  ;;  %v824_v36 = vld [vmem:[%s3682_s1 + $0x120] sm:$0xff] }
  0xce   : > { %1465 = vperm.xlu1 %2616, %v1301_v37   ;;  %1460 = vperm.xlu0 %2615, %v1300_v38  }
  0xd2   : > { %1535 = vperm.xlu1 %2616, %v1315_v39   ;;  %1530 = vperm.xlu0 %2615, %v1314_v40  }
  0xd6   : > { %969 = vperm.xlu1 %2616, %v813_v41   ;;  %964 = vperm.xlu0 %2615, %v812_v42   ;;  %v657_v42 = vunpack.c.h.bf16 %v538_v26  ;;  %v808_v26 = vld [vmem:[%s3682_s1 + $0xa0] sm:$0xff] }
  0xd9   : > { %v3149_v49 = vpop.permute.xlu1 %1400  ;;  %v3151_v50 = vpop.permute.xlu0 %914 }
  0xda   : > { %1039 = vperm.xlu1 %2616, %v827_v44   ;;  %1034 = vperm.xlu0 %2615, %v826_v45   ;;  %v1155_v56 = vmul.f32 %v3151_v50, %v669_v48  ;;  %v1154_v58 = vmul.f32 %v3151_v50, %v668_v51 }
  0xdc   : > { %v1641_v3 = vadd.f32 %v3149_v49, %v1155_v56  ;;  %v1640_v11 = vadd.f32 %v3149_v49, %v1154_v58 }
  0xdd   : > { %v3162_v59 = vpop.permute.xlu1 %1405  ;;  %v3164_v60 = vpop.permute.xlu0 %919 }
  0xde   : > { %v1157_v62 = vmul.f32 %v3164_v60, %v671_v52  ;;  %1455 = vperm.xlu1 %2616, %v1299_v54   ;;  %1450 = vperm.xlu0 %2615, %v1298_v55   ;;  %v1158_v63 = vmul.f32 %v3164_v60, %v672_v53  ;;  %v1803_v13 = vmax.f32 %v1641_v3, 0.0  ;;  %v1802_v25 = vmax.f32 %v1640_v11, 0.0  ;;  %v1296_v53 = vld [vmem:[%s3683_s2 + $0xb0] sm:$0xff] }
  0xdf   : > { %v536_v54 = vld [vmem:[%s3139_s13 + $0x6c] sm:$0xff]  ;;  %v537_v55 = vld [vmem:[%s3139_s13 + $0x68] ss:$12 sps:$4 sm:$0xff]  }
  0xe0   : > { %v1644_v6 = vadd.f32 %v3162_v59, %v1158_v63  ;;  %v1643_v7 = vadd.f32 %v3162_v59, %v1157_v62  ;;  %v654_v3 = vunpack.c.h.bf16 %v536_v54 }
  0xe1   : > { %v3178_v8 = vpop.permute.xlu1 %909  ;;  %v3180_v9 = vpop.permute.xlu0 %904 }
  0xe2   : > { %1525 = vperm.xlu1 %2616, %v1313_v1   ;;  %1520 = vperm.xlu0 %2615, %v1312_v2   ;;  %v1806_v14 = vmax.f32 %v1644_v6, 0.0  ;;  %v1151_v15 = vmul.f32 %v3178_v8, %v665_v0  ;;  %v1152_v16 = vmul.f32 %v3178_v8, %v666_v4  ;;  %v1148_v17 = vmul.f32 %v3180_v9, %v662_v5  ;;  %v1311_v6 = vld [vmem:[%s3683_s2 + $0x128] sm:$0xff] }
  0xe3   : > { %v1805_v19 = vmax.f32 %v1643_v7, 0.0  ;;  %v1149_v21 = vmul.f32 %v3180_v9, %v663_v10  ;;  %v653_v2 = vunpack.c.l.bf16 %v536_v54  ;;  %v655_v4 = vunpack.c.h.bf16 %v537_v55  ;;  %v1310_v7 = vld [vmem:[%s3683_s2 + $0x120] sm:$0xff] }
  0xe4   : > { %v1944_v24 = vpack.c.bf16 %v1806_v14, %v1803_v13  ;;  %v650_v5 = vunpack.c.l.bf16 %v534_v61 }
  0xe5   : > { %v3194_v22 = vpop.permute.xlu1 %1395  ;;  %v3196_v23 = vpop.permute.xlu0 %1390  ;;  %v1943_v31 = vpack.c.bf16 %v1805_v19, %v1802_v25  ;;  %v809_v19 = vld [vmem:[%s3682_s1 + $0xa8] sm:$0xff] }
  0xe6   : > { %v1637_v27 = vadd.f32 %v3194_v22, %v1151_v15  ;;  %v1638_v28 = vadd.f32 %v3194_v22, %v1152_v16  ;;  %v1634_v29 = vadd.f32 %v3196_v23, %v1148_v17  ;;  %959 = vperm.xlu1 %2616, %v811_v12   ;;  %v1635_v30 = vadd.f32 %v3196_v23, %v1149_v21 }
  0xe7   : > { %954 = vperm.xlu0 %2615, %v810_v18   ;;  %2030 = vmatprep.subr.bf16.mxu0 %v1944_v24  ;;  %v651_v15 = vunpack.c.h.bf16 %v534_v61  ;;  %v528_v61 = vld [vmem:[%s3139_s13 + $0x3c] sm:$0xff] }
  0xe8   : > { %v1800_v37 = vmax.f32 %v1638_v28, 0.0  ;;  %v1796_v38 = vmax.f32 %v1634_v29, 0.0  ;;  %v1799_v39 = vmax.f32 %v1637_v27, 0.0  ;;  %2031 = vmatpush1.bf16.msra.mxu0 %v1943_v31  ;;  %v1797_v43 = vmax.f32 %v1635_v30, 0.0  ;;  %v532_v27 = vld [vmem:[%s3139_s13 + $0x54] sm:$0xff] }
  0xe9   : > { %v3209_v40 = vpop.permute.xlu1 %899  ;;  %v3211_v41 = vpop.permute.xlu0 %894  ;;  %v533_v28 = vld [vmem:[%s3139_s13 + $0x50] ss:$12 sps:$4 sm:$0xff]  }
  0xea   : > { %1029 = vperm.xlu1 %2616, %v825_v34   ;;  %v1941_v44 = vpack.c.bf16 %v1800_v37, %v1797_v43  ;;  %v1940_v45 = vpack.c.bf16 %v1799_v39, %v1796_v38  ;;  %v1145_v48 = vmul.f32 %v3209_v40, %v659_v32  ;;  %v1146_v51 = vmul.f32 %v3209_v40, %v660_v33  ;;  %v530_v32 = vld [vmem:[%s3139_s13 + $0x48] sm:$0xff] }
  0xeb   : > { %1024 = vperm.xlu0 %2615, %v824_v36   ;;  %v1142_v52 = vmul.f32 %v3211_v41, %v656_v35  ;;  %v1143_v56 = vmul.f32 %v3211_v41, %v657_v42  ;;  %v647_v38 = vunpack.c.l.bf16 %v532_v27  ;;  %v648_v39 = vunpack.c.h.bf16 %v532_v27 }
  0xec   : > { %2032 = vmatprep.subr.bf16.mxu0 %v1941_v44  ;;  %v649_v42 = vunpack.c.h.bf16 %v533_v28  ;;  %v645_v54 = vunpack.c.h.bf16 %v530_v32  ;;  %v646_v55 = vunpack.c.l.bf16 %v533_v28 }
  0xed   : > { %v3225_v57 = vpop.permute.xlu1 %1385  ;;  %v3227_v58 = vpop.permute.xlu0 %1380  ;;  %2033 = vmatpush1.bf16.msra.mxu0 %v1940_v45  ;;  %v644_v45 = vunpack.c.l.bf16 %v530_v32  ;;  %v1309_v32 = vld [vmem:[%s3683_s2 + $0x118] sm:$0xff] }
  0xee   : > { %v1631_v62 = vadd.f32 %v3225_v57, %v1145_v48  ;;  %v1632_v63 = vadd.f32 %v3225_v57, %v1146_v51  ;;  %v1628_v0 = vadd.f32 %v3227_v58, %v1142_v52  ;;  %v1629_v1 = vadd.f32 %v3227_v58, %v1143_v56  ;;  %1445 = vperm.xlu1 %2616, %v1297_v47   ;;  %v823_v47 = vld [vmem:[%s3682_s1 + $0x118] sm:$0xff]  ;;  %v822_v48 = vld [vmem:[%s3682_s1 + $0x110] sm:$0xff] }
  0xef   : > { %1440 = vperm.xlu0 %2615, %v1296_v53  }
  0xf0   : > { %v1794_v10 = vmax.f32 %v1632_v63, 0.0  ;;  %v1790_v11 = vmax.f32 %v1628_v0, 0.0  ;;  %v1793_v12 = vmax.f32 %v1631_v62, 0.0  ;;  %v1791_v16 = vmax.f32 %v1629_v1, 0.0  ;;  %v1295_v0 = vld [vmem:[%s3683_s2 + $0xa8] sm:$0xff] }
  0xf1   : > { %v890_v13 = vpop.permute.xlu1 %889  ;;  %v3240_v14 = vpop.permute.xlu0 %884 }
  0xf2   : > { %v1139_v17 = vmul.f32 %v890_v13, %v653_v2  ;;  %1515 = vperm.xlu1 %2616, %v1311_v6   ;;  %v1938_v18 = vpack.c.bf16 %v1794_v10, %v1791_v16  ;;  %v1140_v20 = vmul.f32 %v890_v13, %v654_v3  ;;  %v1141_v21 = vmul.f32 %v890_v13, %v655_v4  ;;  %v529_v6 = vld [vmem:[%s3139_s13 + $0x38] ss:$12 sps:$4 sm:$0xff]  }
  0xf3   : > { %1510 = vperm.xlu0 %2615, %v1310_v7   ;;  %v1136_v24 = vmul.f32 %v3240_v14, %v650_v5  ;;  %v1937_v25 = vpack.c.bf16 %v1793_v12, %v1790_v11  ;;  %v1137_v29 = vmul.f32 %v3240_v14, %v651_v15  ;;  %v1294_v5 = vld [vmem:[%s3683_s2 + $0xa0] sm:$0xff]  ;;  %v526_v7 = vld [vmem:[%s3139_s13 + $0x30] sm:$0xff]  ;;  %v641_v15 = vunpack.c.l.bf16 %v528_v61 }
  0xf4   : > { %2034 = vmatprep.subr.bf16.mxu0 %v1938_v18  ;;  %v642_v16 = vunpack.c.h.bf16 %v528_v61 }
  0xf5   : > { %v1376_v30 = vpop.permute.xlu1 %1375  ;;  %v3252_v31 = vpop.permute.xlu0 %1370  ;;  %2035 = vmatpush1.bf16.msra.mxu0 %v1937_v25  ;;  %v643_v25 = vunpack.c.h.bf16 %v529_v6 }
  0xf6   : > { %v1625_v33 = vadd.f32 %v1376_v30, %v1139_v17  ;;  %v1626_v34 = vadd.f32 %v1376_v30, %v1140_v20  ;;  %v3255_v35 = vadd.f32 %v1376_v30, %v1141_v21  ;;  %v1622_v36 = vadd.f32 %v3252_v31, %v1136_v24  ;;  %949 = vperm.xlu1 %2616, %v809_v19  }
  0xf7   : > { %v1623_v37 = vadd.f32 %v3252_v31, %v1137_v29  ;;  %944 = vperm.xlu0 %2615, %v808_v26   ;;  %v638_v26 = vunpack.c.l.bf16 %v526_v7 }
  0xf8   : > { %v1787_v43 = vmax.f32 %v1625_v33, 0.0  ;;  %v1788_v44 = vmax.f32 %v1626_v34, 0.0  ;;  %v1784_v51 = vmax.f32 %v1622_v36, 0.0  ;;  %v1308_v33 = vld [vmem:[%s3683_s2 + $0x110] sm:$0xff] }
  0xf9   : > { %v880_v52 = vpop.permute.xlu1 %879  ;;  %v875_v53 = vpop.permute.xlu0 %874  ;;  %v1785_v56 = vmax.f32 %v1623_v37, 0.0 }
  0xfa   : > { %v1133_v62 = vmul.f32 %v880_v52, %v647_v38  ;;  %1019 = vperm.xlu1 %2616, %v823_v47   ;;  %v1134_v1 = vmul.f32 %v880_v52, %v648_v39  ;;  %v1135_v2 = vmul.f32 %v880_v52, %v649_v42  ;;  %v1130_v3 = vmul.f32 %v875_v53, %v644_v45 }
  0xfb   : > { %1014 = vperm.xlu0 %2615, %v822_v48   ;;  %v1935_v63 = vpack.c.bf16 %v1788_v44, %v1785_v56  ;;  %v1934_v4 = vpack.c.bf16 %v1787_v43, %v1784_v51  ;;  %v1131_v10 = vmul.f32 %v875_v53, %v645_v54  ;;  %v1132_v11 = vmul.f32 %v875_v53, %v646_v55  ;;  %v524_v43 = vld [vmem:[%s3139_s13 + $0x24] sm:$0xff]  ;;  %v807_v54 = vld [vmem:[%s3682_s1 + $0x98] sm:$0xff]  ;;  %v525_v55 = vld [vmem:[%s3139_s13 + $0x20] ss:$12 sps:$4 sm:$0xff]  }
  0xfc   : > { %v639_v39 = vunpack.c.h.bf16 %v526_v7  ;;  %v640_v42 = vunpack.c.l.bf16 %v529_v6  ;;  %v522_v56 = vld [vmem:[%s3139_s13 + $0x18] sm:$0xff] }
  0xfd   : > { %2036 = vmatprep.subr.bf16.mxu0 %v1935_v63  ;;  %v1366_v12 = vpop.permute.xlu1 %1365  ;;  %v1361_v13 = vpop.permute.xlu0 %1360 }
  0xfe   : > { %v1619_v17 = vadd.f32 %v1366_v12, %v1133_v62  ;;  %v1620_v18 = vadd.f32 %v1366_v12, %v1134_v1  ;;  %v1621_v19 = vadd.f32 %v1366_v12, %v1135_v2  ;;  %v1616_v20 = vadd.f32 %v1361_v13, %v1130_v3  ;;  %2037 = vmatpush1.bf16.msra.mxu0 %v1934_v4  ;;  %v806_v1 = vld [vmem:[%s3682_s1 + $0x90] sm:$0xff] }
  0xff   : > { %v1617_v21 = vadd.f32 %v1361_v13, %v1131_v10  ;;  %v1618_v24 = vadd.f32 %v1361_v13, %v1132_v11  ;;  %1435 = vperm.xlu1 %2616, %v1295_v0   ;;  %1430 = vperm.xlu0 %2615, %v1294_v5   ;;  %v635_v2 = vunpack.c.l.bf16 %v524_v43  ;;  %v636_v3 = vunpack.c.h.bf16 %v524_v43 }
 0x100   : > { %v1781_v27 = vmax.f32 %v1619_v17, 0.0  ;;  %v1782_v28 = vmax.f32 %v1620_v18, 0.0  ;;  %v1783_v29 = vmax.f32 %v1621_v19, 0.0  ;;  %v1778_v30 = vmax.f32 %v1616_v20, 0.0  ;;  %v821_v19 = vld [vmem:[%s3682_s1 + $0x108] sm:$0xff] }
 0x101   : > { %v1779_v34 = vmax.f32 %v1617_v21, 0.0  ;;  %v1780_v36 = vmax.f32 %v1618_v24, 0.0  ;;  %v870_v37 = vpop.permute.xlu1 %869  ;;  %v865_v38 = vpop.permute.xlu0 %864  ;;  %v637_v12 = vunpack.c.h.bf16 %v525_v55  ;;  %v632_v13 = vunpack.c.l.bf16 %v522_v56 }
 0x102   : > { %v1127_v45 = vmul.f32 %v870_v37, %v641_v15  ;;  %v1128_v47 = vmul.f32 %v870_v37, %v642_v16  ;;  %v1129_v48 = vmul.f32 %v870_v37, %v643_v25  ;;  %v1124_v51 = vmul.f32 %v865_v38, %v638_v26 }
 0x103   : > { %v3281_v44 = vpack.c.bf16 %v1783_v29, %v1780_v36  ;;  %1505 = vperm.xlu1 %2616, %v1309_v32   ;;  %1500 = vperm.xlu0 %2615, %v1308_v33   ;;  %v1932_v52 = vpack.c.bf16 %v1782_v28, %v1779_v34  ;;  %v1931_v53 = vpack.c.bf16 %v1781_v27, %v1778_v30  ;;  %v633_v26 = vunpack.c.h.bf16 %v522_v56  ;;  %v820_v28 = vld [vmem:[%s3682_s1 + $0x100] sm:$0xff] }
 0x104   : > { %v1125_v61 = vmul.f32 %v865_v38, %v639_v39  ;;  %v1126_v62 = vmul.f32 %v865_v38, %v640_v42  ;;  %v634_v27 = vunpack.c.l.bf16 %v525_v55  ;;  %v1293_v38 = vld [vmem:[%s3683_s2 + $0x98] sm:$0xff] }
 0x105   : > { %3696 = vst [vmem:[#allocation4_spill] sm:$0xff] %v3281_v44  ;;  %v1356_v63 = vpop.permute.xlu1 %1355  ;;  %v1351_v0 = vpop.permute.xlu0 %1350  ;;  %2038 = vmatprep.subr.bf16.mxu0 %v1932_v52 }
 0x106   : > { %v1613_v4 = vadd.f32 %v1356_v63, %v1127_v45  ;;  %v1614_v5 = vadd.f32 %v1356_v63, %v1128_v47  ;;  %v1615_v6 = vadd.f32 %v1356_v63, %v1129_v48  ;;  %v1610_v7 = vadd.f32 %v1351_v0, %v1124_v51  ;;  %2039 = vmatpush1.bf16.msra.mxu0 %v1931_v53  ;;  %v1292_v47 = vld [vmem:[%s3683_s2 + $0x90] sm:$0xff] }
 0x107   : > { %v1611_v10 = vadd.f32 %v1351_v0, %v1125_v61  ;;  %v1612_v11 = vadd.f32 %v1351_v0, %v1126_v62  ;;  %939 = vperm.xlu1 %2616, %v807_v54   ;;  %934 = vperm.xlu0 %2615, %v806_v1   ;;  %v520_v0 = vld [vmem:[%s3139_s13 + $0xc] sm:$0xff] }
 0x108   : > { %v1775_v15 = vmax.f32 %v1613_v4, 0.0  ;;  %v1776_v16 = vmax.f32 %v1614_v5, 0.0  ;;  %v1777_v17 = vmax.f32 %v1615_v6, 0.0  ;;  %v1772_v18 = vmax.f32 %v1610_v7, 0.0  ;;  %v1307_v1 = vld [vmem:[%s3683_s2 + $0x108] sm:$0xff] }
 0x109   : > { %v1773_v20 = vmax.f32 %v1611_v10, 0.0  ;;  %v1774_v21 = vmax.f32 %v1612_v11, 0.0  ;;  %v860_v24 = vpop.permute.xlu1 %859  ;;  %v855_v25 = vpop.permute.xlu0 %854  ;;  %v521_v5 = vld [vmem:[%s3139_s13 + $0x8] ss:$12 sps:$4 sm:$0xff]   ;;  %v518_v7 = vld [vmem:[%s3139_s13] sm:$0xff] }
 0x10a   : > { %v1121_v30 = vmul.f32 %v860_v24, %v635_v2  ;;  %v1122_v33 = vmul.f32 %v860_v24, %v636_v3  ;;  %v1123_v34 = vmul.f32 %v860_v24, %v637_v12  ;;  %v1118_v36 = vmul.f32 %v855_v25, %v632_v13  ;;  %v1306_v10 = vld [vmem:[%s3683_s2 + $0x100] sm:$0xff]  ;;  %v805_v24 = vld [vmem:[%s3682_s1 + $0x88] sm:$0xff] }
 0x10b   : > { %v3297_v29 = vpack.c.bf16 %v1777_v17, %v1774_v21  ;;  %1009 = vperm.xlu1 %2616, %v821_v19   ;;  %v1929_v32 = vpack.c.bf16 %v1776_v16, %v1773_v20  ;;  %1004 = vperm.xlu0 %2615, %v820_v28   ;;  %v1928_v37 = vpack.c.bf16 %v1775_v15, %v1772_v18  ;;  %v612_v11 = vld [vmem:[%s3139_s13 + $0x234] sm:$0xff]  ;;  %v613_v12 = vld [vmem:[%s3139_s13 + $0x230] ss:$12 sps:$4 sm:$0xff]   ;;  %v629_v15 = vunpack.c.l.bf16 %v520_v0  ;;  %v610_v20 = vld [vmem:[%s3139_s13 + $0x228] sm:$0xff] }
 0x10c   : > { %v1119_v39 = vmul.f32 %v855_v25, %v633_v26  ;;  %v1120_v42 = vmul.f32 %v855_v25, %v634_v27  ;;  %v630_v17 = vunpack.c.h.bf16 %v520_v0  ;;  %v631_v18 = vunpack.c.h.bf16 %v521_v5 }
 0x10d   : > { %3697 = vst [vmem:[#allocation5_spill] sm:$0xff] %v3297_v29  ;;  %2040 = vmatprep.subr.bf16.mxu0 %v1929_v32  ;;  %v1346_v43 = vpop.permute.xlu1 %1345  ;;  %v1341_v45 = vpop.permute.xlu0 %1340  ;;  %v626_v19 = vunpack.c.l.bf16 %v518_v7  ;;  %v627_v25 = vunpack.c.h.bf16 %v518_v7  ;;  %v628_v26 = vunpack.c.l.bf16 %v521_v5  ;;  %v767_v28 = vunpack.c.l.bf16 %v612_v11 }
 0x10e   : > { %v1607_v48 = vadd.f32 %v1346_v43, %v1121_v30  ;;  %v1608_v51 = vadd.f32 %v1346_v43, %v1122_v33  ;;  %v1609_v52 = vadd.f32 %v1346_v43, %v1123_v34  ;;  %v1604_v53 = vadd.f32 %v1341_v45, %v1118_v36  ;;  %2041 = vmatpush1.bf16.msra.mxu0 %v1928_v37  ;;  %v804_v33 = vld [vmem:[%s3682_s1 + $0x80] sm:$0xff] }
 0x10f   : > { %v1605_v54 = vadd.f32 %v1341_v45, %v1119_v39  ;;  %v1606_v55 = vadd.f32 %v1341_v45, %v1120_v42  ;;  %1425 = vperm.xlu1 %2616, %v1293_v38   ;;  %1420 = vperm.xlu0 %2615, %v1292_v47   ;;  %v769_v30 = vunpack.c.h.bf16 %v613_v12  ;;  %v768_v34 = vunpack.c.h.bf16 %v612_v11  ;;  %v841_v47 = vld [vmem:[%s3682_s1 + $0x1a8] sm:$0xff] }
 0x110   : > { %v1769_v56 = vmax.f32 %v1607_v48, 0.0  ;;  %v1770_v61 = vmax.f32 %v1608_v51, 0.0  ;;  %v1771_v62 = vmax.f32 %v1609_v52, 0.0  ;;  %v1766_v63 = vmax.f32 %v1604_v53, 0.0  ;;  %v1291_v11 = vld [vmem:[%s3683_s2 + $0x88] sm:$0xff] }
 0x111   : > { %v1767_v2 = vmax.f32 %v1605_v54, 0.0  ;;  %v1768_v3 = vmax.f32 %v1606_v55, 0.0  ;;  %v850_v4 = vpop.permute.xlu1 %849  ;;  %v845_v6 = vpop.permute.xlu0 %844  ;;  %v764_v36 = vunpack.c.l.bf16 %v610_v20  ;;  %v765_v37 = vunpack.c.h.bf16 %v610_v20  ;;  %v1290_v20 = vld [vmem:[%s3683_s2 + $0x80] sm:$0xff] }
 0x112   : > { %v1925_v21 = vpack.c.bf16 %v1769_v56, %v1766_v63  ;;  %v766_v38 = vunpack.c.l.bf16 %v613_v12  ;;  %v1115_v39 = vmul.f32 %v850_v4, %v629_v15  ;;  %v1116_v42 = vmul.f32 %v850_v4, %v630_v17  ;;  %v840_v56 = vld [vmem:[%s3682_s1 + $0x1a0] sm:$0xff] }
 0x113   : > { %v3316_v13 = vpack.c.bf16 %v1771_v62, %v1768_v3  ;;  %1495 = vperm.xlu1 %2616, %v1307_v1   ;;  %v1926_v16 = vpack.c.bf16 %v1770_v61, %v1767_v2  ;;  %1490 = vperm.xlu0 %2615, %v1306_v10   ;;  %v1117_v43 = vmul.f32 %v850_v4, %v631_v18 }
 0x114   : > { %v1112_v45 = vmul.f32 %v845_v6, %v626_v19  ;;  %v1113_v48 = vmul.f32 %v845_v6, %v627_v25  ;;  %v1114_v51 = vmul.f32 %v845_v6, %v628_v26 }
 0x115   : > { %3698 = vst [vmem:[#allocation6_spill] sm:$0xff] %v3316_v13  ;;  %2042 = vmatprep.subr.bf16.mxu0 %v1926_v16  ;;  %v1080_v27 = vpop.permute.xlu1 %1079  ;;  %v1075_v32 = vpop.permute.xlu0 %1074 }
 0x116   : > { %2043 = vmatpush1.bf16.msra.mxu0 %v1925_v21  ;;  %v1253_v52 = vmul.f32 %v1080_v27, %v767_v28  ;;  %v1255_v53 = vmul.f32 %v1080_v27, %v769_v30  ;;  %v1250_v1 = vmul.f32 %v1075_v32, %v764_v36  ;;  %v1252_v2 = vmul.f32 %v1075_v32, %v766_v38  ;;  %v580_v36 = vld [vmem:[%s3139_s13 + $0x174] sm:$0xff] }
 0x117   : > { %929 = vperm.xlu1 %2616, %v805_v24   ;;  %924 = vperm.xlu0 %2615, %v804_v33   ;;  %v1254_v12 = vmul.f32 %v1080_v27, %v768_v34  ;;  %v1251_v15 = vmul.f32 %v1075_v32, %v765_v37  ;;  %v1327_v37 = vld [vmem:[%s3683_s2 + $0x1a8] sm:$0xff] }
 0x119   : > { %v1336_v54 = vpop.permute.xlu1 %1335  ;;  %v1331_v55 = vpop.permute.xlu0 %1330 }
 0x11a   : > { %v1601_v61 = vadd.f32 %v1336_v54, %v1115_v39  ;;  %v1602_v62 = vadd.f32 %v1336_v54, %v1116_v42  ;;  %v1603_v63 = vadd.f32 %v1336_v54, %v1117_v43  ;;  %v1598_v0 = vadd.f32 %v1331_v55, %v1112_v45  ;;  %v581_v43 = vld [vmem:[%s3139_s13 + $0x170] ss:$12 sps:$4 sm:$0xff]  }
 0x11b   : > { %v1599_v3 = vadd.f32 %v1331_v55, %v1113_v48  ;;  %v1600_v4 = vadd.f32 %v1331_v55, %v1114_v51  ;;  %1109 = vperm.xlu1 %2616, %v841_v47   ;;  %1104 = vperm.xlu0 %2615, %v840_v56   ;;  %v578_v47 = vld [vmem:[%s3139_s13 + $0x168] sm:$0xff]  ;;  %v1326_v48 = vld [vmem:[%s3683_s2 + $0x1a0] sm:$0xff]  ;;  %v719_v55 = vunpack.c.l.bf16 %v580_v36  ;;  %v720_v56 = vunpack.c.h.bf16 %v580_v36 }
 0x11c   : > { %v1763_v5 = vmax.f32 %v1601_v61, 0.0  ;;  %v1764_v7 = vmax.f32 %v1602_v62, 0.0  ;;  %v1765_v6 = vmax.f32 %v1603_v63, 0.0  ;;  %v1760_v10 = vmax.f32 %v1598_v0, 0.0  ;;  %v608_v54 = vld [vmem:[%s3139_s13 + $0x21c] sm:$0xff] }
 0x11d   : > { %v1761_v16 = vmax.f32 %v1599_v3, 0.0  ;;  %v1762_v17 = vmax.f32 %v1600_v4, 0.0  ;;  %v1566_v18 = vpop.permute.xlu1 %1565  ;;  %v1561_v19 = vpop.permute.xlu0 %1560  ;;  %v609_v62 = vld [vmem:[%s3139_s13 + $0x218] ss:$12 sps:$4 sm:$0xff]   ;;  %v721_v63 = vunpack.c.h.bf16 %v581_v43  ;;  %v716_v0 = vunpack.c.l.bf16 %v578_v47 }
 0x11e   : > { %v1739_v21 = vadd.f32 %v1566_v18, %v1253_v52  ;;  %v1741_v24 = vadd.f32 %v1566_v18, %v1255_v53  ;;  %v1736_v25 = vadd.f32 %v1561_v19, %v1250_v1  ;;  %v1738_v26 = vadd.f32 %v1561_v19, %v1252_v2  ;;  %v606_v2 = vld [vmem:[%s3139_s13 + $0x210] sm:$0xff] }
 0x11f   : > { %v3337_v28 = vpack.c.bf16 %v1765_v6, %v1762_v17  ;;  %1415 = vperm.xlu1 %2616, %v1291_v11   ;;  %v1923_v27 = vpack.c.bf16 %v1764_v7, %v1761_v16  ;;  %v1922_v30 = vpack.c.bf16 %v1763_v5, %v1760_v10  ;;  %v1737_v32 = vadd.f32 %v1561_v19, %v1251_v15  ;;  %v839_v4 = vld [vmem:[%s3682_s1 + $0x198] sm:$0xff]  ;;  %v2619_v5 = vld [vmem:[%s3684_s3 + $0x4] ss:$16 sps:$4 sm:$0xff]  }
 0x120   : > { %v1903_v33 = vmax.f32 %v1741_v24, 0.0  ;;  %v1900_v34 = vmax.f32 %v1738_v26, 0.0  ;;  %1410 = vperm.xlu0 %2615, %v1290_v20   ;;  %v1740_v38 = vadd.f32 %v1566_v18, %v1254_v12  ;;  %v1898_v39 = vmax.f32 %v1736_v25, 0.0  ;;  %v838_v16 = vld [vmem:[%s3682_s1 + $0x190] sm:$0xff]  ;;  %2062 = vmatprep.mubr.bf16.mxu0 %v2619_v5  ;;  %v836_v5 = vld [vmem:[%s3682_s1 + $0x180] sm:$0xff] }
 0x121   : > { %3699 = vst [vmem:[#allocation7_spill] sm:$0xff] %v3337_v28  ;;  %2044 = vmatprep.subr.bf16.mxu0 %v1923_v27  ;;  %v1000_v42 = vpop.permute.xlu1 %999  ;;  %v995_v45 = vpop.permute.xlu0 %994  ;;  %v1899_v51 = vmax.f32 %v1737_v32, 0.0  ;;  %v1901_v52 = vmax.f32 %v1739_v21, 0.0  ;;  %v717_v1 = vunpack.c.h.bf16 %v578_v47  ;;  %v718_v7 = vunpack.c.l.bf16 %v581_v43  ;;  %v1325_v27 = vld [vmem:[%s3683_s2 + $0x198] sm:$0xff] }
 0x122   : > { %v3348_v53 = vpack.c.bf16 %v1903_v33, %v1900_v34  ;;  %2045 = vmatpush1.bf16.msra.mxu0 %v1922_v30  ;;  %v1902_v61 = vmax.f32 %v1740_v38, 0.0  ;;  %v761_v11 = vunpack.c.l.bf16 %v608_v54  ;;  %v762_v12 = vunpack.c.h.bf16 %v608_v54  ;;  %v1324_v38 = vld [vmem:[%s3683_s2 + $0x190] sm:$0xff] }
 0x123   : > { %1595 = vperm.xlu1 %2616, %v1327_v37   ;;  %v1991_v3 = vpack.c.bf16 %v1901_v52, %v1898_v39  ;;  %v1205_v17 = vmul.f32 %v1000_v42, %v719_v55  ;;  %v763_v18 = vunpack.c.h.bf16 %v609_v62  ;;  %v758_v19 = vunpack.c.l.bf16 %v606_v2 }
 0x124   : > { %1590 = vperm.xlu0 %2615, %v1326_v48   ;;  %v1992_v6 = vpack.c.bf16 %v1902_v61, %v1899_v51  ;;  %v759_v20 = vunpack.c.h.bf16 %v606_v2  ;;  %v1206_v21 = vmul.f32 %v1000_v42, %v720_v56  ;;  %v1207_v24 = vmul.f32 %v1000_v42, %v721_v63 }
 0x125   : > { %v1070_v10 = vpop.permute.xlu1 %1069  ;;  %v1065_v15 = vpop.permute.xlu0 %1064  ;;  %v1202_v25 = vmul.f32 %v995_v45, %v716_v0  ;;  %v760_v26 = vunpack.c.l.bf16 %v609_v62  ;;  %v1203_v30 = vmul.f32 %v995_v45, %v717_v1  ;;  %v1204_v32 = vmul.f32 %v995_v45, %v718_v7  ;;  %v837_v62 = vld [vmem:[%s3682_s1 + $0x188] sm:$0xff] }
 0x126   : > { %2073 = vmatprep.subr.bf16.mxu1 %v1992_v6  ;;  %v1247_v33 = vmul.f32 %v1070_v10, %v761_v11  ;;  %v1248_v34 = vmul.f32 %v1070_v10, %v762_v12  ;;  %v1249_v48 = vmul.f32 %v1070_v10, %v763_v18  ;;  %v1244_v51 = vmul.f32 %v1065_v15, %v758_v19 }
 0x127   : > { %1099 = vperm.xlu1 %2616, %v839_v4   ;;  %2074 = vmatpush1.bf16.msra.mxu1 %v1991_v3  ;;  %v1245_v55 = vmul.f32 %v1065_v15, %v759_v20  ;;  %v1246_v63 = vmul.f32 %v1065_v15, %v760_v26 }
 0x128   : > { %1094 = vperm.xlu0 %2615, %v838_v16  }
 0x129   : > { %v1486_v36 = vpop.permute.xlu1 %1485  ;;  %v1481_v37 = vpop.permute.xlu0 %1480 }
 0x12a   : > { %v1691_v39 = vadd.f32 %v1486_v36, %v1205_v17  ;;  %v1692_v42 = vadd.f32 %v1486_v36, %v1206_v21  ;;  %v1693_v43 = vadd.f32 %v1486_v36, %v1207_v24  ;;  %v1688_v47 = vadd.f32 %v1481_v37, %v1202_v25  ;;  %v576_v24 = vld [vmem:[%s3139_s13 + $0x15c] sm:$0xff] }
 0x12b   : > { %v1689_v52 = vadd.f32 %v1481_v37, %v1203_v30  ;;  %v1690_v54 = vadd.f32 %v1481_v37, %v1204_v32  ;;  %1585 = vperm.xlu1 %2616, %v1325_v27   ;;  %v1323_v25 = vld [vmem:[%s3683_s2 + $0x188] sm:$0xff]  ;;  %v1322_v36 = vld [vmem:[%s3683_s2 + $0x180] sm:$0xff] }
 0x12c   : > { %v1853_v56 = vmax.f32 %v1691_v39, 0.0  ;;  %v1854_v45 = vmax.f32 %v1692_v42, 0.0  ;;  %v1850_v61 = vmax.f32 %v1688_v47, 0.0  ;;  %1580 = vperm.xlu0 %2615, %v1324_v38   ;;  %v1855_v0 = vmax.f32 %v1693_v43, 0.0  ;;  %v577_v32 = vld [vmem:[%s3139_s13 + $0x158] ss:$12 sps:$4 sm:$0xff]  }
 0x12d   : > { %v1851_v1 = vmax.f32 %v1689_v52, 0.0  ;;  %v1852_v2 = vmax.f32 %v1690_v54, 0.0  ;;  %v1556_v3 = vpop.permute.xlu1 %1555  ;;  %v1551_v4 = vpop.permute.xlu0 %1550  ;;  %v604_v37 = vld [vmem:[%s3139_s13 + $0x204] sm:$0xff]  ;;  %v713_v39 = vunpack.c.l.bf16 %v576_v24  ;;  %v714_v42 = vunpack.c.h.bf16 %v576_v24  ;;  %v605_v47 = vld [vmem:[%s3139_s13 + $0x200] ss:$12 sps:$4 sm:$0xff]   ;;  %v602_v52 = vld [vmem:[%s3139_s13 + $0x1f8] sm:$0xff] }
 0x12e   : > { %v1733_v7 = vadd.f32 %v1556_v3, %v1247_v33  ;;  %v1734_v6 = vadd.f32 %v1556_v3, %v1248_v34  ;;  %v1735_v10 = vadd.f32 %v1556_v3, %v1249_v48  ;;  %v1730_v11 = vadd.f32 %v1551_v4, %v1244_v51  ;;  %v574_v34 = vld [vmem:[%s3139_s13 + $0x150] sm:$0xff] }
 0x12f   : > { %v1731_v12 = vadd.f32 %v1551_v4, %v1245_v55  ;;  %v1732_v16 = vadd.f32 %v1551_v4, %v1246_v63  ;;  %1089 = vperm.xlu1 %2616, %v837_v62   ;;  %v1968_v15 = vpack.c.bf16 %v1854_v45, %v1851_v1  ;;  %v1967_v17 = vpack.c.bf16 %v1853_v56, %v1850_v61 }
 0x130   : > { %v1895_v18 = vmax.f32 %v1733_v7, 0.0  ;;  %v1896_v19 = vmax.f32 %v1734_v6, 0.0  ;;  %v1897_v20 = vmax.f32 %v1735_v10, 0.0  ;;  %v1892_v21 = vmax.f32 %v1730_v11, 0.0  ;;  %1084 = vperm.xlu0 %2615, %v836_v5  }
 0x131   : > { %v1893_v26 = vmax.f32 %v1731_v12, 0.0  ;;  %v1894_v27 = vmax.f32 %v1732_v16, 0.0  ;;  %2046 = vmatprep.subr.bf16.mxu0 %v1968_v15  ;;  %v990_v30 = vpop.permute.xlu1 %989  ;;  %v985_v33 = vpop.permute.xlu0 %984  ;;  %v715_v48 = vunpack.c.h.bf16 %v577_v32  ;;  %v710_v51 = vunpack.c.l.bf16 %v574_v34 }
 0x132   : > { %2047 = vmatpush2.bf16.msra.mxu0 %v1967_v17  ;;  %v1988_v54 = vpack.c.bf16 %v1895_v18, %v1892_v21  ;;  %v3388_v55 = vpack.c.bf16 %v1855_v0, %v1852_v2  ;;  %v711_v56 = vunpack.c.h.bf16 %v574_v34  ;;  %v712_v45 = vunpack.c.l.bf16 %v577_v32  ;;  %v3393_v0 = vld [vmem:[%s3684_s3 + $0xc] ss:$16 sps:$4 sm:$0xff]  }
 0x133   : > { %v3384_v38 = vpack.c.bf16 %v1897_v20, %v1894_v27  ;;  %1575 = vperm.xlu1 %2616, %v1323_v25   ;;  %v1989_v43 = vpack.c.bf16 %v1896_v19, %v1893_v26  ;;  %v755_v62 = vunpack.c.l.bf16 %v604_v37  ;;  %v756_v63 = vunpack.c.h.bf16 %v604_v37  ;;  %2544 = vmatprep.mubr.msk.bf16.mxu1 %vm2026_vm0, %v3393_v0 }
 0x134   : > { %1570 = vperm.xlu0 %2615, %v1322_v36   ;;  %v757_v3 = vunpack.c.h.bf16 %v605_v47  ;;  %v1199_v4 = vmul.f32 %v990_v30, %v713_v39  ;;  %v752_v5 = vunpack.c.l.bf16 %v602_v52  ;;  %v753_v7 = vunpack.c.h.bf16 %v602_v52 }
 0x135   : > { %2075 = vmatprep.subr.bf16.mxu1 %v1989_v43  ;;  %v1060_v61 = vpop.permute.xlu1 %1059  ;;  %v1055_v1 = vpop.permute.xlu0 %1054  ;;  %v754_v6 = vunpack.c.l.bf16 %v605_v47  ;;  %v1200_v10 = vmul.f32 %v990_v30, %v714_v42  ;;  %v1201_v11 = vmul.f32 %v990_v30, %v715_v48  ;;  %v1196_v12 = vmul.f32 %v985_v33, %v710_v51 }
 0x136   : > { %2076 = vmatpush1.bf16.msra.mxu1 %v1988_v54  ;;  %v1197_v2 = vmul.f32 %v985_v33, %v711_v56  ;;  %v1198_v16 = vmul.f32 %v985_v33, %v712_v45  ;;  %v1241_v15 = vmul.f32 %v1060_v61, %v755_v62  ;;  %v1242_v17 = vmul.f32 %v1060_v61, %v756_v63 }
 0x137   : > { %v1243_v26 = vmul.f32 %v1060_v61, %v757_v3  ;;  %v1238_v27 = vmul.f32 %v1055_v1, %v752_v5  ;;  %v1239_v34 = vmul.f32 %v1055_v1, %v753_v7  ;;  %v1240_v33 = vmul.f32 %v1055_v1, %v754_v6  ;;  %v572_v6 = vld [vmem:[%s3139_s13 + $0x144] sm:$0xff] }
 0x139   : > { %v1476_v18 = vpop.permute.xlu1 %1475  ;;  %v1471_v19 = vpop.permute.xlu0 %1470 }
 0x13a   : > { %v1685_v20 = vadd.f32 %v1476_v18, %v1199_v4  ;;  %v1686_v21 = vadd.f32 %v1476_v18, %v1200_v10  ;;  %v1687_v24 = vadd.f32 %v1476_v18, %v1201_v11  ;;  %v1682_v25 = vadd.f32 %v1471_v19, %v1196_v12  ;;  %v600_v18 = vld [vmem:[%s3139_s13 + $0x1ec] sm:$0xff] }
 0x13b   : > { %v1683_v30 = vadd.f32 %v1471_v19, %v1197_v2  ;;  %v1684_v32 = vadd.f32 %v1471_v19, %v1198_v16  ;;  %v573_v2 = vld [vmem:[%s3139_s13 + $0x140] ss:$12 sps:$4 sm:$0xff]  }
 0x13c   : > { %v1847_v36 = vmax.f32 %v1685_v20, 0.0  ;;  %v1848_v37 = vmax.f32 %v1686_v21, 0.0  ;;  %v1844_v39 = vmax.f32 %v1682_v25, 0.0  ;;  %v1849_v42 = vmax.f32 %v1687_v24, 0.0 }
 0x13d   : > { %v1845_v43 = vmax.f32 %v1683_v30, 0.0  ;;  %v1846_v47 = vmax.f32 %v1684_v32, 0.0  ;;  %v1546_v48 = vpop.permute.xlu1 %1545  ;;  %v1541_v51 = vpop.permute.xlu0 %1540  ;;  %v707_v20 = vunpack.c.l.bf16 %v572_v6  ;;  %v708_v24 = vunpack.c.h.bf16 %v572_v6  ;;  %v598_v30 = vld [vmem:[%s3139_s13 + $0x1e0] sm:$0xff] }
 0x13e   : > { %v1727_v52 = vadd.f32 %v1546_v48, %v1241_v15  ;;  %v1728_v54 = vadd.f32 %v1546_v48, %v1242_v17  ;;  %v1729_v56 = vadd.f32 %v1546_v48, %v1243_v26  ;;  %v1724_v45 = vadd.f32 %v1541_v51, %v1238_v27  ;;  %v570_v15 = vld [vmem:[%s3139_s13 + $0x138] sm:$0xff]  ;;  %v601_v27 = vld [vmem:[%s3139_s13 + $0x1e8] ss:$12 sps:$4 sm:$0xff]  }
 0x13f   : > { %v1725_v61 = vadd.f32 %v1541_v51, %v1239_v34  ;;  %v1726_v62 = vadd.f32 %v1541_v51, %v1240_v33  ;;  %v1965_v63 = vpack.c.bf16 %v1848_v37, %v1845_v43  ;;  %v1964_v3 = vpack.c.bf16 %v1847_v36, %v1844_v39 }
 0x140   : > { %v1889_v4 = vmax.f32 %v1727_v52, 0.0  ;;  %v1890_v5 = vmax.f32 %v1728_v54, 0.0  ;;  %v1891_v1 = vmax.f32 %v1729_v56, 0.0  ;;  %v1886_v7 = vmax.f32 %v1724_v45, 0.0 }
 0x141   : > { %v1887_v10 = vmax.f32 %v1725_v61, 0.0  ;;  %v1888_v11 = vmax.f32 %v1726_v62, 0.0  ;;  %2048 = vmatprep.subr.bf16.mxu0 %v1965_v63  ;;  %v980_v12 = vpop.permute.xlu1 %979  ;;  %v975_v16 = vpop.permute.xlu0 %974  ;;  %v3400_v17 = vpack.c.bf16 %v1849_v42, %v1846_v47  ;;  %v709_v25 = vunpack.c.h.bf16 %v573_v2 }
 0x142   : > { %2049 = vmatpush2.bf16.msra.mxu0 %v1964_v3  ;;  %v704_v26 = vunpack.c.l.bf16 %v570_v15  ;;  %v1985_v32 = vpack.c.bf16 %v1889_v4, %v1886_v7  ;;  %v705_v34 = vunpack.c.h.bf16 %v570_v15  ;;  %v706_v36 = vunpack.c.l.bf16 %v573_v2 }
 0x143   : > { %v3403_v19 = vpack.c.bf16 %v1891_v1, %v1888_v11  ;;  %v1986_v21 = vpack.c.bf16 %v1890_v5, %v1887_v10  ;;  %v749_v39 = vunpack.c.l.bf16 %v600_v18  ;;  %v750_v33 = vunpack.c.h.bf16 %v600_v18 }
 0x144   : > { %v751_v43 = vunpack.c.h.bf16 %v601_v27  ;;  %v746_v47 = vunpack.c.l.bf16 %v598_v30  ;;  %v747_v48 = vunpack.c.h.bf16 %v598_v30  ;;  %v748_v51 = vunpack.c.l.bf16 %v601_v27 }
 0x145   : > { %2077 = vmatprep.subr.bf16.mxu1 %v1986_v21  ;;  %v1050_v37 = vpop.permute.xlu1 %1049  ;;  %v1045_v42 = vpop.permute.xlu0 %1044  ;;  %v1193_v52 = vmul.f32 %v980_v12, %v707_v20  ;;  %v1194_v54 = vmul.f32 %v980_v12, %v708_v24  ;;  %v1195_v56 = vmul.f32 %v980_v12, %v709_v25  ;;  %v1190_v45 = vmul.f32 %v975_v16, %v704_v26 }
 0x146   : > { %2078 = vmatpush1.bf16.msra.mxu1 %v1985_v32  ;;  %v1191_v61 = vmul.f32 %v975_v16, %v705_v34  ;;  %v1192_v62 = vmul.f32 %v975_v16, %v706_v36  ;;  %v1235_v63 = vmul.f32 %v1050_v37, %v749_v39  ;;  %v1236_v3 = vmul.f32 %v1050_v37, %v750_v33 }
 0x147   : > { %v1237_v11 = vmul.f32 %v1050_v37, %v751_v43  ;;  %v1232_v2 = vmul.f32 %v1045_v42, %v746_v47  ;;  %v1233_v21 = vmul.f32 %v1045_v42, %v747_v48  ;;  %v1234_v12 = vmul.f32 %v1045_v42, %v748_v51 }
 0x149   : > { %v1466_v4 = vpop.permute.xlu1 %1465  ;;  %v1461_v5 = vpop.permute.xlu0 %1460 }
 0x14a   : > { %v1679_v1 = vadd.f32 %v1466_v4, %v1193_v52  ;;  %v1680_v7 = vadd.f32 %v1466_v4, %v1194_v54  ;;  %v1681_v6 = vadd.f32 %v1466_v4, %v1195_v56  ;;  %v1676_v10 = vadd.f32 %v1461_v5, %v1190_v45  ;;  %v568_v56 = vld [vmem:[%s3139_s13 + $0x12c] sm:$0xff]  ;;  %v566_v4 = vld [vmem:[%s3139_s13 + $0x120] sm:$0xff] }
 0x14b   : > { %v1677_v15 = vadd.f32 %v1461_v5, %v1191_v61  ;;  %v1678_v18 = vadd.f32 %v1461_v5, %v1192_v62 }
 0x14c   : > { %v1841_v27 = vmax.f32 %v1679_v1, 0.0  ;;  %v1842_v20 = vmax.f32 %v1680_v7, 0.0  ;;  %v1838_v24 = vmax.f32 %v1676_v10, 0.0  ;;  %v1843_v25 = vmax.f32 %v1681_v6, 0.0  ;;  %v596_v1 = vld [vmem:[%s3139_s13 + $0x1d4] sm:$0xff] }
 0x14d   : > { %v1839_v26 = vmax.f32 %v1677_v15, 0.0  ;;  %v1840_v16 = vmax.f32 %v1678_v18, 0.0  ;;  %v1536_v30 = vpop.permute.xlu1 %1535  ;;  %v1531_v32 = vpop.permute.xlu0 %1530  ;;  %v701_v6 = vunpack.c.l.bf16 %v568_v56  ;;  %v698_v15 = vunpack.c.l.bf16 %v566_v4  ;;  %v597_v18 = vld [vmem:[%s3139_s13 + $0x1d0] ss:$12 sps:$4 sm:$0xff]  }
 0x14e   : > { %v1721_v34 = vadd.f32 %v1536_v30, %v1235_v63  ;;  %v1722_v36 = vadd.f32 %v1536_v30, %v1236_v3  ;;  %v1723_v39 = vadd.f32 %v1536_v30, %v1237_v11  ;;  %v1718_v33 = vadd.f32 %v1531_v32, %v1232_v2  ;;  %v569_v63 = vld [vmem:[%s3139_s13 + $0x128] ss:$12 sps:$4 sm:$0xff]  }
 0x14f   : > { %v1719_v37 = vadd.f32 %v1531_v32, %v1233_v21  ;;  %v1720_v43 = vadd.f32 %v1531_v32, %v1234_v12  ;;  %v1962_v47 = vpack.c.bf16 %v1842_v20, %v1839_v26  ;;  %v1961_v48 = vpack.c.bf16 %v1841_v27, %v1838_v24  ;;  %v594_v21 = vld [vmem:[%s3139_s13 + $0x1c8] sm:$0xff] }
 0x150   : > { %v1883_v52 = vmax.f32 %v1721_v34, 0.0  ;;  %v1884_v54 = vmax.f32 %v1722_v36, 0.0  ;;  %v1885_v42 = vmax.f32 %v1723_v39, 0.0  ;;  %v1880_v51 = vmax.f32 %v1718_v33, 0.0 }
 0x151   : > { %v1881_v45 = vmax.f32 %v1719_v37, 0.0  ;;  %v1882_v61 = vmax.f32 %v1720_v43, 0.0  ;;  %2050 = vmatprep.subr.bf16.mxu0 %v1962_v47  ;;  %v970_v62 = vpop.permute.xlu1 %969  ;;  %v965_v3 = vpop.permute.xlu0 %964  ;;  %v3410_v5 = vpack.c.bf16 %v1843_v25, %v1840_v16  ;;  %v702_v11 = vunpack.c.h.bf16 %v568_v56 }
 0x152   : > { %2051 = vmatpush2.bf16.msra.mxu0 %v1961_v48  ;;  %v703_v2 = vunpack.c.h.bf16 %v569_v63  ;;  %v1982_v27 = vpack.c.bf16 %v1883_v52, %v1880_v51  ;;  %v699_v20 = vunpack.c.h.bf16 %v566_v4  ;;  %v700_v24 = vunpack.c.l.bf16 %v569_v63 }
 0x153   : > { %v3413_v7 = vpack.c.bf16 %v1885_v42, %v1882_v61  ;;  %v1983_v10 = vpack.c.bf16 %v1884_v54, %v1881_v45  ;;  %v743_v26 = vunpack.c.l.bf16 %v596_v1  ;;  %v744_v30 = vunpack.c.h.bf16 %v596_v1 }
 0x154   : > { %v745_v16 = vunpack.c.h.bf16 %v597_v18  ;;  %v740_v32 = vunpack.c.l.bf16 %v594_v21  ;;  %v741_v34 = vunpack.c.h.bf16 %v594_v21  ;;  %v742_v36 = vunpack.c.l.bf16 %v597_v18 }
 0x155   : > { %2079 = vmatprep.subr.bf16.mxu1 %v1983_v10  ;;  %v1040_v12 = vpop.permute.xlu1 %1039  ;;  %v1035_v25 = vpop.permute.xlu0 %1034  ;;  %v1187_v39 = vmul.f32 %v970_v62, %v701_v6  ;;  %v1188_v33 = vmul.f32 %v970_v62, %v702_v11  ;;  %v1189_v37 = vmul.f32 %v970_v62, %v703_v2  ;;  %v1184_v43 = vmul.f32 %v965_v3, %v698_v15 }
 0x156   : > { %2080 = vmatpush1.bf16.msra.mxu1 %v1982_v27  ;;  %v1185_v47 = vmul.f32 %v965_v3, %v699_v20  ;;  %v1186_v48 = vmul.f32 %v965_v3, %v700_v24  ;;  %v1229_v54 = vmul.f32 %v1040_v12, %v743_v26  ;;  %v1230_v52 = vmul.f32 %v1040_v12, %v744_v30 }
 0x157   : > { %v1231_v4 = vmul.f32 %v1040_v12, %v745_v16  ;;  %v1226_v1 = vmul.f32 %v1035_v25, %v740_v32  ;;  %v1227_v21 = vmul.f32 %v1035_v25, %v741_v34  ;;  %v1228_v62 = vmul.f32 %v1035_v25, %v742_v36 }
 0x159   : > { %v1456_v42 = vpop.permute.xlu1 %1455  ;;  %v1451_v51 = vpop.permute.xlu0 %1450 }
 0x15a   : > { %v1673_v56 = vadd.f32 %v1456_v42, %v1187_v39  ;;  %v1674_v45 = vadd.f32 %v1456_v42, %v1188_v33  ;;  %v1675_v61 = vadd.f32 %v1456_v42, %v1189_v37  ;;  %v1670_v63 = vadd.f32 %v1451_v51, %v1184_v43 }
 0x15b   : > { %v1671_v10 = vadd.f32 %v1451_v51, %v1185_v47  ;;  %v1672_v27 = vadd.f32 %v1451_v51, %v1186_v48  ;;  %v565_v51 = vld [vmem:[%s3139_s13 + $0x110] ss:$12 sps:$4 sm:$0xff]  }
 0x15c   : > { %v1835_v18 = vmax.f32 %v1673_v56, 0.0  ;;  %v1836_v6 = vmax.f32 %v1674_v45, 0.0  ;;  %v1832_v11 = vmax.f32 %v1670_v63, 0.0  ;;  %v1837_v2 = vmax.f32 %v1675_v61, 0.0  ;;  %v562_v45 = vld [vmem:[%s3139_s13 + $0x108] sm:$0xff]  ;;  %v592_v63 = vld [vmem:[%s3139_s13 + $0x1bc] sm:$0xff] }
 0x15d   : > { %v1833_v15 = vmax.f32 %v1671_v10, 0.0  ;;  %v1834_v3 = vmax.f32 %v1672_v27, 0.0  ;;  %v1526_v20 = vpop.permute.xlu1 %1525  ;;  %v1521_v24 = vpop.permute.xlu0 %1520 }
 0x15e   : > { %v1715_v26 = vadd.f32 %v1526_v20, %v1229_v54  ;;  %v1716_v30 = vadd.f32 %v1526_v20, %v1230_v52  ;;  %v1717_v39 = vadd.f32 %v1526_v20, %v1231_v4  ;;  %v1712_v33 = vadd.f32 %v1521_v24, %v1226_v1  ;;  %v564_v52 = vld [vmem:[%s3139_s13 + $0x114] sm:$0xff] }
 0x15f   : > { %v1713_v12 = vadd.f32 %v1521_v24, %v1227_v21  ;;  %v1714_v16 = vadd.f32 %v1521_v24, %v1228_v62  ;;  %v1959_v32 = vpack.c.bf16 %v1836_v6, %v1833_v15  ;;  %v1958_v34 = vpack.c.bf16 %v1835_v18, %v1832_v11  ;;  %v593_v11 = vld [vmem:[%s3139_s13 + $0x1b8] ss:$12 sps:$4 sm:$0xff]   ;;  %v590_v62 = vld [vmem:[%s3139_s13 + $0x1b0] sm:$0xff] }
 0x160   : > { %v1877_v37 = vmax.f32 %v1715_v26, 0.0  ;;  %v1878_v43 = vmax.f32 %v1716_v30, 0.0  ;;  %v1879_v25 = vmax.f32 %v1717_v39, 0.0  ;;  %v1874_v36 = vmax.f32 %v1712_v33, 0.0 }
 0x161   : > { %v1875_v47 = vmax.f32 %v1713_v12, 0.0  ;;  %v1876_v48 = vmax.f32 %v1714_v16, 0.0  ;;  %2052 = vmatprep.subr.bf16.mxu0 %v1959_v32  ;;  %v960_v42 = vpop.permute.xlu1 %959  ;;  %v3417_v54 = vpack.c.bf16 %v1837_v2, %v1834_v3  ;;  %v695_v10 = vunpack.c.l.bf16 %v564_v52 }
 0x162   : > { %v955_v56 = vpop.permute.xlu0 %954  ;;  %2053 = vmatpush2.bf16.msra.mxu0 %v1958_v34  ;;  %v1979_v4 = vpack.c.bf16 %v1877_v37, %v1874_v36  ;;  %v696_v27 = vunpack.c.h.bf16 %v564_v52  ;;  %v697_v21 = vunpack.c.h.bf16 %v565_v51  ;;  %v692_v18 = vunpack.c.l.bf16 %v562_v45 }
 0x163   : > { %3700 = vst [vmem:[#allocation8_spill] sm:$0xff] %v3417_v54  ;;  %v3422_v61 = vpack.c.bf16 %v1879_v25, %v1876_v48  ;;  %v1980_v1 = vpack.c.bf16 %v1878_v43, %v1875_v47  ;;  %v693_v2 = vunpack.c.h.bf16 %v562_v45  ;;  %v694_v15 = vunpack.c.l.bf16 %v565_v51 }
 0x164   : > { %v737_v3 = vunpack.c.l.bf16 %v592_v63  ;;  %v738_v20 = vunpack.c.h.bf16 %v592_v63  ;;  %v739_v26 = vunpack.c.h.bf16 %v593_v11  ;;  %v734_v30 = vunpack.c.l.bf16 %v590_v62 }
 0x165   : > { %v1030_v6 = vpop.permute.xlu1 %1029  ;;  %2081 = vmatprep.subr.bf16.mxu1 %v1980_v1  ;;  %v735_v39 = vunpack.c.h.bf16 %v590_v62  ;;  %v736_v33 = vunpack.c.l.bf16 %v593_v11  ;;  %v1181_v12 = vmul.f32 %v960_v42, %v695_v10  ;;  %v1182_v16 = vmul.f32 %v960_v42, %v696_v27 }
 0x166   : > { %v1025_v24 = vpop.permute.xlu0 %1024  ;;  %2082 = vmatpush1.bf16.msra.mxu1 %v1979_v4  ;;  %v1183_v32 = vmul.f32 %v960_v42, %v697_v21  ;;  %v1178_v34 = vmul.f32 %v955_v56, %v692_v18  ;;  %v1179_v37 = vmul.f32 %v955_v56, %v693_v2  ;;  %v1180_v43 = vmul.f32 %v955_v56, %v694_v15 }
 0x167   : > { %v1223_v25 = vmul.f32 %v1030_v6, %v737_v3  ;;  %v1224_v36 = vmul.f32 %v1030_v6, %v738_v20  ;;  %v1225_v1 = vmul.f32 %v1030_v6, %v739_v26  ;;  %v1220_v4 = vmul.f32 %v1025_v24, %v734_v30 }
 0x168   : > { %v1221_v62 = vmul.f32 %v1025_v24, %v735_v39  ;;  %v1222_v42 = vmul.f32 %v1025_v24, %v736_v33  ;;  %v560_v33 = vld [vmem:[%s3139_s13 + $0xfc] sm:$0xff] }
 0x169   : > { %v1446_v47 = vpop.permute.xlu1 %1445 }
 0x16a   : > { %v1441_v48 = vpop.permute.xlu0 %1440  ;;  %v1667_v52 = vadd.f32 %v1446_v47, %v1181_v12  ;;  %v1668_v51 = vadd.f32 %v1446_v47, %v1182_v16  ;;  %v1669_v45 = vadd.f32 %v1446_v47, %v1183_v32  ;;  %v558_v47 = vld [vmem:[%s3139_s13 + $0xf0] sm:$0xff] }
 0x16b   : > { %v1664_v63 = vadd.f32 %v1441_v48, %v1178_v34  ;;  %v1665_v46 = vadd.f32 %v1441_v48, %v1179_v37  ;;  %v1666_v28 = vadd.f32 %v1441_v48, %v1180_v43 }
 0x16c   : > { %v1829_v11 = vmax.f32 %v1667_v52, 0.0  ;;  %v1830_v10 = vmax.f32 %v1668_v51, 0.0  ;;  %v1831_v21 = vmax.f32 %v1669_v45, 0.0  ;;  %v689_v51 = vunpack.c.l.bf16 %v560_v33 }
 0x16d   : > { %v1826_v27 = vmax.f32 %v1664_v63, 0.0  ;;  %v1827_v18 = vmax.f32 %v1665_v46, 0.0  ;;  %v1828_v56 = vmax.f32 %v1666_v28, 0.0  ;;  %v1516_v2 = vpop.permute.xlu1 %1515  ;;  %v690_v63 = vunpack.c.h.bf16 %v560_v33 }
 0x16e   : > { %v1511_v15 = vpop.permute.xlu0 %1510  ;;  %v1709_v3 = vadd.f32 %v1516_v2, %v1223_v25  ;;  %v1710_v20 = vadd.f32 %v1516_v2, %v1224_v36  ;;  %v1711_v12 = vadd.f32 %v1516_v2, %v1225_v1  ;;  %v561_v25 = vld [vmem:[%s3139_s13 + $0xf8] ss:$12 sps:$4 sm:$0xff]  }
 0x16f   : > { %v1706_v16 = vadd.f32 %v1511_v15, %v1220_v4  ;;  %v1707_v6 = vadd.f32 %v1511_v15, %v1221_v62  ;;  %v1708_v26 = vadd.f32 %v1511_v15, %v1222_v42  ;;  %v1956_v30 = vpack.c.bf16 %v1830_v10, %v1827_v18  ;;  %v588_v62 = vld [vmem:[%s3139_s13 + $0x1a4] sm:$0xff] }
 0x170   : > { %v1955_v39 = vpack.c.bf16 %v1829_v11, %v1826_v27  ;;  %v1871_v32 = vmax.f32 %v1709_v3, 0.0  ;;  %v1872_v34 = vmax.f32 %v1710_v20, 0.0  ;;  %v1873_v37 = vmax.f32 %v1711_v12, 0.0  ;;  %v586_v11 = vld [vmem:[%s3139_s13 + $0x198] sm:$0xff] }
 0x171   : > { %v1868_v24 = vmax.f32 %v1706_v16, 0.0  ;;  %v1869_v46 = vmax.f32 %v1707_v6, 0.0  ;;  %v1870_v28 = vmax.f32 %v1708_v26, 0.0  ;;  %2054 = vmatprep.subr.bf16.mxu0 %v1956_v30  ;;  %v950_v43 = vpop.permute.xlu1 %949  ;;  %v3430_v48 = vpack.c.bf16 %v1831_v21, %v1828_v56 }
 0x172   : > { %v945_v36 = vpop.permute.xlu0 %944  ;;  %2055 = vmatpush2.bf16.msra.mxu0 %v1955_v39  ;;  %v691_v1 = vunpack.c.h.bf16 %v561_v25  ;;  %v686_v4 = vunpack.c.l.bf16 %v558_v47  ;;  %v687_v27 = vunpack.c.h.bf16 %v558_v47  ;;  %v688_v42 = vunpack.c.l.bf16 %v561_v25 }
 0x173   : > { %3701 = vst [vmem:[#allocation9_spill] sm:$0xff] %v3430_v48  ;;  %v3432_v52 = vpack.c.bf16 %v1873_v37, %v1870_v28  ;;  %v1977_v45 = vpack.c.bf16 %v1872_v34, %v1869_v46  ;;  %v1976_v10 = vpack.c.bf16 %v1871_v32, %v1868_v24  ;;  %v731_v21 = vunpack.c.l.bf16 %v588_v62 }
 0x174   : > { %v732_v56 = vunpack.c.h.bf16 %v588_v62  ;;  %v728_v15 = vunpack.c.l.bf16 %v586_v11  ;;  %v1175_v3 = vmul.f32 %v950_v43, %v689_v51  ;;  %v1176_v20 = vmul.f32 %v950_v43, %v690_v63 }
 0x175   : > { %2083 = vmatprep.subr.bf16.mxu1 %v1977_v45  ;;  %v3436_v18 = vpop.permute.xlu1 %1019  ;;  %v1177_v12 = vmul.f32 %v950_v43, %v691_v1  ;;  %v1172_v16 = vmul.f32 %v945_v36, %v686_v4  ;;  %v1173_v6 = vmul.f32 %v945_v36, %v687_v27  ;;  %v1174_v26 = vmul.f32 %v945_v36, %v688_v42 }
 0x176   : > { %v3438_v2 = vpop.permute.xlu0 %1014  ;;  %2084 = vmatpush1.bf16.msra.mxu1 %v1976_v10  ;;  %v729_v30 = vunpack.c.h.bf16 %v586_v11  ;;  %v1217_v46 = vmul.f32 %v3436_v18, %v731_v21  ;;  %v1218_v28 = vmul.f32 %v3436_v18, %v732_v56 }
 0x177   : > { %v1214_v51 = vmul.f32 %v3438_v2, %v728_v15 }
 0x178   : > { %v1215_v36 = vmul.f32 %v3438_v2, %v729_v30  ;;  %v556_v30 = vld [vmem:[%s3139_s13 + $0xe4] sm:$0xff] }
 0x17a   : > { %v1436_v39 = vpop.permute.xlu1 %1435  ;;  %v1431_v32 = vpop.permute.xlu0 %1430 }
 0x17b   : > { %v1661_v34 = vadd.f32 %v1436_v39, %v1175_v3  ;;  %v1662_v37 = vadd.f32 %v1436_v39, %v1176_v20  ;;  %v1663_v24 = vadd.f32 %v1436_v39, %v1177_v12  ;;  %v1658_v33 = vadd.f32 %v1431_v32, %v1172_v16  ;;  %v557_v39 = vld [vmem:[%s3139_s13 + $0xe0] ss:$12 sps:$4 sm:$0xff]  }
 0x17c   : > { %v1659_v25 = vadd.f32 %v1431_v32, %v1173_v6  ;;  %v1660_v47 = vadd.f32 %v1431_v32, %v1174_v26 }
 0x17d   : > { %v1823_v45 = vmax.f32 %v1661_v34, 0.0  ;;  %v1824_v43 = vmax.f32 %v1662_v37, 0.0  ;;  %v1820_v63 = vmax.f32 %v1658_v33, 0.0  ;;  %v1825_v1 = vmax.f32 %v1663_v24, 0.0  ;;  %v554_v37 = vld [vmem:[%s3139_s13 + $0xd8] sm:$0xff]  ;;  %v584_v24 = vld [vmem:[%s3139_s13 + $0x18c] sm:$0xff] }
 0x17e   : > { %v1821_v4 = vmax.f32 %v1659_v25, 0.0  ;;  %v1822_v62 = vmax.f32 %v1660_v47, 0.0  ;;  %v3444_v11 = vpop.permute.xlu1 %1505  ;;  %v3446_v10 = vpop.permute.xlu0 %1500  ;;  %v685_v25 = vunpack.c.h.bf16 %v557_v39 }
 0x17f   : > { %v1703_v27 = vadd.f32 %v3444_v11, %v1217_v46  ;;  %v1704_v42 = vadd.f32 %v3444_v11, %v1218_v28  ;;  %v1700_v21 = vadd.f32 %v3446_v10, %v1214_v51  ;;  %v1701_v56 = vadd.f32 %v3446_v10, %v1215_v36  ;;  %v582_v51 = vld [vmem:[%s3139_s13 + $0x180] sm:$0xff] }
 0x180   : > { %v1953_v15 = vpack.c.bf16 %v1824_v43, %v1821_v4  ;;  %v1952_v3 = vpack.c.bf16 %v1823_v45, %v1820_v63  ;;  %v3454_v32 = vpack.c.bf16 %v1825_v1, %v1822_v62  ;;  %v683_v46 = vunpack.c.l.bf16 %v556_v30 }
 0x181   : > { %v1865_v20 = vmax.f32 %v1703_v27, 0.0  ;;  %v1866_v12 = vmax.f32 %v1704_v42, 0.0  ;;  %v1862_v16 = vmax.f32 %v1700_v21, 0.0  ;;  %v1863_v6 = vmax.f32 %v1701_v56, 0.0 }
 0x182   : > { %2056 = vmatprep.subr.bf16.mxu0 %v1953_v15  ;;  %v940_v26 = vpop.permute.xlu1 %939  ;;  %3702 = vst [vmem:[#allocation10_spill] sm:$0xff] %v3454_v32  ;;  %v935_v34 = vpop.permute.xlu0 %934  ;;  %v684_v28 = vunpack.c.h.bf16 %v556_v30  ;;  %v680_v45 = vunpack.c.l.bf16 %v554_v37  ;;  %v681_v43 = vunpack.c.h.bf16 %v554_v37  ;;  %v682_v63 = vunpack.c.l.bf16 %v557_v39 }
 0x183   : > { %2057 = vmatpush2.bf16.msra.mxu0 %v1952_v3  ;;  %v1973_v33 = vpack.c.bf16 %v1865_v20, %v1862_v16  ;;  %v1974_v47 = vpack.c.bf16 %v1866_v12, %v1863_v6  ;;  %v725_v4 = vunpack.c.l.bf16 %v584_v24  ;;  %v726_v1 = vunpack.c.h.bf16 %v584_v24 }
 0x184   : > { %v722_v62 = vunpack.c.l.bf16 %v582_v51  ;;  %v1169_v42 = vmul.f32 %v940_v26, %v683_v46  ;;  %v1170_v21 = vmul.f32 %v940_v26, %v684_v28  ;;  %v1171_v56 = vmul.f32 %v940_v26, %v685_v25 }
 0x185   : > { %2085 = vmatprep.subr.bf16.mxu1 %v1974_v47  ;;  %v723_v15 = vunpack.c.h.bf16 %v582_v51  ;;  %v1166_v3 = vmul.f32 %v935_v34, %v680_v45  ;;  %v1167_v20 = vmul.f32 %v935_v34, %v681_v43  ;;  %v1168_v12 = vmul.f32 %v935_v34, %v682_v63 }
 0x186   : > { %v3459_v36 = vpop.permute.xlu1 %1009  ;;  %v3461_v27 = vpop.permute.xlu0 %1004  ;;  %2086 = vmatpush1.bf16.msra.mxu1 %v1973_v33 }
 0x187   : > { %v1211_v6 = vmul.f32 %v3459_v36, %v725_v4  ;;  %v1212_v13 = vmul.f32 %v3459_v36, %v726_v1  ;;  %v1208_v33 = vmul.f32 %v3461_v27, %v722_v62  ;;  %v1209_v26 = vmul.f32 %v3461_v27, %v723_v15 }
 0x18a   : > { %v1426_v16 = vpop.permute.xlu1 %1425  ;;  %v1421_v47 = vpop.permute.xlu0 %1420 }
 0x18b   : > { %v1655_v30 = vadd.f32 %v1426_v16, %v1169_v42  ;;  %v1656_v39 = vadd.f32 %v1426_v16, %v1170_v21  ;;  %v1657_v37 = vadd.f32 %v1426_v16, %v1171_v56  ;;  %v1652_v29 = vadd.f32 %v1421_v47, %v1166_v3 }
 0x18c   : > { %v1653_v24 = vadd.f32 %v1421_v47, %v1167_v20  ;;  %v1654_v32 = vadd.f32 %v1421_v47, %v1168_v12  ;;  %v552_v12 = vld [vmem:[%s3139_s13 + $0xcc] sm:$0xff] }
 0x18d   : > { %v1817_v46 = vmax.f32 %v1655_v30, 0.0  ;;  %v1818_v28 = vmax.f32 %v1656_v39, 0.0  ;;  %v1819_v25 = vmax.f32 %v1657_v37, 0.0  ;;  %v1814_v34 = vmax.f32 %v1652_v29, 0.0 }
 0x18e   : > { %v1815_v51 = vmax.f32 %v1653_v24, 0.0  ;;  %v1816_v45 = vmax.f32 %v1654_v32, 0.0  ;;  %v3467_v43 = vpop.permute.xlu1 %1495  ;;  %v3471_v1 = vpop.permute.xlu0 %1490  ;;  %v677_v30 = vunpack.c.l.bf16 %v552_v12  ;;  %v678_v39 = vunpack.c.h.bf16 %v552_v12 }
 0x18f   : > { %v1697_v63 = vadd.f32 %v3467_v43, %v1211_v6  ;;  %v1698_v4 = vadd.f32 %v3467_v43, %v1212_v13  ;;  %v1694_v62 = vadd.f32 %v3471_v1, %v1208_v33  ;;  %v1695_v42 = vadd.f32 %v3471_v1, %v1209_v26  ;;  %v550_v6 = vld [vmem:[%s3139_s13 + $0xc0] sm:$0xff] }
 0x190   : > { %v1950_v21 = vpack.c.bf16 %v1818_v28, %v1815_v51  ;;  %v1949_v29 = vpack.c.bf16 %v1817_v46, %v1814_v34  ;;  %v3478_v16 = vpack.c.bf16 %v1819_v25, %v1816_v45  ;;  %v674_v24 = vunpack.c.l.bf16 %v550_v6  ;;  %v624_v46 = vld [vmem:[%s3139_s13 + $0x27c] sm:$0xff]  ;;  %v622_v34 = vld [vmem:[%s3139_s13 + $0x270] sm:$0xff] }
 0x191   : > { %v1859_v56 = vmax.f32 %v1697_v63, 0.0  ;;  %v1860_v15 = vmax.f32 %v1698_v4, 0.0  ;;  %v1856_v3 = vmax.f32 %v1694_v62, 0.0  ;;  %v1857_v32 = vmax.f32 %v1695_v42, 0.0 }
 0x192   : > { %2058 = vmatprep.subr.bf16.mxu0 %v1950_v21  ;;  %v3475_v20 = vpop.permute.xlu1 %929  ;;  %3704 = vst [vmem:[#allocation12_spill] sm:$0xff] %v3478_v16  ;;  %v3480_v13 = vpop.permute.xlu0 %924  ;;  %v675_v33 = vunpack.c.h.bf16 %v550_v6  ;;  %v785_v45 = vunpack.c.l.bf16 %v624_v46  ;;  %v786_v63 = vunpack.c.h.bf16 %v624_v46  ;;  %v782_v42 = vunpack.c.l.bf16 %v622_v34 }
 0x193   : > { %3703 = vst [vmem:[#allocation11_spill] sm:$0xff] %v3475_v20  ;;  %3705 = vst [vmem:[#allocation13_spill] sm:$0xff] %v3480_v13  ;;  %2059 = vmatpush2.bf16.msra.mxu0 %v1949_v29  ;;  %v1971_v37 = vpack.c.bf16 %v1860_v15, %v1857_v32  ;;  %v1970_v47 = vpack.c.bf16 %v1859_v56, %v1856_v3  ;;  %v1163_v25 = vmul.f32 %v3475_v20, %v677_v30 }
 0x194   : > { %v1164_v51 = vmul.f32 %v3475_v20, %v678_v39  ;;  %v1160_v4 = vmul.f32 %v3480_v13, %v674_v24  ;;  %v1161_v62 = vmul.f32 %v3480_v13, %v675_v33  ;;  %v783_v21 = vunpack.c.h.bf16 %v622_v34 }
 0x195   : > { %2087 = vmatprep.subr.bf16.mxu1 %v1971_v37 }
 0x196   : > { %v3483_v26 = vpop.permute.xlu1 %1109  ;;  %v3486_v28 = vpop.permute.xlu0 %1104  ;;  %2088 = vmatpush1.bf16.msra.mxu1 %v1970_v47  ;;  %v620_v47 = vld [vmem:[%s3139_s13 + $0x264] sm:$0xff] }
 0x197   : > { %v1271_v6 = vmul.f32 %v3483_v26, %v785_v45  ;;  %v1272_v30 = vmul.f32 %v3483_v26, %v786_v63  ;;  %v1268_v24 = vmul.f32 %v3486_v28, %v782_v42  ;;  %v1269_v33 = vmul.f32 %v3486_v28, %v783_v21  ;;  %v618_v45 = vld [vmem:[%s3139_s13 + $0x258] sm:$0xff] }
 0x198   : > { %v779_v42 = vunpack.c.l.bf16 %v620_v47 }
 0x19a   : > { %v3493_v56 = vpop.permute.xlu1 %1415 }
 0x19b   : > { %3706 = vst [vmem:[#allocation14_spill] sm:$0xff] %v3493_v56  ;;  %v1649_v15 = vadd.f32 %v3493_v56, %v1163_v25  ;;  %v1650_v29 = vadd.f32 %v3493_v56, %v1164_v51  ;;  %v3497_v3 = vpop.permute.xlu0 %1410  ;;  %v777_v56 = vunpack.c.h.bf16 %v618_v45 }
 0x19c   : > { %3707 = vst [vmem:[#allocation15_spill] sm:$0xff] %v3497_v3  ;;  %v1646_v32 = vadd.f32 %v3497_v3, %v1160_v4  ;;  %v1647_v12 = vadd.f32 %v3497_v3, %v1161_v62 }
 0x19d   : > { %v1811_v39 = vmax.f32 %v1649_v15, 0.0  ;;  %v1812_v37 = vmax.f32 %v1650_v29, 0.0 }
 0x19e   : > { %v1808_v46 = vmax.f32 %v1646_v32, 0.0  ;;  %v1809_v34 = vmax.f32 %v1647_v12, 0.0  ;;  %v3506_v25 = vpop.permute.xlu1 %1595  ;;  %v780_v32 = vunpack.c.h.bf16 %v620_v47  ;;  %v3709_v47 = vmov 0  }
 0x19f   : > { %v1757_v51 = vadd.f32 %v3506_v25, %v1271_v6  ;;  %v1758_v4 = vadd.f32 %v3506_v25, %v1272_v30  ;;  %v3510_v62 = vpop.permute.xlu0 %1590  ;;  %v776_v30 = vunpack.c.l.bf16 %v618_v45 }
 0x1a0   : > { %v1754_v63 = vadd.f32 %v3510_v62, %v1268_v24  ;;  %v1755_v15 = vadd.f32 %v3510_v62, %v1269_v33  ;;  %v1947_v29 = vpack.c.bf16 %v1812_v37, %v1809_v34  ;;  %v1946_v12 = vpack.c.bf16 %v1811_v39, %v1808_v46  ;;  %v3520_v24 = vld [vmem:[%s3684_s3] ss:$16 sps:$4 sm:$0xff]  }
 0x1a1   : > { %v1919_v16 = vmax.f32 %v1757_v51, 0.0  ;;  %v1920_v21 = vmax.f32 %v1758_v4, 0.0  ;;  %3708 = vst [vmem:[#allocation16_spill] sm:$0xff] %v3520_v24  ;;  %v547_v37 = vld [vmem:[%s3139_s13 + $0xb0] ss:$12 sps:$4 sm:$0xff]  }
 0x1a2   : > { %v1916_v44 = vmax.f32 %v1754_v63, 0.0  ;;  %v1917_v3 = vmax.f32 %v1755_v15, 0.0  ;;  %2060 = vmatprep.subr.bf16.mxu0 %v1947_v29  ;;  %v3515_v6 = vpop.permute.xlu1 %1099  ;;  %v673_v34 = vunpack.c.h.bf16 %v547_v37  ;;  %v545_v39 = vld [vmem:[%s3139_s13 + $0x98] ss:$12 sps:$4 sm:$0xff]   ;;  %v670_v48 = vunpack.c.l.bf16 %v547_v37 }
 0x1a3   : > { %v3523_v33 = vpop.permute.xlu0 %1094  ;;  %2061 = vmatpush2.bf16.msra.mxu0 %v1946_v12  ;;  %v1265_v46 = vmul.f32 %v3515_v6, %v779_v42  ;;  %v1266_v51 = vmul.f32 %v3515_v6, %v780_v32  ;;  %v616_v12 = vld [vmem:[%s3139_s13 + $0x24c] sm:$0xff] }
 0x1a4   : > { %2157 = vmatprep.subr.bf16.mxu0 %v3709_v47  ;;  %v2001_v4 = vpack.c.bf16 %v1920_v21, %v1917_v3  ;;  %v2000_v45 = vpack.c.bf16 %v1919_v16, %v1916_v44  ;;  %v1262_v63 = vmul.f32 %v3523_v33, %v776_v30  ;;  %v1263_v15 = vmul.f32 %v3523_v33, %v777_v56  ;;  %v614_v44 = vld [vmem:[%s3139_s13 + $0x240] sm:$0xff] }
 0x1a5   : > { %v1159_v16 = vmul.f32 %v3164_v60, %v673_v34  ;;  %v667_v3 = vunpack.c.h.bf16 %v545_v39  ;;  %v773_v37 = vunpack.c.l.bf16 %v616_v12  ;;  %v770_v34 = vunpack.c.l.bf16 %v614_v44 }
 0x1a6   : > { %v3531_v29 = vpop.permute.xlu1 %1585  ;;  %2063 = vmatmul.mubr.bf16.vlgmr.msra.gmra.mxu0 %v3520_v24  ;;  %2099 = vmatprep.subr.bf16.mxu1 %v2001_v4  ;;  %v771_v4 = vunpack.c.h.bf16 %v614_v44 }
 0x1a7   : > { %v1751_v13 = vadd.f32 %v3531_v29, %v1265_v46  ;;  %v1752_v20 = vadd.f32 %v3531_v29, %v1266_v51  ;;  %v3537_v42 = vpop.permute.xlu0 %1580  ;;  %2158 = vmatpush1.bf16.msra.mxu0 %v3348_v53  ;;  %2100 = vmatpush2.bf16.msra.mxu1 %v2000_v45  ;;  %v774_v46 = vunpack.c.h.bf16 %v616_v12  ;;  %v1156_v45 = vmul.f32 %v3151_v50, %v670_v48 }
 0x1a8   : > { %v1748_v56 = vadd.f32 %v3537_v42, %v1262_v63  ;;  %v1749_v21 = vadd.f32 %v3537_v42, %v1263_v15  ;;  %2159 = vmatprep.subr.bf16.mxu0 %v3709_v47  ;;  %2545 = vmatprep.mubr.msk.bf16.mxu0 %vm2026_vm0, %v3393_v0  ;;  %v589_v15 = vld [vmem:[%s3139_s13 + $0x1a0] ss:$12 sps:$4 sm:$0xff]   ;;  %v1645_v44 = vadd.f32 %v3162_v59, %v1159_v16  ;;  %v585_v16 = vld [vmem:[%s3139_s13 + $0x188] ss:$12 sps:$4 sm:$0xff]  }
 0x1a9   : > { %v1913_v32 = vmax.f32 %v1751_v13, 0.0  ;;  %v1914_v30 = vmax.f32 %v1752_v20, 0.0  ;;  %v664_v13 = vunpack.c.l.bf16 %v545_v39  ;;  %v541_v20 = vld [vmem:[%s3139_s13 + $0x80] ss:$12 sps:$4 sm:$0xff]   ;;  %v1153_v24 = vmul.f32 %v3178_v8, %v667_v3 }
 0x1aa   : > { %v1910_v53 = vmax.f32 %v1748_v56, 0.0  ;;  %v1911_v51 = vmax.f32 %v1749_v21, 0.0  ;;  %v3547_v60 = vpop.permute.xlu1 %1089  ;;  %v733_v39 = vunpack.c.h.bf16 %v589_v15  ;;  %v730_v54 = vunpack.c.l.bf16 %v589_v15 }
 0x1ab   : > { %v3549_v63 = vpop.permute.xlu0 %1084  ;;  %2160 = vmatpush1.bf16.msra.mxu0 %v3384_v38  ;;  %v1259_v12 = vmul.f32 %v3547_v60, %v773_v37  ;;  %v1260_v0 = vmul.f32 %v3547_v60, %v774_v46  ;;  %v1150_v59 = vmul.f32 %v3180_v9, %v664_v13  ;;  %v661_v8 = vunpack.c.h.bf16 %v541_v20 }
 0x1ac   : > { %2161 = vmatprep.subr.bf16.mxu0 %v3709_v47  ;;  %v1998_v56 = vpack.c.bf16 %v1914_v30, %v1911_v51  ;;  %v1997_v21 = vpack.c.bf16 %v1913_v32, %v1910_v53  ;;  %v1256_v38 = vmul.f32 %v3549_v63, %v770_v34  ;;  %v1257_v50 = vmul.f32 %v3549_v63, %v771_v4 }
 0x1ad   : > { %v1642_v53 = vadd.f32 %v3149_v49, %v1156_v45  ;;  %v658_v51 = vunpack.c.l.bf16 %v541_v20  ;;  %v1636_v9 = vadd.f32 %v3196_v23, %v1150_v59  ;;  %v1807_v49 = vmax.f32 %v1645_v44, 0.0 }
 0x1ae   : > { %v3562_v48 = vpop.permute.xlu1 %1575  ;;  %2101 = vmatprep.subr.bf16.mxu1 %v1998_v56  ;;  %v727_v56 = vunpack.c.h.bf16 %v585_v16 }
 0x1af   : > { %v1745_v37 = vadd.f32 %v3562_v48, %v1259_v12  ;;  %v1746_v46 = vadd.f32 %v3562_v48, %v1260_v0  ;;  %v3566_v30 = vpop.permute.xlu0 %1570  ;;  %2162 = vmatpush1.bf16.msra.mxu0 %v3403_v19  ;;  %2102 = vmatpush2.bf16.msra.mxu1 %v1997_v21  ;;  %v1639_v19 = vadd.f32 %v3194_v22, %v1153_v24  ;;  %v724_v21 = vunpack.c.l.bf16 %v585_v16  ;;  %v2623_v22 = vld [vmem:[%s3139_s13 + $0x68] ss:$12 sps:$4 sm:$0xff]  }
 0x1b0   : > { %v1742_v3 = vadd.f32 %v3566_v30, %v1256_v38  ;;  %v1743_v32 = vadd.f32 %v3566_v30, %v1257_v50  ;;  %2163 = vmatprep.subr.bf16.mxu0 %v3709_v47  ;;  %v1219_v12 = vmul.f32 %v3436_v18, %v733_v39  ;;  %v1216_v0 = vmul.f32 %v3438_v2, %v730_v54  ;;  %v625_v38 = vld [vmem:[%s3139_s13 + $0x278] ss:$12 sps:$4 sm:$0xff]  }
 0x1b1   : > { %v1907_v34 = vmax.f32 %v1745_v37, 0.0  ;;  %v1908_v4 = vmax.f32 %v1746_v46, 0.0  ;;  %v1804_v50 = vmax.f32 %v1642_v53, 0.0  ;;  %v652_v24 = vunpack.c.l.bf16 %v2623_v22 }
 0x1b2   : > { %v1904_v13 = vmax.f32 %v1742_v3, 0.0  ;;  %v1905_v15 = vmax.f32 %v1743_v32, 0.0  ;;  %v1705_v23 = vadd.f32 %v3444_v11, %v1219_v12  ;;  %v1702_v18 = vadd.f32 %v3446_v10, %v1216_v0  ;;  %v621_v10 = vld [vmem:[%s3139_s13 + $0x260] ss:$12 sps:$4 sm:$0xff]  }
 0x1b3   : > { %2164 = vmatpush1.bf16.msra.mxu0 %v3413_v7  ;;  %v1147_v54 = vmul.f32 %v3209_v40, %v661_v8  ;;  %v1144_v2 = vmul.f32 %v3211_v41, %v658_v51  ;;  %v787_v39 = vunpack.c.h.bf16 %v625_v38  ;;  %v784_v37 = vunpack.c.l.bf16 %v625_v38  ;;  %v3590_v7 = vld [vmem:[%s3684_s3 + $0x8] ss:$16 sps:$4 sm:$0xff]  }
 0x1b4   : > { %v1995_v45 = vpack.c.bf16 %v1908_v4, %v1905_v15  ;;  %2165 = vmatprep.subr.bf16.mxu0 %v3709_v47  ;;  %v1994_v20 = vpack.c.bf16 %v1907_v34, %v1904_v13  ;;  %v1801_v44 = vmax.f32 %v1639_v19, 0.0  ;;  %v1798_v46 = vmax.f32 %v1636_v9, 0.0 }
 0x1b5   : > { %v1213_v59 = vmul.f32 %v3459_v36, %v727_v56  ;;  %v1210_v11 = vmul.f32 %v3461_v27, %v724_v21  ;;  %v1633_v40 = vadd.f32 %v3225_v57, %v1147_v54  ;;  %v1630_v41 = vadd.f32 %v3227_v58, %v1144_v2  ;;  %v553_v56 = vld [vmem:[%s3139_s13 + $0xc8] ss:$12 sps:$4 sm:$0xff]  }
 0x1b6   : > { %2103 = vmatprep.subr.bf16.mxu1 %v1995_v45  ;;  %v1945_v8 = vpack.c.bf16 %v1807_v49, %v1804_v50  ;;  %v1867_v16 = vmax.f32 %v1705_v23, 0.0  ;;  %v1864_v3 = vmax.f32 %v1702_v18, 0.0  ;;  %v1138_v32 = vmul.f32 %v3240_v14, %v652_v24  ;;  %v617_v14 = vld [vmem:[%s3139_s13 + $0x248] ss:$12 sps:$4 sm:$0xff]   ;;  %v3710_v50 = vld [vmem:[#allocation8_spill] sm:$0xff]  ;;  %s2589_s13 = smul.u32 24, %s467_s17 }
 0x1b7   : > { %2104 = vmatpush2.bf16.msra.mxu1 %v1994_v20  ;;  %2166 = vmatpush1.bf16.msra.mxu0 %v3422_v61  ;;  %v1699_v36 = vadd.f32 %v3467_v43, %v1213_v59  ;;  %v1696_v27 = vadd.f32 %v3471_v1, %v1210_v11  ;;  %v1273_v61 = vmul.f32 %v3483_v26, %v787_v39  ;;  %v781_v58 = vunpack.c.h.bf16 %v621_v10  ;;  %v3712_v23 = vld [vmem:[#allocation13_spill] sm:$0xff]  ;;  %v3715_v59 = vld [vmem:[#allocation15_spill] sm:$0xff]  ;;  %s2558_s17 = sshll.u32 %s508_s21, 4 }
 0x1b8   : > { %2565 = vmatprep.subr.bf16.mxu1 %v3388_v55  ;;  %2167 = vmatprep.subr.bf16.mxu0 %v3709_v47  ;;  %v1270_v57 = vmul.f32 %v3486_v28, %v784_v37  ;;  %v778_v55 = vunpack.c.l.bf16 %v621_v10  ;;  %v1942_v53 = vpack.c.bf16 %v1801_v44, %v1798_v46  ;;  %v1795_v51 = vmax.f32 %v1633_v40, 0.0  ;;  %v3713_v54 = vld [vmem:[#allocation9_spill] sm:$0xff]  ;;  %v3714_v44 = vld [vmem:[#allocation14_spill] sm:$0xff]  ;;  %s3647_s23 = scalar_lea.vmem [#allocation3], %s2589_s13  ;;  %s511_s30 = scalar_lea.vmem %s3686_s5, %s2558_s17 }
 0x1b9   : > { %v1624_v34 = vadd.f32 %v3252_v31, %v1138_v32  ;;  %v1759_v43 = vadd.f32 %v3506_v25, %v1273_v61  ;;  %v1792_v26 = vmax.f32 %v1630_v41, 0.0  ;;  %v1975_v28 = vpack.c.bf16 %v1867_v16, %v1864_v3  ;;  %v3719_v16 = vld [vmem:[#allocation12_spill] sm:$0xff]  ;;  %s516_s9 = scalar_lea.vmem %s3687_s6, %s2558_s17 }
 0x1ba   : > { %2106 = vmatmul.mubr.bf16.vlgmr.msra.gmra.mxu1 %v3590_v7  ;;  %v1756_v1 = vadd.f32 %v3510_v62, %v1270_v57  ;;  %v1861_v4 = vmax.f32 %v1699_v36, 0.0  ;;  %v1858_v19 = vmax.f32 %v1696_v27, 0.0  ;;  %v1267_v31 = vmul.f32 %v3515_v6, %v781_v58  ;;  %v3720_v36 = vld [vmem:[#allocation6_spill] sm:$0xff]  ;;  %v3721_v27 = vld [vmem:[#allocation7_spill] sm:$0xff]  ;;  %v3722_v32 = vld [vmem:[#allocation16_spill] sm:$0xff] }
 0x1bb   : > { %2566 = vmatpush3.bf16.msra.mxu1 %v1945_v8  ;;  %2168 = vmatpush1.bf16.msra.mxu0 %v3432_v52  ;;  %v2624_v52 = vld [vmem:[%s3684_s3 + $0x4] ss:$16 sps:$4 sm:$0xff]   ;;  %v1264_v25 = vmul.f32 %v3523_v33, %v778_v55  ;;  %v775_v62 = vunpack.c.h.bf16 %v617_v14  ;;  %v772_v9 = vunpack.c.l.bf16 %v617_v14  ;;  %v1786_v13 = vmax.f32 %v1624_v34, 0.0  ;;  %v3718_v8 = vld [vmem:[#allocation5_spill] sm:$0xff] }
 0x1bc   : > { %2567 = vmatprep.subr.bf16.mxu1 %v3400_v17  ;;  %2169 = vmatprep.subr.bf16.mxu0 %v3709_v47  ;;  %v1789_v17 = vmax.f32 %v3255_v35, 0.0  ;;  %v1921_v15 = vmax.f32 %v1759_v43, 0.0  ;;  %v1918_v12 = vmax.f32 %v1756_v1, 0.0  ;;  %v1972_v0 = vpack.c.bf16 %v1861_v4, %v1858_v19 }
 0x1bd   : > { %2148 = vmatprep.mubr.bf16.mxu1 %v2624_v52  ;;  %v1753_v21 = vadd.f32 %v3531_v29, %v1267_v31  ;;  %v1750_v6 = vadd.f32 %v3537_v42, %v1264_v25  ;;  %v1939_v33 = vpack.c.bf16 %v1795_v51, %v1792_v26  ;;  %v1261_v38 = vmul.f32 %v3547_v60, %v775_v62  ;;  %v3711_v60 = vld [vmem:[#allocation11_spill] sm:$0xff] }
 0x1be   : > { %v1258_v49 = vmul.f32 %v3549_v63, %v772_v9  ;;  %v679_v35 = vunpack.c.h.bf16 %v553_v56  ;;  %v676_v45 = vunpack.c.l.bf16 %v553_v56  ;;  %v2002_v20 = vpack.c.bf16 %v1921_v15, %v1918_v12 }
 0x1bf   : > { %2568 = vmatpush3.bf16.msra.mxu1 %v1942_v53  ;;  %2170 = vmatpush1.bf16.msra.mxu0 %v1975_v28  ;;  %v1915_v22 = vmax.f32 %v1753_v21, 0.0  ;;  %v1912_v24 = vmax.f32 %v1750_v6, 0.0  ;;  %v1747_v29 = vadd.f32 %v3562_v48, %v1261_v38  ;;  %v3716_v48 = vld [vmem:[#allocation4_spill] sm:$0xff] }
 0x1c0   : > { %2569 = vmatprep.subr.bf16.mxu1 %v3410_v5  ;;  %2171 = vmatprep.subr.bf16.mxu0 %v3709_v47  ;;  %v1936_v5 = vpack.c.bf16 %v1789_v17, %v1786_v13  ;;  %v1744_v42 = vadd.f32 %v3566_v30, %v1258_v49  ;;  %v1165_v63 = vmul.f32 %v3711_v60, %v679_v35  ;;  %v3717_v30 = vld [vmem:[#allocation10_spill] sm:$0xff] }
 0x1c1   : > { %v1162_v18 = vmul.f32 %v3712_v23, %v676_v45  ;;  %v1999_v2 = vpack.c.bf16 %v1915_v22, %v1912_v24  ;;  %v1909_v39 = vmax.f32 %v1747_v29, 0.0 }
 0x1c2   : > { %v1906_v37 = vmax.f32 %v1744_v42, 0.0  ;;  %v1651_v46 = vadd.f32 %v3714_v44, %v1165_v63 }
 0x1c3   : > { %2570 = vmatpush3.bf16.msra.mxu1 %v1939_v33  ;;  %2172 = vmatpush1.bf16.msra.mxu0 %v1972_v0  ;;  %v1648_v11 = vadd.f32 %v3715_v59, %v1162_v18 }
 0x1c4   : > { %2571 = vmatprep.subr.bf16.mxu1 %v3710_v50  ;;  %2183 = vmatprep.subr.bf16.mxu0 %v3709_v47  ;;  %v1996_v40 = vpack.c.bf16 %v1909_v39, %v1906_v37  ;;  %v1813_v41 = vmax.f32 %v1651_v46, 0.0 }
 0x1c5   : > { %v1810_v10 = vmax.f32 %v1648_v11, 0.0 }
 0x1c7   : > { %2572 = vmatpush3.bf16.msra.mxu1 %v1936_v5  ;;  %2184 = vmatpush2.bf16.msra.mxu0 %v2002_v20  ;;  %v1948_v3 = vpack.c.bf16 %v1813_v41, %v1810_v10 }
 0x1c8   : > { %2573 = vmatprep.subr.bf16.mxu1 %v3713_v54  ;;  %2185 = vmatprep.subr.bf16.mxu0 %v3709_v47 }
 0x1cb   : > { %2574 = vmatpush3.bf16.msra.mxu1 %v3716_v48  ;;  %2186 = vmatpush2.bf16.msra.mxu0 %v1999_v2 }
 0x1cc   : > { %2575 = vmatprep.subr.bf16.mxu1 %v3717_v30  ;;  %2187 = vmatprep.subr.bf16.mxu0 %v3709_v47 }
 0x1cf   : > { %2576 = vmatpush3.bf16.msra.mxu1 %v3718_v8  ;;  %2188 = vmatpush2.bf16.msra.mxu0 %v1996_v40 }
 0x1d0   : > { %2577 = vmatprep.subr.bf16.mxu1 %v3719_v16 }
 0x1d2   : > { %2190 = vmatmul.mubr.bf16.vlgmr.msra.gmra.mxu0 %v3590_v7 }
 0x1d3   : > { %2578 = vmatpush3.bf16.msra.mxu1 %v3720_v36 }
 0x1d4   : > { %2579 = vmatprep.subr.bf16.mxu1 %v1948_v3 }
 0x1d7   : > { %2580 = vmatpush3.bf16.msra.mxu1 %v3721_v27 }
 0x1da   : > { %2149 = vmatmul.mubr.bf16.vlgmr.msra.gmra.mxu1 %v3722_v32 }
 0x266   : > { %v2064_v47 = vpop.f32.mrf.mxu0 }
 0x268   : > { %v2066_v61 = vpop.f32.mrf.mxu0 }
 0x26a   : > { %v2068_v58 = vpop.f32.mrf.mxu0 }
 0x26c   : > { %v2070_v1 = vpop.f32.mrf.mxu0 }
 0x27a   : > { %v2107_v57 = vpop.f32.mrf.mxu1 }
 0x27b   : > { %v2108_v53 = vadd.f32 %v2107_v57, %v2064_v47 }
 0x27c   : > { %v2109_v55 = vpop.f32.mrf.mxu1 }
 0x27d   : > { %v2110_v51 = vadd.f32 %v2109_v55, %v2066_v61  ;;  %v2233_v0 = vmul.f32 %v2108_v53, %v2108_v53 }
 0x27e   : > { %v2111_v34 = vpop.f32.mrf.mxu1 }
 0x27f   : > { %v2560_v43 = vpack.c.bf16 %v2110_v51, %v2108_v53  ;;  %v2112_v14 = vadd.f32 %v2111_v34, %v2068_v58  ;;  %v2222_v13 = vadd.f32 %v2110_v51, %v2108_v53  ;;  %v2234_v15 = vmul.f32 %v2110_v51, %v2110_v51 }
 0x280   : > { %v2113_v7 = vpop.f32.mrf.mxu1 }
 0x281   : > { %2218 = vst [vmem:[%s3647_s23] sm:$0xff] %v2560_v43  ;;  %v2114_v26 = vadd.f32 %v2113_v7, %v2070_v1  ;;  %v2239_v20 = vadd.f32 %v2234_v15, %v2233_v0  ;;  %v2236_v50 = vmul.f32 %v2112_v14, %v2112_v14 }
 0x283   : > { %v2562_v28 = vpack.c.bf16 %v2114_v26, %v2112_v14  ;;  %v2226_v49 = vadd.f32 %v2114_v26, %v2112_v14  ;;  %v2237_v35 = vmul.f32 %v2114_v26, %v2114_v26 }
 0x285   : > { %2220 = vst [vmem:[%s3647_s23 + $0xc] sm:$0xff] %v2562_v28  ;;  %v2243_v42 = vadd.f32 %v2237_v35, %v2236_v50 }
 0x288   : > { %v2283_v2 = vld [vmem:[%s3647_s23] sm:$0xff] (%p2716_p5) }
 0x289   : > { %2284 = vst [vmem:[%s2268_s14] sm:$0xff] (%p2716_p5), %v2283_v2 }
 0x28c   : > { %v2285_v39 = vld [vmem:[%s3647_s23 + $0xc] sm:$0xff] (%p2716_p5) }
 0x28d   : > { %2286 = vst [vmem:[%s2268_s14 + $0x18] sm:$0xff] (%p2716_p5), %v2285_v39 }
 0x292   : > { %v2191_v4 = vpop.f32.mrf.mxu0 }
 0x294   : > { %v2193_v19 = vpop.f32.mrf.mxu0 }
 0x296   : > { %v2194_v52 = vpop.f32.mrf.mxu0 }
 0x298   : > { %v2196_v31 = vpop.f32.mrf.mxu0 }
 0x29a   : > { %v2581_v25 = vpop.f32.mrf.mxu1 }
 0x29c   : > { %v2582_v62 = vpop.f32.mrf.mxu1 }
 0x29d   : > { %v2583_v9 = vadd.f32 %v2582_v62, %v2581_v25 }
 0x29e   : > { %v2584_v17 = vpop.f32.mrf.mxu1 }
 0x29f   : > { %v2192_v12 = vadd.f32 %v2583_v9, %v2191_v4 }
 0x2a0   : > { %v2585_v56 = vpop.f32.mrf.mxu1 }
 0x2a1   : > { %v2561_v21 = vpack.c.bf16 %v2192_v12, %v2192_v12  ;;  %v2586_v6 = vadd.f32 %v2585_v56, %v2584_v17  ;;  %v2223_v33 = vadd.f32 %v2222_v13, %v2192_v12  ;;  %v2235_v38 = vmul.f32 %v2192_v12, %v2192_v12 }
 0x2a3   : > { %2219 = vst [vmem:[%s3647_s23 + $0x8] sm:$0xf] %v2561_v21  ;;  %v2195_v45 = vadd.f32 %v2586_v6, %v2194_v52  ;;  %2224 = vadd.xlane.f32.xlu0 %v2223_v33  ;;  %v2240_v22 = vadd.f32 %v2239_v20, %v2235_v38 }
 0x2a5   : > { %v2563_v5 = vpack.c.bf16 %v2195_v45, %v2195_v45  ;;  %v2227_v24 = vadd.f32 %v2226_v49, %v2195_v45  ;;  %v2238_v29 = vmul.f32 %v2195_v45, %v2195_v45 }
 0x2a7   : > { %2221 = vst [vmem:[%s3647_s23 + $0x14] sm:$0xf] %v2563_v5  ;;  %2241 = vadd.xlane.f32.xlu0 %v2240_v22  ;;  %2228 = vadd.xlane.f32.xlu1 %v2227_v24  ;;  %v2244_v60 = vadd.f32 %v2243_v42, %v2238_v29 }
 0x2aa   : > { %v2551_v37 = vld [vmem:[%s3647_s23 + $0x8] sm:$0xf] (%p2716_p5) }
 0x2ab   : > { %2245 = vadd.xlane.f32.xlu0 %v2244_v60  ;;  %2552 = vst [vmem:[%s2268_s14 + $0x8] sm:$0xf] (%p2716_p5), %v2551_v37 }
 0x2ae   : > { %v2553_v44 = vld [vmem:[%s3647_s23 + $0x14] sm:$0xf] (%p2716_p5) }
 0x2af   : > { %2554 = vst [vmem:[%s2268_s14 + $0x20] sm:$0xf] (%p2716_p5), %v2553_v44 }
 0x32c   : > { %v2225_v63 = vpop.xlane.xlu0 %2224 }
 0x32d   : > { %2231 = vst.msk [vmem:[%s511_s30] sm:$0xff] %vm2230_vm1, %v2225_v63 }
 0x330   : > { %v2242_v23 = vpop.xlane.xlu0 %2241  ;;  %v2229_v18 = vpop.xlane.xlu1 %2228 }
 0x331   : > { %2247 = vst.msk [vmem:[%s516_s9] sm:$0xff] %vm2230_vm1, %v2242_v23  ;;  %2232 = vst.msk [vmem:[%s511_s30 + $0x8] sm:$0xff] %vm2230_vm1, %v2229_v18  ;;  %2265 = sbr.rel (!%p2716_p5) target bundleno = 822 (0x336), region = 66 }
 0x334   : > { %v2246_v54 = vpop.xlane.xlu0 %2245 }
 0x335   : > { %2248 = vst.msk [vmem:[%s516_s9 + $0x8] sm:$0xff] %vm2230_vm1, %v2246_v54 }
 0x336 PF: > { %p14_p11 = scmp.ge.s32.totalorder %s2704_s25, 4   ;;  %s3723_s21 = smov %s2643_s22 }
 0x337   : > { %s3724_s22 = smov %s2714_s28  ;;  %s3725_s23 = smov %s2704_s25 }
 0x338   :  { %16 = sbr.rel (!%p14_p11) target bundleno = 2 (0x2), region = 159 }

// kernel: u_net_forward.9
= control target key start
LH: loop header
LB: loop body
LE: loop exit
PB: predicated region body
PF: predicated region fallthrough
CT: control target
= control target key end

     0   :  { %s2814_s24 = smov 0   ;;  %s2816_s25 = smov 0   ;;  %s3788_s0 = inlined_call_operand.vmem [shape: bf16[432,768], index: 0, kind: input, shape index: {}]   ;;  %s3789_s1 = inlined_call_operand.vmem [shape: f32[432,1], index: 1, kind: input, shape index: {}]   ;;  %s3790_s2 = inlined_call_operand.vmem [shape: f32[432,1], index: 2, kind: input, shape index: {}]   ;;  %s3791_s3 = inlined_call_operand.vmem [shape: bf16[16,432], index: 3, kind: input, shape index: {}]   ;;  %s3792_s4 = inlined_call_operand.vmem [shape: bf16[16,768], index: 4, kind: input, shape index: {}]   ;;  %s3793_s5 = inlined_call_operand.vmem [shape: bf16[16,768], index: 5, kind: output, shape index: {0}]   ;;  %s3794_s6 = inlined_call_operand.vmem [shape: f32[2,16,1], index: 6, kind: output, shape index: {1}]   ;;  %s3795_s7 = inlined_call_operand.vmem [shape: f32[2,16,1], index: 7, kind: output, shape index: {2}]  }
   0x1   :  { %s2818_s26 = smov 0  }
   0x2 LB: > { %s2830_s27 = sadd.s32 4294967295, %s2771_s26   ;;  %s2833_s28 = sadd.s32 1, %s2771_s26   ;;  %s2771_s26 = sphi %s2818_s26, %s3817_s26   ;;  %s2767_s25 = sphi %s2816_s25, %s3816_s25   ;;  %s2763_s24 = sphi %s2814_s24, %s3815_s24  }
   0x3   : > { %s22_s29 = ssub.s32 %s2771_s26, %s2833_s28  ;;  %s25_s30 = sadd.s32 1, %s2767_s25 }
   0x4   : > { %p23_p0 = scmp.eq.s32.totalorder %s22_s29, 0  ;;  %p32_p1 = scmp.ne.s32.totalorder %s2767_s25, %s2763_s24 }
   0x5   : > { %p33_p2 = scmp.eq.s32.totalorder %s2771_s26, 0  ;;  %p151_p3 = scmp.eq.s32.totalorder %s2830_s27, 1 }
   0x6   : > { %s2843_s8 = scalar_select %p23_p0, %s2767_s25, %s25_s30  }
   0x7   : > { %p2845_p4 = por %p33_p2, %p32_p1  ;;  %p2849_p5 = por %p151_p3, %p32_p1 }
   0x8   : > { %p2541_p6 = scmp.ge.s32.totalorder %s2771_s26, 2 }
   0xa   : > { %234 = sbr.rel (%p2541_p6) target bundleno = 90 (0x5a), region = 28 }
   0xf   : > { %237 = sbr.rel (!%p2845_p4) target bundleno = 83 (0x53), region = 32  ;;  %s239_s11 = sand.u32 (%p2845_p4), 1, %s2767_s25  }
  0x10   : > { %s2678_s12 = smul.u32 (%p2845_p4), 12, %s2771_s26 }
  0x11   : > { %s2709_s13 = smul.u32 (%p2845_p4), 648, %s239_s11 }
  0x12   : > { %s2861_s16 = scalar_lea.vmem (%p2845_p4), %s3788_s0, %s2678_s12 }
  0x13   : > { %v259_v0 = vld [vmem:[%s2861_s16] sm:$0xff] (%p2845_p4)  ;;  %v261_v1 = vld [vmem:[%s2861_s16 + $0x18] sm:$0xff] (%p2845_p4)  ;;  %v263_v2 = vld [vmem:[%s2861_s16 + $0x30] sm:$0xff] (%p2845_p4)  ;;  %s2866_s17 = scalar_lea.vmem (%p2845_p4), [#allocation2], %s2709_s13 }
  0x14   : > { %260 = vst [vmem:[%s2866_s17] sm:$0xff] %v259_v0  ;;  %262 = vst [vmem:[%s2866_s17 + $0xc] sm:$0xff] %v261_v1  ;;  %v265_v3 = vld [vmem:[%s2861_s16 + $0x48] sm:$0xff]  ;;  %v267_v4 = vld [vmem:[%s2861_s16 + $0x60] sm:$0xff] }
  0x15   : > { %264 = vst [vmem:[%s2866_s17 + $0x18] sm:$0xff] %v263_v2  ;;  %v269_v5 = vld [vmem:[%s2861_s16 + $0x78] sm:$0xff]  ;;  %266 = vst [vmem:[%s2866_s17 + $0x24] sm:$0xff] %v265_v3  ;;  %v271_v6 = vld [vmem:[%s2861_s16 + $0x90] sm:$0xff] }
  0x16   : > { %268 = vst [vmem:[%s2866_s17 + $0x30] sm:$0xff] %v267_v4  ;;  %270 = vst [vmem:[%s2866_s17 + $0x3c] sm:$0xff] %v269_v5  ;;  %v273_v7 = vld [vmem:[%s2861_s16 + $0xa8] sm:$0xff]  ;;  %v275_v8 = vld [vmem:[%s2861_s16 + $0xc0] sm:$0xff] }
  0x17   : > { %272 = vst [vmem:[%s2866_s17 + $0x48] sm:$0xff] %v271_v6  ;;  %274 = vst [vmem:[%s2866_s17 + $0x54] sm:$0xff] %v273_v7  ;;  %v277_v9 = vld [vmem:[%s2861_s16 + $0xd8] sm:$0xff]  ;;  %v279_v10 = vld [vmem:[%s2861_s16 + $0xf0] sm:$0xff] }
  0x18   : > { %276 = vst [vmem:[%s2866_s17 + $0x60] sm:$0xff] %v275_v8  ;;  %v281_v11 = vld [vmem:[%s2861_s16 + $0x108] sm:$0xff]  ;;  %278 = vst [vmem:[%s2866_s17 + $0x6c] sm:$0xff] %v277_v9  ;;  %v283_v12 = vld [vmem:[%s2861_s16 + $0x120] sm:$0xff] }
  0x19   : > { %280 = vst [vmem:[%s2866_s17 + $0x78] sm:$0xff] %v279_v10  ;;  %282 = vst [vmem:[%s2866_s17 + $0x84] sm:$0xff] %v281_v11  ;;  %v285_v13 = vld [vmem:[%s2861_s16 + $0x138] sm:$0xff]  ;;  %v287_v14 = vld [vmem:[%s2861_s16 + $0x150] sm:$0xff] }
  0x1a   : > { %284 = vst [vmem:[%s2866_s17 + $0x90] sm:$0xff] %v283_v12  ;;  %286 = vst [vmem:[%s2866_s17 + $0x9c] sm:$0xff] %v285_v13  ;;  %v289_v15 = vld [vmem:[%s2861_s16 + $0x168] sm:$0xff]  ;;  %v291_v16 = vld [vmem:[%s2861_s16 + $0x180] sm:$0xff] }
  0x1b   : > { %288 = vst [vmem:[%s2866_s17 + $0xa8] sm:$0xff] %v287_v14  ;;  %v293_v17 = vld [vmem:[%s2861_s16 + $0x198] sm:$0xff]  ;;  %290 = vst [vmem:[%s2866_s17 + $0xb4] sm:$0xff] %v289_v15  ;;  %v295_v18 = vld [vmem:[%s2861_s16 + $0x1b0] sm:$0xff] }
  0x1c   : > { %292 = vst [vmem:[%s2866_s17 + $0xc0] sm:$0xff] %v291_v16  ;;  %294 = vst [vmem:[%s2866_s17 + $0xcc] sm:$0xff] %v293_v17  ;;  %v297_v19 = vld [vmem:[%s2861_s16 + $0x1c8] sm:$0xff]  ;;  %v299_v20 = vld [vmem:[%s2861_s16 + $0x1e0] sm:$0xff] }
  0x1d   : > { %296 = vst [vmem:[%s2866_s17 + $0xd8] sm:$0xff] %v295_v18  ;;  %298 = vst [vmem:[%s2866_s17 + $0xe4] sm:$0xff] %v297_v19  ;;  %v301_v21 = vld [vmem:[%s2861_s16 + $0x1f8] sm:$0xff]  ;;  %v303_v22 = vld [vmem:[%s2861_s16 + $0x210] sm:$0xff] }
  0x1e   : > { %300 = vst [vmem:[%s2866_s17 + $0xf0] sm:$0xff] %v299_v20  ;;  %v305_v23 = vld [vmem:[%s2861_s16 + $0x228] sm:$0xff]  ;;  %302 = vst [vmem:[%s2866_s17 + $0xfc] sm:$0xff] %v301_v21  ;;  %v307_v24 = vld [vmem:[%s2861_s16 + $0x240] sm:$0xff] }
  0x1f   : > { %304 = vst [vmem:[%s2866_s17 + $0x108] sm:$0xff] %v303_v22  ;;  %306 = vst [vmem:[%s2866_s17 + $0x114] sm:$0xff] %v305_v23  ;;  %v309_v25 = vld [vmem:[%s2861_s16 + $0x258] sm:$0xff]  ;;  %v311_v26 = vld [vmem:[%s2861_s16 + $0x270] sm:$0xff] }
  0x20   : > { %308 = vst [vmem:[%s2866_s17 + $0x120] sm:$0xff] %v307_v24  ;;  %310 = vst [vmem:[%s2866_s17 + $0x12c] sm:$0xff] %v309_v25  ;;  %v313_v27 = vld [vmem:[%s2861_s16 + $0x288] sm:$0xff]  ;;  %v315_v28 = vld [vmem:[%s2861_s16 + $0x2a0] sm:$0xff] }
  0x21   : > { %312 = vst [vmem:[%s2866_s17 + $0x138] sm:$0xff] %v311_v26  ;;  %v317_v29 = vld [vmem:[%s2861_s16 + $0x2b8] sm:$0xff]  ;;  %314 = vst [vmem:[%s2866_s17 + $0x144] sm:$0xff] %v313_v27  ;;  %v319_v30 = vld [vmem:[%s2861_s16 + $0x2d0] sm:$0xff] }
  0x22   : > { %316 = vst [vmem:[%s2866_s17 + $0x150] sm:$0xff] %v315_v28  ;;  %318 = vst [vmem:[%s2866_s17 + $0x15c] sm:$0xff] %v317_v29  ;;  %v321_v31 = vld [vmem:[%s2861_s16 + $0x2e8] sm:$0xff]  ;;  %v323_v32 = vld [vmem:[%s2861_s16 + $0x300] sm:$0xff] }
  0x23   : > { %320 = vst [vmem:[%s2866_s17 + $0x168] sm:$0xff] %v319_v30  ;;  %322 = vst [vmem:[%s2866_s17 + $0x174] sm:$0xff] %v321_v31  ;;  %v325_v33 = vld [vmem:[%s2861_s16 + $0x318] sm:$0xff]  ;;  %v327_v34 = vld [vmem:[%s2861_s16 + $0x330] sm:$0xff] }
  0x24   : > { %324 = vst [vmem:[%s2866_s17 + $0x180] sm:$0xff] %v323_v32  ;;  %v329_v35 = vld [vmem:[%s2861_s16 + $0x348] sm:$0xff]  ;;  %326 = vst [vmem:[%s2866_s17 + $0x18c] sm:$0xff] %v325_v33  ;;  %v331_v36 = vld [vmem:[%s2861_s16 + $0x360] sm:$0xff] }
  0x25   : > { %328 = vst [vmem:[%s2866_s17 + $0x198] sm:$0xff] %v327_v34  ;;  %330 = vst [vmem:[%s2866_s17 + $0x1a4] sm:$0xff] %v329_v35  ;;  %v333_v37 = vld [vmem:[%s2861_s16 + $0x378] sm:$0xff]  ;;  %v335_v38 = vld [vmem:[%s2861_s16 + $0x390] sm:$0xff] }
  0x26   : > { %332 = vst [vmem:[%s2866_s17 + $0x1b0] sm:$0xff] %v331_v36  ;;  %334 = vst [vmem:[%s2866_s17 + $0x1bc] sm:$0xff] %v333_v37  ;;  %v337_v39 = vld [vmem:[%s2861_s16 + $0x3a8] sm:$0xff]  ;;  %v339_v40 = vld [vmem:[%s2861_s16 + $0x3c0] sm:$0xff] }
  0x27   : > { %336 = vst [vmem:[%s2866_s17 + $0x1c8] sm:$0xff] %v335_v38  ;;  %v341_v41 = vld [vmem:[%s2861_s16 + $0x3d8] sm:$0xff]  ;;  %338 = vst [vmem:[%s2866_s17 + $0x1d4] sm:$0xff] %v337_v39  ;;  %v343_v42 = vld [vmem:[%s2861_s16 + $0x3f0] sm:$0xff] }
  0x28   : > { %340 = vst [vmem:[%s2866_s17 + $0x1e0] sm:$0xff] %v339_v40  ;;  %342 = vst [vmem:[%s2866_s17 + $0x1ec] sm:$0xff] %v341_v41  ;;  %v345_v43 = vld [vmem:[%s2861_s16 + $0x408] sm:$0xff]  ;;  %v347_v44 = vld [vmem:[%s2861_s16 + $0x420] sm:$0xff] }
  0x29   : > { %344 = vst [vmem:[%s2866_s17 + $0x1f8] sm:$0xff] %v343_v42  ;;  %346 = vst [vmem:[%s2866_s17 + $0x204] sm:$0xff] %v345_v43  ;;  %v349_v45 = vld [vmem:[%s2861_s16 + $0x438] sm:$0xff]  ;;  %v351_v46 = vld [vmem:[%s2861_s16 + $0x450] sm:$0xff] }
  0x2a   : > { %348 = vst [vmem:[%s2866_s17 + $0x210] sm:$0xff] %v347_v44  ;;  %v353_v47 = vld [vmem:[%s2861_s16 + $0x468] sm:$0xff]  ;;  %350 = vst [vmem:[%s2866_s17 + $0x21c] sm:$0xff] %v349_v45  ;;  %v355_v48 = vld [vmem:[%s2861_s16 + $0x480] sm:$0xff] }
  0x2b   : > { %352 = vst [vmem:[%s2866_s17 + $0x228] sm:$0xff] %v351_v46  ;;  %354 = vst [vmem:[%s2866_s17 + $0x234] sm:$0xff] %v353_v47  ;;  %v357_v49 = vld [vmem:[%s2861_s16 + $0x498] sm:$0xff]  ;;  %v359_v50 = vld [vmem:[%s2861_s16 + $0x4b0] sm:$0xff] }
  0x2c   : > { %356 = vst [vmem:[%s2866_s17 + $0x240] sm:$0xff] %v355_v48  ;;  %358 = vst [vmem:[%s2866_s17 + $0x24c] sm:$0xff] %v357_v49  ;;  %v361_v51 = vld [vmem:[%s2861_s16 + $0x4c8] sm:$0xff]  ;;  %v363_v52 = vld [vmem:[%s2861_s16 + $0x4e0] sm:$0xff] }
  0x2d   : > { %360 = vst [vmem:[%s2866_s17 + $0x258] sm:$0xff] %v359_v50  ;;  %v365_v53 = vld [vmem:[%s2861_s16 + $0x4f8] sm:$0xff]  ;;  %362 = vst [vmem:[%s2866_s17 + $0x264] sm:$0xff] %v361_v51  ;;  %v2543_v54 = vld [vmem:[%s2861_s16 + $0x8] sm:$0xf] }
  0x2e   : > { %364 = vst [vmem:[%s2866_s17 + $0x270] sm:$0xff] %v363_v52  ;;  %366 = vst [vmem:[%s2866_s17 + $0x27c] sm:$0xff] %v365_v53  ;;  %v2545_v55 = vld [vmem:[%s2861_s16 + $0x20] sm:$0xf]  ;;  %v2547_v56 = vld [vmem:[%s2861_s16 + $0x38] sm:$0xf] }
  0x2f   : > { %2544 = vst [vmem:[%s2866_s17 + $0x8] sm:$0xf] %v2543_v54  ;;  %2546 = vst [vmem:[%s2866_s17 + $0x14] sm:$0xf] %v2545_v55  ;;  %v2549_v57 = vld [vmem:[%s2861_s16 + $0x50] sm:$0xf] }
  0x30   : > { %2548 = vst [vmem:[%s2866_s17 + $0x20] sm:$0xf] %v2547_v56  ;;  %v2551_v58 = vld [vmem:[%s2861_s16 + $0x68] sm:$0xf]  ;;  %v2553_v59 = vld [vmem:[%s2861_s16 + $0x80] sm:$0xf] }
  0x31   : > { %2550 = vst [vmem:[%s2866_s17 + $0x2c] sm:$0xf] %v2549_v57  ;;  %2552 = vst [vmem:[%s2866_s17 + $0x38] sm:$0xf] %v2551_v58  ;;  %v2555_v60 = vld [vmem:[%s2861_s16 + $0x98] sm:$0xf] }
  0x32   : > { %2554 = vst [vmem:[%s2866_s17 + $0x44] sm:$0xf] %v2553_v59  ;;  %v2557_v61 = vld [vmem:[%s2861_s16 + $0xb0] sm:$0xf]  ;;  %v2559_v62 = vld [vmem:[%s2861_s16 + $0xc8] sm:$0xf] }
  0x33   : > { %2556 = vst [vmem:[%s2866_s17 + $0x50] sm:$0xf] %v2555_v60  ;;  %2558 = vst [vmem:[%s2866_s17 + $0x5c] sm:$0xf] %v2557_v61  ;;  %v2561_v63 = vld [vmem:[%s2861_s16 + $0xe0] sm:$0xf] }
  0x34   : > { %2560 = vst [vmem:[%s2866_s17 + $0x68] sm:$0xf] %v2559_v62  ;;  %v2563_v0 = vld [vmem:[%s2861_s16 + $0xf8] sm:$0xf]  ;;  %v2565_v1 = vld [vmem:[%s2861_s16 + $0x110] sm:$0xf] }
  0x35   : > { %2562 = vst [vmem:[%s2866_s17 + $0x74] sm:$0xf] %v2561_v63  ;;  %2564 = vst [vmem:[%s2866_s17 + $0x80] sm:$0xf] %v2563_v0  ;;  %v2567_v2 = vld [vmem:[%s2861_s16 + $0x128] sm:$0xf] }
  0x36   : > { %2566 = vst [vmem:[%s2866_s17 + $0x8c] sm:$0xf] %v2565_v1  ;;  %v2569_v3 = vld [vmem:[%s2861_s16 + $0x140] sm:$0xf]  ;;  %v2571_v4 = vld [vmem:[%s2861_s16 + $0x158] sm:$0xf] }
  0x37   : > { %2568 = vst [vmem:[%s2866_s17 + $0x98] sm:$0xf] %v2567_v2  ;;  %2570 = vst [vmem:[%s2866_s17 + $0xa4] sm:$0xf] %v2569_v3  ;;  %v2573_v5 = vld [vmem:[%s2861_s16 + $0x170] sm:$0xf] }
  0x38   : > { %2572 = vst [vmem:[%s2866_s17 + $0xb0] sm:$0xf] %v2571_v4  ;;  %v2575_v6 = vld [vmem:[%s2861_s16 + $0x188] sm:$0xf]  ;;  %v2577_v7 = vld [vmem:[%s2861_s16 + $0x1a0] sm:$0xf] }
  0x39   : > { %2574 = vst [vmem:[%s2866_s17 + $0xbc] sm:$0xf] %v2573_v5  ;;  %2576 = vst [vmem:[%s2866_s17 + $0xc8] sm:$0xf] %v2575_v6  ;;  %v2579_v8 = vld [vmem:[%s2861_s16 + $0x1b8] sm:$0xf] }
  0x3a   : > { %2578 = vst [vmem:[%s2866_s17 + $0xd4] sm:$0xf] %v2577_v7  ;;  %v2581_v9 = vld [vmem:[%s2861_s16 + $0x1d0] sm:$0xf]  ;;  %v2583_v10 = vld [vmem:[%s2861_s16 + $0x1e8] sm:$0xf] }
  0x3b   : > { %2580 = vst [vmem:[%s2866_s17 + $0xe0] sm:$0xf] %v2579_v8  ;;  %2582 = vst [vmem:[%s2866_s17 + $0xec] sm:$0xf] %v2581_v9  ;;  %v2585_v11 = vld [vmem:[%s2861_s16 + $0x200] sm:$0xf] }
  0x3c   : > { %2584 = vst [vmem:[%s2866_s17 + $0xf8] sm:$0xf] %v2583_v10  ;;  %v2587_v12 = vld [vmem:[%s2861_s16 + $0x218] sm:$0xf]  ;;  %v2589_v13 = vld [vmem:[%s2861_s16 + $0x230] sm:$0xf] }
  0x3d   : > { %2586 = vst [vmem:[%s2866_s17 + $0x104] sm:$0xf] %v2585_v11  ;;  %2588 = vst [vmem:[%s2866_s17 + $0x110] sm:$0xf] %v2587_v12  ;;  %v2591_v14 = vld [vmem:[%s2861_s16 + $0x248] sm:$0xf] }
  0x3e   : > { %2590 = vst [vmem:[%s2866_s17 + $0x11c] sm:$0xf] %v2589_v13  ;;  %v2593_v15 = vld [vmem:[%s2861_s16 + $0x260] sm:$0xf]  ;;  %v2595_v16 = vld [vmem:[%s2861_s16 + $0x278] sm:$0xf] }
  0x3f   : > { %2592 = vst [vmem:[%s2866_s17 + $0x128] sm:$0xf] %v2591_v14  ;;  %2594 = vst [vmem:[%s2866_s17 + $0x134] sm:$0xf] %v2593_v15  ;;  %v2597_v17 = vld [vmem:[%s2861_s16 + $0x290] sm:$0xf] }
  0x40   : > { %2596 = vst [vmem:[%s2866_s17 + $0x140] sm:$0xf] %v2595_v16  ;;  %v2599_v18 = vld [vmem:[%s2861_s16 + $0x2a8] sm:$0xf]  ;;  %v2601_v19 = vld [vmem:[%s2861_s16 + $0x2c0] sm:$0xf] }
  0x41   : > { %2598 = vst [vmem:[%s2866_s17 + $0x14c] sm:$0xf] %v2597_v17  ;;  %2600 = vst [vmem:[%s2866_s17 + $0x158] sm:$0xf] %v2599_v18  ;;  %v2603_v20 = vld [vmem:[%s2861_s16 + $0x2d8] sm:$0xf] }
  0x42   : > { %2602 = vst [vmem:[%s2866_s17 + $0x164] sm:$0xf] %v2601_v19  ;;  %v2605_v21 = vld [vmem:[%s2861_s16 + $0x2f0] sm:$0xf]  ;;  %v2607_v22 = vld [vmem:[%s2861_s16 + $0x308] sm:$0xf] }
  0x43   : > { %2604 = vst [vmem:[%s2866_s17 + $0x170] sm:$0xf] %v2603_v20  ;;  %2606 = vst [vmem:[%s2866_s17 + $0x17c] sm:$0xf] %v2605_v21  ;;  %v2609_v23 = vld [vmem:[%s2861_s16 + $0x320] sm:$0xf] }
  0x44   : > { %2608 = vst [vmem:[%s2866_s17 + $0x188] sm:$0xf] %v2607_v22  ;;  %v2611_v24 = vld [vmem:[%s2861_s16 + $0x338] sm:$0xf]  ;;  %v2613_v25 = vld [vmem:[%s2861_s16 + $0x350] sm:$0xf] }
  0x45   : > { %2610 = vst [vmem:[%s2866_s17 + $0x194] sm:$0xf] %v2609_v23  ;;  %2612 = vst [vmem:[%s2866_s17 + $0x1a0] sm:$0xf] %v2611_v24  ;;  %v2615_v26 = vld [vmem:[%s2861_s16 + $0x368] sm:$0xf] }
  0x46   : > { %2614 = vst [vmem:[%s2866_s17 + $0x1ac] sm:$0xf] %v2613_v25  ;;  %v2617_v27 = vld [vmem:[%s2861_s16 + $0x380] sm:$0xf]  ;;  %v2619_v28 = vld [vmem:[%s2861_s16 + $0x398] sm:$0xf] }
  0x47   : > { %2616 = vst [vmem:[%s2866_s17 + $0x1b8] sm:$0xf] %v2615_v26  ;;  %2618 = vst [vmem:[%s2866_s17 + $0x1c4] sm:$0xf] %v2617_v27  ;;  %v2621_v29 = vld [vmem:[%s2861_s16 + $0x3b0] sm:$0xf] }
  0x48   : > { %2620 = vst [vmem:[%s2866_s17 + $0x1d0] sm:$0xf] %v2619_v28  ;;  %v2623_v30 = vld [vmem:[%s2861_s16 + $0x3c8] sm:$0xf]  ;;  %v2625_v31 = vld [vmem:[%s2861_s16 + $0x3e0] sm:$0xf] }
  0x49   : > { %2622 = vst [vmem:[%s2866_s17 + $0x1dc] sm:$0xf] %v2621_v29  ;;  %2624 = vst [vmem:[%s2866_s17 + $0x1e8] sm:$0xf] %v2623_v30  ;;  %v2627_v32 = vld [vmem:[%s2861_s16 + $0x3f8] sm:$0xf] }
  0x4a   : > { %2626 = vst [vmem:[%s2866_s17 + $0x1f4] sm:$0xf] %v2625_v31  ;;  %v2629_v33 = vld [vmem:[%s2861_s16 + $0x410] sm:$0xf]  ;;  %v2631_v34 = vld [vmem:[%s2861_s16 + $0x428] sm:$0xf] }
  0x4b   : > { %2628 = vst [vmem:[%s2866_s17 + $0x200] sm:$0xf] %v2627_v32  ;;  %2630 = vst [vmem:[%s2866_s17 + $0x20c] sm:$0xf] %v2629_v33  ;;  %v2633_v35 = vld [vmem:[%s2861_s16 + $0x440] sm:$0xf] }
  0x4c   : > { %2632 = vst [vmem:[%s2866_s17 + $0x218] sm:$0xf] %v2631_v34  ;;  %v2635_v36 = vld [vmem:[%s2861_s16 + $0x458] sm:$0xf]  ;;  %v2637_v37 = vld [vmem:[%s2861_s16 + $0x470] sm:$0xf] }
  0x4d   : > { %2634 = vst [vmem:[%s2866_s17 + $0x224] sm:$0xf] %v2633_v35  ;;  %2636 = vst [vmem:[%s2866_s17 + $0x230] sm:$0xf] %v2635_v36  ;;  %v2639_v38 = vld [vmem:[%s2861_s16 + $0x488] sm:$0xf] }
  0x4e   : > { %2638 = vst [vmem:[%s2866_s17 + $0x23c] sm:$0xf] %v2637_v37  ;;  %v2641_v39 = vld [vmem:[%s2861_s16 + $0x4a0] sm:$0xf]  ;;  %v2643_v40 = vld [vmem:[%s2861_s16 + $0x4b8] sm:$0xf] }
  0x4f   : > { %2640 = vst [vmem:[%s2866_s17 + $0x248] sm:$0xf] %v2639_v38  ;;  %2642 = vst [vmem:[%s2866_s17 + $0x254] sm:$0xf] %v2641_v39  ;;  %v2645_v41 = vld [vmem:[%s2861_s16 + $0x4d0] sm:$0xf] }
  0x50   : > { %2644 = vst [vmem:[%s2866_s17 + $0x260] sm:$0xf] %v2643_v40  ;;  %v2647_v42 = vld [vmem:[%s2861_s16 + $0x4e8] sm:$0xf]  ;;  %v2649_v43 = vld [vmem:[%s2861_s16 + $0x500] sm:$0xf] }
  0x51   : > { %2646 = vst [vmem:[%s2866_s17 + $0x26c] sm:$0xf] %v2645_v41  ;;  %2648 = vst [vmem:[%s2866_s17 + $0x278] sm:$0xf] %v2647_v42 }
  0x52   : > { %2650 = vst [vmem:[%s2866_s17 + $0x284] sm:$0xf] %v2649_v43 }
  0x53 PF: > { %488 = sbr.rel (!%p2845_p4) target bundleno = 90 (0x5a), region = 58  ;;  %s490_s18 = sand.u32 (%p2845_p4), 1, %s2767_s25  }
  0x54   : > { %s2679_s19 = smul.u32 (%p2845_p4), 12, %s2771_s26 }
  0x55   : > { %s2710_s20 = smul.u32 (%p2845_p4), 24, %s490_s18 }
  0x56   : > { %s495_s23 = scalar_lea.vmem (%p2845_p4), %s3792_s4, %s2679_s19 }
  0x57   : > { %v510_v44 = vld [vmem:[%s495_s23] sm:$0xff] (%p2845_p4)  ;;  %v512_v45 = vld [vmem:[%s495_s23 + $0x18] sm:$0xff] (%p2845_p4)  ;;  %v2652_v46 = vld [vmem:[%s495_s23 + $0x8] sm:$0xf] (%p2845_p4)  ;;  %s492_s29 = scalar_lea.vmem (%p2845_p4), [#allocation3], %s2710_s20 }
  0x58   : > { %511 = vst [vmem:[%s492_s29] sm:$0xff] %v510_v44  ;;  %513 = vst [vmem:[%s492_s29 + $0xc] sm:$0xff] %v512_v45  ;;  %v2654_v47 = vld [vmem:[%s495_s23 + $0x20] sm:$0xf] }
  0x59   : > { %2653 = vst [vmem:[%s492_s29 + $0x8] sm:$0xf] %v2652_v46  ;;  %2655 = vst [vmem:[%s492_s29 + $0x14] sm:$0xf] %v2654_v47 }
  0x5a PF: > { %p2656_p7 = scmp.ge.s32.totalorder %s2771_s26, 1  ;;  %p530_p8 = scmp.lt.s32.totalorder %s2771_s26, 3 }
  0x5c   : > { %p531_p9 = pnand %p2656_p7, %p530_p8 }
  0x5e   : > { %534 = sbr.rel (%p531_p9) target bundleno = 830 (0x33e), region = 84 }
  0x63   : > { %v1372_v48 = vld [vmem:[%s3790_s2 + $0x70] sm:$0xff]  ;;  %v3796_v50 = vmov 0   ;;  %v1373_v51 = vld [vmem:[%s3790_s2 + $0x78] sm:$0xff]  ;;  %v885_v53 = vld [vmem:[%s3789_s1 + $0x68] sm:$0xff]  ;;  %s537_s18 = sand.u32 1, %s2763_s24   ;;  %vm2120_vm0 = vcmask 392192  }
  0x64   : > { %v886_v49 = vld [vmem:[%s3789_s1 + $0x70] sm:$0xff]  ;;  %2739 = vset.pattern.permute.xlu1 %v3796_v50  ;;  %2738 = vset.pattern.permute.xlu0 %v3796_v50  ;;  %v887_v52 = vld [vmem:[%s3789_s1 + $0x78] sm:$0xff]  ;;  %v884_v54 = vld [vmem:[%s3789_s1 + $0x60] sm:$0xff]  ;;  %s2711_s23 = smul.u32 648, %s537_s18  ;;  %p591_p10 = scmp.lt.s32.totalorder %s2830_s27, 1  ;;  %vm2324_vm1 = vcmask 7168  }
  0x65   : > { %1484 = vperm.xlu1 %2739, %v1372_v48   ;;  %998 = vperm.xlu0 %2738, %v886_v49   ;;  %v1371_v55 = vld [vmem:[%s3790_s2 + $0x68] sm:$0xff]  ;;  %v1370_v56 = vld [vmem:[%s3790_s2 + $0x60] sm:$0xff]  ;;  %v883_v57 = vld [vmem:[%s3789_s1 + $0x58] sm:$0xff]  ;;  %s2686_s29 = smul.u32 (%p2849_p5), 12, %s2830_s27 }
  0x66   : > { %v882_v58 = vld [vmem:[%s3789_s1 + $0x50] sm:$0xff]  ;;  %v1369_v59 = vld [vmem:[%s3790_s2 + $0x58] sm:$0xff]  ;;  %v881_v61 = vld [vmem:[%s3789_s1 + $0x48] sm:$0xff]  ;;  %s3281_s15 = scalar_lea.vmem [#allocation2], %s2711_s23 }
  0x67   : > { %v1368_v60 = vld [vmem:[%s3790_s2 + $0x50] sm:$0xff]  ;;  %v880_v62 = vld [vmem:[%s3789_s1 + $0x40] sm:$0xff]  ;;  %v1367_v63 = vld [vmem:[%s3790_s2 + $0x48] sm:$0xff]  ;;  %s2362_s11 = scalar_lea.vmem (%p2849_p5), %s3793_s5, %s2686_s29 }
  0x68   : > { %v1366_v0 = vld [vmem:[%s3790_s2 + $0x40] sm:$0xff]  ;;  %v879_v1 = vld [vmem:[%s3789_s1 + $0x38] sm:$0xff]  ;;  %v878_v2 = vld [vmem:[%s3789_s1 + $0x30] sm:$0xff] }
  0x69   : > { %1489 = vperm.xlu1 %2739, %v1373_v51   ;;  %1003 = vperm.xlu0 %2738, %v887_v52   ;;  %v1365_v3 = vld [vmem:[%s3790_s2 + $0x38] sm:$0xff]  ;;  %v1364_v4 = vld [vmem:[%s3790_s2 + $0x30] sm:$0xff]  ;;  %v877_v5 = vld [vmem:[%s3789_s1 + $0x28] sm:$0xff] }
  0x6a   : > { %v876_v6 = vld [vmem:[%s3789_s1 + $0x20] sm:$0xff]  ;;  %v1363_v7 = vld [vmem:[%s3790_s2 + $0x28] sm:$0xff]  ;;  %v875_v9 = vld [vmem:[%s3789_s1 + $0x18] sm:$0xff] }
  0x6b   : > { %v1362_v8 = vld [vmem:[%s3790_s2 + $0x20] sm:$0xff]  ;;  %v874_v10 = vld [vmem:[%s3789_s1 + $0x10] sm:$0xff]  ;;  %v919_v11 = vld [vmem:[%s3789_s1 + $0x178] sm:$0xff] }
  0x6c   : > { %v918_v12 = vld [vmem:[%s3789_s1 + $0x170] sm:$0xff]  ;;  %v1361_v13 = vld [vmem:[%s3790_s2 + $0x18] sm:$0xff]  ;;  %v873_v15 = vld [vmem:[%s3789_s1 + $0x8] sm:$0xff] }
  0x6d   : > { %993 = vperm.xlu1 %2739, %v885_v53   ;;  %988 = vperm.xlu0 %2738, %v884_v54   ;;  %v1360_v14 = vld [vmem:[%s3790_s2 + $0x10] sm:$0xff]  ;;  %v872_v16 = vld [vmem:[%s3789_s1] sm:$0xff]  ;;  %v1405_v17 = vld [vmem:[%s3790_s2 + $0x178] sm:$0xff] }
  0x6e   : > { %v1404_v18 = vld [vmem:[%s3790_s2 + $0x170] sm:$0xff]  ;;  %v917_v19 = vld [vmem:[%s3789_s1 + $0x168] sm:$0xff]  ;;  %v916_v20 = vld [vmem:[%s3789_s1 + $0x160] sm:$0xff] }
  0x6f   : > { %v1359_v21 = vld [vmem:[%s3790_s2 + $0x8] sm:$0xff]  ;;  %v1358_v22 = vld [vmem:[%s3790_s2] sm:$0xff]  ;;  %v903_v23 = vld [vmem:[%s3789_s1 + $0xf8] sm:$0xff] }
  0x70   : > { %v902_v24 = vld [vmem:[%s3789_s1 + $0xf0] sm:$0xff]  ;;  %v1403_v25 = vld [vmem:[%s3790_s2 + $0x168] sm:$0xff]  ;;  %v1402_v26 = vld [vmem:[%s3790_s2 + $0x160] sm:$0xff] }
  0x71   : > { %1479 = vperm.xlu1 %2739, %v1371_v55   ;;  %1474 = vperm.xlu0 %2738, %v1370_v56   ;;  %v915_v27 = vld [vmem:[%s3789_s1 + $0x158] sm:$0xff]  ;;  %v914_v28 = vld [vmem:[%s3789_s1 + $0x150] sm:$0xff]  ;;  %v901_v31 = vld [vmem:[%s3789_s1 + $0xe8] sm:$0xff] }
  0x72   : > { %v1389_v29 = vld [vmem:[%s3790_s2 + $0xf8] sm:$0xff]  ;;  %v1388_v30 = vld [vmem:[%s3790_s2 + $0xf0] sm:$0xff]  ;;  %v900_v32 = vld [vmem:[%s3789_s1 + $0xe0] sm:$0xff] }
  0x73   : > { %v1401_v33 = vld [vmem:[%s3790_s2 + $0x158] sm:$0xff]  ;;  %v1400_v34 = vld [vmem:[%s3790_s2 + $0x150] sm:$0xff]  ;;  %v913_v35 = vld [vmem:[%s3789_s1 + $0x148] sm:$0xff] }
  0x74   : > { %v912_v36 = vld [vmem:[%s3789_s1 + $0x140] sm:$0xff]  ;;  %v1387_v37 = vld [vmem:[%s3790_s2 + $0xe8] sm:$0xff]  ;;  %v899_v39 = vld [vmem:[%s3789_s1 + $0xd8] sm:$0xff] }
  0x75   : > { %983 = vperm.xlu1 %2739, %v883_v57   ;;  %978 = vperm.xlu0 %2738, %v882_v58   ;;  %v1386_v38 = vld [vmem:[%s3790_s2 + $0xe0] sm:$0xff]  ;;  %v898_v40 = vld [vmem:[%s3789_s1 + $0xd0] sm:$0xff]  ;;  %v1399_v41 = vld [vmem:[%s3790_s2 + $0x148] sm:$0xff] }
  0x76   : > { %v1398_v42 = vld [vmem:[%s3790_s2 + $0x140] sm:$0xff]  ;;  %v911_v43 = vld [vmem:[%s3789_s1 + $0x138] sm:$0xff]  ;;  %v910_v44 = vld [vmem:[%s3789_s1 + $0x130] sm:$0xff] }
  0x77   : > { %v1385_v45 = vld [vmem:[%s3790_s2 + $0xd8] sm:$0xff]  ;;  %v1384_v46 = vld [vmem:[%s3790_s2 + $0xd0] sm:$0xff]  ;;  %v897_v48 = vld [vmem:[%s3789_s1 + $0xc8] sm:$0xff] }
  0x78   : > { %v630_v47 = vld [vmem:[%s3281_s15 + $0xa8] sm:$0xff]  ;;  %v896_v49 = vld [vmem:[%s3789_s1 + $0xc0] sm:$0xff]  ;;  %v1397_v58 = vld [vmem:[%s3790_s2 + $0x138] sm:$0xff] }
  0x79   : > { %1469 = vperm.xlu1 %2739, %v1369_v59   ;;  %1464 = vperm.xlu0 %2738, %v1368_v60   ;;  %v632_v51 = vld [vmem:[%s3281_s15 + $0xb4] sm:$0xff]  ;;  %v753_v52 = vunpack.c.h.bf16 %v630_v47  ;;  %v752_v55 = vunpack.c.l.bf16 %v630_v47 }
  0x7a   : > { %v755_v56 = vunpack.c.l.bf16 %v632_v51  ;;  %v756_v57 = vunpack.c.h.bf16 %v632_v51  ;;  %v1396_v59 = vld [vmem:[%s3790_s2 + $0x130] sm:$0xff]  ;;  %v1395_v51 = vld [vmem:[%s3790_s2 + $0x128] sm:$0xff] }
  0x7d   : > { %973 = vperm.xlu1 %2739, %v881_v61   ;;  %968 = vperm.xlu0 %2738, %v880_v62   ;;  %v628_v61 = vld [vmem:[%s3281_s15 + $0x9c] sm:$0xff] }
  0x81   : > { %1459 = vperm.xlu1 %2739, %v1367_v63   ;;  %1454 = vperm.xlu0 %2738, %v1366_v0  }
  0x85   : > { %963 = vperm.xlu1 %2739, %v879_v1   ;;  %958 = vperm.xlu0 %2738, %v878_v2   ;;  %v626_v1 = vld [vmem:[%s3281_s15 + $0x90] sm:$0xff] }
  0x89   : > { %1449 = vperm.xlu1 %2739, %v1365_v3   ;;  %1444 = vperm.xlu0 %2738, %v1364_v4   ;;  %v749_v4 = vunpack.c.l.bf16 %v628_v61 }
  0x8d   : > { %953 = vperm.xlu1 %2739, %v877_v5   ;;  %948 = vperm.xlu0 %2738, %v876_v6   ;;  %v909_v5 = vld [vmem:[%s3789_s1 + $0x128] sm:$0xff]  ;;  %v908_v6 = vld [vmem:[%s3789_s1 + $0x120] sm:$0xff] }
  0x91   : > { %1439 = vperm.xlu1 %2739, %v1363_v7   ;;  %1434 = vperm.xlu0 %2738, %v1362_v8   ;;  %v750_v8 = vunpack.c.h.bf16 %v628_v61 }
  0x95   : > { %943 = vperm.xlu1 %2739, %v875_v9   ;;  %938 = vperm.xlu0 %2738, %v874_v10   ;;  %v746_v9 = vunpack.c.l.bf16 %v626_v1 }
  0x99   : > { %1163 = vperm.xlu1 %2739, %v919_v11   ;;  %1158 = vperm.xlu0 %2738, %v918_v12  }
  0x9d   : > { %1429 = vperm.xlu1 %2739, %v1361_v13   ;;  %1424 = vperm.xlu0 %2738, %v1360_v14   ;;  %v747_v14 = vunpack.c.h.bf16 %v626_v1  ;;  %v618_v1 = vld [vmem:[%s3281_s15 + $0x60] sm:$0xff] }
  0xa1   : > { %933 = vperm.xlu1 %2739, %v873_v15   ;;  %928 = vperm.xlu0 %2738, %v872_v16   ;;  %v1383_v16 = vld [vmem:[%s3790_s2 + $0xc8] sm:$0xff] }
  0xa5   : > { %1649 = vperm.xlu1 %2739, %v1405_v17   ;;  %1644 = vperm.xlu0 %2738, %v1404_v18  }
  0xa9   : > { %1153 = vperm.xlu1 %2739, %v917_v19   ;;  %1148 = vperm.xlu0 %2738, %v916_v20  }
  0xad   : > { %1419 = vperm.xlu1 %2739, %v1359_v21   ;;  %1414 = vperm.xlu0 %2738, %v1358_v22   ;;  %v1382_v22 = vld [vmem:[%s3790_s2 + $0xc0] sm:$0xff] }
  0xb1   : > { %1083 = vperm.xlu1 %2739, %v903_v23   ;;  %1078 = vperm.xlu0 %2738, %v902_v24   ;;  %v624_v24 = vld [vmem:[%s3281_s15 + $0x84] sm:$0xff] }
  0xb5   : > { %1639 = vperm.xlu1 %2739, %v1403_v25   ;;  %1634 = vperm.xlu0 %2738, %v1402_v26  }
  0xb9   : > { %1143 = vperm.xlu1 %2739, %v915_v27   ;;  %1138 = vperm.xlu0 %2738, %v914_v28  }
  0xbd   : > { %1569 = vperm.xlu1 %2739, %v1389_v29   ;;  %1564 = vperm.xlu0 %2738, %v1388_v30   ;;  %v622_v30 = vld [vmem:[%s3281_s15 + $0x78] sm:$0xff] }
  0xc1   : > { %1073 = vperm.xlu1 %2739, %v901_v31   ;;  %1068 = vperm.xlu0 %2738, %v900_v32  }
  0xc5   : > { %1629 = vperm.xlu1 %2739, %v1401_v33   ;;  %1624 = vperm.xlu0 %2738, %v1400_v34  }
  0xc9   : > { %1133 = vperm.xlu1 %2739, %v913_v35   ;;  %1128 = vperm.xlu0 %2738, %v912_v36   ;;  %v743_v36 = vunpack.c.l.bf16 %v624_v24 }
  0xcd   : > { %1559 = vperm.xlu1 %2739, %v1387_v37   ;;  %1554 = vperm.xlu0 %2738, %v1386_v38   ;;  %v744_v37 = vunpack.c.h.bf16 %v624_v24  ;;  %v895_v38 = vld [vmem:[%s3789_s1 + $0xb8] sm:$0xff] }
  0xd1   : > { %1063 = vperm.xlu1 %2739, %v899_v39   ;;  %1058 = vperm.xlu0 %2738, %v898_v40   ;;  %v740_v39 = vunpack.c.l.bf16 %v622_v30  ;;  %v894_v40 = vld [vmem:[%s3789_s1 + $0xb0] sm:$0xff] }
  0xd5   : > { %1619 = vperm.xlu1 %2739, %v1399_v41   ;;  %1614 = vperm.xlu0 %2738, %v1398_v42  }
  0xd9   : > { %1123 = vperm.xlu1 %2739, %v911_v43   ;;  %1118 = vperm.xlu0 %2738, %v910_v44  }
  0xdd   : > { %1549 = vperm.xlu1 %2739, %v1385_v45   ;;  %1544 = vperm.xlu0 %2738, %v1384_v46   ;;  %v741_v46 = vunpack.c.h.bf16 %v622_v30  ;;  %v1380_v30 = vld [vmem:[%s3790_s2 + $0xb0] sm:$0xff] }
  0xe0   : > { %v3291_v53 = vpop.permute.xlu1 %1484  ;;  %v3293_v54 = vpop.permute.xlu0 %998 }
  0xe1   : > { %1053 = vperm.xlu1 %2739, %v897_v48   ;;  %1048 = vperm.xlu0 %2738, %v896_v49   ;;  %v1239_v60 = vmul.f32 %v3293_v54, %v753_v52  ;;  %v1238_v62 = vmul.f32 %v3293_v54, %v752_v55 }
  0xe3   : > { %v1725_v7 = vadd.f32 %v3291_v53, %v1239_v60  ;;  %v1724_v15 = vadd.f32 %v3291_v53, %v1238_v62 }
  0xe4   : > { %v3304_v63 = vpop.permute.xlu1 %1489  ;;  %v3306_v0 = vpop.permute.xlu0 %1003 }
  0xe5   : > { %v1241_v2 = vmul.f32 %v3306_v0, %v755_v56  ;;  %1609 = vperm.xlu1 %2739, %v1397_v58   ;;  %1604 = vperm.xlu0 %2738, %v1396_v59   ;;  %v1242_v3 = vmul.f32 %v3306_v0, %v756_v57  ;;  %v1887_v17 = vmax.f32 %v1725_v7, 0.0  ;;  %v1886_v29 = vmax.f32 %v1724_v15, 0.0  ;;  %v1394_v57 = vld [vmem:[%s3790_s2 + $0x120] sm:$0xff]  ;;  %v620_v58 = vld [vmem:[%s3281_s15 + $0x6c] sm:$0xff]  ;;  %v621_v59 = vld [vmem:[%s3281_s15 + $0x68] ss:$12 sps:$4 sm:$0xff]  }
  0xe6   : > { %v738_v7 = vunpack.c.h.bf16 %v620_v58 }
  0xe7   : > { %v1728_v10 = vadd.f32 %v3304_v63, %v1242_v3  ;;  %v1727_v11 = vadd.f32 %v3304_v63, %v1241_v2 }
  0xe8   : > { %v3320_v12 = vpop.permute.xlu1 %993  ;;  %v3322_v13 = vpop.permute.xlu0 %988 }
  0xe9   : > { %1113 = vperm.xlu1 %2739, %v909_v5   ;;  %1108 = vperm.xlu0 %2738, %v908_v6   ;;  %v1890_v18 = vmax.f32 %v1728_v10, 0.0  ;;  %v1235_v19 = vmul.f32 %v3320_v12, %v749_v4  ;;  %v1236_v20 = vmul.f32 %v3320_v12, %v750_v8  ;;  %v1232_v21 = vmul.f32 %v3322_v13, %v746_v9  ;;  %v907_v10 = vld [vmem:[%s3789_s1 + $0x118] sm:$0xff] }
  0xea   : > { %v1889_v23 = vmax.f32 %v1727_v11, 0.0  ;;  %v1233_v25 = vmul.f32 %v3322_v13, %v747_v14  ;;  %v737_v6 = vunpack.c.l.bf16 %v620_v58  ;;  %v739_v8 = vunpack.c.h.bf16 %v621_v59  ;;  %v906_v11 = vld [vmem:[%s3789_s1 + $0x110] sm:$0xff] }
  0xeb   : > { %v2028_v28 = vpack.c.bf16 %v1890_v18, %v1887_v17  ;;  %v734_v9 = vunpack.c.l.bf16 %v618_v1 }
  0xec   : > { %v3336_v26 = vpop.permute.xlu1 %1479  ;;  %v3338_v27 = vpop.permute.xlu0 %1474  ;;  %v2027_v35 = vpack.c.bf16 %v1889_v23, %v1886_v29  ;;  %v1381_v23 = vld [vmem:[%s3790_s2 + $0xb8] sm:$0xff] }
  0xed   : > { %v1721_v31 = vadd.f32 %v3336_v26, %v1235_v19  ;;  %v1722_v32 = vadd.f32 %v3336_v26, %v1236_v20  ;;  %v1718_v33 = vadd.f32 %v3338_v27, %v1232_v21  ;;  %1539 = vperm.xlu1 %2739, %v1383_v16   ;;  %v1719_v34 = vadd.f32 %v3338_v27, %v1233_v25 }
  0xee   : > { %1534 = vperm.xlu0 %2738, %v1382_v22   ;;  %2124 = vmatprep.subr.bf16.mxu0 %v2028_v28  ;;  %v735_v19 = vunpack.c.h.bf16 %v618_v1  ;;  %v612_v1 = vld [vmem:[%s3281_s15 + $0x3c] sm:$0xff] }
  0xef   : > { %v1884_v41 = vmax.f32 %v1722_v32, 0.0  ;;  %v1880_v42 = vmax.f32 %v1718_v33, 0.0  ;;  %v1883_v43 = vmax.f32 %v1721_v31, 0.0  ;;  %2125 = vmatpush1.bf16.msra.mxu0 %v2027_v35  ;;  %v1881_v47 = vmax.f32 %v1719_v34, 0.0  ;;  %v616_v31 = vld [vmem:[%s3281_s15 + $0x54] sm:$0xff] }
  0xf0   : > { %v3351_v44 = vpop.permute.xlu1 %983  ;;  %v3353_v45 = vpop.permute.xlu0 %978  ;;  %v617_v32 = vld [vmem:[%s3281_s15 + $0x50] ss:$12 sps:$4 sm:$0xff]  }
  0xf1   : > { %1043 = vperm.xlu1 %2739, %v895_v38   ;;  %v2025_v48 = vpack.c.bf16 %v1884_v41, %v1881_v47  ;;  %v2024_v49 = vpack.c.bf16 %v1883_v43, %v1880_v42  ;;  %v1229_v52 = vmul.f32 %v3351_v44, %v743_v36  ;;  %v1230_v55 = vmul.f32 %v3351_v44, %v744_v37  ;;  %v614_v36 = vld [vmem:[%s3281_s15 + $0x48] sm:$0xff] }
  0xf2   : > { %1038 = vperm.xlu0 %2738, %v894_v40   ;;  %v1226_v56 = vmul.f32 %v3353_v45, %v740_v39  ;;  %v1227_v60 = vmul.f32 %v3353_v45, %v741_v46  ;;  %v731_v42 = vunpack.c.l.bf16 %v616_v31  ;;  %v732_v43 = vunpack.c.h.bf16 %v616_v31 }
  0xf3   : > { %2126 = vmatprep.subr.bf16.mxu0 %v2025_v48  ;;  %v733_v46 = vunpack.c.h.bf16 %v617_v32  ;;  %v729_v58 = vunpack.c.h.bf16 %v614_v36  ;;  %v730_v59 = vunpack.c.l.bf16 %v617_v32 }
  0xf4   : > { %v3367_v61 = vpop.permute.xlu1 %1469  ;;  %v3369_v62 = vpop.permute.xlu0 %1464  ;;  %2127 = vmatpush1.bf16.msra.mxu0 %v2024_v49  ;;  %v728_v49 = vunpack.c.l.bf16 %v614_v36  ;;  %v905_v36 = vld [vmem:[%s3789_s1 + $0x108] sm:$0xff] }
  0xf5   : > { %v1715_v2 = vadd.f32 %v3367_v61, %v1229_v52  ;;  %v1716_v3 = vadd.f32 %v3367_v61, %v1230_v55  ;;  %v1712_v4 = vadd.f32 %v3369_v62, %v1226_v56  ;;  %v1713_v5 = vadd.f32 %v3369_v62, %v1227_v60  ;;  %1599 = vperm.xlu1 %2739, %v1395_v51   ;;  %v893_v51 = vld [vmem:[%s3789_s1 + $0xa8] sm:$0xff]  ;;  %v892_v52 = vld [vmem:[%s3789_s1 + $0xa0] sm:$0xff] }
  0xf6   : > { %1594 = vperm.xlu0 %2738, %v1394_v57  }
  0xf7   : > { %v1878_v14 = vmax.f32 %v1716_v3, 0.0  ;;  %v1874_v15 = vmax.f32 %v1712_v4, 0.0  ;;  %v1877_v16 = vmax.f32 %v1715_v2, 0.0  ;;  %v1875_v20 = vmax.f32 %v1713_v5, 0.0  ;;  %v1393_v4 = vld [vmem:[%s3790_s2 + $0x118] sm:$0xff] }
  0xf8   : > { %v974_v17 = vpop.permute.xlu1 %973  ;;  %v3382_v18 = vpop.permute.xlu0 %968 }
  0xf9   : > { %v1223_v21 = vmul.f32 %v974_v17, %v737_v6  ;;  %1103 = vperm.xlu1 %2739, %v907_v10   ;;  %v2022_v22 = vpack.c.bf16 %v1878_v14, %v1875_v20  ;;  %v1224_v24 = vmul.f32 %v974_v17, %v738_v7  ;;  %v1225_v25 = vmul.f32 %v974_v17, %v739_v8  ;;  %v613_v10 = vld [vmem:[%s3281_s15 + $0x38] ss:$12 sps:$4 sm:$0xff]  }
  0xfa   : > { %1098 = vperm.xlu0 %2738, %v906_v11   ;;  %v1220_v28 = vmul.f32 %v3382_v18, %v734_v9  ;;  %v2021_v29 = vpack.c.bf16 %v1877_v16, %v1874_v15  ;;  %v1221_v33 = vmul.f32 %v3382_v18, %v735_v19  ;;  %v1392_v9 = vld [vmem:[%s3790_s2 + $0x110] sm:$0xff]  ;;  %v725_v19 = vunpack.c.l.bf16 %v612_v1 }
  0xfb   : > { %2128 = vmatprep.subr.bf16.mxu0 %v2022_v22  ;;  %v610_v11 = vld [vmem:[%s3281_s15 + $0x30] sm:$0xff]  ;;  %v726_v20 = vunpack.c.h.bf16 %v612_v1 }
  0xfc   : > { %v1460_v34 = vpop.permute.xlu1 %1459  ;;  %v3394_v35 = vpop.permute.xlu0 %1454  ;;  %2129 = vmatpush1.bf16.msra.mxu0 %v2021_v29  ;;  %v727_v29 = vunpack.c.h.bf16 %v613_v10 }
  0xfd   : > { %v1709_v37 = vadd.f32 %v1460_v34, %v1223_v21  ;;  %v1710_v38 = vadd.f32 %v1460_v34, %v1224_v24  ;;  %v3397_v39 = vadd.f32 %v1460_v34, %v1225_v25  ;;  %v1706_v40 = vadd.f32 %v3394_v35, %v1220_v28  ;;  %1529 = vperm.xlu1 %2739, %v1381_v23  }
  0xfe   : > { %v1707_v41 = vadd.f32 %v3394_v35, %v1221_v33  ;;  %1524 = vperm.xlu0 %2738, %v1380_v30   ;;  %v722_v30 = vunpack.c.l.bf16 %v610_v11 }
  0xff   : > { %v1871_v47 = vmax.f32 %v1709_v37, 0.0  ;;  %v1872_v48 = vmax.f32 %v1710_v38, 0.0  ;;  %v1868_v55 = vmax.f32 %v1706_v40, 0.0  ;;  %v904_v37 = vld [vmem:[%s3789_s1 + $0x100] sm:$0xff] }
 0x100   : > { %v964_v56 = vpop.permute.xlu1 %963  ;;  %v959_v57 = vpop.permute.xlu0 %958  ;;  %v1869_v60 = vmax.f32 %v1707_v41, 0.0 }
 0x101   : > { %v1217_v2 = vmul.f32 %v964_v56, %v731_v42  ;;  %1033 = vperm.xlu1 %2739, %v893_v51   ;;  %v1218_v5 = vmul.f32 %v964_v56, %v732_v43  ;;  %v1219_v6 = vmul.f32 %v964_v56, %v733_v46  ;;  %v1214_v7 = vmul.f32 %v959_v57, %v728_v49 }
 0x102   : > { %1028 = vperm.xlu0 %2738, %v892_v52   ;;  %v2019_v3 = vpack.c.bf16 %v1872_v48, %v1869_v60  ;;  %v2018_v8 = vpack.c.bf16 %v1871_v47, %v1868_v55  ;;  %v1215_v14 = vmul.f32 %v959_v57, %v729_v58  ;;  %v1216_v15 = vmul.f32 %v959_v57, %v730_v59  ;;  %v1379_v57 = vld [vmem:[%s3790_s2 + $0xa8] sm:$0xff] }
 0x103   : > { %v723_v43 = vunpack.c.h.bf16 %v610_v11  ;;  %v724_v46 = vunpack.c.l.bf16 %v613_v10 }
 0x104   : > { %2130 = vmatprep.subr.bf16.mxu0 %v2019_v3  ;;  %v1450_v16 = vpop.permute.xlu1 %1449  ;;  %v1445_v17 = vpop.permute.xlu0 %1444 }
 0x105   : > { %v1703_v21 = vadd.f32 %v1450_v16, %v1217_v2  ;;  %v1704_v22 = vadd.f32 %v1450_v16, %v1218_v5  ;;  %v1705_v23 = vadd.f32 %v1450_v16, %v1219_v6  ;;  %v1700_v24 = vadd.f32 %v1445_v17, %v1214_v7  ;;  %2131 = vmatpush1.bf16.msra.mxu0 %v2018_v8  ;;  %v1378_v2 = vld [vmem:[%s3790_s2 + $0xa0] sm:$0xff]  ;;  %v891_v16 = vld [vmem:[%s3789_s1 + $0x98] sm:$0xff] }
 0x106   : > { %v1701_v25 = vadd.f32 %v1445_v17, %v1215_v14  ;;  %v1702_v28 = vadd.f32 %v1445_v17, %v1216_v15  ;;  %1589 = vperm.xlu1 %2739, %v1393_v4   ;;  %1584 = vperm.xlu0 %2738, %v1392_v9   ;;  %v608_v15 = vld [vmem:[%s3281_s15 + $0x24] sm:$0xff] }
 0x107   : > { %v1865_v31 = vmax.f32 %v1703_v21, 0.0  ;;  %v1866_v32 = vmax.f32 %v1704_v22, 0.0  ;;  %v1867_v33 = vmax.f32 %v1705_v23, 0.0  ;;  %v1862_v34 = vmax.f32 %v1700_v24, 0.0  ;;  %v609_v21 = vld [vmem:[%s3281_s15 + $0x20] ss:$12 sps:$4 sm:$0xff]  }
 0x108   : > { %v1863_v38 = vmax.f32 %v1701_v25, 0.0  ;;  %v1864_v40 = vmax.f32 %v1702_v28, 0.0  ;;  %v954_v41 = vpop.permute.xlu1 %953  ;;  %v949_v42 = vpop.permute.xlu0 %948  ;;  %v606_v23 = vld [vmem:[%s3281_s15 + $0x18] sm:$0xff]  ;;  %v890_v24 = vld [vmem:[%s3789_s1 + $0x90] sm:$0xff]  ;;  %v719_v28 = vunpack.c.l.bf16 %v608_v15 }
 0x109   : > { %v1211_v48 = vmul.f32 %v954_v41, %v725_v19  ;;  %v1212_v49 = vmul.f32 %v954_v41, %v726_v20  ;;  %v1213_v51 = vmul.f32 %v954_v41, %v727_v29  ;;  %v1208_v52 = vmul.f32 %v949_v42, %v722_v30  ;;  %v1390_v41 = vld [vmem:[%s3790_s2 + $0x100] sm:$0xff] }
 0x10a   : > { %v3422_v47 = vpack.c.bf16 %v1867_v33, %v1864_v40  ;;  %1093 = vperm.xlu1 %2739, %v905_v36   ;;  %1088 = vperm.xlu0 %2738, %v904_v37   ;;  %v2016_v55 = vpack.c.bf16 %v1866_v32, %v1863_v38  ;;  %v2015_v56 = vpack.c.bf16 %v1865_v31, %v1862_v34  ;;  %v720_v30 = vunpack.c.h.bf16 %v608_v15  ;;  %v1391_v34 = vld [vmem:[%s3790_s2 + $0x108] sm:$0xff] }
 0x10b   : > { %v1209_v58 = vmul.f32 %v949_v42, %v723_v43  ;;  %v1210_v59 = vmul.f32 %v949_v42, %v724_v46  ;;  %v721_v31 = vunpack.c.h.bf16 %v609_v21  ;;  %v716_v32 = vunpack.c.l.bf16 %v606_v23  ;;  %v696_v42 = vld [vmem:[%s3281_s15 + $0x234] sm:$0xff]  ;;  %v697_v43 = vld [vmem:[%s3281_s15 + $0x230] ss:$12 sps:$4 sm:$0xff]  }
 0x10c   : > { %3800 = vst [vmem:[#allocation5_spill] sm:$0xff] %v3422_v47  ;;  %v1440_v60 = vpop.permute.xlu1 %1439  ;;  %v1435_v1 = vpop.permute.xlu0 %1434  ;;  %2132 = vmatprep.subr.bf16.mxu0 %v2016_v55  ;;  %v717_v36 = vunpack.c.h.bf16 %v606_v23  ;;  %v718_v37 = vunpack.c.l.bf16 %v609_v21  ;;  %v925_v55 = vld [vmem:[%s3789_s1 + $0x1a8] sm:$0xff] }
 0x10d   : > { %v1697_v3 = vadd.f32 %v1440_v60, %v1211_v48  ;;  %v1698_v4 = vadd.f32 %v1440_v60, %v1212_v49  ;;  %v1699_v5 = vadd.f32 %v1440_v60, %v1213_v51  ;;  %v1694_v6 = vadd.f32 %v1435_v1, %v1208_v52  ;;  %2133 = vmatpush1.bf16.msra.mxu0 %v2015_v56  ;;  %v694_v52 = vld [vmem:[%s3281_s15 + $0x228] sm:$0xff] }
 0x10e   : > { %v1695_v7 = vadd.f32 %v1435_v1, %v1209_v58  ;;  %v1696_v8 = vadd.f32 %v1435_v1, %v1210_v59  ;;  %1519 = vperm.xlu1 %2739, %v1379_v57   ;;  %1514 = vperm.xlu0 %2738, %v1378_v2   ;;  %v851_v58 = vunpack.c.l.bf16 %v696_v42  ;;  %v853_v59 = vunpack.c.h.bf16 %v697_v43  ;;  %v924_v2 = vld [vmem:[%s3789_s1 + $0x1a0] sm:$0xff] }
 0x10f   : > { %v1859_v9 = vmax.f32 %v1697_v3, 0.0  ;;  %v1860_v10 = vmax.f32 %v1698_v4, 0.0  ;;  %v1861_v11 = vmax.f32 %v1699_v5, 0.0  ;;  %v1856_v14 = vmax.f32 %v1694_v6, 0.0 }
 0x110   : > { %v1857_v17 = vmax.f32 %v1695_v7, 0.0  ;;  %v1858_v19 = vmax.f32 %v1696_v8, 0.0  ;;  %v944_v20 = vpop.permute.xlu1 %943  ;;  %v939_v22 = vpop.permute.xlu0 %938  ;;  %v848_v7 = vunpack.c.l.bf16 %v694_v52  ;;  %v850_v8 = vunpack.c.l.bf16 %v697_v43  ;;  %v889_v43 = vld [vmem:[%s3789_s1 + $0x88] sm:$0xff] }
 0x111   : > { %v2012_v33 = vpack.c.bf16 %v1859_v9, %v1856_v14  ;;  %v1205_v46 = vmul.f32 %v944_v20, %v719_v28  ;;  %v1206_v48 = vmul.f32 %v944_v20, %v720_v30  ;;  %v1207_v49 = vmul.f32 %v944_v20, %v721_v31  ;;  %v1376_v28 = vld [vmem:[%s3790_s2 + $0x90] sm:$0xff] }
 0x112   : > { %v3439_v25 = vpack.c.bf16 %v1861_v11, %v1858_v19  ;;  %1023 = vperm.xlu1 %2739, %v891_v16   ;;  %v2013_v29 = vpack.c.bf16 %v1860_v10, %v1857_v17  ;;  %1018 = vperm.xlu0 %2738, %v890_v24   ;;  %v1202_v51 = vmul.f32 %v939_v22, %v716_v32  ;;  %v1377_v17 = vld [vmem:[%s3790_s2 + $0x98] sm:$0xff]  ;;  %v852_v19 = vunpack.c.h.bf16 %v696_v42 }
 0x113   : > { %v1203_v56 = vmul.f32 %v939_v22, %v717_v36  ;;  %v1204_v57 = vmul.f32 %v939_v22, %v718_v37  ;;  %v849_v20 = vunpack.c.h.bf16 %v694_v52  ;;  %v605_v37 = vld [vmem:[%s3281_s15 + $0x8] ss:$12 sps:$4 sm:$0xff]  }
 0x114   : > { %3801 = vst [vmem:[#allocation6_spill] sm:$0xff] %v3439_v25  ;;  %2134 = vmatprep.subr.bf16.mxu0 %v2013_v29  ;;  %v1164_v38 = vpop.permute.xlu1 %1163  ;;  %v1159_v40 = vpop.permute.xlu0 %1158  ;;  %v604_v29 = vld [vmem:[%s3281_s15 + $0xc] sm:$0xff] }
 0x115   : > { %2135 = vmatpush1.bf16.msra.mxu0 %v2012_v33  ;;  %v1337_v30 = vmul.f32 %v1164_v38, %v851_v58  ;;  %v1339_v33 = vmul.f32 %v1164_v38, %v853_v59  ;;  %v1336_v36 = vmul.f32 %v1159_v40, %v850_v8 }
 0x116   : > { %1579 = vperm.xlu1 %2739, %v1391_v34   ;;  %1574 = vperm.xlu0 %2738, %v1390_v41   ;;  %v1334_v34 = vmul.f32 %v1159_v40, %v848_v7  ;;  %v602_v41 = vld [vmem:[%s3281_s15] sm:$0xff] }
 0x117   : > { %v711_v8 = vunpack.c.h.bf16 %v602_v41 }
 0x118   : > { %v1430_v60 = vpop.permute.xlu1 %1429  ;;  %v1425_v1 = vpop.permute.xlu0 %1424 }
 0x119   : > { %v1691_v3 = vadd.f32 %v1430_v60, %v1205_v46  ;;  %v1692_v4 = vadd.f32 %v1430_v60, %v1206_v48  ;;  %v1693_v5 = vadd.f32 %v1430_v60, %v1207_v49  ;;  %v1688_v6 = vadd.f32 %v1425_v1, %v1202_v51 }
 0x11a   : > { %v1689_v9 = vadd.f32 %v1425_v1, %v1203_v56  ;;  %v1690_v10 = vadd.f32 %v1425_v1, %v1204_v57  ;;  %1193 = vperm.xlu1 %2739, %v925_v55   ;;  %1188 = vperm.xlu0 %2738, %v924_v2   ;;  %v1338_v46 = vmul.f32 %v1164_v38, %v852_v19  ;;  %v713_v49 = vunpack.c.l.bf16 %v604_v29  ;;  %v888_v56 = vld [vmem:[%s3789_s1 + $0x80] sm:$0xff] }
 0x11b   : > { %v1853_v11 = vmax.f32 %v1691_v3, 0.0  ;;  %v1854_v14 = vmax.f32 %v1692_v4, 0.0  ;;  %v1855_v15 = vmax.f32 %v1693_v5, 0.0  ;;  %v1850_v16 = vmax.f32 %v1688_v6, 0.0  ;;  %v1411_v5 = vld [vmem:[%s3790_s2 + $0x1a8] sm:$0xff] }
 0x11c   : > { %v1851_v21 = vmax.f32 %v1689_v9, 0.0  ;;  %v1852_v22 = vmax.f32 %v1690_v10, 0.0  ;;  %v934_v23 = vpop.permute.xlu1 %933  ;;  %v929_v24 = vpop.permute.xlu0 %928  ;;  %v1335_v48 = vmul.f32 %v1159_v40, %v849_v20  ;;  %v714_v51 = vunpack.c.h.bf16 %v604_v29  ;;  %v692_v19 = vld [vmem:[%s3281_s15 + $0x21c] sm:$0xff] }
 0x11d   : > { %v2009_v42 = vpack.c.bf16 %v1853_v11, %v1850_v16  ;;  %v715_v1 = vunpack.c.h.bf16 %v605_v37  ;;  %v710_v2 = vunpack.c.l.bf16 %v602_v41  ;;  %v712_v9 = vunpack.c.l.bf16 %v605_v37 }
 0x11e   : > { %v3463_v31 = vpack.c.bf16 %v1855_v15, %v1852_v22  ;;  %1509 = vperm.xlu1 %2739, %v1377_v17   ;;  %v2010_v32 = vpack.c.bf16 %v1854_v14, %v1851_v21  ;;  %1504 = vperm.xlu0 %2738, %v1376_v28   ;;  %v1410_v14 = vld [vmem:[%s3790_s2 + $0x1a0] sm:$0xff]  ;;  %v1199_v20 = vmul.f32 %v934_v23, %v713_v49  ;;  %v845_v41 = vunpack.c.l.bf16 %v692_v19 }
 0x11f   : > { %v1200_v22 = vmul.f32 %v934_v23, %v714_v51  ;;  %v1201_v28 = vmul.f32 %v934_v23, %v715_v1  ;;  %v1196_v29 = vmul.f32 %v929_v24, %v710_v2  ;;  %v1198_v37 = vmul.f32 %v929_v24, %v712_v9  ;;  %v922_v23 = vld [vmem:[%s3789_s1 + $0x190] sm:$0xff]  ;;  %v1375_v2 = vld [vmem:[%s3790_s2 + $0x88] sm:$0xff] }
 0x120   : > { %3802 = vst [vmem:[#allocation7_spill] sm:$0xff] %v3463_v31  ;;  %2136 = vmatprep.subr.bf16.mxu0 %v2010_v32  ;;  %v1650_v52 = vpop.permute.xlu1 %1649  ;;  %v1645_v55 = vpop.permute.xlu0 %1644  ;;  %v690_v32 = vld [vmem:[%s3281_s15 + $0x210] sm:$0xff] }
 0x121   : > { %v1823_v57 = vadd.f32 %v1650_v52, %v1337_v30  ;;  %v1825_v58 = vadd.f32 %v1650_v52, %v1339_v33  ;;  %v1820_v59 = vadd.f32 %v1645_v55, %v1334_v34  ;;  %v1822_v60 = vadd.f32 %v1645_v55, %v1336_v36  ;;  %2137 = vmatpush1.bf16.msra.mxu0 %v2009_v42  ;;  %v693_v30 = vld [vmem:[%s3281_s15 + $0x218] ss:$12 sps:$4 sm:$0xff]  }
 0x122   : > { %1013 = vperm.xlu1 %2739, %v889_v43   ;;  %v1821_v3 = vadd.f32 %v1645_v55, %v1335_v48  ;;  %v1824_v38 = vadd.f32 %v1650_v52, %v1338_v46  ;;  %1008 = vperm.xlu0 %2738, %v888_v56   ;;  %v923_v34 = vld [vmem:[%s3789_s1 + $0x198] sm:$0xff]  ;;  %v1197_v36 = vmul.f32 %v929_v24, %v711_v8  ;;  %v846_v42 = vunpack.c.h.bf16 %v692_v19 }
 0x123   : > { %v1987_v40 = vmax.f32 %v1825_v58, 0.0  ;;  %v1984_v4 = vmax.f32 %v1822_v60, 0.0  ;;  %v1982_v6 = vmax.f32 %v1820_v59, 0.0  ;;  %v1985_v7 = vmax.f32 %v1823_v57, 0.0  ;;  %v664_v8 = vld [vmem:[%s3281_s15 + $0x174] sm:$0xff] }
 0x124   : > { %v1154_v10 = vpop.permute.xlu1 %1153  ;;  %v1149_v11 = vpop.permute.xlu0 %1148  ;;  %v1983_v15 = vmax.f32 %v1821_v3, 0.0  ;;  %v1986_v16 = vmax.f32 %v1824_v38, 0.0  ;;  %v847_v55 = vunpack.c.h.bf16 %v693_v30  ;;  %v842_v56 = vunpack.c.l.bf16 %v690_v32 }
 0x125   : > { %v3479_v17 = vpack.c.bf16 %v1987_v40, %v1984_v4  ;;  %v2075_v33 = vpack.c.bf16 %v1985_v7, %v1982_v6  ;;  %v843_v3 = vunpack.c.h.bf16 %v690_v32  ;;  %v844_v38 = vunpack.c.l.bf16 %v693_v30  ;;  %v1374_v7 = vld [vmem:[%s3790_s2 + $0x80] sm:$0xff] }
 0x126   : > { %1679 = vperm.xlu1 %2739, %v1411_v5   ;;  %v2076_v21 = vpack.c.bf16 %v1986_v16, %v1983_v15  ;;  %1674 = vperm.xlu0 %2738, %v1410_v14   ;;  %v1331_v9 = vmul.f32 %v1154_v10, %v845_v41  ;;  %v1332_v16 = vmul.f32 %v1154_v10, %v846_v42 }
 0x127   : > { %v1333_v19 = vmul.f32 %v1154_v10, %v847_v55  ;;  %v1329_v30 = vmul.f32 %v1149_v11, %v843_v3  ;;  %v1330_v32 = vmul.f32 %v1149_v11, %v844_v38  ;;  %v1408_v10 = vld [vmem:[%s3790_s2 + $0x190] sm:$0xff]  ;;  %v920_v3 = vld [vmem:[%s3789_s1 + $0x180] sm:$0xff] }
 0x128   : > { %2167 = vmatprep.subr.bf16.mxu1 %v2076_v21  ;;  %v1420_v43 = vpop.permute.xlu1 %1419  ;;  %v1415_v46 = vpop.permute.xlu0 %1414  ;;  %v665_v21 = vld [vmem:[%s3281_s15 + $0x170] ss:$12 sps:$4 sm:$0xff]  }
 0x129   : > { %v1685_v48 = vadd.f32 %v1420_v43, %v1199_v20  ;;  %v1686_v49 = vadd.f32 %v1420_v43, %v1200_v22  ;;  %v1687_v51 = vadd.f32 %v1420_v43, %v1201_v28  ;;  %v1682_v52 = vadd.f32 %v1415_v46, %v1196_v29  ;;  %2168 = vmatpush1.bf16.msra.mxu1 %v2075_v33  ;;  %v662_v22 = vld [vmem:[%s3281_s15 + $0x168] sm:$0xff]  ;;  %v1409_v29 = vld [vmem:[%s3790_s2 + $0x198] sm:$0xff] }
 0x12a   : > { %v1683_v57 = vadd.f32 %v1415_v46, %v1197_v36  ;;  %v1684_v58 = vadd.f32 %v1415_v46, %v1198_v37  ;;  %1183 = vperm.xlu1 %2739, %v923_v34   ;;  %1178 = vperm.xlu0 %2738, %v922_v23   ;;  %v1328_v20 = vmul.f32 %v1149_v11, %v842_v56  ;;  %v803_v33 = vunpack.c.l.bf16 %v664_v8  ;;  %v2742_v38 = vld [vmem:[%s3791_s3 + $0x4] ss:$16 sps:$4 sm:$0xff]  }
 0x12b   : > { %v1847_v24 = vmax.f32 %v1685_v48, 0.0  ;;  %v1848_v59 = vmax.f32 %v1686_v49, 0.0  ;;  %v1849_v60 = vmax.f32 %v1687_v51, 0.0  ;;  %v1844_v1 = vmax.f32 %v1682_v52, 0.0  ;;  %2156 = vmatprep.mubr.bf16.mxu0 %v2742_v38 }
 0x12c   : > { %v1845_v40 = vmax.f32 %v1683_v57, 0.0  ;;  %v1846_v4 = vmax.f32 %v1684_v58, 0.0  ;;  %v1084_v5 = vpop.permute.xlu1 %1083  ;;  %v1079_v6 = vpop.permute.xlu0 %1078  ;;  %v804_v34 = vunpack.c.h.bf16 %v664_v8  ;;  %v805_v23 = vunpack.c.h.bf16 %v665_v21  ;;  %v921_v57 = vld [vmem:[%s3789_s1 + $0x188] sm:$0xff] }
 0x12d   : > { %v2006_v28 = vpack.c.bf16 %v1847_v24, %v1844_v1  ;;  %v800_v48 = vunpack.c.l.bf16 %v662_v22  ;;  %v801_v58 = vunpack.c.h.bf16 %v662_v22  ;;  %v802_v24 = vunpack.c.l.bf16 %v665_v21  ;;  %v1407_v22 = vld [vmem:[%s3790_s2 + $0x188] sm:$0xff] }
 0x12e   : > { %v3497_v14 = vpack.c.bf16 %v1849_v60, %v1846_v4  ;;  %1499 = vperm.xlu1 %2739, %v1375_v2   ;;  %v2007_v15 = vpack.c.bf16 %v1848_v59, %v1845_v40  ;;  %1494 = vperm.xlu0 %2738, %v1374_v7   ;;  %v688_v40 = vld [vmem:[%s3281_s15 + $0x204] sm:$0xff]  ;;  %v1289_v4 = vmul.f32 %v1084_v5, %v803_v33 }
 0x12f   : > { %v1290_v7 = vmul.f32 %v1084_v5, %v804_v34 }
 0x130   : > { %3803 = vst [vmem:[#allocation8_spill] sm:$0xff] %v3497_v14  ;;  %2138 = vmatprep.subr.bf16.mxu0 %v2007_v15  ;;  %v1640_v36 = vpop.permute.xlu1 %1639  ;;  %v1635_v37 = vpop.permute.xlu0 %1634  ;;  %v1291_v15 = vmul.f32 %v1084_v5, %v805_v23  ;;  %v1406_v5 = vld [vmem:[%s3790_s2 + $0x180] sm:$0xff] }
 0x131   : > { %v1817_v41 = vadd.f32 %v1640_v36, %v1331_v9  ;;  %v1818_v42 = vadd.f32 %v1640_v36, %v1332_v16  ;;  %v1819_v43 = vadd.f32 %v1640_v36, %v1333_v19  ;;  %v1814_v46 = vadd.f32 %v1635_v37, %v1328_v20  ;;  %2139 = vmatpush1.bf16.msra.mxu0 %v2006_v28  ;;  %v689_v19 = vld [vmem:[%s3281_s15 + $0x200] ss:$12 sps:$4 sm:$0xff]   ;;  %v686_v20 = vld [vmem:[%s3281_s15 + $0x1f8] sm:$0xff] }
 0x132   : > { %v1815_v49 = vadd.f32 %v1635_v37, %v1329_v30  ;;  %v1816_v51 = vadd.f32 %v1635_v37, %v1330_v32  ;;  %1669 = vperm.xlu1 %2739, %v1409_v29   ;;  %1664 = vperm.xlu0 %2738, %v1408_v10   ;;  %v1286_v16 = vmul.f32 %v1079_v6, %v800_v48  ;;  %v839_v30 = vunpack.c.l.bf16 %v688_v40 }
 0x133   : > { %v1979_v11 = vmax.f32 %v1817_v41, 0.0  ;;  %v1980_v52 = vmax.f32 %v1818_v42, 0.0  ;;  %v1981_v55 = vmax.f32 %v1819_v43, 0.0  ;;  %v1976_v56 = vmax.f32 %v1814_v46, 0.0 }
 0x134   : > { %v1977_v59 = vmax.f32 %v1815_v49, 0.0  ;;  %v1978_v60 = vmax.f32 %v1816_v51, 0.0  ;;  %v1144_v1 = vpop.permute.xlu1 %1143  ;;  %v1139_v2 = vpop.permute.xlu0 %1138  ;;  %v1287_v28 = vmul.f32 %v1079_v6, %v801_v58  ;;  %v1288_v29 = vmul.f32 %v1079_v6, %v802_v24  ;;  %v660_v24 = vld [vmem:[%s3281_s15 + $0x15c] sm:$0xff] }
 0x135   : > { %v2072_v21 = vpack.c.bf16 %v1979_v11, %v1976_v56  ;;  %v840_v32 = vunpack.c.h.bf16 %v688_v40  ;;  %v841_v42 = vunpack.c.h.bf16 %v689_v19  ;;  %v836_v43 = vunpack.c.l.bf16 %v686_v20 }
 0x136   : > { %v3517_v8 = vpack.c.bf16 %v1981_v55, %v1978_v60  ;;  %1173 = vperm.xlu1 %2739, %v921_v57   ;;  %v2073_v9 = vpack.c.bf16 %v1980_v52, %v1977_v59  ;;  %1168 = vperm.xlu0 %2738, %v920_v3   ;;  %v837_v11 = vunpack.c.h.bf16 %v686_v20  ;;  %v838_v52 = vunpack.c.l.bf16 %v689_v19 }
 0x137   : > { %v1325_v59 = vmul.f32 %v1144_v1, %v839_v30  ;;  %v1326_v60 = vmul.f32 %v1144_v1, %v840_v32  ;;  %v1327_v40 = vmul.f32 %v1144_v1, %v841_v42 }
 0x138   : > { %2169 = vmatprep.subr.bf16.mxu1 %v2073_v9  ;;  %v1570_v33 = vpop.permute.xlu1 %1569  ;;  %v1565_v34 = vpop.permute.xlu0 %1564  ;;  %v658_v9 = vld [vmem:[%s3281_s15 + $0x150] sm:$0xff]  ;;  %v1323_v19 = vmul.f32 %v1139_v2, %v837_v11  ;;  %v1324_v20 = vmul.f32 %v1139_v2, %v838_v52 }
 0x139   : > { %v1775_v36 = vadd.f32 %v1570_v33, %v1289_v4  ;;  %v1776_v37 = vadd.f32 %v1570_v33, %v1290_v7  ;;  %v1777_v10 = vadd.f32 %v1570_v33, %v1291_v15  ;;  %v1772_v41 = vadd.f32 %v1565_v34, %v1286_v16  ;;  %2170 = vmatpush1.bf16.msra.mxu1 %v2072_v21  ;;  %v661_v7 = vld [vmem:[%s3281_s15 + $0x158] ss:$12 sps:$4 sm:$0xff]  }
 0x13a   : > { %v1773_v46 = vadd.f32 %v1565_v34, %v1287_v28  ;;  %v1774_v23 = vadd.f32 %v1565_v34, %v1288_v29  ;;  %1659 = vperm.xlu1 %2739, %v1407_v22   ;;  %1654 = vperm.xlu0 %2738, %v1406_v5   ;;  %v1322_v4 = vmul.f32 %v1139_v2, %v836_v43  ;;  %v2745_v16 = vld [vmem:[%s3791_s3 + $0xc] ss:$16 sps:$4 sm:$0xff]   ;;  %v797_v21 = vunpack.c.l.bf16 %v660_v24 }
 0x13b   : > { %v1937_v6 = vmax.f32 %v1775_v36, 0.0  ;;  %v1938_v48 = vmax.f32 %v1776_v37, 0.0  ;;  %v1939_v49 = vmax.f32 %v1777_v10, 0.0  ;;  %v1934_v51 = vmax.f32 %v1772_v41, 0.0  ;;  %2665 = vmatprep.mubr.msk.bf16.mxu1 %vm2120_vm0, %v2745_v16 }
 0x13c   : > { %v1935_v55 = vmax.f32 %v1773_v46, 0.0  ;;  %v1936_v56 = vmax.f32 %v1774_v23, 0.0  ;;  %v1074_v57 = vpop.permute.xlu1 %1073  ;;  %v1069_v58 = vpop.permute.xlu0 %1068  ;;  %v798_v22 = vunpack.c.h.bf16 %v660_v24  ;;  %v799_v34 = vunpack.c.h.bf16 %v661_v7 }
 0x13d   : > { %v2051_v38 = vpack.c.bf16 %v1937_v6, %v1934_v51  ;;  %v794_v5 = vunpack.c.l.bf16 %v658_v9  ;;  %v795_v43 = vunpack.c.h.bf16 %v658_v9  ;;  %v796_v46 = vunpack.c.l.bf16 %v661_v7  ;;  %v684_v51 = vld [vmem:[%s3281_s15 + $0x1ec] sm:$0xff] }
 0x13e   : > { %v2052_v3 = vpack.c.bf16 %v1938_v48, %v1935_v55  ;;  %v3530_v15 = vpack.c.bf16 %v1939_v49, %v1936_v56  ;;  %v1283_v11 = vmul.f32 %v1074_v57, %v797_v21  ;;  %v1284_v56 = vmul.f32 %v1074_v57, %v798_v22 }
 0x13f   : > { %v1285_v24 = vmul.f32 %v1074_v57, %v799_v34  ;;  %v833_v16 = vunpack.c.l.bf16 %v684_v51  ;;  %v834_v9 = vunpack.c.h.bf16 %v684_v51 }
 0x140   : > { %2140 = vmatprep.subr.bf16.mxu0 %v2052_v3  ;;  %v1630_v28 = vpop.permute.xlu1 %1629  ;;  %v1625_v29 = vpop.permute.xlu0 %1624  ;;  %v682_v3 = vld [vmem:[%s3281_s15 + $0x1e0] sm:$0xff] }
 0x141   : > { %v1811_v30 = vadd.f32 %v1630_v28, %v1325_v59  ;;  %v1812_v32 = vadd.f32 %v1630_v28, %v1326_v60  ;;  %v1813_v1 = vadd.f32 %v1630_v28, %v1327_v40  ;;  %v1808_v33 = vadd.f32 %v1625_v29, %v1322_v4  ;;  %2141 = vmatpush2.bf16.msra.mxu0 %v2051_v38  ;;  %v685_v60 = vld [vmem:[%s3281_s15 + $0x1e8] ss:$12 sps:$4 sm:$0xff]  }
 0x142   : > { %v1809_v36 = vadd.f32 %v1625_v29, %v1323_v19  ;;  %v1810_v37 = vadd.f32 %v1625_v29, %v1324_v20  ;;  %v1280_v59 = vmul.f32 %v1069_v58, %v794_v5  ;;  %v1281_v40 = vmul.f32 %v1069_v58, %v795_v43 }
 0x143   : > { %v1973_v10 = vmax.f32 %v1811_v30, 0.0  ;;  %v1974_v41 = vmax.f32 %v1812_v32, 0.0  ;;  %v1975_v2 = vmax.f32 %v1813_v1, 0.0  ;;  %v1970_v42 = vmax.f32 %v1808_v33, 0.0 }
 0x144   : > { %v1971_v23 = vmax.f32 %v1809_v36, 0.0  ;;  %v1972_v6 = vmax.f32 %v1810_v37, 0.0  ;;  %v1134_v48 = vpop.permute.xlu1 %1133  ;;  %v1129_v49 = vpop.permute.xlu0 %1128  ;;  %v1282_v4 = vmul.f32 %v1069_v58, %v796_v46  ;;  %v835_v30 = vunpack.c.h.bf16 %v685_v60 }
 0x145   : > { %v2069_v38 = vpack.c.bf16 %v1973_v10, %v1970_v42  ;;  %v830_v22 = vunpack.c.l.bf16 %v682_v3  ;;  %v831_v5 = vunpack.c.h.bf16 %v682_v3  ;;  %v832_v36 = vunpack.c.l.bf16 %v685_v60  ;;  %v656_v42 = vld [vmem:[%s3281_s15 + $0x144] sm:$0xff] }
 0x146   : > { %v3537_v52 = vpack.c.bf16 %v1975_v2, %v1972_v6  ;;  %v2070_v55 = vpack.c.bf16 %v1974_v41, %v1971_v23  ;;  %v1319_v43 = vmul.f32 %v1134_v48, %v833_v16  ;;  %v1320_v6 = vmul.f32 %v1134_v48, %v834_v9 }
 0x147   : > { %v1321_v51 = vmul.f32 %v1134_v48, %v835_v30  ;;  %v792_v3 = vunpack.c.h.bf16 %v656_v42 }
 0x148   : > { %2171 = vmatprep.subr.bf16.mxu1 %v2070_v55  ;;  %v1560_v7 = vpop.permute.xlu1 %1559  ;;  %v1555_v19 = vpop.permute.xlu0 %1554  ;;  %v657_v55 = vld [vmem:[%s3281_s15 + $0x140] ss:$12 sps:$4 sm:$0xff]  }
 0x149   : > { %v1769_v20 = vadd.f32 %v1560_v7, %v1283_v11  ;;  %v1770_v28 = vadd.f32 %v1560_v7, %v1284_v56  ;;  %v1771_v29 = vadd.f32 %v1560_v7, %v1285_v24  ;;  %v1766_v21 = vadd.f32 %v1555_v19, %v1280_v59  ;;  %2172 = vmatpush1.bf16.msra.mxu1 %v2069_v38  ;;  %v654_v56 = vld [vmem:[%s3281_s15 + $0x138] sm:$0xff] }
 0x14a   : > { %v1767_v57 = vadd.f32 %v1555_v19, %v1281_v40  ;;  %v1768_v32 = vadd.f32 %v1555_v19, %v1282_v4  ;;  %v1316_v11 = vmul.f32 %v1129_v49, %v830_v22  ;;  %v1317_v59 = vmul.f32 %v1129_v49, %v831_v5  ;;  %v680_v5 = vld [vmem:[%s3281_s15 + $0x1d4] sm:$0xff] }
 0x14b   : > { %v1931_v1 = vmax.f32 %v1769_v20, 0.0  ;;  %v1932_v33 = vmax.f32 %v1770_v28, 0.0  ;;  %v1933_v34 = vmax.f32 %v1771_v29, 0.0  ;;  %v1928_v58 = vmax.f32 %v1766_v21, 0.0 }
 0x14c   : > { %v1929_v37 = vmax.f32 %v1767_v57, 0.0  ;;  %v1930_v10 = vmax.f32 %v1768_v32, 0.0  ;;  %v1064_v41 = vpop.permute.xlu1 %1063  ;;  %v1059_v2 = vpop.permute.xlu0 %1058  ;;  %v1318_v38 = vmul.f32 %v1129_v49, %v832_v36  ;;  %v791_v40 = vunpack.c.l.bf16 %v656_v42 }
 0x14d   : > { %v2048_v23 = vpack.c.bf16 %v1931_v1, %v1928_v58  ;;  %v793_v9 = vunpack.c.h.bf16 %v657_v55  ;;  %v788_v48 = vunpack.c.l.bf16 %v654_v56  ;;  %v789_v57 = vunpack.c.h.bf16 %v654_v56 }
 0x14e   : > { %v2049_v46 = vpack.c.bf16 %v1932_v33, %v1929_v37  ;;  %v3544_v24 = vpack.c.bf16 %v1933_v34, %v1930_v10  ;;  %v790_v32 = vunpack.c.l.bf16 %v657_v55  ;;  %v1277_v36 = vmul.f32 %v1064_v41, %v791_v40 }
 0x14f   : > { %v1278_v42 = vmul.f32 %v1064_v41, %v792_v3  ;;  %v828_v56 = vunpack.c.h.bf16 %v680_v5 }
 0x150   : > { %2142 = vmatprep.subr.bf16.mxu0 %v2049_v46  ;;  %v1620_v60 = vpop.permute.xlu1 %1619  ;;  %v1615_v4 = vpop.permute.xlu0 %1614  ;;  %v1274_v46 = vmul.f32 %v1059_v2, %v788_v48 }
 0x151   : > { %v1805_v7 = vadd.f32 %v1620_v60, %v1319_v43  ;;  %v1806_v19 = vadd.f32 %v1620_v60, %v1320_v6  ;;  %v1807_v20 = vadd.f32 %v1620_v60, %v1321_v51  ;;  %v1802_v16 = vadd.f32 %v1615_v4, %v1316_v11  ;;  %2143 = vmatpush2.bf16.msra.mxu0 %v2048_v23  ;;  %v681_v23 = vld [vmem:[%s3281_s15 + $0x1d0] ss:$12 sps:$4 sm:$0xff]   ;;  %v678_v6 = vld [vmem:[%s3281_s15 + $0x1c8] sm:$0xff] }
 0x152   : > { %v1803_v28 = vadd.f32 %v1615_v4, %v1317_v59  ;;  %v1804_v29 = vadd.f32 %v1615_v4, %v1318_v38  ;;  %v1279_v43 = vmul.f32 %v1064_v41, %v793_v9  ;;  %v1275_v11 = vmul.f32 %v1059_v2, %v789_v57 }
 0x153   : > { %v1967_v21 = vmax.f32 %v1805_v7, 0.0  ;;  %v1968_v30 = vmax.f32 %v1806_v19, 0.0  ;;  %v1969_v22 = vmax.f32 %v1807_v20, 0.0  ;;  %v1964_v49 = vmax.f32 %v1802_v16, 0.0 }
 0x154   : > { %v1965_v1 = vmax.f32 %v1803_v28, 0.0  ;;  %v1966_v33 = vmax.f32 %v1804_v29, 0.0  ;;  %v1124_v34 = vpop.permute.xlu1 %1123  ;;  %v1119_v58 = vpop.permute.xlu0 %1118  ;;  %v1276_v59 = vmul.f32 %v1059_v2, %v790_v32  ;;  %v827_v38 = vunpack.c.l.bf16 %v680_v5  ;;  %v652_v32 = vld [vmem:[%s3281_s15 + $0x12c] sm:$0xff] }
 0x155   : > { %v2066_v51 = vpack.c.bf16 %v1967_v21, %v1964_v49  ;;  %v829_v20 = vunpack.c.h.bf16 %v681_v23  ;;  %v824_v3 = vunpack.c.l.bf16 %v678_v6  ;;  %v825_v29 = vunpack.c.h.bf16 %v678_v6 }
 0x156   : > { %v3547_v37 = vpack.c.bf16 %v1969_v22, %v1966_v33  ;;  %v2067_v10 = vpack.c.bf16 %v1968_v30, %v1965_v1  ;;  %v826_v21 = vunpack.c.l.bf16 %v681_v23  ;;  %v1313_v1 = vmul.f32 %v1124_v34, %v827_v38 }
 0x157   : > { %v786_v6 = vunpack.c.h.bf16 %v652_v32 }
 0x158   : > { %2173 = vmatprep.subr.bf16.mxu1 %v2067_v10  ;;  %v1550_v55 = vpop.permute.xlu1 %1549  ;;  %v1545_v60 = vpop.permute.xlu0 %1544  ;;  %v1315_v10 = vmul.f32 %v1124_v34, %v829_v20 }
 0x159   : > { %v1763_v4 = vadd.f32 %v1550_v55, %v1277_v36  ;;  %v1764_v7 = vadd.f32 %v1550_v55, %v1278_v42  ;;  %v1765_v19 = vadd.f32 %v1550_v55, %v1279_v43  ;;  %v1760_v40 = vadd.f32 %v1545_v60, %v1274_v46  ;;  %2174 = vmatpush1.bf16.msra.mxu1 %v2066_v51  ;;  %v653_v43 = vld [vmem:[%s3281_s15 + $0x128] ss:$12 sps:$4 sm:$0xff]  }
 0x15a   : > { %v1761_v41 = vadd.f32 %v1545_v60, %v1275_v11  ;;  %v1762_v16 = vadd.f32 %v1545_v60, %v1276_v59  ;;  %v1314_v36 = vmul.f32 %v1124_v34, %v828_v56  ;;  %v1310_v42 = vmul.f32 %v1119_v58, %v824_v3  ;;  %v650_v60 = vld [vmem:[%s3281_s15 + $0x120] sm:$0xff] }
 0x15b   : > { %v1925_v9 = vmax.f32 %v1763_v4, 0.0  ;;  %v1926_v48 = vmax.f32 %v1764_v7, 0.0  ;;  %v1927_v28 = vmax.f32 %v1765_v19, 0.0  ;;  %v1922_v2 = vmax.f32 %v1760_v40, 0.0 }
 0x15c   : > { %v1923_v30 = vmax.f32 %v1761_v41, 0.0  ;;  %v1924_v22 = vmax.f32 %v1762_v16, 0.0  ;;  %v1054_v49 = vpop.permute.xlu1 %1053  ;;  %v1049_v57 = vpop.permute.xlu0 %1048  ;;  %v1311_v51 = vmul.f32 %v1119_v58, %v825_v29  ;;  %v1312_v11 = vmul.f32 %v1119_v58, %v826_v21 }
 0x15d   : > { %v2045_v5 = vpack.c.bf16 %v1925_v9, %v1922_v2  ;;  %v785_v59 = vunpack.c.l.bf16 %v652_v32  ;;  %v787_v56 = vunpack.c.h.bf16 %v653_v43  ;;  %v784_v34 = vunpack.c.l.bf16 %v653_v43 }
 0x15e   : > { %v2046_v33 = vpack.c.bf16 %v1926_v48, %v1923_v30  ;;  %v3553_v46 = vpack.c.bf16 %v1927_v28, %v1924_v22  ;;  %v782_v9 = vunpack.c.l.bf16 %v650_v60  ;;  %v783_v48 = vunpack.c.h.bf16 %v650_v60  ;;  %v676_v22 = vld [vmem:[%s3281_s15 + $0x1bc] sm:$0xff] }
 0x15f   : > { %v1270_v43 = vmul.f32 %v1049_v57, %v784_v34 }
 0x160   : > { %2144 = vmatprep.subr.bf16.mxu0 %v2046_v33  ;;  %v1610_v23 = vpop.permute.xlu1 %1609  ;;  %v1605_v55 = vpop.permute.xlu0 %1604  ;;  %v1272_v33 = vmul.f32 %v1054_v49, %v786_v6 }
 0x161   : > { %v1799_v4 = vadd.f32 %v1610_v23, %v1313_v1  ;;  %v1800_v7 = vadd.f32 %v1610_v23, %v1314_v36  ;;  %v1801_v19 = vadd.f32 %v1610_v23, %v1315_v10  ;;  %v1796_v38 = vadd.f32 %v1605_v55, %v1310_v42  ;;  %2145 = vmatpush2.bf16.msra.mxu0 %v2045_v5 }
 0x162   : > { %v1797_v40 = vadd.f32 %v1605_v55, %v1311_v51  ;;  %v1798_v20 = vadd.f32 %v1605_v55, %v1312_v11  ;;  %v1271_v1 = vmul.f32 %v1054_v49, %v785_v59  ;;  %v1273_v5 = vmul.f32 %v1054_v49, %v787_v56  ;;  %v677_v51 = vld [vmem:[%s3281_s15 + $0x1b8] ss:$12 sps:$4 sm:$0xff]   ;;  %v674_v55 = vld [vmem:[%s3281_s15 + $0x1b0] sm:$0xff] }
 0x163   : > { %v1961_v3 = vmax.f32 %v1799_v4, 0.0  ;;  %v1962_v41 = vmax.f32 %v1800_v7, 0.0  ;;  %v1963_v16 = vmax.f32 %v1801_v19, 0.0  ;;  %v1958_v58 = vmax.f32 %v1796_v38, 0.0 }
 0x164   : > { %v1959_v28 = vmax.f32 %v1797_v40, 0.0  ;;  %v1960_v2 = vmax.f32 %v1798_v20, 0.0  ;;  %v1114_v29 = vpop.permute.xlu1 %1113  ;;  %v1109_v21 = vpop.permute.xlu0 %1108  ;;  %v1268_v10 = vmul.f32 %v1049_v57, %v782_v9  ;;  %v1269_v42 = vmul.f32 %v1049_v57, %v783_v48 }
 0x165   : > { %v2063_v36 = vpack.c.bf16 %v1961_v3, %v1958_v58  ;;  %v821_v23 = vunpack.c.l.bf16 %v676_v22  ;;  %v822_v38 = vunpack.c.h.bf16 %v676_v22  ;;  %v823_v49 = vunpack.c.h.bf16 %v677_v51 }
 0x166   : > { %v3556_v30 = vpack.c.bf16 %v1963_v16, %v1960_v2  ;;  %v2064_v32 = vpack.c.bf16 %v1962_v41, %v1959_v28  ;;  %v818_v57 = vunpack.c.l.bf16 %v674_v55  ;;  %v819_v9 = vunpack.c.h.bf16 %v674_v55  ;;  %v648_v2 = vld [vmem:[%s3281_s15 + $0x114] sm:$0xff] }
 0x167   : > { %v820_v48 = vunpack.c.l.bf16 %v677_v51 }
 0x168   : > { %2175 = vmatprep.subr.bf16.mxu1 %v2064_v32  ;;  %v1540_v11 = vpop.permute.xlu1 %1539 }
 0x169   : > { %v1757_v60 = vadd.f32 %v1540_v11, %v1271_v1  ;;  %v1758_v4 = vadd.f32 %v1540_v11, %v1272_v33  ;;  %v1759_v7 = vadd.f32 %v1540_v11, %v1273_v5  ;;  %v1535_v19 = vpop.permute.xlu0 %1534  ;;  %2176 = vmatpush1.bf16.msra.mxu1 %v2063_v36  ;;  %v1307_v33 = vmul.f32 %v1114_v29, %v821_v23 }
 0x16a   : > { %v1754_v40 = vadd.f32 %v1535_v19, %v1268_v10  ;;  %v1755_v59 = vadd.f32 %v1535_v19, %v1269_v42  ;;  %v1756_v6 = vadd.f32 %v1535_v19, %v1270_v43  ;;  %v1308_v5 = vmul.f32 %v1114_v29, %v822_v38  ;;  %v649_v42 = vld [vmem:[%s3281_s15 + $0x110] ss:$12 sps:$4 sm:$0xff]   ;;  %v646_v43 = vld [vmem:[%s3281_s15 + $0x108] sm:$0xff] }
 0x16b   : > { %v1919_v56 = vmax.f32 %v1757_v60, 0.0  ;;  %v1920_v20 = vmax.f32 %v1758_v4, 0.0  ;;  %v1921_v3 = vmax.f32 %v1759_v7, 0.0  ;;  %v1309_v36 = vmul.f32 %v1114_v29, %v823_v49 }
 0x16c   : > { %v1916_v34 = vmax.f32 %v1754_v40, 0.0  ;;  %v1917_v41 = vmax.f32 %v1755_v59, 0.0  ;;  %v1918_v16 = vmax.f32 %v1756_v6, 0.0  ;;  %v1044_v58 = vpop.permute.xlu1 %1043  ;;  %v1304_v10 = vmul.f32 %v1109_v21, %v818_v57 }
 0x16d   : > { %v1039_v28 = vpop.permute.xlu0 %1038  ;;  %v1305_v11 = vmul.f32 %v1109_v21, %v819_v9  ;;  %v1306_v60 = vmul.f32 %v1109_v21, %v820_v48  ;;  %v779_v4 = vunpack.c.l.bf16 %v648_v2  ;;  %v780_v7 = vunpack.c.h.bf16 %v648_v2  ;;  %v672_v2 = vld [vmem:[%s3281_s15 + $0x1a4] sm:$0xff] }
 0x16e   : > { %v2043_v22 = vpack.c.bf16 %v1920_v20, %v1917_v41  ;;  %v2042_v32 = vpack.c.bf16 %v1919_v56, %v1916_v34  ;;  %v3562_v1 = vpack.c.bf16 %v1921_v3, %v1918_v16  ;;  %v781_v56 = vunpack.c.h.bf16 %v649_v42 }
 0x16f   : > { %v776_v23 = vunpack.c.l.bf16 %v646_v43  ;;  %v777_v57 = vunpack.c.h.bf16 %v646_v43  ;;  %v778_v34 = vunpack.c.l.bf16 %v649_v42  ;;  %v816_v43 = vunpack.c.h.bf16 %v672_v2 }
 0x170   : > { %2146 = vmatprep.subr.bf16.mxu0 %v2043_v22  ;;  %v1600_v19 = vpop.permute.xlu1 %1599  ;;  %v1265_v22 = vmul.f32 %v1044_v58, %v779_v4 }
 0x171   : > { %v1595_v55 = vpop.permute.xlu0 %1594  ;;  %2147 = vmatpush2.bf16.msra.mxu0 %v2042_v32  ;;  %v1793_v51 = vadd.f32 %v1600_v19, %v1307_v33  ;;  %v1794_v40 = vadd.f32 %v1600_v19, %v1308_v5  ;;  %v1795_v59 = vadd.f32 %v1600_v19, %v1309_v36  ;;  %v1266_v5 = vmul.f32 %v1044_v58, %v780_v7 }
 0x172   : > { %v1790_v6 = vadd.f32 %v1595_v55, %v1304_v10  ;;  %v1791_v38 = vadd.f32 %v1595_v55, %v1305_v11  ;;  %v1792_v29 = vadd.f32 %v1595_v55, %v1306_v60  ;;  %v1267_v36 = vmul.f32 %v1044_v58, %v781_v56  ;;  %v673_v11 = vld [vmem:[%s3281_s15 + $0x1a0] ss:$12 sps:$4 sm:$0xff]   ;;  %v670_v60 = vld [vmem:[%s3281_s15 + $0x198] sm:$0xff] }
 0x173   : > { %v1955_v49 = vmax.f32 %v1793_v51, 0.0  ;;  %v1956_v20 = vmax.f32 %v1794_v40, 0.0  ;;  %v1957_v3 = vmax.f32 %v1795_v59, 0.0  ;;  %v1262_v10 = vmul.f32 %v1039_v28, %v776_v23 }
 0x174   : > { %v1952_v21 = vmax.f32 %v1790_v6, 0.0  ;;  %v1953_v41 = vmax.f32 %v1791_v38, 0.0  ;;  %v1954_v16 = vmax.f32 %v1792_v29, 0.0  ;;  %v1104_v9 = vpop.permute.xlu1 %1103  ;;  %v1263_v55 = vmul.f32 %v1039_v28, %v777_v57 }
 0x175   : > { %v1099_v48 = vpop.permute.xlu0 %1098  ;;  %v1264_v51 = vmul.f32 %v1039_v28, %v778_v34  ;;  %v815_v40 = vunpack.c.l.bf16 %v672_v2  ;;  %v812_v7 = vunpack.c.l.bf16 %v670_v60  ;;  %v814_v57 = vunpack.c.l.bf16 %v673_v11 }
 0x176   : > { %v3567_v32 = vpack.c.bf16 %v1957_v3, %v1954_v16  ;;  %v2061_v33 = vpack.c.bf16 %v1956_v20, %v1953_v41  ;;  %v2060_v19 = vpack.c.bf16 %v1955_v49, %v1952_v21  ;;  %v817_v20 = vunpack.c.h.bf16 %v673_v11 }
 0x177   : > { %v813_v21 = vunpack.c.h.bf16 %v670_v60 }
 0x178   : > { %2177 = vmatprep.subr.bf16.mxu1 %v2061_v33  ;;  %v1530_v42 = vpop.permute.xlu1 %1529  ;;  %v1301_v33 = vmul.f32 %v1104_v9, %v815_v40 }
 0x179   : > { %v1525_v59 = vpop.permute.xlu0 %1524  ;;  %v1751_v6 = vadd.f32 %v1530_v42, %v1265_v22  ;;  %v1752_v38 = vadd.f32 %v1530_v42, %v1266_v5  ;;  %v1753_v29 = vadd.f32 %v1530_v42, %v1267_v36  ;;  %2178 = vmatpush1.bf16.msra.mxu1 %v2060_v19  ;;  %v644_v22 = vld [vmem:[%s3281_s15 + $0xfc] sm:$0xff]  ;;  %v1303_v19 = vmul.f32 %v1104_v9, %v817_v20  ;;  %v642_v42 = vld [vmem:[%s3281_s15 + $0xf0] sm:$0xff] }
 0x17a   : > { %v1748_v4 = vadd.f32 %v1525_v59, %v1262_v10  ;;  %v1749_v58 = vadd.f32 %v1525_v59, %v1263_v55  ;;  %v1750_v56 = vadd.f32 %v1525_v59, %v1264_v51  ;;  %v1302_v10 = vmul.f32 %v1104_v9, %v816_v43  ;;  %v645_v51 = vld [vmem:[%s3281_s15 + $0xf8] ss:$12 sps:$4 sm:$0xff]  }
 0x17b   : > { %v1913_v23 = vmax.f32 %v1751_v6, 0.0  ;;  %v1914_v3 = vmax.f32 %v1752_v38, 0.0  ;;  %v1915_v49 = vmax.f32 %v1753_v29, 0.0  ;;  %v1298_v55 = vmul.f32 %v1099_v48, %v812_v7 }
 0x17c   : > { %v1910_v28 = vmax.f32 %v1748_v4, 0.0  ;;  %v1911_v34 = vmax.f32 %v1749_v58, 0.0  ;;  %v1912_v41 = vmax.f32 %v1750_v56, 0.0  ;;  %v1034_v16 = vpop.permute.xlu1 %1033  ;;  %v1299_v6 = vmul.f32 %v1099_v48, %v813_v21  ;;  %v668_v21 = vld [vmem:[%s3281_s15 + $0x18c] sm:$0xff] }
 0x17d   : > { %v1029_v2 = vpop.permute.xlu0 %1028  ;;  %v1300_v38 = vmul.f32 %v1099_v48, %v814_v57  ;;  %v773_v29 = vunpack.c.l.bf16 %v644_v22  ;;  %v774_v60 = vunpack.c.h.bf16 %v644_v22  ;;  %v775_v43 = vunpack.c.h.bf16 %v645_v51 }
 0x17e   : > { %v2040_v5 = vpack.c.bf16 %v1914_v3, %v1911_v34  ;;  %v2039_v36 = vpack.c.bf16 %v1913_v23, %v1910_v28  ;;  %v3574_v59 = vpack.c.bf16 %v1915_v49, %v1912_v41  ;;  %v770_v9 = vunpack.c.l.bf16 %v642_v42 }
 0x17f   : > { %v771_v57 = vunpack.c.h.bf16 %v642_v42  ;;  %v772_v34 = vunpack.c.l.bf16 %v645_v51  ;;  %v810_v50 = vunpack.c.h.bf16 %v668_v21 }
 0x180   : > { %2148 = vmatprep.subr.bf16.mxu0 %v2040_v5 }
 0x181   : > { %v1590_v11 = vpop.permute.xlu1 %1589  ;;  %v1585_v4 = vpop.permute.xlu0 %1584  ;;  %2149 = vmatpush2.bf16.msra.mxu0 %v2039_v36  ;;  %v669_v36 = vld [vmem:[%s3281_s15 + $0x188] ss:$12 sps:$4 sm:$0xff]  }
 0x182   : > { %v1787_v58 = vadd.f32 %v1590_v11, %v1301_v33  ;;  %v1788_v56 = vadd.f32 %v1590_v11, %v1302_v10  ;;  %v1789_v40 = vadd.f32 %v1590_v11, %v1303_v19  ;;  %v1784_v3 = vadd.f32 %v1585_v4, %v1298_v55 }
 0x183   : > { %v1785_v20 = vadd.f32 %v1585_v4, %v1299_v6  ;;  %v1786_v7 = vadd.f32 %v1585_v4, %v1300_v38  ;;  %v809_v19 = vunpack.c.l.bf16 %v668_v21  ;;  %v1259_v11 = vmul.f32 %v1034_v16, %v773_v29  ;;  %v666_v4 = vld [vmem:[%s3281_s15 + $0x180] sm:$0xff] }
 0x184   : > { %v1949_v23 = vmax.f32 %v1787_v58, 0.0  ;;  %v1950_v49 = vmax.f32 %v1788_v56, 0.0  ;;  %v1951_v28 = vmax.f32 %v1789_v40, 0.0  ;;  %v1946_v48 = vmax.f32 %v1784_v3, 0.0 }
 0x185   : > { %v1947_v41 = vmax.f32 %v1785_v20, 0.0  ;;  %v1948_v22 = vmax.f32 %v1786_v7, 0.0  ;;  %v1094_v33 = vpop.permute.xlu1 %1093  ;;  %v1089_v5 = vpop.permute.xlu0 %1088  ;;  %v1260_v6 = vmul.f32 %v1034_v16, %v774_v60  ;;  %v1261_v38 = vmul.f32 %v1034_v16, %v775_v43 }
 0x186   : > { %v2057_v58 = vpack.c.bf16 %v1949_v23, %v1946_v48  ;;  %v1256_v56 = vmul.f32 %v1029_v2, %v770_v9  ;;  %v1257_v40 = vmul.f32 %v1029_v2, %v771_v57  ;;  %v1258_v3 = vmul.f32 %v1029_v2, %v772_v34 }
 0x187   : > { %v3577_v10 = vpack.c.bf16 %v1951_v28, %v1948_v22  ;;  %v2058_v55 = vpack.c.bf16 %v1950_v49, %v1947_v41  ;;  %v811_v42 = vunpack.c.h.bf16 %v669_v36  ;;  %v806_v14 = vunpack.c.l.bf16 %v666_v4  ;;  %v640_v49 = vld [vmem:[%s3281_s15 + $0xe4] sm:$0xff] }
 0x188   : > { %v807_v43 = vunpack.c.h.bf16 %v666_v4  ;;  %v808_v48 = vunpack.c.l.bf16 %v669_v36 }
 0x189   : > { %2179 = vmatprep.subr.bf16.mxu1 %v2058_v55  ;;  %v1520_v51 = vpop.permute.xlu1 %1519  ;;  %v1515_v22 = vpop.permute.xlu0 %1514 }
 0x18a   : > { %v1745_v20 = vadd.f32 %v1520_v51, %v1259_v11  ;;  %v1746_v7 = vadd.f32 %v1520_v51, %v1260_v6  ;;  %v1747_v28 = vadd.f32 %v1520_v51, %v1261_v38  ;;  %2180 = vmatpush1.bf16.msra.mxu1 %v2057_v58  ;;  %v1742_v29 = vadd.f32 %v1515_v22, %v1256_v56  ;;  %v641_v6 = vld [vmem:[%s3281_s15 + $0xe0] ss:$12 sps:$4 sm:$0xff]  }
 0x18b   : > { %v1743_v60 = vadd.f32 %v1515_v22, %v1257_v40  ;;  %v1744_v16 = vadd.f32 %v1515_v22, %v1258_v3  ;;  %v1295_v11 = vmul.f32 %v1094_v33, %v809_v19  ;;  %v767_v38 = vunpack.c.l.bf16 %v640_v49  ;;  %v638_v40 = vld [vmem:[%s3281_s15 + $0xd8] sm:$0xff] }
 0x18c   : > { %v1907_v23 = vmax.f32 %v1745_v20, 0.0  ;;  %v1908_v9 = vmax.f32 %v1746_v7, 0.0  ;;  %v1909_v2 = vmax.f32 %v1747_v28, 0.0  ;;  %v1904_v21 = vmax.f32 %v1742_v29, 0.0 }
 0x18d   : > { %v1905_v57 = vmax.f32 %v1743_v60, 0.0  ;;  %v1906_v34 = vmax.f32 %v1744_v16, 0.0  ;;  %v1024_v41 = vpop.permute.xlu1 %1023  ;;  %v1019_v55 = vpop.permute.xlu0 %1018  ;;  %v1296_v51 = vmul.f32 %v1094_v33, %v810_v50  ;;  %v1297_v56 = vmul.f32 %v1094_v33, %v811_v42 }
 0x18e   : > { %v2036_v3 = vpack.c.bf16 %v1907_v23, %v1904_v21  ;;  %v1292_v20 = vmul.f32 %v1089_v5, %v806_v14  ;;  %v1293_v7 = vmul.f32 %v1089_v5, %v807_v43  ;;  %v1294_v28 = vmul.f32 %v1089_v5, %v808_v48 }
 0x18f   : > { %v2037_v58 = vpack.c.bf16 %v1908_v9, %v1905_v57  ;;  %v3584_v4 = vpack.c.bf16 %v1909_v2, %v1906_v34  ;;  %v768_v22 = vunpack.c.h.bf16 %v640_v49  ;;  %v769_v29 = vunpack.c.h.bf16 %v641_v6 }
 0x190   : > { %v764_v25 = vunpack.c.l.bf16 %v638_v40  ;;  %v765_v23 = vunpack.c.h.bf16 %v638_v40  ;;  %v766_v43 = vunpack.c.l.bf16 %v641_v6  ;;  %v1253_v34 = vmul.f32 %v1024_v41, %v767_v38  ;;  %v706_v6 = vld [vmem:[%s3281_s15 + $0x270] sm:$0xff] }
 0x191   : > { %3804 = vst [vmem:[#allocation9_spill] sm:$0xff] %v3584_v4  ;;  %2150 = vmatprep.subr.bf16.mxu0 %v2037_v58  ;;  %v1580_v36 = vpop.permute.xlu1 %1579  ;;  %v1575_v19 = vpop.permute.xlu0 %1574  ;;  %v708_v58 = vld [vmem:[%s3281_s15 + $0x27c] sm:$0xff] }
 0x192   : > { %v1781_v60 = vadd.f32 %v1580_v36, %v1295_v11  ;;  %v1782_v16 = vadd.f32 %v1580_v36, %v1296_v51  ;;  %v1783_v31 = vadd.f32 %v1580_v36, %v1297_v56  ;;  %2151 = vmatpush2.bf16.msra.mxu0 %v2036_v3  ;;  %v1778_v50 = vadd.f32 %v1575_v19, %v1292_v20 }
 0x193   : > { %v1779_v33 = vadd.f32 %v1575_v19, %v1293_v7  ;;  %v1780_v42 = vadd.f32 %v1575_v19, %v1294_v28  ;;  %v1254_v51 = vmul.f32 %v1024_v41, %v768_v22  ;;  %v1255_v56 = vmul.f32 %v1024_v41, %v769_v29 }
 0x194   : > { %v1943_v9 = vmax.f32 %v1781_v60, 0.0  ;;  %v1944_v2 = vmax.f32 %v1782_v16, 0.0  ;;  %v1945_v14 = vmax.f32 %v1783_v31, 0.0  ;;  %v1940_v5 = vmax.f32 %v1778_v50, 0.0 }
 0x195   : > { %v1941_v49 = vmax.f32 %v1779_v33, 0.0  ;;  %v1942_v48 = vmax.f32 %v1780_v42, 0.0  ;;  %v3586_v21 = vpop.permute.xlu1 %1193  ;;  %v3588_v57 = vpop.permute.xlu0 %1188  ;;  %v1250_v20 = vmul.f32 %v1019_v55, %v764_v25  ;;  %v1251_v7 = vmul.f32 %v1019_v55, %v765_v23 }
 0x196   : > { %v2054_v40 = vpack.c.bf16 %v1943_v9, %v1940_v5  ;;  %v1252_v31 = vmul.f32 %v1019_v55, %v766_v43  ;;  %v869_v36 = vunpack.c.l.bf16 %v708_v58  ;;  %v870_v33 = vunpack.c.h.bf16 %v708_v58 }
 0x197   : > { %v3590_v11 = vpack.c.bf16 %v1945_v14, %v1942_v48  ;;  %v2055_v3 = vpack.c.bf16 %v1944_v2, %v1941_v49  ;;  %v866_v22 = vunpack.c.l.bf16 %v706_v6  ;;  %v867_v23 = vunpack.c.h.bf16 %v706_v6 }
 0x198   : > { %v1355_v48 = vmul.f32 %v3586_v21, %v869_v36 }
 0x199   : > { %3805 = vst [vmem:[#allocation10_spill] sm:$0xff] %v3590_v11  ;;  %v1510_v28 = vpop.permute.xlu1 %1509  ;;  %2181 = vmatprep.subr.bf16.mxu1 %v2055_v3  ;;  %v1505_v50 = vpop.permute.xlu0 %1504  ;;  %v1353_v3 = vmul.f32 %v3588_v57, %v867_v23  ;;  %v702_v23 = vld [vmem:[%s3281_s15 + $0x258] sm:$0xff] }
 0x19a   : > { %v1739_v60 = vadd.f32 %v1510_v28, %v1253_v34  ;;  %v1740_v16 = vadd.f32 %v1510_v28, %v1254_v51  ;;  %v1741_v19 = vadd.f32 %v1510_v28, %v1255_v56  ;;  %v1736_v38 = vadd.f32 %v1505_v50, %v1250_v20  ;;  %2182 = vmatpush1.bf16.msra.mxu1 %v2054_v40  ;;  %v636_v40 = vld [vmem:[%s3281_s15 + $0xcc] sm:$0xff] }
 0x19b   : > { %v1737_v42 = vadd.f32 %v1505_v50, %v1251_v7  ;;  %v1738_v14 = vadd.f32 %v1505_v50, %v1252_v31  ;;  %v1356_v34 = vmul.f32 %v3586_v21, %v870_v33  ;;  %v1352_v56 = vmul.f32 %v3588_v57, %v866_v22  ;;  %v634_v7 = vld [vmem:[%s3281_s15 + $0xc0] sm:$0xff] }
 0x19c   : > { %v1901_v41 = vmax.f32 %v1739_v60, 0.0  ;;  %v1902_v29 = vmax.f32 %v1740_v16, 0.0  ;;  %v1903_v25 = vmax.f32 %v1741_v19, 0.0  ;;  %v1898_v55 = vmax.f32 %v1736_v38, 0.0  ;;  %v704_v38 = vld [vmem:[%s3281_s15 + $0x264] sm:$0xff] }
 0x19d   : > { %v1899_v9 = vmax.f32 %v1737_v42, 0.0  ;;  %v1900_v2 = vmax.f32 %v1738_v14, 0.0  ;;  %v3594_v43 = vpop.permute.xlu1 %1013  ;;  %v3596_v5 = vpop.permute.xlu0 %1008  ;;  %v761_v16 = vunpack.c.l.bf16 %v636_v40  ;;  %v762_v19 = vunpack.c.h.bf16 %v636_v40 }
 0x19e   : > { %v2033_v58 = vpack.c.bf16 %v1901_v41, %v1898_v55  ;;  %v758_v42 = vunpack.c.l.bf16 %v634_v7  ;;  %v759_v14 = vunpack.c.h.bf16 %v634_v7  ;;  %v863_v55 = vunpack.c.l.bf16 %v704_v38 }
 0x19f   : > { %v2034_v49 = vpack.c.bf16 %v1902_v29, %v1899_v9  ;;  %v3600_v51 = vpack.c.bf16 %v1903_v25, %v1900_v2  ;;  %v864_v9 = vunpack.c.h.bf16 %v704_v38  ;;  %v1247_v2 = vmul.f32 %v3594_v43, %v761_v16 }
 0x1a0   : > { %v861_v40 = vunpack.c.h.bf16 %v702_v23 }
 0x1a1   : > { %3806 = vst [vmem:[#allocation11_spill] sm:$0xff] %v3600_v51  ;;  %2152 = vmatprep.subr.bf16.mxu0 %v2034_v49  ;;  %v3605_v20 = vpop.permute.xlu1 %1679  ;;  %v3610_v28 = vpop.permute.xlu0 %1674  ;;  %v1248_v49 = vmul.f32 %v3594_v43, %v762_v19 }
 0x1a2   : > { %v1841_v31 = vadd.f32 %v3605_v20, %v1355_v48  ;;  %v1842_v6 = vadd.f32 %v3605_v20, %v1356_v34  ;;  %2153 = vmatpush2.bf16.msra.mxu0 %v2033_v58  ;;  %v1838_v36 = vadd.f32 %v3610_v28, %v1352_v56  ;;  %v1839_v60 = vadd.f32 %v3610_v28, %v1353_v3 }
 0x1a3   : > { %v1244_v58 = vmul.f32 %v3596_v5, %v758_v42  ;;  %v1245_v56 = vmul.f32 %v3596_v5, %v759_v14  ;;  %v860_v3 = vunpack.c.l.bf16 %v702_v23  ;;  %v700_v14 = vld [vmem:[%s3281_s15 + $0x24c] sm:$0xff] }
 0x1a4   : > { %v2003_v50 = vmax.f32 %v1841_v31, 0.0  ;;  %v2004_v33 = vmax.f32 %v1842_v6, 0.0  ;;  %v2000_v22 = vmax.f32 %v1838_v36, 0.0  ;;  %v2001_v41 = vmax.f32 %v1839_v60, 0.0  ;;  %v631_v60 = vld [vmem:[%s3281_s15 + $0xb0] ss:$12 sps:$4 sm:$0xff]  }
 0x1a5   : > { %v3615_v29 = vpop.permute.xlu1 %1183  ;;  %v3617_v25 = vpop.permute.xlu0 %1178  ;;  %v858_v51 = vunpack.c.h.bf16 %v700_v14 }
 0x1a6   : > { %v2085_v48 = vpack.c.bf16 %v2004_v33, %v2001_v41  ;;  %v2084_v34 = vpack.c.bf16 %v2003_v50, %v2000_v22  ;;  %v1349_v50 = vmul.f32 %v3615_v29, %v863_v55  ;;  %v1350_v33 = vmul.f32 %v3615_v29, %v864_v9  ;;  %v698_v9 = vld [vmem:[%s3281_s15 + $0x240] sm:$0xff] }
 0x1a7   : > { %v1346_v22 = vmul.f32 %v3617_v25, %v860_v3  ;;  %v1347_v41 = vmul.f32 %v3617_v25, %v861_v40  ;;  %v857_v40 = vunpack.c.l.bf16 %v700_v14  ;;  %v855_v47 = vunpack.c.h.bf16 %v698_v9 }
 0x1a8   : > { %2193 = vmatprep.subr.bf16.mxu1 %v2085_v48  ;;  %v754_v48 = vunpack.c.l.bf16 %v631_v60  ;;  %v3807_v14 = vmov 0  }
 0x1a9   : > { %v3624_v7 = vpop.permute.xlu1 %1499  ;;  %v3628_v36 = vpop.permute.xlu0 %1494  ;;  %2194 = vmatpush2.bf16.msra.mxu1 %v2084_v34 }
 0x1aa   : > { %v1733_v31 = vadd.f32 %v3624_v7, %v1247_v2  ;;  %v1734_v6 = vadd.f32 %v3624_v7, %v1248_v49  ;;  %v1730_v16 = vadd.f32 %v3628_v36, %v1244_v58  ;;  %v1731_v19 = vadd.f32 %v3628_v36, %v1245_v56 }
 0x1ab   : > { %v757_v58 = vunpack.c.h.bf16 %v631_v60 }
 0x1ac   : > { %v1895_v38 = vmax.f32 %v1733_v31, 0.0  ;;  %v1896_v42 = vmax.f32 %v1734_v6, 0.0  ;;  %v1892_v23 = vmax.f32 %v1730_v16, 0.0  ;;  %v1893_v2 = vmax.f32 %v1731_v19, 0.0 }
 0x1ad   : > { %v3638_v49 = vpop.permute.xlu1 %1669  ;;  %v3642_v55 = vpop.permute.xlu0 %1664 }
 0x1ae   : > { %v1835_v34 = vadd.f32 %v3638_v49, %v1349_v50  ;;  %v1836_v56 = vadd.f32 %v3638_v49, %v1350_v33  ;;  %v1832_v31 = vadd.f32 %v3642_v55, %v1346_v22  ;;  %v1833_v6 = vadd.f32 %v3642_v55, %v1347_v41  ;;  %v3652_v22 = vld [vmem:[%s3791_s3] ss:$16 sps:$4 sm:$0xff]  }
 0x1af   : > { %v2031_v3 = vpack.c.bf16 %v1896_v42, %v1893_v2  ;;  %v2030_v4 = vpack.c.bf16 %v1895_v38, %v1892_v23  ;;  %v854_v33 = vunpack.c.l.bf16 %v698_v9  ;;  %v1243_v42 = vmul.f32 %v3306_v0, %v757_v58  ;;  %v629_v2 = vld [vmem:[%s3281_s15 + $0x98] ss:$12 sps:$4 sm:$0xff]  }
 0x1b0   : > { %v1997_v16 = vmax.f32 %v1835_v34, 0.0  ;;  %v1998_v19 = vmax.f32 %v1836_v56, 0.0  ;;  %v1994_v11 = vmax.f32 %v1832_v31, 0.0  ;;  %v1995_v60 = vmax.f32 %v1833_v6, 0.0 }
 0x1b1   : > { %2154 = vmatprep.subr.bf16.mxu0 %v2031_v3  ;;  %v3647_v50 = vpop.permute.xlu1 %1173  ;;  %v3654_v41 = vpop.permute.xlu0 %1168  ;;  %v1240_v9 = vmul.f32 %v3293_v54, %v754_v48  ;;  %v751_v0 = vunpack.c.h.bf16 %v629_v2  ;;  %v1729_v54 = vadd.f32 %v3304_v63, %v1243_v42 }
 0x1b2   : > { %2155 = vmatpush2.bf16.msra.mxu0 %v2030_v4  ;;  %v1343_v38 = vmul.f32 %v3647_v50, %v857_v40  ;;  %v1344_v23 = vmul.f32 %v3647_v50, %v858_v51  ;;  %v2082_v34 = vpack.c.bf16 %v1998_v19, %v1995_v60  ;;  %v2081_v56 = vpack.c.bf16 %v1997_v16, %v1994_v11  ;;  %v625_v11 = vld [vmem:[%s3281_s15 + $0x80] ss:$12 sps:$4 sm:$0xff]  }
 0x1b3   : > { %2251 = vmatprep.subr.bf16.mxu0 %v3807_v14  ;;  %v1340_v31 = vmul.f32 %v3654_v41, %v854_v33  ;;  %v1341_v6 = vmul.f32 %v3654_v41, %v855_v47  ;;  %v748_v4 = vunpack.c.l.bf16 %v629_v2  ;;  %v2746_v60 = vld [vmem:[%s3791_s3 + $0xc] ss:$16 sps:$4 sm:$0xff]   ;;  %v1237_v42 = vmul.f32 %v3320_v12, %v751_v0  ;;  %v3691_v12 = vld [vmem:[%s3791_s3 + $0x8] ss:$16 sps:$4 sm:$0xff]  }
 0x1b4   : > { %2195 = vmatprep.subr.bf16.mxu1 %v2082_v34  ;;  %v1891_v34 = vmax.f32 %v1729_v54, 0.0  ;;  %v2747_v0 = vld [vmem:[%s3281_s15 + $0x68] ss:$12 sps:$4 sm:$0xff]  }
 0x1b5   : > { %v3664_v3 = vpop.permute.xlu1 %1659  ;;  %2157 = vmatmul.mubr.bf16.vlgmr.msra.gmra.mxu0 %v3652_v22  ;;  %v3669_v40 = vpop.permute.xlu0 %1654  ;;  %2196 = vmatpush2.bf16.msra.mxu1 %v2081_v56  ;;  %v1234_v2 = vmul.f32 %v3322_v13, %v748_v4  ;;  %v736_v4 = vunpack.c.l.bf16 %v2747_v0 }
 0x1b6   : > { %v1829_v58 = vadd.f32 %v3664_v3, %v1343_v38  ;;  %v1830_v51 = vadd.f32 %v3664_v3, %v1344_v23  ;;  %2252 = vmatpush1.bf16.msra.mxu0 %v3479_v17  ;;  %v1826_v47 = vadd.f32 %v3669_v40, %v1340_v31  ;;  %v1827_v48 = vadd.f32 %v3669_v40, %v1341_v6 }
 0x1b7   : > { %2253 = vmatprep.subr.bf16.mxu0 %v3807_v14  ;;  %2666 = vmatprep.mubr.msk.bf16.mxu0 %vm2120_vm0, %v2746_v60  ;;  %v1726_v17 = vadd.f32 %v3291_v53, %v1240_v9  ;;  %v745_v38 = vunpack.c.h.bf16 %v625_v11  ;;  %v742_v23 = vunpack.c.l.bf16 %v625_v11  ;;  %v1723_v6 = vadd.f32 %v3336_v26, %v1237_v42 }
 0x1b8   : > { %v1991_v16 = vmax.f32 %v1829_v58, 0.0  ;;  %v1992_v19 = vmax.f32 %v1830_v51, 0.0  ;;  %v1988_v33 = vmax.f32 %v1826_v47, 0.0  ;;  %v1989_v63 = vmax.f32 %v1827_v48, 0.0  ;;  %v637_v48 = vld [vmem:[%s3281_s15 + $0xc8] ss:$12 sps:$4 sm:$0xff]  }
 0x1b9   : > { %v1720_v53 = vadd.f32 %v3338_v27, %v1234_v2  ;;  %v1888_v9 = vmax.f32 %v1726_v17, 0.0  ;;  %v1231_v13 = vmul.f32 %v3351_v44, %v745_v38  ;;  %v1885_v27 = vmax.f32 %v1723_v6, 0.0  ;;  %v701_v2 = vld [vmem:[%s3281_s15 + $0x248] ss:$12 sps:$4 sm:$0xff]  }
 0x1ba   : > { %2254 = vmatpush1.bf16.msra.mxu0 %v3517_v8  ;;  %v2079_v56 = vpack.c.bf16 %v1992_v19, %v1989_v63  ;;  %v2078_v31 = vpack.c.bf16 %v1991_v16, %v1988_v33  ;;  %v1228_v8 = vmul.f32 %v3353_v45, %v742_v23  ;;  %v1222_v44 = vmul.f32 %v3382_v18, %v736_v4  ;;  %v709_v45 = vld [vmem:[%s3281_s15 + $0x278] ss:$12 sps:$4 sm:$0xff]  }
 0x1bb   : > { %2255 = vmatprep.subr.bf16.mxu0 %v3807_v14  ;;  %v2029_v26 = vpack.c.bf16 %v1891_v34, %v1888_v9  ;;  %v1882_v58 = vmax.f32 %v1720_v53, 0.0  ;;  %v1717_v51 = vadd.f32 %v3367_v61, %v1231_v13  ;;  %v871_v18 = vunpack.c.h.bf16 %v709_v45 }
 0x1bc   : > { %2197 = vmatprep.subr.bf16.mxu1 %v2079_v56  ;;  %v1714_v54 = vadd.f32 %v3369_v62, %v1228_v8  ;;  %v1708_v61 = vadd.f32 %v3394_v35, %v1222_v44  ;;  %v2748_v62 = vld [vmem:[%s3791_s3 + $0x4] ss:$16 sps:$4 sm:$0xff]   ;;  %v868_v47 = vunpack.c.l.bf16 %v709_v45  ;;  %v760_v63 = vunpack.c.l.bf16 %v637_v48 }
 0x1bd   : > { %2198 = vmatpush2.bf16.msra.mxu1 %v2078_v31  ;;  %v2026_v11 = vpack.c.bf16 %v1885_v27, %v1882_v58  ;;  %v1357_v19 = vmul.f32 %v3586_v21, %v871_v18  ;;  %v859_v38 = vunpack.c.h.bf16 %v701_v2  ;;  %v856_v23 = vunpack.c.l.bf16 %v701_v2  ;;  %v3808_v31 = vld [vmem:[#allocation5_spill] sm:$0xff] }
 0x1be   : > { %2256 = vmatpush1.bf16.msra.mxu0 %v3537_v52  ;;  %2687 = vmatprep.subr.bf16.mxu1 %v3530_v15  ;;  %v1879_v15 = vmax.f32 %v1717_v51, 0.0  ;;  %v1876_v52 = vmax.f32 %v1714_v54, 0.0  ;;  %v1870_v35 = vmax.f32 %v1708_v61, 0.0  ;;  %v1354_v60 = vmul.f32 %v3588_v57, %v868_v47 }
 0x1bf   : > { %2257 = vmatprep.subr.bf16.mxu0 %v3807_v14 }
 0x1c0   : > { %2200 = vmatmul.mubr.bf16.vlgmr.msra.gmra.mxu1 %v3691_v12  ;;  %v2023_v16 = vpack.c.bf16 %v1879_v15, %v1876_v52  ;;  %v1840_v42 = vadd.f32 %v3610_v28, %v1354_v60 }
 0x1c1   : > { %2688 = vmatpush3.bf16.msra.mxu1 %v2029_v26  ;;  %2242 = vmatprep.mubr.bf16.mxu1 %v2748_v62  ;;  %v3813_v26 = vld [vmem:[#allocation7_spill] sm:$0xff] }
 0x1c2   : > { %2258 = vmatpush1.bf16.msra.mxu0 %v3547_v37  ;;  %2689 = vmatprep.subr.bf16.mxu1 %v3544_v24  ;;  %v705_v37 = vld [vmem:[%s3281_s15 + $0x260] ss:$12 sps:$4 sm:$0xff]   ;;  %v1873_v24 = vmax.f32 %v3397_v39, 0.0  ;;  %v2002_v34 = vmax.f32 %v1840_v42, 0.0  ;;  %s2712_s15 = smul.u32 24, %s537_s18 }
 0x1c3   : > { %2259 = vmatprep.subr.bf16.mxu0 %v3807_v14  ;;  %v865_v17 = vunpack.c.h.bf16 %v705_v37  ;;  %v862_v33 = vunpack.c.l.bf16 %v705_v37  ;;  %s592_s18 = scalar_select %p591_p10, %s2830_s27, 1 }
 0x1c4   : > { %v2020_v39 = vpack.c.bf16 %v1873_v24, %v1870_v35  ;;  %s546_s26 = scalar_lea.vmem [#allocation3], %s2712_s15  ;;  %s3754_s24 = scalar_lea.vmem [#allocation4], %s2712_s15 }
 0x1c5   : > { %2690 = vmatpush3.bf16.msra.mxu1 %v2026_v11  ;;  %v1351_v21 = vmul.f32 %v3615_v29, %v865_v17  ;;  %v1348_v57 = vmul.f32 %v3617_v25, %v862_v33  ;;  %v2091_v58 = vld [vmem:[%s546_s26] sm:$0xff]  ;;  %v2093_v45 = vld [vmem:[%s546_s26 + $0xc] sm:$0xff]  ;;  %v2092_v33 = vld [vmem:[%s546_s26 + $0x8] ss:$12 sps:$4 sm:$0xff]   ;;  %s2680_s16 = sshll.u32 %s592_s18, 4 }
 0x1c6   : > { %2260 = vmatpush1.bf16.msra.mxu0 %v3556_v30  ;;  %2691 = vmatprep.subr.bf16.mxu1 %v3553_v46  ;;  %v763_v30 = vunpack.c.h.bf16 %v637_v48  ;;  %v1843_v46 = vadd.f32 %v3605_v20, %v1357_v19  ;;  %v1246_v20 = vmul.f32 %v3596_v5, %v760_v63  ;;  %v3809_v5 = vld [vmem:[#allocation10_spill] sm:$0xff]  ;;  %v2095_v54 = vunpack.c.l.bf16 %v2091_v58  ;;  %s595_s20 = scalar_lea.vmem %s3794_s6, %s2680_s16  ;;  %s600_s23 = scalar_lea.vmem %s3795_s7, %s2680_s16 }
 0x1c7   : > { %2261 = vmatprep.subr.bf16.mxu0 %v3807_v14  ;;  %v1834_v29 = vadd.f32 %v3642_v55, %v1348_v57  ;;  %v2096_v44 = vunpack.c.h.bf16 %v2091_v58  ;;  %v2098_v11 = vunpack.c.l.bf16 %v2093_v45  ;;  %v2099_v62 = vunpack.c.h.bf16 %v2093_v45 }
 0x1c8   : > { %v2005_v28 = vmax.f32 %v1843_v46, 0.0  ;;  %v1732_v56 = vadd.f32 %v3628_v36, %v1246_v20  ;;  %v2097_v46 = vunpack.c.l.bf16 %v2092_v33 }
 0x1c9   : > { %2692 = vmatpush3.bf16.msra.mxu1 %v2023_v16  ;;  %v1996_v53 = vmax.f32 %v1834_v29, 0.0 }
 0x1ca   : > { %2262 = vmatpush1.bf16.msra.mxu0 %v3567_v32  ;;  %2693 = vmatprep.subr.bf16.mxu1 %v3562_v1  ;;  %v1249_v32 = vmul.f32 %v3594_v43, %v763_v30  ;;  %v1837_v1 = vadd.f32 %v3638_v49, %v1351_v21  ;;  %v1342_v43 = vmul.f32 %v3654_v41, %v856_v23  ;;  %v1894_v9 = vmax.f32 %v1732_v56, 0.0  ;;  %v3812_v41 = vld [vmem:[#allocation11_spill] sm:$0xff] }
 0x1cb   : > { %2263 = vmatprep.subr.bf16.mxu0 %v3807_v14  ;;  %v2086_v6 = vpack.c.bf16 %v2005_v28, %v2002_v34  ;;  %v2100_v23 = vunpack.c.h.bf16 %v2092_v33 }
 0x1cc   : > { %v1735_v25 = vadd.f32 %v3624_v7, %v1249_v32  ;;  %v1999_v49 = vmax.f32 %v1837_v1, 0.0  ;;  %v1828_v7 = vadd.f32 %v3669_v40, %v1342_v43  ;;  %v3814_v40 = vld [vmem:[#allocation8_spill] sm:$0xff] }
 0x1cd   : > { %2694 = vmatpush3.bf16.msra.mxu1 %v2020_v39 }
 0x1ce   : > { %2264 = vmatpush1.bf16.msra.mxu0 %v3577_v10  ;;  %2695 = vmatprep.subr.bf16.mxu1 %v3574_v59  ;;  %v1345_v10 = vmul.f32 %v3647_v50, %v859_v38  ;;  %v3810_v59 = vld [vmem:[#allocation9_spill] sm:$0xff]  ;;  %v1897_v36 = vmax.f32 %v1735_v25, 0.0  ;;  %v3811_v50 = vld [vmem:[#allocation6_spill] sm:$0xff]  ;;  %v2083_v13 = vpack.c.bf16 %v1999_v49, %v1996_v53  ;;  %v1990_v0 = vmax.f32 %v1828_v7, 0.0 }
 0x1cf   : > { %2265 = vmatprep.subr.bf16.mxu0 %v3807_v14 }
 0x1d0   : > { %v1831_v55 = vadd.f32 %v3664_v3, %v1345_v10  ;;  %v2032_v4 = vpack.c.bf16 %v1897_v36, %v1894_v9 }
 0x1d1   : > { %2696 = vmatpush3.bf16.msra.mxu1 %v3808_v31 }
 0x1d2   : > { %2266 = vmatpush1.bf16.msra.mxu0 %v3809_v5  ;;  %2697 = vmatprep.subr.bf16.mxu1 %v3810_v59  ;;  %v1993_v8 = vmax.f32 %v1831_v55, 0.0 }
 0x1d3   : > { %2277 = vmatprep.subr.bf16.mxu0 %v3807_v14 }
 0x1d4   : > { %v2080_v3 = vpack.c.bf16 %v1993_v8, %v1990_v0 }
 0x1d5   : > { %2698 = vmatpush3.bf16.msra.mxu1 %v3811_v50 }
 0x1d6   : > { %2278 = vmatpush2.bf16.msra.mxu0 %v2086_v6  ;;  %2699 = vmatprep.subr.bf16.mxu1 %v3812_v41 }
 0x1d7   : > { %2279 = vmatprep.subr.bf16.mxu0 %v3807_v14 }
 0x1d9   : > { %2700 = vmatpush3.bf16.msra.mxu1 %v3813_v26 }
 0x1da   : > { %2280 = vmatpush2.bf16.msra.mxu0 %v2083_v13  ;;  %2701 = vmatprep.subr.bf16.mxu1 %v2032_v4 }
 0x1db   : > { %2281 = vmatprep.subr.bf16.mxu0 %v3807_v14 }
 0x1dd   : > { %2702 = vmatpush3.bf16.msra.mxu1 %v3814_v40 }
 0x1de   : > { %2282 = vmatpush2.bf16.msra.mxu0 %v2080_v3 }
 0x1e0   : > { %2243 = vmatmul.mubr.bf16.vlgmr.msra.gmra.mxu1 %v3652_v22 }
 0x1e1   : > { %2284 = vmatmul.mubr.bf16.vlgmr.msra.gmra.mxu0 %v3691_v12 }
 0x275   : > { %v2158_v27 = vpop.f32.mrf.mxu0 }
 0x276   : > { %v2159_v14 = vadd.f32 %v2158_v27, %v2095_v54 }
 0x277   : > { %v2160_v51 = vpop.f32.mrf.mxu0 }
 0x278   : > { %v2161_v61 = vadd.f32 %v2160_v51, %v2096_v44 }
 0x279   : > { %v2162_v15 = vpop.f32.mrf.mxu0 }
 0x27a   : > { %v2163_v24 = vadd.f32 %v2162_v15, %v2098_v11 }
 0x27b   : > { %v2164_v18 = vpop.f32.mrf.mxu0 }
 0x27c   : > { %v2165_v35 = vadd.f32 %v2164_v18, %v2099_v62 }
 0x280   : > { %v2201_v52 = vpop.f32.mrf.mxu1 }
 0x281   : > { %v2202_v22 = vadd.f32 %v2201_v52, %v2159_v14 }
 0x282   : > { %v2203_v47 = vpop.f32.mrf.mxu1 }
 0x283   : > { %v2204_v37 = vadd.f32 %v2203_v47, %v2161_v61  ;;  %v2327_v25 = vmul.f32 %v2202_v22, %v2202_v22 }
 0x284   : > { %v2205_v12 = vpop.f32.mrf.mxu1 }
 0x285   : > { %v2682_v48 = vpack.c.bf16 %v2204_v37, %v2202_v22  ;;  %v2206_v19 = vadd.f32 %v2205_v12, %v2163_v24  ;;  %v2316_v28 = vadd.f32 %v2204_v37, %v2202_v22  ;;  %v2328_v34 = vmul.f32 %v2204_v37, %v2204_v37 }
 0x286   : > { %v2207_v16 = vpop.f32.mrf.mxu1 }
 0x287   : > { %2312 = vst [vmem:[%s3754_s24] sm:$0xff] %v2682_v48  ;;  %v2208_v60 = vadd.f32 %v2207_v16, %v2165_v35  ;;  %v2333_v49 = vadd.f32 %v2328_v34, %v2327_v25  ;;  %v2330_v53 = vmul.f32 %v2206_v19, %v2206_v19 }
 0x289   : > { %v2684_v17 = vpack.c.bf16 %v2208_v60, %v2206_v19  ;;  %v2320_v5 = vadd.f32 %v2208_v60, %v2206_v19  ;;  %v2331_v6 = vmul.f32 %v2208_v60, %v2208_v60 }
 0x28b   : > { %2314 = vst [vmem:[%s3754_s24 + $0xc] sm:$0xff] %v2684_v17  ;;  %v2337_v50 = vadd.f32 %v2331_v6, %v2330_v53 }
 0x28e   : > { %v2377_v26 = vld [vmem:[%s3754_s24] sm:$0xff] (%p2849_p5) }
 0x28f   : > { %2378 = vst [vmem:[%s2362_s11] sm:$0xff] (%p2849_p5), %v2377_v26 }
 0x292   : > { %v2379_v3 = vld [vmem:[%s3754_s24 + $0xc] sm:$0xff] (%p2849_p5) }
 0x293   : > { %2380 = vst [vmem:[%s2362_s11 + $0x18] sm:$0xff] (%p2849_p5), %v2379_v3 }
 0x2a0   : > { %v2703_v30 = vpop.f32.mrf.mxu1 }
 0x2a1   : > { %v2285_v63 = vpop.f32.mrf.mxu0 }
 0x2a2   : > { %v2704_v42 = vpop.f32.mrf.mxu1 }
 0x2a3   : > { %v2287_v2 = vpop.f32.mrf.mxu0  ;;  %v2705_v39 = vadd.f32 %v2704_v42, %v2703_v30 }
 0x2a4   : > { %v2706_v21 = vpop.f32.mrf.mxu1 }
 0x2a5   : > { %v2288_v57 = vpop.f32.mrf.mxu0  ;;  %v2245_v38 = vadd.f32 %v2705_v39, %v2097_v46 }
 0x2a6   : > { %v2707_v32 = vpop.f32.mrf.mxu1 }
 0x2a7   : > { %v2290_v20 = vpop.f32.mrf.mxu0  ;;  %v2286_v1 = vadd.f32 %v2285_v63, %v2245_v38  ;;  %v2708_v29 = vadd.f32 %v2707_v32, %v2706_v21 }
 0x2a9   : > { %v2683_v56 = vpack.c.bf16 %v2286_v1, %v2286_v1  ;;  %v2248_v10 = vadd.f32 %v2708_v29, %v2100_v23  ;;  %v2317_v43 = vadd.f32 %v2316_v28, %v2286_v1  ;;  %v2329_v31 = vmul.f32 %v2286_v1, %v2286_v1 }
 0x2ab   : > { %2313 = vst [vmem:[%s3754_s24 + $0x8] sm:$0xf] %v2683_v56  ;;  %v2289_v59 = vadd.f32 %v2288_v57, %v2248_v10  ;;  %2318 = vadd.xlane.f32.xlu0 %v2317_v43  ;;  %v2334_v36 = vadd.f32 %v2333_v49, %v2329_v31 }
 0x2ad   : > { %v2685_v55 = vpack.c.bf16 %v2289_v59, %v2289_v59  ;;  %v2321_v7 = vadd.f32 %v2320_v5, %v2289_v59  ;;  %v2332_v9 = vmul.f32 %v2289_v59, %v2289_v59 }
 0x2af   : > { %2315 = vst [vmem:[%s3754_s24 + $0x14] sm:$0xf] %v2685_v55  ;;  %2322 = vadd.xlane.f32.xlu1 %v2321_v7  ;;  %2335 = vadd.xlane.f32.xlu0 %v2334_v36  ;;  %v2338_v41 = vadd.f32 %v2337_v50, %v2332_v9 }
 0x2b2   : > { %v2672_v40 = vld [vmem:[%s3754_s24 + $0x8] sm:$0xf] (%p2849_p5) }
 0x2b3   : > { %2339 = vadd.xlane.f32.xlu0 %v2338_v41  ;;  %2673 = vst [vmem:[%s2362_s11 + $0x8] sm:$0xf] (%p2849_p5), %v2672_v40 }
 0x2b6   : > { %v2674_v27 = vld [vmem:[%s3754_s24 + $0x14] sm:$0xf] (%p2849_p5) }
 0x2b7   : > { %2675 = vst [vmem:[%s2362_s11 + $0x20] sm:$0xf] (%p2849_p5), %v2674_v27 }
 0x334   : > { %v2319_v13 = vpop.xlane.xlu0 %2318 }
 0x335   : > { %2325 = vst.msk [vmem:[%s595_s20] sm:$0xff] %vm2324_vm1, %v2319_v13 }
 0x338   : > { %v2323_v8 = vpop.xlane.xlu1 %2322  ;;  %v2336_v0 = vpop.xlane.xlu0 %2335 }
 0x339   : > { %2326 = vst.msk [vmem:[%s595_s20 + $0x8] sm:$0xff] %vm2324_vm1, %v2323_v8  ;;  %2341 = vst.msk [vmem:[%s600_s23] sm:$0xff] %vm2324_vm1, %v2336_v0  ;;  %2359 = sbr.rel (!%p2849_p5) target bundleno = 830 (0x33e), region = 96 }
 0x33c   : > { %v2340_v4 = vpop.xlane.xlu0 %2339 }
 0x33d   : > { %2342 = vst.msk [vmem:[%s600_s23 + $0x8] sm:$0xff] %vm2324_vm1, %v2340_v4 }
 0x33e PF: > { %p15_p11 = scmp.ge.s32.totalorder %s2833_s28, 4   ;;  %s3815_s24 = smov %s2767_s25 }
 0x33f   : > { %s3816_s25 = smov %s2843_s8  ;;  %s3817_s26 = smov %s2833_s28 }
 0x340   :  { %17 = sbr.rel (!%p15_p11) target bundleno = 2 (0x2), region = 203 }

// kernel: u_net_forward.12
= control target key start
LH: loop header
LB: loop body
LE: loop exit
PB: predicated region body
PF: predicated region fallthrough
CT: control target
= control target key end

     0   :  { %s847_s24 = smov 0   ;;  %s849_s25 = smov 0   ;;  %s967_s0 = inlined_call_operand.vmem [shape: bf16[16,1024], index: 0, kind: input, shape index: {}]   ;;  %s968_s1 = inlined_call_operand.vmem [shape: f32[16,1], index: 1, kind: input, shape index: {}]   ;;  %s969_s2 = inlined_call_operand.vmem [shape: f32[16,1], index: 2, kind: input, shape index: {}]   ;;  %s970_s3 = inlined_call_operand.vmem [shape: bf16[16,16], index: 3, kind: input, shape index: {}]   ;;  %s971_s4 = inlined_call_operand.vmem [shape: f32[16,1], index: 4, kind: input, shape index: {}]   ;;  %s972_s5 = inlined_call_operand.vmem [shape: f32[16,1024], index: 5, kind: output, shape index: {0}]   ;;  %s973_s6 = inlined_call_operand.vmem [shape: f32[2,16,1], index: 6, kind: output, shape index: {1}]   ;;  %s974_s7 = inlined_call_operand.vmem [shape: f32[2,16,1], index: 7, kind: output, shape index: {2}]  }
   0x1   :  { %s851_s26 = smov 0  }
   0x2 LB: > { %s863_s27 = sadd.s32 4294967295, %s804_s26   ;;  %s866_s28 = sadd.s32 1, %s804_s26   ;;  %s804_s26 = sphi %s851_s26, %s978_s26   ;;  %s800_s25 = sphi %s849_s25, %s977_s25   ;;  %s796_s24 = sphi %s847_s24, %s976_s24  }
   0x3   : > { %s22_s29 = ssub.s32 %s804_s26, %s866_s28  ;;  %s25_s30 = sadd.s32 1, %s800_s25 }
   0x4   : > { %p23_p0 = scmp.eq.s32.totalorder %s22_s29, 0  ;;  %p32_p1 = scmp.ne.s32.totalorder %s800_s25, %s796_s24 }
   0x5   : > { %p33_p2 = scmp.eq.s32.totalorder %s804_s26, 0  ;;  %p146_p3 = scmp.eq.s32.totalorder %s863_s27, 1 }
   0x6   : > { %s876_s8 = scalar_select %p23_p0, %s800_s25, %s25_s30  }
   0x7   : > { %p34_p4 = por %p33_p2, %p32_p1  ;;  %p878_p5 = por %p146_p3, %p32_p1 }
   0x8   : > { %p730_p6 = scmp.ge.s32.totalorder %s804_s26, 2 }
   0xa   : > { %232 = sbr.rel (%p730_p6) target bundleno = 21 (0x15), region = 32 }
   0xf   : > { %235 = sbr.rel (!%p34_p4) target bundleno = 21 (0x15), region = 36  ;;  %s237_s10 = sand.u32 (%p34_p4), 1, %s800_s25  }
  0x10   : > { %s750_s11 = sshll.u32 (%p34_p4), %s804_s26, 4  ;;  %s731_s12 = sshll.u32 (%p34_p4), %s237_s10, 5 }
  0x11   : > { %s242_s15 = scalar_lea.vmem (%p34_p4), %s967_s0, %s750_s11  ;;  %s239_s16 = scalar_lea.vmem (%p34_p4), [#allocation2], %s731_s12 }
  0x12   : > { %v255_v0 = vld [vmem:[%s242_s15] sm:$0xff] (%p34_p4)  ;;  %v257_v1 = vld [vmem:[%s242_s15 + $0x8] sm:$0xff] (%p34_p4) }
  0x13   : > { %v259_v2 = vld [vmem:[%s242_s15 + $0x20] sm:$0xff] (%p34_p4)  ;;  %256 = vst [vmem:[%s239_s16] sm:$0xff] (%p34_p4), %v255_v0  ;;  %258 = vst [vmem:[%s239_s16 + $0x8] sm:$0xff] (%p34_p4), %v257_v1  ;;  %v261_v3 = vld [vmem:[%s242_s15 + $0x28] sm:$0xff] (%p34_p4) }
  0x14   : > { %260 = vst [vmem:[%s239_s16 + $0x10] sm:$0xff] %v259_v2  ;;  %262 = vst [vmem:[%s239_s16 + $0x18] sm:$0xff] %v261_v3 }
  0x15 PF: > { %p734_p7 = scmp.ge.s32.totalorder %s804_s26, 1  ;;  %p267_p8 = scmp.lt.s32.totalorder %s804_s26, 3 }
  0x17   : > { %p268_p9 = pnand %p734_p7, %p267_p8 }
  0x18   : > { %s274_s12 = sand.u32 (!%p268_p9), 1, %s796_s24   ;;  %s744_s17 = sshll.u32 (!%p268_p9), %s863_s27, 9 }
  0x19   : > { %271 = sbr.rel (%p268_p9) target bundleno = 523 (0x20b), region = 59  ;;  %s735_s13 = sshll.u32 (!%p268_p9), %s274_s12, 5 }
  0x1a   : > { %s276_s14 = scalar_lea.vmem (!%p268_p9), [#allocation2], %s735_s13  ;;  %s736_s18 = sshll.u32 (!%p268_p9), %s274_s12, 6 }
  0x1b   : > { %s918_s19 = scalar_lea.vmem (!%p268_p9), [#allocation3], %s736_s18  ;;  %p316_p10 = scmp.lt.s32.totalorder (!%p268_p9), %s863_s27, 1 }
  0x1e   : > { %v359_v4 = vld [vmem:[%s969_s2] sm:$0xff]  ;;  %v806_v6 = vmov 0   ;;  %v360_v7 = vld [vmem:[%s969_s2 + $0x8] sm:$0xff]  ;;  %v329_v15 = vld [vmem:[%s276_s14 + $0x10] sm:$0xff]  ;;  %vm410_vm0 = vcmask 130048   ;;  %v501_v56 = vlaneseq  ;;  %v506_v58 = vstv %s744_s17  ;;  %s317_s24 = scalar_select %p316_p10, %s863_s27, 1 }
  0x1f   : > { %v331_v5 = vld [vmem:[%s968_s1] sm:$0xff]  ;;  %780 = vset.pattern.permute.xlu1 %v806_v6  ;;  %779 = vset.pattern.permute.xlu0 %v806_v6  ;;  %v332_v8 = vld [vmem:[%s968_s1 + $0x8] sm:$0xff]  ;;  %v330_v16 = vld [vmem:[%s276_s14 + $0x18] sm:$0xff]  ;;  %v337_v21 = vunpack.c.l.bf16 %v329_v15  ;;  %v338_v25 = vunpack.c.h.bf16 %v329_v15  ;;  %vm541_vm5 = vcmask 7168   ;;  %s753_s10 = sshll.u32 (%p878_p5), %s863_s27, 5 }
  0x20   : > { %363 = vperm.xlu1 %780, %v359_v4   ;;  %343 = vperm.xlu0 %779, %v331_v5   ;;  %v394_v9 = vld [vmem:[%s971_s4 + $0x8] sm:$0xff]  ;;  %v393_v10 = vld [vmem:[%s971_s4] sm:$0xff]  ;;  %v339_v22 = vunpack.c.l.bf16 %v330_v16  ;;  %v340_v27 = vunpack.c.h.bf16 %v330_v16  ;;  %v502_v57 = vand.u32 127, %v501_v56  ;;  %s751_s20 = sshll.u32 %s317_s24, 4  ;;  %s583_s13 = scalar_lea.vmem (%p878_p5), %s972_s5, %s753_s10 }
  0x21   : > { %446 = vmatprep.mubr.bf16.mxu0 %v806_v6  ;;  %489 = vmatprep.mubr.bf16.mxu1 %v806_v6  ;;  %v327_v11 = vld [vmem:[%s276_s14] sm:$0xff]  ;;  %v328_v12 = vld [vmem:[%s276_s14 + $0x8] sm:$0xff]  ;;  %s320_s23 = scalar_lea.vmem %s973_s6, %s751_s20  ;;  %s325_s30 = scalar_lea.vmem %s974_s7, %s751_s20 }
  0x22   : > { %v333_v13 = vunpack.c.l.bf16 %v327_v11  ;;  %v335_v14 = vunpack.c.l.bf16 %v328_v12  ;;  %v334_v17 = vunpack.c.h.bf16 %v327_v11  ;;  %v336_v18 = vunpack.c.h.bf16 %v328_v12  ;;  %v781_v55 = vld [vmem:[%s970_s3] sm:$0xff]  }
  0x23   : > { %v504_v59 = vadd.s32 256, %v502_v57  ;;  %v503_v60 = vadd.s32 128, %v502_v57  ;;  %v505_v61 = vadd.s32 384, %v502_v57  ;;  %v507_v62 = vadd.s32 %v506_v58, %v502_v57 }
  0x24   : > { %368 = vperm.xlu1 %780, %v360_v7   ;;  %348 = vperm.xlu0 %779, %v332_v8  }
  0x25   : > { %v509_v63 = vadd.s32 %v506_v58, %v504_v59  ;;  %v508_v0 = vadd.s32 %v506_v58, %v503_v60  ;;  %v510_v1 = vadd.s32 %v506_v58, %v505_v61  ;;  %vm511_vm1 = vcmp.lt.s32.totalorder %v507_v62, 900 }
  0x27   : > { %vm513_vm2 = vcmp.lt.s32.totalorder %v509_v63, 900  ;;  %vm512_vm3 = vcmp.lt.s32.totalorder %v508_v0, 900  ;;  %vm514_vm4 = vcmp.lt.s32.totalorder %v510_v1, 900 }
  0x28   : > { %402 = vperm.xlu1 %780, %v394_v9   ;;  %397 = vperm.xlu0 %779, %v393_v10  }
  0x9b   : > { %v364_v19 = vpop.permute.xlu1 %363  ;;  %v344_v20 = vpop.permute.xlu0 %343 }
  0x9c   : > { %v351_v23 = vmul.f32 %v344_v20, %v333_v13  ;;  %v353_v24 = vmul.f32 %v344_v20, %v335_v14  ;;  %v352_v26 = vmul.f32 %v344_v20, %v334_v17  ;;  %v354_v28 = vmul.f32 %v344_v20, %v336_v18 }
  0x9e   : > { %v372_v30 = vadd.f32 %v364_v19, %v352_v26  ;;  %v371_v31 = vadd.f32 %v364_v19, %v351_v23  ;;  %v373_v35 = vadd.f32 %v364_v19, %v353_v24  ;;  %v374_v38 = vadd.f32 %v364_v19, %v354_v28 }
  0x9f   : > { %v349_v29 = vpop.permute.xlu0 %348  ;;  %v369_v36 = vpop.permute.xlu1 %368 }
  0xa0   : > { %v355_v32 = vmul.f32 %v349_v29, %v337_v21  ;;  %v357_v33 = vmul.f32 %v349_v29, %v339_v22  ;;  %v356_v34 = vmul.f32 %v349_v29, %v338_v25  ;;  %v358_v37 = vmul.f32 %v349_v29, %v340_v27 }
  0xa1   : > { %v380_v42 = vmax.f32 %v372_v30, 0.0  ;;  %v379_v44 = vmax.f32 %v371_v31, 0.0  ;;  %v381_v47 = vmax.f32 %v373_v35, 0.0  ;;  %v382_v49 = vmax.f32 %v374_v38, 0.0 }
  0xa2   : > { %v376_v39 = vadd.f32 %v369_v36, %v356_v34  ;;  %v375_v40 = vadd.f32 %v369_v36, %v355_v32  ;;  %v377_v41 = vadd.f32 %v369_v36, %v357_v33  ;;  %v378_v43 = vadd.f32 %v369_v36, %v358_v37 }
  0xa3   : > { %v398_v2 = vpop.permute.xlu0 %397  ;;  %v403_v11 = vpop.permute.xlu1 %402 }
  0xa4   : > { %v384_v45 = vmax.f32 %v376_v39, 0.0  ;;  %v383_v46 = vmax.f32 %v375_v40, 0.0  ;;  %v385_v48 = vmax.f32 %v377_v41, 0.0  ;;  %v386_v50 = vmax.f32 %v378_v43, 0.0 }
  0xa6   : > { %v390_v51 = vpack.c.bf16 %v384_v45, %v380_v42  ;;  %v389_v52 = vpack.c.bf16 %v383_v46, %v379_v44  ;;  %v391_v53 = vpack.c.bf16 %v385_v48, %v381_v47  ;;  %v392_v54 = vpack.c.bf16 %v386_v50, %v382_v49 }
  0xa8   : > { %428 = vmatprep.subr.bf16.mxu0 %v390_v51  ;;  %471 = vmatprep.subr.bf16.mxu1 %v392_v54 }
  0xa9   : > { %429 = vmatpush1.bf16.msra.mxu0 %v389_v52  ;;  %472 = vmatpush1.bf16.msra.mxu1 %v391_v53 }
  0xac   : > { %742 = vmatmul.mubr.msk.bf16.vlgmr.msra.gmra.mxu0 %vm410_vm0, %v781_v55  ;;  %743 = vmatmul.mubr.msk.bf16.vlgmr.msra.gmra.mxu1 %vm410_vm0, %v781_v55 }
 0x16c   : > { %v448_v3 = vpop.f32.mrf.mxu0  ;;  %v491_v5 = vpop.f32.mrf.mxu1 }
 0x16d   : > { %v449_v4 = vadd.f32 %v448_v3, %v398_v2  ;;  %v492_v6 = vadd.f32 %v491_v5, %v398_v2 }
 0x16e   : > { %v450_v7 = vpop.f32.mrf.mxu0  ;;  %v493_v10 = vpop.f32.mrf.mxu1 }
 0x16f   : > { %v515_v8 = vsel %vm511_vm1, %v449_v4, 0.0  ;;  %v451_v9 = vadd.f32 %v450_v7, %v398_v2  ;;  %v517_v12 = vsel %vm513_vm2, %v492_v6, 0.0  ;;  %v494_v13 = vadd.f32 %v493_v10, %v398_v2 }
 0x170   : > { %523 = vst [vmem:[%s918_s19] sm:$0xff] %v515_v8  ;;  %v452_v14 = vpop.f32.mrf.mxu0  ;;  %525 = vst [vmem:[%s918_s19 + $0x10] sm:$0xff] %v517_v12  ;;  %v495_v17 = vpop.f32.mrf.mxu1  ;;  %v544_v23 = vmul.f32 %v515_v8, %v515_v8  ;;  %v546_v30 = vmul.f32 %v517_v12, %v517_v12 }
 0x171   : > { %v516_v15 = vsel %vm512_vm3, %v451_v9, 0.0  ;;  %v453_v16 = vadd.f32 %v452_v14, %v403_v11  ;;  %v518_v20 = vsel %vm514_vm4, %v494_v13, 0.0  ;;  %v496_v21 = vadd.f32 %v495_v17, %v403_v11 }
 0x172   : > { %524 = vst [vmem:[%s918_s19 + $0x8] sm:$0xff] %v516_v15  ;;  %v531_v18 = vadd.f32 %v516_v15, %v515_v8  ;;  %v545_v19 = vmul.f32 %v516_v15, %v516_v15  ;;  %v454_v22 = vpop.f32.mrf.mxu0  ;;  %526 = vst [vmem:[%s918_s19 + $0x18] sm:$0xff] %v518_v20  ;;  %v497_v26 = vpop.f32.mrf.mxu1  ;;  %v547_v41 = vmul.f32 %v518_v20, %v518_v20 }
 0x173   : > { %v519_v24 = vsel %vm511_vm1, %v453_v16, 0.0  ;;  %v455_v25 = vadd.f32 %v454_v22, %v403_v11  ;;  %v521_v27 = vsel %vm513_vm2, %v496_v21, 0.0  ;;  %v498_v28 = vadd.f32 %v497_v26, %v403_v11 }
 0x174   : > { %527 = vst [vmem:[%s918_s19 + $0x20] sm:$0xff] %v519_v24  ;;  %v532_v29 = vadd.f32 %v531_v18, %v517_v12  ;;  %v548_v31 = vmul.f32 %v519_v24, %v519_v24  ;;  %529 = vst [vmem:[%s918_s19 + $0x30] sm:$0xff] %v521_v27  ;;  %v552_v33 = vadd.f32 %v545_v19, %v544_v23 }
 0x175   : > { %v520_v32 = vsel %vm512_vm3, %v455_v25, 0.0  ;;  %v522_v36 = vsel %vm514_vm4, %v498_v28, 0.0  ;;  %v550_v39 = vmul.f32 %v521_v27, %v521_v27 }
 0x176   : > { %528 = vst [vmem:[%s918_s19 + $0x28] sm:$0xff] %v520_v32  ;;  %v536_v34 = vadd.f32 %v520_v32, %v519_v24  ;;  %v549_v35 = vmul.f32 %v520_v32, %v520_v32  ;;  %v533_v37 = vadd.f32 %v532_v29, %v518_v20  ;;  %530 = vst [vmem:[%s918_s19 + $0x38] sm:$0xff] %v522_v36 }
 0x177   : > { %v553_v38 = vadd.f32 %v552_v33, %v546_v30  ;;  %v551_v46 = vmul.f32 %v522_v36, %v522_v36  ;;  %v596_v52 = vld [vmem:[%s918_s19] sm:$0xff] (%p878_p5)  ;;  %v600_v54 = vld [vmem:[%s918_s19 + $0x10] sm:$0xff] (%p878_p5) }
 0x178   : > { %534 = vadd.xlane.f32.xlu0 %v533_v37  ;;  %v537_v40 = vadd.f32 %v536_v34, %v521_v27  ;;  %v557_v42 = vadd.f32 %v549_v35, %v548_v31  ;;  %597 = vst [vmem:[%s583_s13] sm:$0xff] (%p878_p5), %v596_v52  ;;  %601 = vst [vmem:[%s583_s13 + $0x10] sm:$0xff] (%p878_p5), %v600_v54 }
 0x179   : > { %v554_v44 = vadd.f32 %v553_v38, %v547_v41  ;;  %v598_v53 = vld [vmem:[%s918_s19 + $0x8] sm:$0xff] (%p878_p5)  ;;  %v602_v55 = vld [vmem:[%s918_s19 + $0x18] sm:$0xff] (%p878_p5) }
 0x17a   : > { %v538_v43 = vadd.f32 %v537_v40, %v522_v36  ;;  %v558_v45 = vadd.f32 %v557_v42, %v550_v39  ;;  %599 = vst [vmem:[%s583_s13 + $0x8] sm:$0xff] (%p878_p5), %v598_v53  ;;  %603 = vst [vmem:[%s583_s13 + $0x18] sm:$0xff] (%p878_p5), %v602_v55 }
 0x17b   : > { %v604_v56 = vld [vmem:[%s918_s19 + $0x20] sm:$0xff] (%p878_p5)  ;;  %v608_v58 = vld [vmem:[%s918_s19 + $0x30] sm:$0xff] (%p878_p5) }
 0x17c   : > { %539 = vadd.xlane.f32.xlu1 %v538_v43  ;;  %555 = vadd.xlane.f32.xlu0 %v554_v44  ;;  %v559_v47 = vadd.f32 %v558_v45, %v551_v46  ;;  %605 = vst [vmem:[%s583_s13 + $0x40] sm:$0xff] (%p878_p5), %v604_v56  ;;  %609 = vst [vmem:[%s583_s13 + $0x50] sm:$0xff] (%p878_p5), %v608_v58 }
 0x17d   : > { %v606_v57 = vld [vmem:[%s918_s19 + $0x28] sm:$0xff] (%p878_p5)  ;;  %v610_v59 = vld [vmem:[%s918_s19 + $0x38] sm:$0xff] (%p878_p5) }
 0x17e   : > { %607 = vst [vmem:[%s583_s13 + $0x48] sm:$0xff] (%p878_p5), %v606_v57  ;;  %611 = vst [vmem:[%s583_s13 + $0x58] sm:$0xff] (%p878_p5), %v610_v59 }
 0x180   : > { %560 = vadd.xlane.f32.xlu0 %v559_v47 }
 0x201   : > { %v535_v48 = vpop.xlane.xlu0 %534 }
 0x202   : > { %542 = vst.msk [vmem:[%s320_s23] sm:$0xff] %vm541_vm5, %v535_v48 }
 0x205   : > { %v540_v49 = vpop.xlane.xlu1 %539  ;;  %v556_v50 = vpop.xlane.xlu0 %555 }
 0x206   : > { %543 = vst.msk [vmem:[%s320_s23 + $0x8] sm:$0xff] %vm541_vm5, %v540_v49  ;;  %562 = vst.msk [vmem:[%s325_s30] sm:$0xff] %vm541_vm5, %v556_v50  ;;  %580 = sbr.rel (!%p878_p5) target bundleno = 523 (0x20b), region = 67 }
 0x209   : > { %v561_v51 = vpop.xlane.xlu0 %560 }
 0x20a   : > { %563 = vst.msk [vmem:[%s325_s30 + $0x8] sm:$0xff] %vm541_vm5, %v561_v51 }
 0x20b PF: > { %p15_p11 = scmp.ge.s32.totalorder %s866_s28, 4   ;;  %s976_s24 = smov %s800_s25 }
 0x20c   : > { %s977_s25 = smov %s876_s8  ;;  %s978_s26 = smov %s866_s28 }
 0x20d   :  { %17 = sbr.rel (!%p15_p11) target bundleno = 2 (0x2), region = 145 }

// kernel: u_net_forward.13
= control target key start
LH: loop header
LB: loop body
LE: loop exit
PB: predicated region body
PF: predicated region fallthrough
CT: control target
= control target key end

     0   :  { %s579_s18 = smov 0   ;;  %s581_s19 = smov 0   ;;  %s649_s0 = inlined_call_operand.vmem [shape: f32[16,1024], index: 0, kind: input, shape index: {}]   ;;  %s650_s1 = inlined_call_operand.vmem [shape: f32[16,1], index: 1, kind: input, shape index: {}]   ;;  %s651_s2 = inlined_call_operand.vmem [shape: f32[16,1], index: 2, kind: input, shape index: {}]   ;;  %s652_s3 = inlined_call_operand.vmem [shape: bf16[8,16], index: 3, kind: input, shape index: {}]   ;;  %s653_s4 = inlined_call_operand.vmem [shape: f32[8,1], index: 4, kind: input, shape index: {}]   ;;  %s654_s5 = inlined_call_operand.vmem [shape: f32[8,1024], index: 5, kind: output, shape index: {}]  }
   0x1   :  { %s583_s20 = smov 0  }
   0x2 LB: > { %s481_s21 = sadd.s32 4294967295, %s546_s20   ;;  %s596_s22 = sadd.s32 1, %s546_s20   ;;  %s546_s20 = sphi %s583_s20, %s657_s20   ;;  %s542_s19 = sphi %s581_s19, %s656_s19   ;;  %s538_s18 = sphi %s579_s18, %s655_s18  }
   0x3   : > { %s19_s23 = ssub.s32 %s546_s20, %s596_s22  ;;  %s22_s24 = sadd.s32 1, %s542_s19 }
   0x4   : > { %p20_p0 = scmp.eq.s32.totalorder %s19_s23, 0  ;;  %p29_p1 = scmp.ne.s32.totalorder %s542_s19, %s538_s18 }
   0x5   : > { %p30_p2 = scmp.eq.s32.totalorder %s546_s20, 0  ;;  %p484_p4 = scmp.ge.s32.totalorder %s546_s20, 2 }
   0x6   : > { %s605_s25 = scalar_select %p20_p0, %s542_s19, %s22_s24  }
   0x7   : > { %p31_p3 = por %p30_p2, %p29_p1  ;;  %177 = sbr.rel (%p484_p4) target bundleno = 20 (0x14), region = 32 }
   0xc   : > { %180 = sbr.rel (!%p31_p3) target bundleno = 20 (0x14), region = 36  ;;  %s182_s26 = sand.u32 (%p31_p3), 1, %s542_s19  }
   0xd   : > { %s496_s27 = sshll.u32 (%p31_p3), %s546_s20, 5  ;;  %s485_s28 = sshll.u32 (%p31_p3), %s182_s26, 6 }
   0xe   : > { %s187_s6 = scalar_lea.vmem (%p31_p3), %s649_s0, %s496_s27  ;;  %s184_s7 = scalar_lea.vmem (%p31_p3), [#allocation2], %s485_s28 }
   0xf   : > { %v200_v0 = vld [vmem:[%s187_s6] sm:$0xff] (%p31_p3)  ;;  %v202_v1 = vld [vmem:[%s187_s6 + $0x8] sm:$0xff] (%p31_p3)  ;;  %v204_v2 = vld [vmem:[%s187_s6 + $0x10] sm:$0xff] (%p31_p3) }
  0x10   : > { %201 = vst [vmem:[%s184_s7] sm:$0xff] (%p31_p3), %v200_v0  ;;  %203 = vst [vmem:[%s184_s7 + $0x8] sm:$0xff] (%p31_p3), %v202_v1  ;;  %v206_v3 = vld [vmem:[%s187_s6 + $0x18] sm:$0xff] (%p31_p3)  ;;  %v208_v4 = vld [vmem:[%s187_s6 + $0x40] sm:$0xff] (%p31_p3) }
  0x11   : > { %205 = vst [vmem:[%s184_s7 + $0x10] sm:$0xff] %v204_v2  ;;  %v210_v5 = vld [vmem:[%s187_s6 + $0x48] sm:$0xff]  ;;  %207 = vst [vmem:[%s184_s7 + $0x18] sm:$0xff] %v206_v3  ;;  %v212_v6 = vld [vmem:[%s187_s6 + $0x50] sm:$0xff] }
  0x12   : > { %209 = vst [vmem:[%s184_s7 + $0x20] sm:$0xff] %v208_v4  ;;  %211 = vst [vmem:[%s184_s7 + $0x28] sm:$0xff] %v210_v5  ;;  %v214_v7 = vld [vmem:[%s187_s6 + $0x58] sm:$0xff] }
  0x13   : > { %213 = vst [vmem:[%s184_s7 + $0x30] sm:$0xff] %v212_v6  ;;  %215 = vst [vmem:[%s184_s7 + $0x38] sm:$0xff] %v214_v7 }
  0x14 PF: > { %p488_p5 = scmp.ge.s32.totalorder %s546_s20, 1  ;;  %p220_p6 = scmp.lt.s32.totalorder %s546_s20, 3 }
  0x16   : > { %p221_p7 = pnand %p488_p5, %p220_p6 }
  0x17   : > { %s227_s23 = sand.u32 (!%p221_p7), 1, %s538_s18   ;;  %s490_s28 = sshll.u32 (!%p221_p7), %s481_s21, 2 }
  0x18   : > { %224 = sbr.rel (%p221_p7) target bundleno = 370 (0x172), region = 59  ;;  %s489_s24 = sshll.u32 (!%p221_p7), %s227_s23, 6 }
  0x19   : > { %s229_s26 = scalar_lea.vmem (!%p221_p7), [#allocation2], %s489_s24  ;;  %p256_p8 = scmp.lt.s32.totalorder (!%p221_p7), %s490_s28, 7 }
  0x1d   : > { %v290_v8 = vld [vmem:[%s651_s2] sm:$0xff]  ;;  %v548_v10 = vmov 0   ;;  %v291_v11 = vld [vmem:[%s651_s2 + $0x8] sm:$0xff]  ;;  %v264_v15 = vld [vmem:[%s229_s26 + $0x10] sm:$0xff]  ;;  %vm329_vm0 = vcmask 130048   ;;  %s659_s28 = smov (!%p256_p8, %s490_s28), 7 }
  0x1e   : > { %v270_v9 = vld [vmem:[%s650_s1] sm:$0xff]  ;;  %523 = vset.pattern.permute.xlu1 %v548_v10  ;;  %522 = vset.pattern.permute.xlu0 %v548_v10  ;;  %v271_v12 = vld [vmem:[%s650_s1 + $0x8] sm:$0xff]  ;;  %v265_v17 = vld [vmem:[%s229_s26 + $0x18] sm:$0xff]  ;;  %s491_s29 = sshll.u32 %s659_s28, 3 }
  0x1f   : > { %294 = vperm.xlu1 %523, %v290_v8   ;;  %274 = vperm.xlu0 %522, %v270_v9   ;;  %v323_v13 = vld [vmem:[%s653_s4] sm:$0xff]  ;;  %v263_v16 = vld [vmem:[%s229_s26 + $0x8] sm:$0xff]  ;;  %v268_v24 = vld [vmem:[%s229_s26 + $0x30] sm:$0xff]  ;;  %s259_s7 = scalar_lea.vmem %s654_s5, %s491_s29 }
  0x20   : > { %365 = vmatprep.mubr.bf16.mxu0 %v548_v10  ;;  %406 = vmatprep.mubr.bf16.mxu1 %v548_v10  ;;  %v262_v14 = vld [vmem:[%s229_s26] sm:$0xff]  ;;  %v267_v25 = vld [vmem:[%s229_s26 + $0x28] sm:$0xff]  ;;  %v269_v27 = vld [vmem:[%s229_s26 + $0x38] sm:$0xff] }
  0x21   : > { %v266_v23 = vld [vmem:[%s229_s26 + $0x20] sm:$0xff] }
  0x22   : > { %v318_v54 = vld [vmem:[%s652_s3] sm:$0xf] }
  0x23   : > { %299 = vperm.xlu1 %523, %v291_v11   ;;  %279 = vperm.xlu0 %522, %v271_v12  }
  0x27   : > { %326 = vperm.xlu0 %522, %v323_v13  }
  0x9a   : > { %v295_v18 = vpop.permute.xlu1 %294  ;;  %v275_v19 = vpop.permute.xlu0 %274 }
  0x9b   : > { %v282_v20 = vmul.f32 %v275_v19, %v262_v14  ;;  %v284_v21 = vmul.f32 %v275_v19, %v264_v15  ;;  %v283_v22 = vmul.f32 %v275_v19, %v263_v16  ;;  %v285_v26 = vmul.f32 %v275_v19, %v265_v17 }
  0x9d   : > { %v303_v29 = vadd.f32 %v295_v18, %v283_v22  ;;  %v302_v30 = vadd.f32 %v295_v18, %v282_v20  ;;  %v304_v34 = vadd.f32 %v295_v18, %v284_v21  ;;  %v305_v37 = vadd.f32 %v295_v18, %v285_v26 }
  0x9e   : > { %v280_v28 = vpop.permute.xlu0 %279  ;;  %v300_v35 = vpop.permute.xlu1 %299 }
  0x9f   : > { %v286_v31 = vmul.f32 %v280_v28, %v266_v23  ;;  %v288_v32 = vmul.f32 %v280_v28, %v268_v24  ;;  %v287_v33 = vmul.f32 %v280_v28, %v267_v25  ;;  %v289_v36 = vmul.f32 %v280_v28, %v269_v27 }
  0xa0   : > { %v311_v41 = vmax.f32 %v303_v29, 0.0  ;;  %v310_v43 = vmax.f32 %v302_v30, 0.0  ;;  %v312_v46 = vmax.f32 %v304_v34, 0.0  ;;  %v313_v48 = vmax.f32 %v305_v37, 0.0 }
  0xa1   : > { %v307_v38 = vadd.f32 %v300_v35, %v287_v33  ;;  %v306_v39 = vadd.f32 %v300_v35, %v286_v31  ;;  %v308_v40 = vadd.f32 %v300_v35, %v288_v32  ;;  %v309_v42 = vadd.f32 %v300_v35, %v289_v36 }
  0xa2   : > { %v327_v55 = vpop.permute.xlu0 %326 }
  0xa3   : > { %v315_v44 = vmax.f32 %v307_v38, 0.0  ;;  %v314_v45 = vmax.f32 %v306_v39, 0.0  ;;  %v316_v47 = vmax.f32 %v308_v40, 0.0  ;;  %v317_v49 = vmax.f32 %v309_v42, 0.0 }
  0xa5   : > { %v320_v50 = vpack.c.bf16 %v315_v44, %v311_v41  ;;  %v319_v51 = vpack.c.bf16 %v314_v45, %v310_v43  ;;  %v321_v52 = vpack.c.bf16 %v316_v47, %v312_v46  ;;  %v322_v53 = vpack.c.bf16 %v317_v49, %v313_v48 }
  0xa7   : > { %347 = vmatprep.subr.bf16.mxu0 %v320_v50  ;;  %388 = vmatprep.subr.bf16.mxu1 %v322_v53 }
  0xa8   : > { %348 = vmatpush1.bf16.msra.mxu0 %v319_v51  ;;  %389 = vmatpush1.bf16.msra.mxu1 %v321_v52 }
  0xab   : > { %492 = vmatmul.mubr.msk.bf16.vlgmr.msra.gmra.mxu0 %vm329_vm0, %v318_v54  ;;  %493 = vmatmul.mubr.msk.bf16.vlgmr.msra.gmra.mxu1 %vm329_vm0, %v318_v54 }
 0x16b   : > { %v367_v56 = vpop.f32.mrf.mxu0  ;;  %v408_v58 = vpop.f32.mrf.mxu1 }
 0x16c   : > { %v368_v57 = vadd.f32 %v367_v56, %v327_v55  ;;  %v409_v62 = vadd.f32 %v408_v58, %v327_v55 }
 0x16d   : > { %v369_v59 = vpop.f32.mrf.mxu0  ;;  %v410_v61 = vpop.f32.mrf.mxu1 }
 0x16e   : > { %415 = vst [vmem:[%s259_s7] sm:$0xff] %v368_v57  ;;  %v370_v60 = vadd.f32 %v369_v59, %v327_v55  ;;  %v411_v0 = vadd.f32 %v410_v61, %v327_v55  ;;  %417 = vst [vmem:[%s259_s7 + $0x10] sm:$0xff] %v409_v62 }
 0x16f   : > { %v371_v63 = vpop.f32.mrf.mxu0  ;;  %v412_v1 = vpop.f32.mrf.mxu1 }
 0x170   : > { %416 = vst [vmem:[%s259_s7 + $0x8] sm:$0xff] %v370_v60  ;;  %418 = vst [vmem:[%s259_s7 + $0x18] sm:$0xff] %v411_v0 }
 0x171   : > { %v372_v2 = vpop.f32.mrf.mxu0  ;;  %v413_v3 = vpop.f32.mrf.mxu1 }
 0x172 PF: > { %p12_p9 = scmp.ge.s32.totalorder %s596_s22, 4   ;;  %s655_s18 = smov %s542_s19 }
 0x173   : > { %s656_s19 = smov %s605_s25  ;;  %s657_s20 = smov %s596_s22 }
 0x174   :  { %14 = sbr.rel (!%p12_p9) target bundleno = 2 (0x2), region = 98 }

</bundles_post_ra>
